<compile_context>
chip_gen: v6e
topology: v6e:2x2x1
jax: 0.10.0
libtpu: 0.0.40
codegen_flags: <defaults>
</compile_context>

<pallas_src>
import functools

import jax
import jax.numpy as jnp
from jax.experimental import pallas as pl
from jax.experimental.pallas import tpu as pltpu


def _round_up(x, m):
    return (x + m - 1) // m * m


@functools.lru_cache(maxsize=None)
def _vmem_limit_bytes():
    """Generation-aware VMEM budget: physical - 16 MiB, capped at 100 MiB."""
    try:
        cap = pltpu.get_tpu_info().vmem_capacity_bytes
        return int(min(max(cap - 16 * 1024 * 1024, 32 * 1024 * 1024),
                       100 * 1024 * 1024))
    except Exception:
        return 48 * 1024 * 1024   # safe on every generation incl. v7x (64 MiB)


# ---------------------------------------------------------------------------
# Generic tanh(A @ B + bias) kernel (bias broadcast over rows of the output).
# ---------------------------------------------------------------------------
def _mm_bias_tanh_kernel(a_ref, b_ref, bias_ref, o_ref):
    acc = jnp.dot(a_ref[...], b_ref[...], preferred_element_type=jnp.float32)
    o_ref[...] = jnp.tanh(acc + bias_ref[...]).astype(o_ref.dtype)


def matmul_bias_tanh(a, b, bias, *, out_dtype=jnp.float32, crop=True):
    """tanh(a @ b + bias). a:(M,K), b:(K,N), bias:(N,).

    Single full-M tile (M padded to a multiple of 16) and a 1-D grid over
    lane-dense (multiple-of-128) weight tiles: the activation tile is DMA'd
    once and stays resident in VMEM while weight tiles stream.  With
    crop=False the padded (Mp, Np) result is returned so back-to-back layers
    avoid an HBM crop / re-pad round trip (padded rows = tanh(bias), padded
    cols = tanh(0), discarded by the caller's final slice).
    """
    M, K = a.shape
    K2, N = b.shape
    assert K == K2
    b = b.astype(a.dtype)

    # Full-M single tile: no dead-row MXU work beyond rounding to 16.
    Mp = _round_up(M, 16)
    if Mp != M:
        a = jnp.pad(a, ((0, Mp - M), (0, 0)))

    # Pad N to a lane-dense multiple of 128 (zero weight cols, zero bias) so
    # output stores are full 128-lane stores instead of masked vst.msk.
    Np = _round_up(N, 128)
    if Np != N:
        b = jnp.pad(b, ((0, 0), (0, Np - N)))
        bias = jnp.pad(bias, (0, Np - N))
    tile_n = 512 if Np % 512 == 0 else (256 if Np % 256 == 0 else 128)
    bias2 = bias.reshape(1, Np).astype(jnp.float32)

    out = pl.pallas_call(
        _mm_bias_tanh_kernel,
        out_shape=jax.ShapeDtypeStruct((Mp, Np), out_dtype),
        grid_spec=pltpu.PrefetchScalarGridSpec(
            num_scalar_prefetch=0,
            grid=(Np // tile_n,),          # 1-D grid over weight tiles
            in_specs=[
                pl.BlockSpec((Mp, K), lambda jn: (0, 0)),      # resident acts
                pl.BlockSpec((K, tile_n), lambda jn: (0, jn)),  # streaming W
                pl.BlockSpec((1, tile_n), lambda jn: (0, jn)),
            ],
            out_specs=pl.BlockSpec((Mp, tile_n), lambda jn: (0, jn)),
        ),
        compiler_params=pltpu.CompilerParams(
            dimension_semantics=("parallel",),
            vmem_limit_bytes=_vmem_limit_bytes(),
        ),
    )(a, b, bias2)

    if crop and (Mp != M or Np != N):
        out = out[:M, :N]
    return out


# ---------------------------------------------------------------------------
# conv1 (1x1) as channel-major VPU FMAs: tanh(W @ X + b), X = (Cin, N*H*W).
# The huge spatial axis sits on the lane axis -> full-lane loads/stores.
# ---------------------------------------------------------------------------
_CONV1_TILE_MAX = 16384   # lanes per grid step; handful of steps, tiny VMEM


def _conv1x1_cm_kernel(w_ref, x_ref, b_ref, o_ref):
    x = x_ref[...]                       # (Cin, T) f32
    w = w_ref[...]                       # (Cout, Cin), Cin == 4
    acc = w[:, 0:1] * x[0:1, :]
    for c in range(1, w.shape[1]):       # static unroll over Cin (4 FMAs)
        acc = acc + w[:, c:c + 1] * x[c:c + 1, :]
    o_ref[...] = jnp.tanh(acc + b_ref[...]).astype(o_ref.dtype)


def conv1x1_bias_tanh_cm(w, bias, x_cm, *, out_dtype=jnp.bfloat16):
    """tanh(w @ x_cm + bias[:,None]); w:(Cout,Cin), x_cm:(Cin,M) -> (Cout,M)."""
    Cout, Cin = w.shape
    Cin2, M = x_cm.shape
    assert Cin == Cin2
    # Big lane tile -> few grid steps. Per-step VMEM (double-buffered) is
    # ~ (4*T f32 in + 13*T bf16 out)*2 < 1.5 MiB at T=16384: fits all gens.
    tile = min(_CONV1_TILE_MAX, _round_up(M, 128))
    Mp = _round_up(M, tile)
    if Mp != M:
        x_cm = jnp.pad(x_cm, ((0, 0), (0, Mp - M)))
    b2 = bias.reshape(Cout, 1).astype(jnp.float32)

    out = pl.pallas_call(
        _conv1x1_cm_kernel,
        out_shape=jax.ShapeDtypeStruct((Cout, Mp), out_dtype),
        grid_spec=pltpu.PrefetchScalarGridSpec(
            num_scalar_prefetch=0,
            grid=(Mp // tile,),
            in_specs=[
                pl.BlockSpec((Cout, Cin), lambda j: (0, 0)),
                pl.BlockSpec((Cin, tile), lambda j: (0, j)),
                pl.BlockSpec((Cout, 1), lambda j: (0, 0)),
            ],
            out_specs=pl.BlockSpec((Cout, tile), lambda j: (0, j)),
        ),
        compiler_params=pltpu.CompilerParams(
            dimension_semantics=("parallel",),
            vmem_limit_bytes=_vmem_limit_bytes(),
        ),
    )(w.astype(jnp.float32), x_cm.astype(jnp.float32), b2)
    return out[:, :M] if Mp != M else out


# ---------------------------------------------------------------------------
# Parameters + forward
# ---------------------------------------------------------------------------
def init_params(key):
    """Deterministic parameter init matching the PyTorch module's shapes."""
    k1, k2, k3, k4, k5, k6 = jax.random.split(key, 6)

    def uniform(k, shape, fan_in):
        bound = 1.0 / jnp.sqrt(fan_in)
        return jax.random.uniform(k, shape, jnp.float32, -bound, bound)

    return {
        "w1": uniform(k1, (13, 4, 1, 1), 4 * 1 * 1),
        "b1": uniform(k2, (13,), 4 * 1 * 1),
        "w2": uniform(k3, (3072, 13, 11, 11), 13 * 11 * 11),
        "b2": uniform(k4, (3072,), 13 * 11 * 11),
        "w3": uniform(k5, (1000, 3072, 1, 1), 3072 * 1 * 1),
        "b3": uniform(k6, (1000,), 3072 * 1 * 1),
    }


def model_forward(params, x_nchw):
    """Forward pass. x_nchw: (N, 4, H, W) f32 -> (N, 1000, OH, OW) f32."""
    N, C, H, W = x_nchw.shape
    assert C == 4
    KH = KW = 11
    OH = (H - KH) // KH + 1
    OW = (W - KW) // KW + 1
    M = N * OH * OW

    # ---- conv1 (1x1) + tanh, channel-major, bf16 output -------------------
    x_cm = jnp.transpose(x_nchw, (1, 0, 2, 3)).reshape(C, N * H * W)
    w1 = params["w1"].reshape(13, C)
    v2 = conv1x1_bias_tanh_cm(w1, params["b1"], x_cm)        # (13, N*H*W) bf16

    # ---- conv2 (11x11, stride 11) + tanh: non-overlapping patches -> matmul
    # K-ordering is (C, KH, KW), so the weight only needs reshape(3072,1573).T.
    v2r = v2.reshape(13, N, H, W)[:, :, : OH * KH, : OW * KW]
    patches = v2r.reshape(13, N, OH, KH, OW, KW)
    patches = jnp.transpose(patches, (1, 2, 4, 0, 3, 5))     # (N,OH,OW,13,KH,KW)
    a2 = patches.reshape(M, 13 * KH * KW)                    # already bf16
    w2 = params["w2"].reshape(3072, 13 * KH * KW).T.astype(jnp.bfloat16)
    v4 = matmul_bias_tanh(a2, w2, params["b2"], out_dtype=jnp.bfloat16,
                          crop=False)                        # (Mp, 3072) bf16

    # ---- conv3 (1x1) + tanh: padded M flows straight through --------------
    w3 = params["w3"].reshape(1000, 3072).T.astype(jnp.bfloat16)
    v6 = matmul_bias_tanh(v4, w3, params["b3"], out_dtype=jnp.float32,
                          crop=False)                        # (Mp, 1024) f32
    v6 = v6[:M, :1000]                                       # single final crop

    out = v6.reshape(N, OH, OW, 1000)
    return jnp.transpose(out, (0, 3, 1, 2))                  # (N, 1000, OH, OW)


def model_forward_ref(params, x_nchw):
    """Pure-JAX f32 reference (same math, no Pallas) for a sanity check."""
    N, C, H, W = x_nchw.shape
    x_nhwc = jnp.transpose(x_nchw, (0, 2, 3, 1)).reshape(N * H * W, 4)
    v2 = jnp.tanh(x_nhwc @ params["w1"].reshape(13, 4).T + params["b1"])
    v2 = v2.reshape(N, H, W, 13)
    KH = KW = 11
    OH = (H - KH) // KH + 1
    OW = (W - KW) // KW + 1
    p = v2[:, : OH * KH, : OW * KW, :].reshape(N, OH, KH, OW, KW, 13)
    p = jnp.transpose(p, (0, 1, 3, 5, 2, 4)).reshape(N * OH * OW, 13 * KH * KW)
    v4 = jnp.tanh(p @ params["w2"].reshape(3072, -1).T + params["b2"])
    v6 = jnp.tanh(v4 @ params["w3"].reshape(1000, 3072).T + params["b3"])
    return jnp.transpose(v6.reshape(N, OH, OW, 1000), (0, 3, 1, 2))


if __name__ == "__main__":
    key = jax.random.PRNGKey(0)
    pkey, xkey = jax.random.split(key)
    params = init_params(pkey)

    # Small input consistent with the module (original was (1, 4, 318, 255));
    # spatial dims >= 11 so the 11x11 stride-11 conv produces a valid output.
    x = jax.random.normal(xkey, (1, 4, 33, 22), dtype=jnp.float32)

    fwd = jax.jit(model_forward)
    out = jax.block_until_ready(fwd(params, x))
    assert out.shape == (1, 1000, 3, 2), out.shape
    assert bool(jnp.all(jnp.isfinite(out)))

    ref = jax.block_until_ready(model_forward_ref(params, x))
    # bf16 MXU inputs on conv2/conv3 -> loosened tolerance vs. the f32 reference.
    assert jnp.allclose(out, ref, atol=2e-2, rtol=2e-2), \
        float(jnp.max(jnp.abs(out - ref)))

    print("KERNEL_OK")
</pallas_src>

<mosaic_0001>
module attributes {stable_mosaic.version = 11 : i64} {
  func.func @_conv1x1_cm_kernel(%arg0: i32, %arg1: memref<13x4xf32, #tpu.memory_space<vmem>>, %arg2: memref<4x768xf32, #tpu.memory_space<vmem>>, %arg3: memref<13x1xf32, #tpu.memory_space<vmem>>, %arg4: memref<13x768xbf16, #tpu.memory_space<vmem>>) attributes {dimension_semantics = [#tpu.dimension_semantics<parallel>], iteration_bounds = array<i64: 1>, scalar_prefetch = 0 : i64, scratch_operands = 0 : i64, tpu.core_type = #tpu.core_type<tc>, window_params = [{pipeline_mode = #tpu.pipeline_mode<synchronous>, transform_indices = @transform_0, window_bounds = array<i64: 13, 4>}, {transform_indices = @transform_1, window_bounds = array<i64: 4, 768>}, {pipeline_mode = #tpu.pipeline_mode<synchronous>, transform_indices = @transform_2, window_bounds = array<i64: 13, 1>}, {transform_indices = @transform_3, window_bounds = array<i64: 13, 768>}]} {
    %c0 = arith.constant 0 : index
    %c0_0 = arith.constant 0 : index
    %0 = vector.load %arg2[%c0, %c0_0] : memref<4x768xf32, #tpu.memory_space<vmem>>, vector<4x768xf32>
    %c0_1 = arith.constant 0 : index
    %c0_2 = arith.constant 0 : index
    %1 = vector.load %arg1[%c0_1, %c0_2] : memref<13x4xf32, #tpu.memory_space<vmem>>, vector<13x4xf32>
    %2 = vector.extract_strided_slice %1 {offsets = [0, 0], sizes = [13, 1], strides = [1, 1]} : vector<13x4xf32> to vector<13x1xf32>
    %3 = vector.extract_strided_slice %0 {offsets = [0, 0], sizes = [1, 768], strides = [1, 1]} : vector<4x768xf32> to vector<1x768xf32>
    %4 = vector.broadcast %2 : vector<13x1xf32> to vector<13x768xf32>
    %5 = vector.broadcast %3 : vector<1x768xf32> to vector<13x768xf32>
    %6 = arith.mulf %4, %5 : vector<13x768xf32>
    %7 = vector.extract_strided_slice %1 {offsets = [0, 1], sizes = [13, 1], strides = [1, 1]} : vector<13x4xf32> to vector<13x1xf32>
    %8 = vector.extract_strided_slice %0 {offsets = [1, 0], sizes = [1, 768], strides = [1, 1]} : vector<4x768xf32> to vector<1x768xf32>
    %9 = vector.broadcast %7 : vector<13x1xf32> to vector<13x768xf32>
    %10 = vector.broadcast %8 : vector<1x768xf32> to vector<13x768xf32>
    %11 = arith.mulf %9, %10 : vector<13x768xf32>
    %12 = arith.addf %6, %11 : vector<13x768xf32>
    %13 = vector.extract_strided_slice %1 {offsets = [0, 2], sizes = [13, 1], strides = [1, 1]} : vector<13x4xf32> to vector<13x1xf32>
    %14 = vector.extract_strided_slice %0 {offsets = [2, 0], sizes = [1, 768], strides = [1, 1]} : vector<4x768xf32> to vector<1x768xf32>
    %15 = vector.broadcast %13 : vector<13x1xf32> to vector<13x768xf32>
    %16 = vector.broadcast %14 : vector<1x768xf32> to vector<13x768xf32>
    %17 = arith.mulf %15, %16 : vector<13x768xf32>
    %18 = arith.addf %12, %17 : vector<13x768xf32>
    %19 = vector.extract_strided_slice %1 {offsets = [0, 3], sizes = [13, 1], strides = [1, 1]} : vector<13x4xf32> to vector<13x1xf32>
    %20 = vector.extract_strided_slice %0 {offsets = [3, 0], sizes = [1, 768], strides = [1, 1]} : vector<4x768xf32> to vector<1x768xf32>
    %21 = vector.broadcast %19 : vector<13x1xf32> to vector<13x768xf32>
    %22 = vector.broadcast %20 : vector<1x768xf32> to vector<13x768xf32>
    %23 = arith.mulf %21, %22 : vector<13x768xf32>
    %24 = arith.addf %18, %23 : vector<13x768xf32>
    %c0_3 = arith.constant 0 : index
    %c0_4 = arith.constant 0 : index
    %25 = vector.load %arg3[%c0_3, %c0_4] : memref<13x1xf32, #tpu.memory_space<vmem>>, vector<13x1xf32>
    %26 = vector.broadcast %25 : vector<13x1xf32> to vector<13x768xf32>
    %27 = arith.addf %24, %26 : vector<13x768xf32>
    %28 = math.tanh %27 : vector<13x768xf32>
    %29 = arith.truncf %28 : vector<13x768xf32> to vector<13x768xbf16>
    %c0_5 = arith.constant 0 : index
    %c0_6 = arith.constant 0 : index
    %30 = vector.load %arg4[%c0_5, %c0_6] : memref<13x768xbf16, #tpu.memory_space<vmem>>, vector<13x768xbf16>
    tpu.vector_store %arg4[%c0_5, %c0_6], %29 {strides = array<i32>} : memref<13x768xbf16, #tpu.memory_space<vmem>>, vector<13x768xbf16>,
    return
  }
  func.func @transform_0(%arg0: i32) -> (i32, i32) {
    %c0_i32 = arith.constant 0 : i32
    %c0_i32_0 = arith.constant 0 : i32
    %c0_i32_1 = arith.constant 0 : i32
    return %c0_i32, %c0_i32_0 : i32, i32
  }
  func.func @transform_1(%arg0: i32) -> (i32, i32) {
    %c0_i32 = arith.constant 0 : i32
    %c0_i32_0 = arith.constant 0 : i32
    return %c0_i32, %arg0 : i32, i32
  }
  func.func @transform_2(%arg0: i32) -> (i32, i32) {
    %c0_i32 = arith.constant 0 : i32
    %c0_i32_0 = arith.constant 0 : i32
    %c0_i32_1 = arith.constant 0 : i32
    return %c0_i32, %c0_i32_0 : i32, i32
  }
  func.func @transform_3(%arg0: i32) -> (i32, i32) {
    %c0_i32 = arith.constant 0 : i32
    %c0_i32_0 = arith.constant 0 : i32
    return %c0_i32, %arg0 : i32, i32
  }
}

module attributes {stable_mosaic.version = 11 : i64} {
  func.func @_mm_bias_tanh_kernel(%arg0: i32, %arg1: memref<16x1573xbf16, #tpu.memory_space<vmem>>, %arg2: memref<1573x512xbf16, #tpu.memory_space<vmem>>, %arg3: memref<1x512xf32, #tpu.memory_space<vmem>>, %arg4: memref<16x512xbf16, #tpu.memory_space<vmem>>) attributes {dimension_semantics = [#tpu.dimension_semantics<parallel>], iteration_bounds = array<i64: 6>, scalar_prefetch = 0 : i64, scratch_operands = 0 : i64, tpu.core_type = #tpu.core_type<tc>, window_params = [{pipeline_mode = #tpu.pipeline_mode<synchronous>, transform_indices = @transform_0, window_bounds = array<i64: 16, 1573>}, {transform_indices = @transform_1, window_bounds = array<i64: 1573, 512>}, {transform_indices = @transform_2, window_bounds = array<i64: 1, 512>}, {transform_indices = @transform_3, window_bounds = array<i64: 16, 512>}]} {
    %c0 = arith.constant 0 : index
    %c0_0 = arith.constant 0 : index
    %0 = vector.load %arg1[%c0, %c0_0] : memref<16x1573xbf16, #tpu.memory_space<vmem>>, vector<16x1573xbf16>
    %c0_1 = arith.constant 0 : index
    %c0_2 = arith.constant 0 : index
    %1 = vector.load %arg2[%c0_1, %c0_2] : memref<1573x512xbf16, #tpu.memory_space<vmem>>, vector<1573x512xbf16>
    %cst = arith.constant dense<0.000000e+00> : vector<16x512xf32>
    %2 = tpu.matmul %0, %1, %cst {dimension_numbers = #tpu.dot_dimension_numbers<[1], [0], [0], [1], [0, 0, 1, 1], [], []>} : vector<16x1573xbf16>, vector<1573x512xbf16>, vector<16x512xf32> -> vector<16x512xf32>
    %c0_3 = arith.constant 0 : index
    %c0_4 = arith.constant 0 : index
    %3 = vector.load %arg3[%c0_3, %c0_4] : memref<1x512xf32, #tpu.memory_space<vmem>>, vector<1x512xf32>
    %4 = vector.broadcast %3 : vector<1x512xf32> to vector<16x512xf32>
    %5 = arith.addf %2, %4 : vector<16x512xf32>
    %6 = math.tanh %5 : vector<16x512xf32>
    %7 = arith.truncf %6 : vector<16x512xf32> to vector<16x512xbf16>
    %c0_5 = arith.constant 0 : index
    %c0_6 = arith.constant 0 : index
    %8 = vector.load %arg4[%c0_5, %c0_6] : memref<16x512xbf16, #tpu.memory_space<vmem>>, vector<16x512xbf16>
    tpu.vector_store %arg4[%c0_5, %c0_6], %7 {strides = array<i32>} : memref<16x512xbf16, #tpu.memory_space<vmem>>, vector<16x512xbf16>,
    return
  }
  func.func @transform_0(%arg0: i32) -> (i32, i32) {
    %c0_i32 = arith.constant 0 : i32
    %c0_i32_0 = arith.constant 0 : i32
    %c0_i32_1 = arith.constant 0 : i32
    return %c0_i32, %c0_i32_0 : i32, i32
  }
  func.func @transform_1(%arg0: i32) -> (i32, i32) {
    %c0_i32 = arith.constant 0 : i32
    %c0_i32_0 = arith.constant 0 : i32
    return %c0_i32, %arg0 : i32, i32
  }
  func.func @transform_2(%arg0: i32) -> (i32, i32) {
    %c0_i32 = arith.constant 0 : i32
    %c0_i32_0 = arith.constant 0 : i32
    return %c0_i32, %arg0 : i32, i32
  }
  func.func @transform_3(%arg0: i32) -> (i32, i32) {
    %c0_i32 = arith.constant 0 : i32
    %c0_i32_0 = arith.constant 0 : i32
    return %c0_i32, %arg0 : i32, i32
  }
}

module attributes {stable_mosaic.version = 11 : i64} {
  func.func @_mm_bias_tanh_kernel(%arg0: i32, %arg1: memref<16x3072xbf16, #tpu.memory_space<vmem>>, %arg2: memref<3072x512xbf16, #tpu.memory_space<vmem>>, %arg3: memref<1x512xf32, #tpu.memory_space<vmem>>, %arg4: memref<16x512xf32, #tpu.memory_space<vmem>>) attributes {dimension_semantics = [#tpu.dimension_semantics<parallel>], iteration_bounds = array<i64: 2>, scalar_prefetch = 0 : i64, scratch_operands = 0 : i64, tpu.core_type = #tpu.core_type<tc>, window_params = [{pipeline_mode = #tpu.pipeline_mode<synchronous>, transform_indices = @transform_0, window_bounds = array<i64: 16, 3072>}, {transform_indices = @transform_1, window_bounds = array<i64: 3072, 512>}, {transform_indices = @transform_2, window_bounds = array<i64: 1, 512>}, {transform_indices = @transform_3, window_bounds = array<i64: 16, 512>}]} {
    %c0 = arith.constant 0 : index
    %c0_0 = arith.constant 0 : index
    %0 = vector.load %arg1[%c0, %c0_0] : memref<16x3072xbf16, #tpu.memory_space<vmem>>, vector<16x3072xbf16>
    %c0_1 = arith.constant 0 : index
    %c0_2 = arith.constant 0 : index
    %1 = vector.load %arg2[%c0_1, %c0_2] : memref<3072x512xbf16, #tpu.memory_space<vmem>>, vector<3072x512xbf16>
    %cst = arith.constant dense<0.000000e+00> : vector<16x512xf32>
    %2 = tpu.matmul %0, %1, %cst {dimension_numbers = #tpu.dot_dimension_numbers<[1], [0], [0], [1], [0, 0, 1, 1], [], []>} : vector<16x3072xbf16>, vector<3072x512xbf16>, vector<16x512xf32> -> vector<16x512xf32>
    %c0_3 = arith.constant 0 : index
    %c0_4 = arith.constant 0 : index
    %3 = vector.load %arg3[%c0_3, %c0_4] : memref<1x512xf32, #tpu.memory_space<vmem>>, vector<1x512xf32>
    %4 = vector.broadcast %3 : vector<1x512xf32> to vector<16x512xf32>
    %5 = arith.addf %2, %4 : vector<16x512xf32>
    %6 = math.tanh %5 : vector<16x512xf32>
    %c0_5 = arith.constant 0 : index
    %c0_6 = arith.constant 0 : index
    %7 = vector.load %arg4[%c0_5, %c0_6] : memref<16x512xf32, #tpu.memory_space<vmem>>, vector<16x512xf32>
    tpu.vector_store %arg4[%c0_5, %c0_6], %6 {strides = array<i32>} : memref<16x512xf32, #tpu.memory_space<vmem>>, vector<16x512xf32>,
    return
  }
  func.func @transform_0(%arg0: i32) -> (i32, i32) {
    %c0_i32 = arith.constant 0 : i32
    %c0_i32_0 = arith.constant 0 : i32
    %c0_i32_1 = arith.constant 0 : i32
    return %c0_i32, %c0_i32_0 : i32, i32
  }
  func.func @transform_1(%arg0: i32) -> (i32, i32) {
    %c0_i32 = arith.constant 0 : i32
    %c0_i32_0 = arith.constant 0 : i32
    return %c0_i32, %arg0 : i32, i32
  }
  func.func @transform_2(%arg0: i32) -> (i32, i32) {
    %c0_i32 = arith.constant 0 : i32
    %c0_i32_0 = arith.constant 0 : i32
    return %c0_i32, %arg0 : i32, i32
  }
  func.func @transform_3(%arg0: i32) -> (i32, i32) {
    %c0_i32 = arith.constant 0 : i32
    %c0_i32_0 = arith.constant 0 : i32
    return %c0_i32, %arg0 : i32, i32
  }
}

</mosaic_0001>

<bundles_post_ra>
// kernel: model_forward.3
= control target key start
LH: loop header
LB: loop body
LE: loop exit
PB: predicated region body
PF: predicated region fallthrough
CT: control target
= control target key end

     0   :  { %v500_v0 = vmov 0   ;;  %v501_v3 = vmov 1   ;;  %v502_v4 = vmov 2   ;;  %v503_v6 = vmov 3   ;;  %s612_s0 = inlined_call_operand.vmem [shape: f32[13,4], index: 0, kind: input, shape index: {}]   ;;  %s613_s2 = inlined_call_operand.vmem [shape: f32[13,1], index: 2, kind: input, shape index: {}]   ;;  %s614_s1 = inlined_call_operand.vmem [shape: f32[4,768], index: 1, kind: input, shape index: {}]   ;;  %s615_s3 = inlined_call_operand.vmem [shape: bf16[13,768], index: 3, kind: output, shape index: {}]  }
   0x1   :  { %469 = vset.pattern.permute.xlu1 %v500_v0  ;;  %467 = vset.pattern.permute.xlu0 %v500_v0  ;;  %v18_v1 = vld [vmem:[%s612_s0 + $0x8] sm:$0x1f]  ;;  %v17_v2 = vld [vmem:[%s612_s0] sm:$0xff]  ;;  %v32_v8 = vlaneseq  ;;  %v16_v14 = vld [vmem:[%s614_s1 + $0x10] sm:$0xff]  ;;  %vm431_vm0 = vcmask 1042432   ;;  %vm434_vm2 = vcmask 1046532  }
   0x2   :  { %26 = vperm.xlu0 %467, %v18_v1   ;;  %21 = vperm.xlu1 %469, %v17_v2   ;;  %v357_v5 = vld [vmem:[%s613_s2 + $0x8] sm:$0x1f]  ;;  %v356_v7 = vld [vmem:[%s613_s2] sm:$0xff]  ;;  %vm432_vm1 = vsmask.f32 2304 }
   0x3   :  { %v33_v9 = vshrl.u32 %v32_v8, 7  ;;  %v14_v12 = vld [vmem:[%s614_s1] sm:$0xff]  ;;  %v15_v13 = vld [vmem:[%s614_s1 + $0x8] sm:$0xff]  ;;  %vm435_vm3 = vsmask.f32 6400  ;;  %vm433_vm4 = vmand %vm431_vm0, %vm432_vm1 }
   0x4   :  { %vm436_vm5 = vmand %vm434_vm2, %vm435_vm3 }
   0x5   :  { %v34_v10 = vsub.s32 0, %v33_v9  ;;  %v38_v11 = vsub.s32 4, %v33_v9  ;;  %v108_v15 = vsub.s32 1, %v33_v9  ;;  %v112_v16 = vsub.s32 5, %v33_v9  ;;  %vm575_vm6 = vmor %vm436_vm5, %vm433_vm4 }
   0x6   :  { %468 = vset.pattern.permute.xlu0 %v501_v3  ;;  %470 = vset.pattern.permute.xlu1 %v501_v3  ;;  %v194_v27 = vsub.s32 2, %v33_v9  ;;  %v198_v28 = vsub.s32 6, %v33_v9  ;;  %v280_v31 = vsub.s32 3, %v33_v9  ;;  %v284_v32 = vsub.s32 7, %v33_v9 }
   0x7   :  { %103 = vperm.xlu0 %468, %v18_v1   ;;  %99 = vperm.xlu1 %470, %v17_v2   ;;  %v35_v17 = vrot.slane %v14_v12, %v34_v10  ;;  %v39_v18 = vrot.slane %v14_v12, %v38_v11  ;;  %v43_v19 = vrot.slane %v15_v13, %v34_v10 }
   0x8   :  { %v47_v20 = vrot.slane %v15_v13, %v38_v11  ;;  %v51_v21 = vrot.slane %v16_v14, %v34_v10  ;;  %v55_v22 = vrot.slane %v16_v14, %v38_v11  ;;  %v109_v23 = vrot.slane %v14_v12, %v108_v15 }
   0x9   :  { %v113_v24 = vrot.slane %v14_v12, %v112_v16  ;;  %v65_v25 = vrot.slane %v35_v17, %v34_v10  ;;  %v69_v26 = vrot.slane %v39_v18, %v34_v10  ;;  %v73_v29 = vrot.slane %v43_v19, %v34_v10 }
   0xa   :  { %v77_v30 = vrot.slane %v47_v20, %v34_v10  ;;  %v81_v33 = vrot.slane %v51_v21, %v34_v10  ;;  %v85_v34 = vrot.slane %v55_v22, %v34_v10  ;;  %v117_v35 = vrot.slane %v15_v13, %v108_v15 }
   0xb   :  { %472 = vset.pattern.permute.xlu0 %v502_v4  ;;  %471 = vset.pattern.permute.xlu1 %v502_v4  ;;  %v121_v36 = vrot.slane %v15_v13, %v112_v16  ;;  %v125_v37 = vrot.slane %v16_v14, %v108_v15  ;;  %v129_v38 = vrot.slane %v16_v14, %v112_v16 }
   0xc   :  { %185 = vperm.xlu0 %472, %v17_v2   ;;  %189 = vperm.xlu1 %471, %v18_v1   ;;  %v139_v39 = vrot.slane %v109_v23, %v108_v15  ;;  %v143_v40 = vrot.slane %v113_v24, %v108_v15  ;;  %v195_v41 = vrot.slane %v14_v12, %v194_v27 }
   0xd   :  { %v199_v42 = vrot.slane %v14_v12, %v198_v28  ;;  %v203_v43 = vrot.slane %v15_v13, %v194_v27  ;;  %v207_v44 = vrot.slane %v15_v13, %v198_v28  ;;  %v211_v45 = vrot.slane %v16_v14, %v194_v27 }
   0xe   :  { %v215_v46 = vrot.slane %v16_v14, %v198_v28  ;;  %v281_v47 = vrot.slane %v14_v12, %v280_v31  ;;  %v285_v48 = vrot.slane %v14_v12, %v284_v32  ;;  %v289_v49 = vrot.slane %v15_v13, %v280_v31 }
   0xf   :  { %v293_v50 = vrot.slane %v15_v13, %v284_v32  ;;  %v297_v51 = vrot.slane %v16_v14, %v280_v31  ;;  %v301_v52 = vrot.slane %v16_v14, %v284_v32  ;;  %v147_v53 = vrot.slane %v117_v35, %v108_v15 }
  0x10   :  { %473 = vset.pattern.permute.xlu1 %v503_v6  ;;  %474 = vset.pattern.permute.xlu0 %v500_v0  ;;  %v151_v54 = vrot.slane %v121_v36, %v108_v15  ;;  %v155_v55 = vrot.slane %v125_v37, %v108_v15  ;;  %v159_v56 = vrot.slane %v129_v38, %v108_v15 }
  0x11   :  { %275 = vperm.xlu1 %473, %v18_v1   ;;  %365 = vperm.xlu0 %474, %v357_v5   ;;  %v225_v59 = vrot.slane %v195_v41, %v194_v27  ;;  %v229_v60 = vrot.slane %v199_v42, %v194_v27  ;;  %v233_v61 = vrot.slane %v203_v43, %v194_v27 }
  0x12   :  { %v237_v62 = vrot.slane %v207_v44, %v194_v27  ;;  %v241_v63 = vrot.slane %v211_v45, %v194_v27  ;;  %v545_v1 = vrot.slane %v281_v47, %v280_v31  ;;  %v549_v3 = vrot.slane %v289_v49, %v280_v31 }
  0x13   :  { %v551_v4 = vrot.slane %v293_v50, %v280_v31  ;;  %v553_v5 = vrot.slane %v297_v51, %v280_v31  ;;  %v555_v6 = vrot.slane %v301_v52, %v280_v31 }
  0x15   :  { %271 = vperm.xlu1 %473, %v17_v2   ;;  %v547_v2 = vrot.slane %v285_v48, %v280_v31 }
  0x19   :  { %475 = vset.pattern.permute.xlu1 %v500_v0  ;;  %v245_v0 = vrot.slane %v215_v46, %v194_v27 }
  0x1a   :  { %360 = vperm.xlu1 %475, %v356_v7  }
  0x7d   :  { %v22_v57 = vpop.permute.xlu1 %21  ;;  %v27_v58 = vpop.permute.xlu0 %26 }
  0x7e   :  { %v86_v7 = vmul.f32 %v65_v25, %v22_v57  ;;  %v87_v8 = vmul.f32 %v69_v26, %v22_v57  ;;  %v88_v9 = vmul.f32 %v73_v29, %v22_v57  ;;  %v89_v10 = vmul.f32 %v77_v30, %v22_v57 }
  0x7f   :  { %v90_v11 = vmul.f32 %v81_v33, %v22_v57  ;;  %v91_v12 = vmul.f32 %v85_v34, %v22_v57  ;;  %v92_v13 = vmul.f32 %v65_v25, %v27_v58  ;;  %v93_v14 = vmul.f32 %v69_v26, %v27_v58 }
  0x80   :  { %v94_v15 = vmul.f32 %v73_v29, %v27_v58  ;;  %v95_v16 = vmul.f32 %v77_v30, %v27_v58  ;;  %v96_v17 = vmul.f32 %v81_v33, %v27_v58  ;;  %v97_v18 = vmul.f32 %v85_v34, %v27_v58 }
  0x82   :  { %v100_v19 = vpop.permute.xlu1 %99  ;;  %v104_v20 = vpop.permute.xlu0 %103 }
  0x83   :  { %v160_v21 = vmul.f32 %v139_v39, %v100_v19  ;;  %v161_v22 = vmul.f32 %v143_v40, %v100_v19  ;;  %v162_v23 = vmul.f32 %v147_v53, %v100_v19  ;;  %v163_v24 = vmul.f32 %v151_v54, %v100_v19 }
  0x84   :  { %v164_v27 = vmul.f32 %v155_v55, %v100_v19  ;;  %v165_v28 = vmul.f32 %v159_v56, %v100_v19  ;;  %v166_v31 = vmul.f32 %v139_v39, %v104_v20  ;;  %v167_v32 = vmul.f32 %v143_v40, %v104_v20 }
  0x85   :  { %v172_v35 = vadd.f32 %v160_v21, %v86_v7  ;;  %v173_v36 = vadd.f32 %v161_v22, %v87_v8  ;;  %v174_v37 = vadd.f32 %v162_v23, %v88_v9  ;;  %v175_v38 = vadd.f32 %v163_v24, %v89_v10 }
  0x86   :  { %v557_v25 = vadd.f32 %v164_v27, %v90_v11  ;;  %v559_v26 = vadd.f32 %v165_v28, %v91_v12  ;;  %v168_v29 = vmul.f32 %v147_v53, %v104_v20  ;;  %v169_v30 = vmul.f32 %v151_v54, %v104_v20 }
  0x87   :  { %v170_v33 = vmul.f32 %v155_v55, %v104_v20  ;;  %v171_v34 = vmul.f32 %v159_v56, %v104_v20  ;;  %v178_v41 = vadd.f32 %v166_v31, %v92_v13  ;;  %v179_v42 = vadd.f32 %v167_v32, %v93_v14  ;;  %v186_v43 = vpop.permute.xlu0 %185  ;;  %v190_v44 = vpop.permute.xlu1 %189 }
  0x88   :  { %v180_v45 = vadd.f32 %v168_v29, %v94_v15  ;;  %v181_v46 = vadd.f32 %v169_v30, %v95_v16  ;;  %v246_v39 = vmul.f32 %v225_v59, %v186_v43  ;;  %v247_v40 = vmul.f32 %v229_v60, %v186_v43 }
  0x89   :  { %v182_v47 = vadd.f32 %v170_v33, %v96_v17  ;;  %v183_v48 = vadd.f32 %v171_v34, %v97_v18  ;;  %v248_v49 = vmul.f32 %v233_v61, %v186_v43  ;;  %v249_v50 = vmul.f32 %v237_v62, %v186_v43 }
  0x8a   :  { %v250_v51 = vmul.f32 %v241_v63, %v186_v43  ;;  %v251_v52 = vmul.f32 %v245_v0, %v186_v43  ;;  %v252_v57 = vmul.f32 %v225_v59, %v190_v44  ;;  %v253_v58 = vmul.f32 %v229_v60, %v190_v44 }
  0x8b   :  { %v254_v53 = vmul.f32 %v233_v61, %v190_v44  ;;  %v255_v54 = vmul.f32 %v237_v62, %v190_v44  ;;  %v256_v55 = vmul.f32 %v241_v63, %v190_v44  ;;  %v257_v56 = vmul.f32 %v245_v0, %v190_v44 }
  0x8c   :  { %v276_v7 = vpop.permute.xlu1 %275  ;;  %v264_v8 = vadd.f32 %v252_v57, %v178_v41  ;;  %v265_v9 = vadd.f32 %v253_v58, %v179_v42  ;;  %v258_v10 = vadd.f32 %v246_v39, %v172_v35  ;;  %v259_v11 = vadd.f32 %v247_v40, %v173_v36  ;;  %v366_v61 = vpop.permute.xlu0 %365  ;;  %v441_v58 = vld [vmem:[%s615_s3 + $0x20] sm:$0x77] }
  0x8d   :  { %v338_v12 = vmul.f32 %v545_v1, %v276_v7  ;;  %v339_v13 = vmul.f32 %v547_v2, %v276_v7  ;;  %v340_v14 = vmul.f32 %v549_v3, %v276_v7  ;;  %v341_v15 = vmul.f32 %v551_v4, %v276_v7 }
  0x8e   :  { %v342_v59 = vmul.f32 %v553_v5, %v276_v7  ;;  %v343_v60 = vmul.f32 %v555_v6, %v276_v7  ;;  %v266_v62 = vadd.f32 %v254_v53, %v180_v45  ;;  %v267_v63 = vadd.f32 %v255_v54, %v181_v46  ;;  %v444_v7 = vld [vmem:[%s615_s3 + $0x28] sm:$0x77] }
  0x8f   :  { %v268_v0 = vadd.f32 %v256_v55, %v182_v47  ;;  %v269_v16 = vadd.f32 %v257_v56, %v183_v48  ;;  %v350_v17 = vadd.f32 %v338_v12, %v264_v8  ;;  %v351_v18 = vadd.f32 %v339_v13, %v265_v9 }
  0x90   :  { %v352_v19 = vadd.f32 %v340_v14, %v266_v62  ;;  %v353_v20 = vadd.f32 %v341_v15, %v267_v63  ;;  %v272_v21 = vpop.permute.xlu1 %271  ;;  %v260_v22 = vadd.f32 %v248_v49, %v174_v37  ;;  %v261_v23 = vadd.f32 %v249_v50, %v175_v38  ;;  %v438_v50 = vld [vmem:[%s615_s3 + $0x18] sm:$0x77] }
  0x91   :  { %v354_v24 = vadd.f32 %v342_v59, %v268_v0  ;;  %v355_v27 = vadd.f32 %v343_v60, %v269_v16  ;;  %v374_v28 = vadd.f32 %v366_v61, %v350_v17  ;;  %v375_v31 = vadd.f32 %v366_v61, %v351_v18 }
  0x92   :  { %v376_v32 = vadd.f32 %v366_v61, %v352_v19  ;;  %v377_v35 = vadd.f32 %v366_v61, %v353_v20  ;;  %v332_v36 = vmul.f32 %v545_v1, %v272_v21  ;;  %v333_v29 = vmul.f32 %v547_v2, %v272_v21 }
  0x93   :  { %v378_v30 = vadd.f32 %v366_v61, %v354_v24  ;;  %v379_v33 = vadd.f32 %v366_v61, %v355_v27  ;;  %476 = vtanh.f32 %v374_v28  ;;  %v334_v34 = vmul.f32 %v549_v3, %v272_v21 }
  0x94   :  { %478 = vtanh.f32 %v375_v31  ;;  %v335_v41 = vmul.f32 %v551_v4, %v272_v21  ;;  %v336_v37 = vmul.f32 %v553_v5, %v272_v21  ;;  %v337_v38 = vmul.f32 %v555_v6, %v272_v21 }
  0x95   :  { %480 = vtanh.f32 %v376_v32  ;;  %v262_v42 = vadd.f32 %v250_v51, %v557_v25  ;;  %v263_v43 = vadd.f32 %v251_v52, %v559_v26  ;;  %v344_v1 = vadd.f32 %v332_v36, %v258_v10  ;;  %v361_v44 = vpop.permute.xlu1 %360 }
  0x96   :  { %482 = vtanh.f32 %v377_v35  ;;  %v345_v2 = vadd.f32 %v333_v29, %v259_v11  ;;  %v346_v45 = vadd.f32 %v334_v34, %v260_v22  ;;  %v347_v46 = vadd.f32 %v335_v41, %v261_v23 }
  0x97   :  { %484 = vtanh.f32 %v378_v30  ;;  %v348_v3 = vadd.f32 %v336_v37, %v262_v42  ;;  %v349_v39 = vadd.f32 %v337_v38, %v263_v43  ;;  %v368_v40 = vadd.f32 %v361_v44, %v344_v1 }
  0x98   :  { %486 = vtanh.f32 %v379_v33  ;;  %v369_v4 = vadd.f32 %v361_v44, %v345_v2  ;;  %v370_v5 = vadd.f32 %v361_v44, %v346_v45  ;;  %v371_v47 = vadd.f32 %v361_v44, %v347_v46 }
  0x99   :  { %v372_v6 = vadd.f32 %v361_v44, %v348_v3  ;;  %488 = vtanh.f32 %v368_v40  ;;  %v373_v25 = vadd.f32 %v361_v44, %v349_v39 }
  0x9a   :  { %490 = vtanh.f32 %v369_v4 }
  0x9b   :  { %492 = vtanh.f32 %v370_v5 }
  0x9c   :  { %494 = vtanh.f32 %v371_v47 }
  0x9d   :  { %496 = vtanh.f32 %v372_v6 }
  0x9e   :  { %498 = vtanh.f32 %v373_v25 }
  0xa0   :  { %v477_v26 = vpop.eup %476 }
  0xa1   :  { %v479_v48 = vpop.eup %478 }
  0xa2   :  { %v481_v51 = vpop.eup %480  ;;  %v460_v52 = vpack.c.bf16 %v479_v48, %v477_v26 }
  0xa3   :  { %v483_v57 = vpop.eup %482 }
  0xa4   :  { %v485_v53 = vpop.eup %484  ;;  %v461_v54 = vpack.c.bf16 %v483_v57, %v481_v51  ;;  %v439_v55 = vsel %vm575_vm6, %v460_v52, %v438_v50 }
  0xa5   :  { %v487_v56 = vpop.eup %486  ;;  %440 = vst [vmem:[%s615_s3 + $0x18] sm:$0x77] %v439_v55 }
  0xa6   :  { %v489_v8 = vpop.eup %488  ;;  %v462_v9 = vpack.c.bf16 %v487_v56, %v485_v53  ;;  %v442_v10 = vsel %vm575_vm6, %v461_v54, %v441_v58 }
  0xa7   :  { %v491_v11 = vpop.eup %490  ;;  %443 = vst [vmem:[%s615_s3 + $0x20] sm:$0x77] %v442_v10 }
  0xa8   :  { %v493_v12 = vpop.eup %492  ;;  %v445_v13 = vsel %vm575_vm6, %v462_v9, %v444_v7  ;;  %v457_v14 = vpack.c.bf16 %v491_v11, %v489_v8 }
  0xa9   :  { %v495_v15 = vpop.eup %494  ;;  %446 = vst [vmem:[%s615_s3 + $0x28] sm:$0x77] %v445_v13 }
  0xaa   :  { %v497_v59 = vpop.eup %496  ;;  %v458_v60 = vpack.c.bf16 %v495_v15, %v493_v12  ;;  %428 = vst [vmem:[%s615_s3] sm:$0xff] %v457_v14 }
  0xab   :  { %v499_v61 = vpop.eup %498 }
  0xac   :  { %v459_v62 = vpack.c.bf16 %v499_v61, %v497_v59  ;;  %429 = vst [vmem:[%s615_s3 + $0x8] sm:$0xff] %v458_v60 }
  0xae   :  { %430 = vst [vmem:[%s615_s3 + $0x10] sm:$0xff] %v459_v62 }

// kernel: model_forward.4
= control target key start
LH: loop header
LB: loop body
LE: loop exit
PB: predicated region body
PF: predicated region fallthrough
CT: control target
= control target key end

     0   :  { %s5363_s12 = smov 0   ;;  %s5365_s13 = smov 0   ;;  %s6747_s0 = inlined_call_operand.vmem [shape: bf16[16,1573], index: 0, kind: input, shape index: {}]   ;;  %s6748_s1 = inlined_call_operand.vmem [shape: bf16[1573,3072], index: 1, kind: input, shape index: {}]   ;;  %s6749_s2 = inlined_call_operand.vmem [shape: f32[1,3072], index: 2, kind: input, shape index: {}]   ;;  %s6750_s3 = inlined_call_operand.vmem [shape: bf16[16,3072], index: 3, kind: output, shape index: {}]  }
   0x1   :  { %s5367_s14 = smov 0  }
   0x2 LB: > { %s5379_s15 = sadd.s32 4294967295, %s5339_s14   ;;  %s5382_s16 = sadd.s32 1, %s5339_s14   ;;  %s5339_s14 = sphi %s5367_s14, %s6754_s14   ;;  %s5335_s13 = sphi %s5365_s13, %s6753_s13   ;;  %s5331_s12 = sphi %s5363_s12, %s6752_s12  }
   0x3   : > { %s38_s17 = ssub.s32 %s5339_s14, %s5382_s16  ;;  %s41_s18 = sadd.s32 1, %s5335_s13 }
   0x4   : > { %p39_p0 = scmp.eq.s32.totalorder %s38_s17, 0  ;;  %p48_p1 = scmp.ne.s32.totalorder %s5335_s13, %s5331_s12 }
   0x5   : > { %p49_p2 = scmp.eq.s32.totalorder %s5339_s14, 0  ;;  %p104_p3 = scmp.eq.s32.totalorder %s5379_s15, 5 }
   0x6   : > { %s5392_s19 = scalar_select %p39_p0, %s5335_s13, %s41_s18  }
   0x7   : > { %p50_p4 = por %p49_p2, %p48_p1  ;;  %p5394_p5 = por %p104_p3, %p48_p1 }
   0x8   : > { %p4217_p6 = scmp.ge.s32.totalorder %s5339_s14, 6 }
   0xa   : > { %129 = sbr.rel (%p4217_p6) target bundleno = 216 (0xd8), region = 20 }
   0xf   : > { %132 = sbr.rel (!%p50_p4) target bundleno = 216 (0xd8), region = 24  ;;  %s134_s21 = sand.u32 (%p50_p4), 1, %s5335_s13  }
  0x10   : > { %s4643_s22 = sshll.u32 (%p50_p4), %s5339_s14, 4  ;;  %s4649_s23 = smul.u32 (%p50_p4), 3152, %s134_s21 }
  0x11   : > { %s5404_s26 = scalar_lea.vmem (%p50_p4), %s6748_s1, %s4643_s22 }
  0x12   : > { %v152_v0 = vld [vmem:[%s5404_s26] sm:$0xff] (%p50_p4)  ;;  %v154_v1 = vld [vmem:[%s5404_s26 + $0x8] sm:$0xff] (%p50_p4)  ;;  %s5412_s27 = scalar_lea.vmem (%p50_p4), [#allocation2], %s4649_s23 }
  0x13   : > { %v156_v2 = vld [vmem:[%s5404_s26 + $0x60] sm:$0xff] (%p50_p4)  ;;  %v158_v3 = vld [vmem:[%s5404_s26 + $0x68] sm:$0xff] (%p50_p4)  ;;  %153 = vst [vmem:[%s5412_s27] sm:$0xff] (%p50_p4), %v152_v0  ;;  %155 = vst [vmem:[%s5412_s27 + $0x8] sm:$0xff] (%p50_p4), %v154_v1 }
  0x14   : > { %v160_v4 = vld [vmem:[%s5404_s26 + $0xc0] sm:$0xff]  ;;  %v162_v5 = vld [vmem:[%s5404_s26 + $0xc8] sm:$0xff]  ;;  %157 = vst [vmem:[%s5412_s27 + $0x10] sm:$0xff] %v156_v2  ;;  %159 = vst [vmem:[%s5412_s27 + $0x18] sm:$0xff] %v158_v3 }
  0x15   : > { %161 = vst [vmem:[%s5412_s27 + $0x20] sm:$0xff] %v160_v4  ;;  %163 = vst [vmem:[%s5412_s27 + $0x28] sm:$0xff] %v162_v5  ;;  %v164_v6 = vld [vmem:[%s5404_s26 + $0x120] sm:$0xff]  ;;  %v166_v7 = vld [vmem:[%s5404_s26 + $0x128] sm:$0xff] }
  0x16   : > { %v168_v8 = vld [vmem:[%s5404_s26 + $0x180] sm:$0xff]  ;;  %165 = vst [vmem:[%s5412_s27 + $0x30] sm:$0xff] %v164_v6  ;;  %167 = vst [vmem:[%s5412_s27 + $0x38] sm:$0xff] %v166_v7  ;;  %v170_v9 = vld [vmem:[%s5404_s26 + $0x188] sm:$0xff] }
  0x17   : > { %169 = vst [vmem:[%s5412_s27 + $0x40] sm:$0xff] %v168_v8  ;;  %v172_v10 = vld [vmem:[%s5404_s26 + $0x1e0] sm:$0xff]  ;;  %v174_v11 = vld [vmem:[%s5404_s26 + $0x1e8] sm:$0xff]  ;;  %171 = vst [vmem:[%s5412_s27 + $0x48] sm:$0xff] %v170_v9 }
  0x18   : > { %173 = vst [vmem:[%s5412_s27 + $0x50] sm:$0xff] %v172_v10  ;;  %175 = vst [vmem:[%s5412_s27 + $0x58] sm:$0xff] %v174_v11  ;;  %v176_v12 = vld [vmem:[%s5404_s26 + $0x240] sm:$0xff]  ;;  %v178_v13 = vld [vmem:[%s5404_s26 + $0x248] sm:$0xff] }
  0x19   : > { %v180_v14 = vld [vmem:[%s5404_s26 + $0x2a0] sm:$0xff]  ;;  %177 = vst [vmem:[%s5412_s27 + $0x60] sm:$0xff] %v176_v12  ;;  %179 = vst [vmem:[%s5412_s27 + $0x68] sm:$0xff] %v178_v13  ;;  %v182_v15 = vld [vmem:[%s5404_s26 + $0x2a8] sm:$0xff] }
  0x1a   : > { %181 = vst [vmem:[%s5412_s27 + $0x70] sm:$0xff] %v180_v14  ;;  %v184_v16 = vld [vmem:[%s5404_s26 + $0x300] sm:$0xff]  ;;  %v186_v17 = vld [vmem:[%s5404_s26 + $0x308] sm:$0xff]  ;;  %183 = vst [vmem:[%s5412_s27 + $0x78] sm:$0xff] %v182_v15 }
  0x1b   : > { %185 = vst [vmem:[%s5412_s27 + $0x80] sm:$0xff] %v184_v16  ;;  %187 = vst [vmem:[%s5412_s27 + $0x88] sm:$0xff] %v186_v17  ;;  %v188_v18 = vld [vmem:[%s5404_s26 + $0x360] sm:$0xff]  ;;  %v190_v19 = vld [vmem:[%s5404_s26 + $0x368] sm:$0xff] }
  0x1c   : > { %v192_v20 = vld [vmem:[%s5404_s26 + $0x3c0] sm:$0xff]  ;;  %189 = vst [vmem:[%s5412_s27 + $0x90] sm:$0xff] %v188_v18  ;;  %191 = vst [vmem:[%s5412_s27 + $0x98] sm:$0xff] %v190_v19  ;;  %v194_v21 = vld [vmem:[%s5404_s26 + $0x3c8] sm:$0xff] }
  0x1d   : > { %193 = vst [vmem:[%s5412_s27 + $0xa0] sm:$0xff] %v192_v20  ;;  %v196_v22 = vld [vmem:[%s5404_s26 + $0x420] sm:$0xff]  ;;  %v198_v23 = vld [vmem:[%s5404_s26 + $0x428] sm:$0xff]  ;;  %195 = vst [vmem:[%s5412_s27 + $0xa8] sm:$0xff] %v194_v21 }
  0x1e   : > { %197 = vst [vmem:[%s5412_s27 + $0xb0] sm:$0xff] %v196_v22  ;;  %199 = vst [vmem:[%s5412_s27 + $0xb8] sm:$0xff] %v198_v23  ;;  %v200_v24 = vld [vmem:[%s5404_s26 + $0x480] sm:$0xff]  ;;  %v202_v25 = vld [vmem:[%s5404_s26 + $0x488] sm:$0xff] }
  0x1f   : > { %v204_v26 = vld [vmem:[%s5404_s26 + $0x4e0] sm:$0xff]  ;;  %201 = vst [vmem:[%s5412_s27 + $0xc0] sm:$0xff] %v200_v24  ;;  %203 = vst [vmem:[%s5412_s27 + $0xc8] sm:$0xff] %v202_v25  ;;  %v206_v27 = vld [vmem:[%s5404_s26 + $0x4e8] sm:$0xff] }
  0x20   : > { %205 = vst [vmem:[%s5412_s27 + $0xd0] sm:$0xff] %v204_v26  ;;  %v208_v28 = vld [vmem:[%s5404_s26 + $0x540] sm:$0xff]  ;;  %v210_v29 = vld [vmem:[%s5404_s26 + $0x548] sm:$0xff]  ;;  %207 = vst [vmem:[%s5412_s27 + $0xd8] sm:$0xff] %v206_v27 }
  0x21   : > { %209 = vst [vmem:[%s5412_s27 + $0xe0] sm:$0xff] %v208_v28  ;;  %211 = vst [vmem:[%s5412_s27 + $0xe8] sm:$0xff] %v210_v29  ;;  %v212_v30 = vld [vmem:[%s5404_s26 + $0x5a0] sm:$0xff]  ;;  %v214_v31 = vld [vmem:[%s5404_s26 + $0x5a8] sm:$0xff] }
  0x22   : > { %v216_v32 = vld [vmem:[%s5404_s26 + $0x600] sm:$0xff]  ;;  %213 = vst [vmem:[%s5412_s27 + $0xf0] sm:$0xff] %v212_v30  ;;  %215 = vst [vmem:[%s5412_s27 + $0xf8] sm:$0xff] %v214_v31  ;;  %v218_v33 = vld [vmem:[%s5404_s26 + $0x608] sm:$0xff] }
  0x23   : > { %217 = vst [vmem:[%s5412_s27 + $0x100] sm:$0xff] %v216_v32  ;;  %v220_v34 = vld [vmem:[%s5404_s26 + $0x660] sm:$0xff]  ;;  %v222_v35 = vld [vmem:[%s5404_s26 + $0x668] sm:$0xff]  ;;  %219 = vst [vmem:[%s5412_s27 + $0x108] sm:$0xff] %v218_v33 }
  0x24   : > { %221 = vst [vmem:[%s5412_s27 + $0x110] sm:$0xff] %v220_v34  ;;  %223 = vst [vmem:[%s5412_s27 + $0x118] sm:$0xff] %v222_v35  ;;  %v224_v36 = vld [vmem:[%s5404_s26 + $0x6c0] sm:$0xff]  ;;  %v226_v37 = vld [vmem:[%s5404_s26 + $0x6c8] sm:$0xff] }
  0x25   : > { %v228_v38 = vld [vmem:[%s5404_s26 + $0x720] sm:$0xff]  ;;  %225 = vst [vmem:[%s5412_s27 + $0x120] sm:$0xff] %v224_v36  ;;  %227 = vst [vmem:[%s5412_s27 + $0x128] sm:$0xff] %v226_v37  ;;  %v230_v39 = vld [vmem:[%s5404_s26 + $0x728] sm:$0xff] }
  0x26   : > { %229 = vst [vmem:[%s5412_s27 + $0x130] sm:$0xff] %v228_v38  ;;  %v232_v40 = vld [vmem:[%s5404_s26 + $0x780] sm:$0xff]  ;;  %v234_v41 = vld [vmem:[%s5404_s26 + $0x788] sm:$0xff]  ;;  %231 = vst [vmem:[%s5412_s27 + $0x138] sm:$0xff] %v230_v39 }
  0x27   : > { %233 = vst [vmem:[%s5412_s27 + $0x140] sm:$0xff] %v232_v40  ;;  %235 = vst [vmem:[%s5412_s27 + $0x148] sm:$0xff] %v234_v41  ;;  %v236_v42 = vld [vmem:[%s5404_s26 + $0x7e0] sm:$0xff]  ;;  %v238_v43 = vld [vmem:[%s5404_s26 + $0x7e8] sm:$0xff] }
  0x28   : > { %v240_v44 = vld [vmem:[%s5404_s26 + $0x840] sm:$0xff]  ;;  %237 = vst [vmem:[%s5412_s27 + $0x150] sm:$0xff] %v236_v42  ;;  %239 = vst [vmem:[%s5412_s27 + $0x158] sm:$0xff] %v238_v43  ;;  %v242_v45 = vld [vmem:[%s5404_s26 + $0x848] sm:$0xff] }
  0x29   : > { %241 = vst [vmem:[%s5412_s27 + $0x160] sm:$0xff] %v240_v44  ;;  %v244_v46 = vld [vmem:[%s5404_s26 + $0x8a0] sm:$0xff]  ;;  %v246_v47 = vld [vmem:[%s5404_s26 + $0x8a8] sm:$0xff]  ;;  %243 = vst [vmem:[%s5412_s27 + $0x168] sm:$0xff] %v242_v45 }
  0x2a   : > { %245 = vst [vmem:[%s5412_s27 + $0x170] sm:$0xff] %v244_v46  ;;  %247 = vst [vmem:[%s5412_s27 + $0x178] sm:$0xff] %v246_v47  ;;  %v248_v48 = vld [vmem:[%s5404_s26 + $0x900] sm:$0xff]  ;;  %v250_v49 = vld [vmem:[%s5404_s26 + $0x908] sm:$0xff] }
  0x2b   : > { %v252_v50 = vld [vmem:[%s5404_s26 + $0x960] sm:$0xff]  ;;  %249 = vst [vmem:[%s5412_s27 + $0x180] sm:$0xff] %v248_v48  ;;  %251 = vst [vmem:[%s5412_s27 + $0x188] sm:$0xff] %v250_v49  ;;  %v254_v51 = vld [vmem:[%s5404_s26 + $0x968] sm:$0xff] }
  0x2c   : > { %253 = vst [vmem:[%s5412_s27 + $0x190] sm:$0xff] %v252_v50  ;;  %v256_v52 = vld [vmem:[%s5404_s26 + $0x9c0] sm:$0xff]  ;;  %v258_v53 = vld [vmem:[%s5404_s26 + $0x9c8] sm:$0xff]  ;;  %255 = vst [vmem:[%s5412_s27 + $0x198] sm:$0xff] %v254_v51 }
  0x2d   : > { %257 = vst [vmem:[%s5412_s27 + $0x1a0] sm:$0xff] %v256_v52  ;;  %259 = vst [vmem:[%s5412_s27 + $0x1a8] sm:$0xff] %v258_v53  ;;  %v260_v54 = vld [vmem:[%s5404_s26 + $0xa20] sm:$0xff]  ;;  %v262_v55 = vld [vmem:[%s5404_s26 + $0xa28] sm:$0xff] }
  0x2e   : > { %v264_v56 = vld [vmem:[%s5404_s26 + $0xa80] sm:$0xff]  ;;  %261 = vst [vmem:[%s5412_s27 + $0x1b0] sm:$0xff] %v260_v54  ;;  %263 = vst [vmem:[%s5412_s27 + $0x1b8] sm:$0xff] %v262_v55  ;;  %v266_v57 = vld [vmem:[%s5404_s26 + $0xa88] sm:$0xff] }
  0x2f   : > { %265 = vst [vmem:[%s5412_s27 + $0x1c0] sm:$0xff] %v264_v56  ;;  %v268_v58 = vld [vmem:[%s5404_s26 + $0xae0] sm:$0xff]  ;;  %v270_v59 = vld [vmem:[%s5404_s26 + $0xae8] sm:$0xff]  ;;  %267 = vst [vmem:[%s5412_s27 + $0x1c8] sm:$0xff] %v266_v57 }
  0x30   : > { %269 = vst [vmem:[%s5412_s27 + $0x1d0] sm:$0xff] %v268_v58  ;;  %271 = vst [vmem:[%s5412_s27 + $0x1d8] sm:$0xff] %v270_v59  ;;  %v272_v60 = vld [vmem:[%s5404_s26 + $0xb40] sm:$0xff]  ;;  %v274_v61 = vld [vmem:[%s5404_s26 + $0xb48] sm:$0xff] }
  0x31   : > { %v276_v62 = vld [vmem:[%s5404_s26 + $0xba0] sm:$0xff]  ;;  %273 = vst [vmem:[%s5412_s27 + $0x1e0] sm:$0xff] %v272_v60  ;;  %275 = vst [vmem:[%s5412_s27 + $0x1e8] sm:$0xff] %v274_v61  ;;  %v278_v63 = vld [vmem:[%s5404_s26 + $0xba8] sm:$0xff] }
  0x32   : > { %277 = vst [vmem:[%s5412_s27 + $0x1f0] sm:$0xff] %v276_v62  ;;  %v280_v0 = vld [vmem:[%s5404_s26 + $0xc00] sm:$0xff]  ;;  %v282_v1 = vld [vmem:[%s5404_s26 + $0xc08] sm:$0xff]  ;;  %279 = vst [vmem:[%s5412_s27 + $0x1f8] sm:$0xff] %v278_v63 }
  0x33   : > { %281 = vst [vmem:[%s5412_s27 + $0x200] sm:$0xff] %v280_v0  ;;  %283 = vst [vmem:[%s5412_s27 + $0x208] sm:$0xff] %v282_v1  ;;  %v284_v2 = vld [vmem:[%s5404_s26 + $0xc60] sm:$0xff]  ;;  %v286_v3 = vld [vmem:[%s5404_s26 + $0xc68] sm:$0xff] }
  0x34   : > { %v288_v4 = vld [vmem:[%s5404_s26 + $0xcc0] sm:$0xff]  ;;  %285 = vst [vmem:[%s5412_s27 + $0x210] sm:$0xff] %v284_v2  ;;  %287 = vst [vmem:[%s5412_s27 + $0x218] sm:$0xff] %v286_v3  ;;  %v290_v5 = vld [vmem:[%s5404_s26 + $0xcc8] sm:$0xff] }
  0x35   : > { %289 = vst [vmem:[%s5412_s27 + $0x220] sm:$0xff] %v288_v4  ;;  %v292_v6 = vld [vmem:[%s5404_s26 + $0xd20] sm:$0xff]  ;;  %v294_v7 = vld [vmem:[%s5404_s26 + $0xd28] sm:$0xff]  ;;  %291 = vst [vmem:[%s5412_s27 + $0x228] sm:$0xff] %v290_v5 }
  0x36   : > { %293 = vst [vmem:[%s5412_s27 + $0x230] sm:$0xff] %v292_v6  ;;  %295 = vst [vmem:[%s5412_s27 + $0x238] sm:$0xff] %v294_v7  ;;  %v296_v8 = vld [vmem:[%s5404_s26 + $0xd80] sm:$0xff]  ;;  %v298_v9 = vld [vmem:[%s5404_s26 + $0xd88] sm:$0xff] }
  0x37   : > { %v300_v10 = vld [vmem:[%s5404_s26 + $0xde0] sm:$0xff]  ;;  %297 = vst [vmem:[%s5412_s27 + $0x240] sm:$0xff] %v296_v8  ;;  %299 = vst [vmem:[%s5412_s27 + $0x248] sm:$0xff] %v298_v9  ;;  %v302_v11 = vld [vmem:[%s5404_s26 + $0xde8] sm:$0xff] }
  0x38   : > { %301 = vst [vmem:[%s5412_s27 + $0x250] sm:$0xff] %v300_v10  ;;  %v304_v12 = vld [vmem:[%s5404_s26 + $0xe40] sm:$0xff]  ;;  %v306_v13 = vld [vmem:[%s5404_s26 + $0xe48] sm:$0xff]  ;;  %303 = vst [vmem:[%s5412_s27 + $0x258] sm:$0xff] %v302_v11 }
  0x39   : > { %305 = vst [vmem:[%s5412_s27 + $0x260] sm:$0xff] %v304_v12  ;;  %307 = vst [vmem:[%s5412_s27 + $0x268] sm:$0xff] %v306_v13  ;;  %v308_v14 = vld [vmem:[%s5404_s26 + $0xea0] sm:$0xff]  ;;  %v310_v15 = vld [vmem:[%s5404_s26 + $0xea8] sm:$0xff] }
  0x3a   : > { %v312_v16 = vld [vmem:[%s5404_s26 + $0xf00] sm:$0xff]  ;;  %309 = vst [vmem:[%s5412_s27 + $0x270] sm:$0xff] %v308_v14  ;;  %311 = vst [vmem:[%s5412_s27 + $0x278] sm:$0xff] %v310_v15  ;;  %v314_v17 = vld [vmem:[%s5404_s26 + $0xf08] sm:$0xff] }
  0x3b   : > { %313 = vst [vmem:[%s5412_s27 + $0x280] sm:$0xff] %v312_v16  ;;  %v316_v18 = vld [vmem:[%s5404_s26 + $0xf60] sm:$0xff]  ;;  %v318_v19 = vld [vmem:[%s5404_s26 + $0xf68] sm:$0xff]  ;;  %315 = vst [vmem:[%s5412_s27 + $0x288] sm:$0xff] %v314_v17 }
  0x3c   : > { %317 = vst [vmem:[%s5412_s27 + $0x290] sm:$0xff] %v316_v18  ;;  %319 = vst [vmem:[%s5412_s27 + $0x298] sm:$0xff] %v318_v19  ;;  %v320_v20 = vld [vmem:[%s5404_s26 + $0xfc0] sm:$0xff]  ;;  %v322_v21 = vld [vmem:[%s5404_s26 + $0xfc8] sm:$0xff] }
  0x3d   : > { %v324_v22 = vld [vmem:[%s5404_s26 + $0x1020] sm:$0xff]  ;;  %321 = vst [vmem:[%s5412_s27 + $0x2a0] sm:$0xff] %v320_v20  ;;  %323 = vst [vmem:[%s5412_s27 + $0x2a8] sm:$0xff] %v322_v21  ;;  %v326_v23 = vld [vmem:[%s5404_s26 + $0x1028] sm:$0xff] }
  0x3e   : > { %325 = vst [vmem:[%s5412_s27 + $0x2b0] sm:$0xff] %v324_v22  ;;  %v328_v24 = vld [vmem:[%s5404_s26 + $0x1080] sm:$0xff]  ;;  %v330_v25 = vld [vmem:[%s5404_s26 + $0x1088] sm:$0xff]  ;;  %327 = vst [vmem:[%s5412_s27 + $0x2b8] sm:$0xff] %v326_v23 }
  0x3f   : > { %329 = vst [vmem:[%s5412_s27 + $0x2c0] sm:$0xff] %v328_v24  ;;  %331 = vst [vmem:[%s5412_s27 + $0x2c8] sm:$0xff] %v330_v25  ;;  %v332_v26 = vld [vmem:[%s5404_s26 + $0x10e0] sm:$0xff]  ;;  %v334_v27 = vld [vmem:[%s5404_s26 + $0x10e8] sm:$0xff] }
  0x40   : > { %v336_v28 = vld [vmem:[%s5404_s26 + $0x1140] sm:$0xff]  ;;  %333 = vst [vmem:[%s5412_s27 + $0x2d0] sm:$0xff] %v332_v26  ;;  %335 = vst [vmem:[%s5412_s27 + $0x2d8] sm:$0xff] %v334_v27  ;;  %v338_v29 = vld [vmem:[%s5404_s26 + $0x1148] sm:$0xff] }
  0x41   : > { %337 = vst [vmem:[%s5412_s27 + $0x2e0] sm:$0xff] %v336_v28  ;;  %v340_v30 = vld [vmem:[%s5404_s26 + $0x11a0] sm:$0xff]  ;;  %v342_v31 = vld [vmem:[%s5404_s26 + $0x11a8] sm:$0xff]  ;;  %339 = vst [vmem:[%s5412_s27 + $0x2e8] sm:$0xff] %v338_v29 }
  0x42   : > { %341 = vst [vmem:[%s5412_s27 + $0x2f0] sm:$0xff] %v340_v30  ;;  %343 = vst [vmem:[%s5412_s27 + $0x2f8] sm:$0xff] %v342_v31  ;;  %v344_v32 = vld [vmem:[%s5404_s26 + $0x1200] sm:$0xff]  ;;  %v346_v33 = vld [vmem:[%s5404_s26 + $0x1208] sm:$0xff] }
  0x43   : > { %v348_v34 = vld [vmem:[%s5404_s26 + $0x1260] sm:$0xff]  ;;  %345 = vst [vmem:[%s5412_s27 + $0x300] sm:$0xff] %v344_v32  ;;  %347 = vst [vmem:[%s5412_s27 + $0x308] sm:$0xff] %v346_v33  ;;  %v350_v35 = vld [vmem:[%s5404_s26 + $0x1268] sm:$0xff] }
  0x44   : > { %349 = vst [vmem:[%s5412_s27 + $0x310] sm:$0xff] %v348_v34  ;;  %v352_v36 = vld [vmem:[%s5404_s26 + $0x12c0] sm:$0xff]  ;;  %v354_v37 = vld [vmem:[%s5404_s26 + $0x12c8] sm:$0xff]  ;;  %351 = vst [vmem:[%s5412_s27 + $0x318] sm:$0xff] %v350_v35 }
  0x45   : > { %353 = vst [vmem:[%s5412_s27 + $0x320] sm:$0xff] %v352_v36  ;;  %355 = vst [vmem:[%s5412_s27 + $0x328] sm:$0xff] %v354_v37  ;;  %v356_v38 = vld [vmem:[%s5404_s26 + $0x1320] sm:$0xff]  ;;  %v358_v39 = vld [vmem:[%s5404_s26 + $0x1328] sm:$0xff] }
  0x46   : > { %v360_v40 = vld [vmem:[%s5404_s26 + $0x1380] sm:$0xff]  ;;  %357 = vst [vmem:[%s5412_s27 + $0x330] sm:$0xff] %v356_v38  ;;  %359 = vst [vmem:[%s5412_s27 + $0x338] sm:$0xff] %v358_v39  ;;  %v362_v41 = vld [vmem:[%s5404_s26 + $0x1388] sm:$0xff] }
  0x47   : > { %361 = vst [vmem:[%s5412_s27 + $0x340] sm:$0xff] %v360_v40  ;;  %v364_v42 = vld [vmem:[%s5404_s26 + $0x13e0] sm:$0xff]  ;;  %v366_v43 = vld [vmem:[%s5404_s26 + $0x13e8] sm:$0xff]  ;;  %363 = vst [vmem:[%s5412_s27 + $0x348] sm:$0xff] %v362_v41 }
  0x48   : > { %365 = vst [vmem:[%s5412_s27 + $0x350] sm:$0xff] %v364_v42  ;;  %367 = vst [vmem:[%s5412_s27 + $0x358] sm:$0xff] %v366_v43  ;;  %v368_v44 = vld [vmem:[%s5404_s26 + $0x1440] sm:$0xff]  ;;  %v370_v45 = vld [vmem:[%s5404_s26 + $0x1448] sm:$0xff] }
  0x49   : > { %v372_v46 = vld [vmem:[%s5404_s26 + $0x14a0] sm:$0xff]  ;;  %369 = vst [vmem:[%s5412_s27 + $0x360] sm:$0xff] %v368_v44  ;;  %371 = vst [vmem:[%s5412_s27 + $0x368] sm:$0xff] %v370_v45  ;;  %v374_v47 = vld [vmem:[%s5404_s26 + $0x14a8] sm:$0xff] }
  0x4a   : > { %373 = vst [vmem:[%s5412_s27 + $0x370] sm:$0xff] %v372_v46  ;;  %v376_v48 = vld [vmem:[%s5404_s26 + $0x1500] sm:$0xff]  ;;  %v378_v49 = vld [vmem:[%s5404_s26 + $0x1508] sm:$0xff]  ;;  %375 = vst [vmem:[%s5412_s27 + $0x378] sm:$0xff] %v374_v47 }
  0x4b   : > { %377 = vst [vmem:[%s5412_s27 + $0x380] sm:$0xff] %v376_v48  ;;  %379 = vst [vmem:[%s5412_s27 + $0x388] sm:$0xff] %v378_v49  ;;  %v380_v50 = vld [vmem:[%s5404_s26 + $0x1560] sm:$0xff]  ;;  %v382_v51 = vld [vmem:[%s5404_s26 + $0x1568] sm:$0xff] }
  0x4c   : > { %v384_v52 = vld [vmem:[%s5404_s26 + $0x15c0] sm:$0xff]  ;;  %381 = vst [vmem:[%s5412_s27 + $0x390] sm:$0xff] %v380_v50  ;;  %383 = vst [vmem:[%s5412_s27 + $0x398] sm:$0xff] %v382_v51  ;;  %v386_v53 = vld [vmem:[%s5404_s26 + $0x15c8] sm:$0xff] }
  0x4d   : > { %385 = vst [vmem:[%s5412_s27 + $0x3a0] sm:$0xff] %v384_v52  ;;  %v388_v54 = vld [vmem:[%s5404_s26 + $0x1620] sm:$0xff]  ;;  %v390_v55 = vld [vmem:[%s5404_s26 + $0x1628] sm:$0xff]  ;;  %387 = vst [vmem:[%s5412_s27 + $0x3a8] sm:$0xff] %v386_v53 }
  0x4e   : > { %389 = vst [vmem:[%s5412_s27 + $0x3b0] sm:$0xff] %v388_v54  ;;  %391 = vst [vmem:[%s5412_s27 + $0x3b8] sm:$0xff] %v390_v55  ;;  %v392_v56 = vld [vmem:[%s5404_s26 + $0x1680] sm:$0xff]  ;;  %v394_v57 = vld [vmem:[%s5404_s26 + $0x1688] sm:$0xff] }
  0x4f   : > { %v396_v58 = vld [vmem:[%s5404_s26 + $0x16e0] sm:$0xff]  ;;  %393 = vst [vmem:[%s5412_s27 + $0x3c0] sm:$0xff] %v392_v56  ;;  %395 = vst [vmem:[%s5412_s27 + $0x3c8] sm:$0xff] %v394_v57  ;;  %v398_v59 = vld [vmem:[%s5404_s26 + $0x16e8] sm:$0xff] }
  0x50   : > { %397 = vst [vmem:[%s5412_s27 + $0x3d0] sm:$0xff] %v396_v58  ;;  %v400_v60 = vld [vmem:[%s5404_s26 + $0x1740] sm:$0xff]  ;;  %v402_v61 = vld [vmem:[%s5404_s26 + $0x1748] sm:$0xff]  ;;  %399 = vst [vmem:[%s5412_s27 + $0x3d8] sm:$0xff] %v398_v59 }
  0x51   : > { %401 = vst [vmem:[%s5412_s27 + $0x3e0] sm:$0xff] %v400_v60  ;;  %403 = vst [vmem:[%s5412_s27 + $0x3e8] sm:$0xff] %v402_v61  ;;  %v404_v62 = vld [vmem:[%s5404_s26 + $0x17a0] sm:$0xff]  ;;  %v406_v63 = vld [vmem:[%s5404_s26 + $0x17a8] sm:$0xff] }
  0x52   : > { %v408_v0 = vld [vmem:[%s5404_s26 + $0x1800] sm:$0xff]  ;;  %405 = vst [vmem:[%s5412_s27 + $0x3f0] sm:$0xff] %v404_v62  ;;  %407 = vst [vmem:[%s5412_s27 + $0x3f8] sm:$0xff] %v406_v63  ;;  %v410_v1 = vld [vmem:[%s5404_s26 + $0x1808] sm:$0xff] }
  0x53   : > { %409 = vst [vmem:[%s5412_s27 + $0x400] sm:$0xff] %v408_v0  ;;  %v412_v2 = vld [vmem:[%s5404_s26 + $0x1860] sm:$0xff]  ;;  %v414_v3 = vld [vmem:[%s5404_s26 + $0x1868] sm:$0xff]  ;;  %411 = vst [vmem:[%s5412_s27 + $0x408] sm:$0xff] %v410_v1 }
  0x54   : > { %413 = vst [vmem:[%s5412_s27 + $0x410] sm:$0xff] %v412_v2  ;;  %415 = vst [vmem:[%s5412_s27 + $0x418] sm:$0xff] %v414_v3  ;;  %v416_v4 = vld [vmem:[%s5404_s26 + $0x18c0] sm:$0xff]  ;;  %v418_v5 = vld [vmem:[%s5404_s26 + $0x18c8] sm:$0xff] }
  0x55   : > { %v420_v6 = vld [vmem:[%s5404_s26 + $0x1920] sm:$0xff]  ;;  %417 = vst [vmem:[%s5412_s27 + $0x420] sm:$0xff] %v416_v4  ;;  %419 = vst [vmem:[%s5412_s27 + $0x428] sm:$0xff] %v418_v5  ;;  %v422_v7 = vld [vmem:[%s5404_s26 + $0x1928] sm:$0xff] }
  0x56   : > { %421 = vst [vmem:[%s5412_s27 + $0x430] sm:$0xff] %v420_v6  ;;  %v424_v8 = vld [vmem:[%s5404_s26 + $0x1980] sm:$0xff]  ;;  %v426_v9 = vld [vmem:[%s5404_s26 + $0x1988] sm:$0xff]  ;;  %423 = vst [vmem:[%s5412_s27 + $0x438] sm:$0xff] %v422_v7 }
  0x57   : > { %425 = vst [vmem:[%s5412_s27 + $0x440] sm:$0xff] %v424_v8  ;;  %427 = vst [vmem:[%s5412_s27 + $0x448] sm:$0xff] %v426_v9  ;;  %v428_v10 = vld [vmem:[%s5404_s26 + $0x19e0] sm:$0xff]  ;;  %v430_v11 = vld [vmem:[%s5404_s26 + $0x19e8] sm:$0xff] }
  0x58   : > { %v432_v12 = vld [vmem:[%s5404_s26 + $0x1a40] sm:$0xff]  ;;  %429 = vst [vmem:[%s5412_s27 + $0x450] sm:$0xff] %v428_v10  ;;  %431 = vst [vmem:[%s5412_s27 + $0x458] sm:$0xff] %v430_v11  ;;  %v434_v13 = vld [vmem:[%s5404_s26 + $0x1a48] sm:$0xff] }
  0x59   : > { %433 = vst [vmem:[%s5412_s27 + $0x460] sm:$0xff] %v432_v12  ;;  %v436_v14 = vld [vmem:[%s5404_s26 + $0x1aa0] sm:$0xff]  ;;  %v438_v15 = vld [vmem:[%s5404_s26 + $0x1aa8] sm:$0xff]  ;;  %435 = vst [vmem:[%s5412_s27 + $0x468] sm:$0xff] %v434_v13 }
  0x5a   : > { %437 = vst [vmem:[%s5412_s27 + $0x470] sm:$0xff] %v436_v14  ;;  %439 = vst [vmem:[%s5412_s27 + $0x478] sm:$0xff] %v438_v15  ;;  %v440_v16 = vld [vmem:[%s5404_s26 + $0x1b00] sm:$0xff]  ;;  %v442_v17 = vld [vmem:[%s5404_s26 + $0x1b08] sm:$0xff] }
  0x5b   : > { %v444_v18 = vld [vmem:[%s5404_s26 + $0x1b60] sm:$0xff]  ;;  %441 = vst [vmem:[%s5412_s27 + $0x480] sm:$0xff] %v440_v16  ;;  %443 = vst [vmem:[%s5412_s27 + $0x488] sm:$0xff] %v442_v17  ;;  %v446_v19 = vld [vmem:[%s5404_s26 + $0x1b68] sm:$0xff] }
  0x5c   : > { %445 = vst [vmem:[%s5412_s27 + $0x490] sm:$0xff] %v444_v18  ;;  %v448_v20 = vld [vmem:[%s5404_s26 + $0x1bc0] sm:$0xff]  ;;  %v450_v21 = vld [vmem:[%s5404_s26 + $0x1bc8] sm:$0xff]  ;;  %447 = vst [vmem:[%s5412_s27 + $0x498] sm:$0xff] %v446_v19 }
  0x5d   : > { %449 = vst [vmem:[%s5412_s27 + $0x4a0] sm:$0xff] %v448_v20  ;;  %451 = vst [vmem:[%s5412_s27 + $0x4a8] sm:$0xff] %v450_v21  ;;  %v452_v22 = vld [vmem:[%s5404_s26 + $0x1c20] sm:$0xff]  ;;  %v454_v23 = vld [vmem:[%s5404_s26 + $0x1c28] sm:$0xff] }
  0x5e   : > { %v456_v24 = vld [vmem:[%s5404_s26 + $0x1c80] sm:$0xff]  ;;  %453 = vst [vmem:[%s5412_s27 + $0x4b0] sm:$0xff] %v452_v22  ;;  %455 = vst [vmem:[%s5412_s27 + $0x4b8] sm:$0xff] %v454_v23  ;;  %v458_v25 = vld [vmem:[%s5404_s26 + $0x1c88] sm:$0xff] }
  0x5f   : > { %457 = vst [vmem:[%s5412_s27 + $0x4c0] sm:$0xff] %v456_v24  ;;  %v460_v26 = vld [vmem:[%s5404_s26 + $0x1ce0] sm:$0xff]  ;;  %v462_v27 = vld [vmem:[%s5404_s26 + $0x1ce8] sm:$0xff]  ;;  %459 = vst [vmem:[%s5412_s27 + $0x4c8] sm:$0xff] %v458_v25 }
  0x60   : > { %461 = vst [vmem:[%s5412_s27 + $0x4d0] sm:$0xff] %v460_v26  ;;  %463 = vst [vmem:[%s5412_s27 + $0x4d8] sm:$0xff] %v462_v27  ;;  %v464_v28 = vld [vmem:[%s5404_s26 + $0x1d40] sm:$0xff]  ;;  %v466_v29 = vld [vmem:[%s5404_s26 + $0x1d48] sm:$0xff] }
  0x61   : > { %v468_v30 = vld [vmem:[%s5404_s26 + $0x1da0] sm:$0xff]  ;;  %465 = vst [vmem:[%s5412_s27 + $0x4e0] sm:$0xff] %v464_v28  ;;  %467 = vst [vmem:[%s5412_s27 + $0x4e8] sm:$0xff] %v466_v29  ;;  %v470_v31 = vld [vmem:[%s5404_s26 + $0x1da8] sm:$0xff] }
  0x62   : > { %469 = vst [vmem:[%s5412_s27 + $0x4f0] sm:$0xff] %v468_v30  ;;  %v472_v32 = vld [vmem:[%s5404_s26 + $0x1e00] sm:$0xff]  ;;  %v474_v33 = vld [vmem:[%s5404_s26 + $0x1e08] sm:$0xff]  ;;  %471 = vst [vmem:[%s5412_s27 + $0x4f8] sm:$0xff] %v470_v31 }
  0x63   : > { %473 = vst [vmem:[%s5412_s27 + $0x500] sm:$0xff] %v472_v32  ;;  %475 = vst [vmem:[%s5412_s27 + $0x508] sm:$0xff] %v474_v33  ;;  %v476_v34 = vld [vmem:[%s5404_s26 + $0x1e60] sm:$0xff]  ;;  %v478_v35 = vld [vmem:[%s5404_s26 + $0x1e68] sm:$0xff] }
  0x64   : > { %v480_v36 = vld [vmem:[%s5404_s26 + $0x1ec0] sm:$0xff]  ;;  %477 = vst [vmem:[%s5412_s27 + $0x510] sm:$0xff] %v476_v34  ;;  %479 = vst [vmem:[%s5412_s27 + $0x518] sm:$0xff] %v478_v35  ;;  %v482_v37 = vld [vmem:[%s5404_s26 + $0x1ec8] sm:$0xff] }
  0x65   : > { %481 = vst [vmem:[%s5412_s27 + $0x520] sm:$0xff] %v480_v36  ;;  %v484_v38 = vld [vmem:[%s5404_s26 + $0x1f20] sm:$0xff]  ;;  %v486_v39 = vld [vmem:[%s5404_s26 + $0x1f28] sm:$0xff]  ;;  %483 = vst [vmem:[%s5412_s27 + $0x528] sm:$0xff] %v482_v37 }
  0x66   : > { %485 = vst [vmem:[%s5412_s27 + $0x530] sm:$0xff] %v484_v38  ;;  %487 = vst [vmem:[%s5412_s27 + $0x538] sm:$0xff] %v486_v39  ;;  %v488_v40 = vld [vmem:[%s5404_s26 + $0x1f80] sm:$0xff]  ;;  %v490_v41 = vld [vmem:[%s5404_s26 + $0x1f88] sm:$0xff] }
  0x67   : > { %v492_v42 = vld [vmem:[%s5404_s26 + $0x1fe0] sm:$0xff]  ;;  %489 = vst [vmem:[%s5412_s27 + $0x540] sm:$0xff] %v488_v40  ;;  %491 = vst [vmem:[%s5412_s27 + $0x548] sm:$0xff] %v490_v41  ;;  %v494_v43 = vld [vmem:[%s5404_s26 + $0x1fe8] sm:$0xff] }
  0x68   : > { %493 = vst [vmem:[%s5412_s27 + $0x550] sm:$0xff] %v492_v42  ;;  %v496_v44 = vld [vmem:[%s5404_s26 + $0x2040] sm:$0xff]  ;;  %v498_v45 = vld [vmem:[%s5404_s26 + $0x2048] sm:$0xff]  ;;  %495 = vst [vmem:[%s5412_s27 + $0x558] sm:$0xff] %v494_v43 }
  0x69   : > { %497 = vst [vmem:[%s5412_s27 + $0x560] sm:$0xff] %v496_v44  ;;  %499 = vst [vmem:[%s5412_s27 + $0x568] sm:$0xff] %v498_v45  ;;  %v500_v46 = vld [vmem:[%s5404_s26 + $0x20a0] sm:$0xff]  ;;  %v502_v47 = vld [vmem:[%s5404_s26 + $0x20a8] sm:$0xff] }
  0x6a   : > { %v504_v48 = vld [vmem:[%s5404_s26 + $0x2100] sm:$0xff]  ;;  %501 = vst [vmem:[%s5412_s27 + $0x570] sm:$0xff] %v500_v46  ;;  %503 = vst [vmem:[%s5412_s27 + $0x578] sm:$0xff] %v502_v47  ;;  %v506_v49 = vld [vmem:[%s5404_s26 + $0x2108] sm:$0xff] }
  0x6b   : > { %505 = vst [vmem:[%s5412_s27 + $0x580] sm:$0xff] %v504_v48  ;;  %v508_v50 = vld [vmem:[%s5404_s26 + $0x2160] sm:$0xff]  ;;  %v510_v51 = vld [vmem:[%s5404_s26 + $0x2168] sm:$0xff]  ;;  %507 = vst [vmem:[%s5412_s27 + $0x588] sm:$0xff] %v506_v49 }
  0x6c   : > { %509 = vst [vmem:[%s5412_s27 + $0x590] sm:$0xff] %v508_v50  ;;  %511 = vst [vmem:[%s5412_s27 + $0x598] sm:$0xff] %v510_v51  ;;  %v512_v52 = vld [vmem:[%s5404_s26 + $0x21c0] sm:$0xff]  ;;  %v514_v53 = vld [vmem:[%s5404_s26 + $0x21c8] sm:$0xff] }
  0x6d   : > { %v516_v54 = vld [vmem:[%s5404_s26 + $0x2220] sm:$0xff]  ;;  %513 = vst [vmem:[%s5412_s27 + $0x5a0] sm:$0xff] %v512_v52  ;;  %515 = vst [vmem:[%s5412_s27 + $0x5a8] sm:$0xff] %v514_v53  ;;  %v518_v55 = vld [vmem:[%s5404_s26 + $0x2228] sm:$0xff] }
  0x6e   : > { %517 = vst [vmem:[%s5412_s27 + $0x5b0] sm:$0xff] %v516_v54  ;;  %v520_v56 = vld [vmem:[%s5404_s26 + $0x2280] sm:$0xff]  ;;  %v522_v57 = vld [vmem:[%s5404_s26 + $0x2288] sm:$0xff]  ;;  %519 = vst [vmem:[%s5412_s27 + $0x5b8] sm:$0xff] %v518_v55 }
  0x6f   : > { %521 = vst [vmem:[%s5412_s27 + $0x5c0] sm:$0xff] %v520_v56  ;;  %523 = vst [vmem:[%s5412_s27 + $0x5c8] sm:$0xff] %v522_v57  ;;  %v524_v58 = vld [vmem:[%s5404_s26 + $0x22e0] sm:$0xff]  ;;  %v526_v59 = vld [vmem:[%s5404_s26 + $0x22e8] sm:$0xff] }
  0x70   : > { %v528_v60 = vld [vmem:[%s5404_s26 + $0x2340] sm:$0xff]  ;;  %525 = vst [vmem:[%s5412_s27 + $0x5d0] sm:$0xff] %v524_v58  ;;  %527 = vst [vmem:[%s5412_s27 + $0x5d8] sm:$0xff] %v526_v59  ;;  %v530_v61 = vld [vmem:[%s5404_s26 + $0x2348] sm:$0xff] }
  0x71   : > { %529 = vst [vmem:[%s5412_s27 + $0x5e0] sm:$0xff] %v528_v60  ;;  %v532_v62 = vld [vmem:[%s5404_s26 + $0x23a0] sm:$0xff]  ;;  %v534_v63 = vld [vmem:[%s5404_s26 + $0x23a8] sm:$0xff]  ;;  %531 = vst [vmem:[%s5412_s27 + $0x5e8] sm:$0xff] %v530_v61 }
  0x72   : > { %533 = vst [vmem:[%s5412_s27 + $0x5f0] sm:$0xff] %v532_v62  ;;  %535 = vst [vmem:[%s5412_s27 + $0x5f8] sm:$0xff] %v534_v63  ;;  %v536_v0 = vld [vmem:[%s5404_s26 + $0x2400] sm:$0xff]  ;;  %v538_v1 = vld [vmem:[%s5404_s26 + $0x2408] sm:$0xff] }
  0x73   : > { %v540_v2 = vld [vmem:[%s5404_s26 + $0x2460] sm:$0xff]  ;;  %537 = vst [vmem:[%s5412_s27 + $0x600] sm:$0xff] %v536_v0  ;;  %539 = vst [vmem:[%s5412_s27 + $0x608] sm:$0xff] %v538_v1  ;;  %v542_v3 = vld [vmem:[%s5404_s26 + $0x2468] sm:$0xff] }
  0x74   : > { %541 = vst [vmem:[%s5412_s27 + $0x610] sm:$0xff] %v540_v2  ;;  %v544_v4 = vld [vmem:[%s5404_s26 + $0x24c0] sm:$0xff]  ;;  %v546_v5 = vld [vmem:[%s5404_s26 + $0x24c8] sm:$0xff]  ;;  %543 = vst [vmem:[%s5412_s27 + $0x618] sm:$0xff] %v542_v3 }
  0x75   : > { %545 = vst [vmem:[%s5412_s27 + $0x620] sm:$0xff] %v544_v4  ;;  %547 = vst [vmem:[%s5412_s27 + $0x628] sm:$0xff] %v546_v5  ;;  %v548_v6 = vld [vmem:[%s5404_s26 + $0x2520] sm:$0xff]  ;;  %v550_v7 = vld [vmem:[%s5404_s26 + $0x2528] sm:$0xff] }
  0x76   : > { %v552_v8 = vld [vmem:[%s5404_s26 + $0x2580] sm:$0xff]  ;;  %549 = vst [vmem:[%s5412_s27 + $0x630] sm:$0xff] %v548_v6  ;;  %551 = vst [vmem:[%s5412_s27 + $0x638] sm:$0xff] %v550_v7  ;;  %v554_v9 = vld [vmem:[%s5404_s26 + $0x2588] sm:$0xff] }
  0x77   : > { %553 = vst [vmem:[%s5412_s27 + $0x640] sm:$0xff] %v552_v8  ;;  %v556_v10 = vld [vmem:[%s5404_s26 + $0x25e0] sm:$0xff]  ;;  %v558_v11 = vld [vmem:[%s5404_s26 + $0x25e8] sm:$0xff]  ;;  %555 = vst [vmem:[%s5412_s27 + $0x648] sm:$0xff] %v554_v9 }
  0x78   : > { %557 = vst [vmem:[%s5412_s27 + $0x650] sm:$0xff] %v556_v10  ;;  %559 = vst [vmem:[%s5412_s27 + $0x658] sm:$0xff] %v558_v11  ;;  %v560_v12 = vld [vmem:[%s5404_s26 + $0x2640] sm:$0xff]  ;;  %v562_v13 = vld [vmem:[%s5404_s26 + $0x2648] sm:$0xff] }
  0x79   : > { %v564_v14 = vld [vmem:[%s5404_s26 + $0x26a0] sm:$0xff]  ;;  %561 = vst [vmem:[%s5412_s27 + $0x660] sm:$0xff] %v560_v12  ;;  %563 = vst [vmem:[%s5412_s27 + $0x668] sm:$0xff] %v562_v13  ;;  %v566_v15 = vld [vmem:[%s5404_s26 + $0x26a8] sm:$0xff] }
  0x7a   : > { %565 = vst [vmem:[%s5412_s27 + $0x670] sm:$0xff] %v564_v14  ;;  %v568_v16 = vld [vmem:[%s5404_s26 + $0x2700] sm:$0xff]  ;;  %v570_v17 = vld [vmem:[%s5404_s26 + $0x2708] sm:$0xff]  ;;  %567 = vst [vmem:[%s5412_s27 + $0x678] sm:$0xff] %v566_v15 }
  0x7b   : > { %569 = vst [vmem:[%s5412_s27 + $0x680] sm:$0xff] %v568_v16  ;;  %571 = vst [vmem:[%s5412_s27 + $0x688] sm:$0xff] %v570_v17  ;;  %v572_v18 = vld [vmem:[%s5404_s26 + $0x2760] sm:$0xff]  ;;  %v574_v19 = vld [vmem:[%s5404_s26 + $0x2768] sm:$0xff] }
  0x7c   : > { %v576_v20 = vld [vmem:[%s5404_s26 + $0x27c0] sm:$0xff]  ;;  %573 = vst [vmem:[%s5412_s27 + $0x690] sm:$0xff] %v572_v18  ;;  %575 = vst [vmem:[%s5412_s27 + $0x698] sm:$0xff] %v574_v19  ;;  %v578_v21 = vld [vmem:[%s5404_s26 + $0x27c8] sm:$0xff] }
  0x7d   : > { %577 = vst [vmem:[%s5412_s27 + $0x6a0] sm:$0xff] %v576_v20  ;;  %v580_v22 = vld [vmem:[%s5404_s26 + $0x2820] sm:$0xff]  ;;  %v582_v23 = vld [vmem:[%s5404_s26 + $0x2828] sm:$0xff]  ;;  %579 = vst [vmem:[%s5412_s27 + $0x6a8] sm:$0xff] %v578_v21 }
  0x7e   : > { %581 = vst [vmem:[%s5412_s27 + $0x6b0] sm:$0xff] %v580_v22  ;;  %583 = vst [vmem:[%s5412_s27 + $0x6b8] sm:$0xff] %v582_v23  ;;  %v584_v24 = vld [vmem:[%s5404_s26 + $0x2880] sm:$0xff]  ;;  %v586_v25 = vld [vmem:[%s5404_s26 + $0x2888] sm:$0xff] }
  0x7f   : > { %v588_v26 = vld [vmem:[%s5404_s26 + $0x28e0] sm:$0xff]  ;;  %585 = vst [vmem:[%s5412_s27 + $0x6c0] sm:$0xff] %v584_v24  ;;  %587 = vst [vmem:[%s5412_s27 + $0x6c8] sm:$0xff] %v586_v25  ;;  %v590_v27 = vld [vmem:[%s5404_s26 + $0x28e8] sm:$0xff] }
  0x80   : > { %589 = vst [vmem:[%s5412_s27 + $0x6d0] sm:$0xff] %v588_v26  ;;  %v592_v28 = vld [vmem:[%s5404_s26 + $0x2940] sm:$0xff]  ;;  %v594_v29 = vld [vmem:[%s5404_s26 + $0x2948] sm:$0xff]  ;;  %591 = vst [vmem:[%s5412_s27 + $0x6d8] sm:$0xff] %v590_v27 }
  0x81   : > { %593 = vst [vmem:[%s5412_s27 + $0x6e0] sm:$0xff] %v592_v28  ;;  %595 = vst [vmem:[%s5412_s27 + $0x6e8] sm:$0xff] %v594_v29  ;;  %v596_v30 = vld [vmem:[%s5404_s26 + $0x29a0] sm:$0xff]  ;;  %v598_v31 = vld [vmem:[%s5404_s26 + $0x29a8] sm:$0xff] }
  0x82   : > { %v600_v32 = vld [vmem:[%s5404_s26 + $0x2a00] sm:$0xff]  ;;  %597 = vst [vmem:[%s5412_s27 + $0x6f0] sm:$0xff] %v596_v30  ;;  %599 = vst [vmem:[%s5412_s27 + $0x6f8] sm:$0xff] %v598_v31  ;;  %v602_v33 = vld [vmem:[%s5404_s26 + $0x2a08] sm:$0xff] }
  0x83   : > { %601 = vst [vmem:[%s5412_s27 + $0x700] sm:$0xff] %v600_v32  ;;  %v604_v34 = vld [vmem:[%s5404_s26 + $0x2a60] sm:$0xff]  ;;  %v606_v35 = vld [vmem:[%s5404_s26 + $0x2a68] sm:$0xff]  ;;  %603 = vst [vmem:[%s5412_s27 + $0x708] sm:$0xff] %v602_v33 }
  0x84   : > { %605 = vst [vmem:[%s5412_s27 + $0x710] sm:$0xff] %v604_v34  ;;  %607 = vst [vmem:[%s5412_s27 + $0x718] sm:$0xff] %v606_v35  ;;  %v608_v36 = vld [vmem:[%s5404_s26 + $0x2ac0] sm:$0xff]  ;;  %v610_v37 = vld [vmem:[%s5404_s26 + $0x2ac8] sm:$0xff] }
  0x85   : > { %v612_v38 = vld [vmem:[%s5404_s26 + $0x2b20] sm:$0xff]  ;;  %609 = vst [vmem:[%s5412_s27 + $0x720] sm:$0xff] %v608_v36  ;;  %611 = vst [vmem:[%s5412_s27 + $0x728] sm:$0xff] %v610_v37  ;;  %v614_v39 = vld [vmem:[%s5404_s26 + $0x2b28] sm:$0xff] }
  0x86   : > { %613 = vst [vmem:[%s5412_s27 + $0x730] sm:$0xff] %v612_v38  ;;  %v616_v40 = vld [vmem:[%s5404_s26 + $0x2b80] sm:$0xff]  ;;  %v618_v41 = vld [vmem:[%s5404_s26 + $0x2b88] sm:$0xff]  ;;  %615 = vst [vmem:[%s5412_s27 + $0x738] sm:$0xff] %v614_v39 }
  0x87   : > { %617 = vst [vmem:[%s5412_s27 + $0x740] sm:$0xff] %v616_v40  ;;  %619 = vst [vmem:[%s5412_s27 + $0x748] sm:$0xff] %v618_v41  ;;  %v620_v42 = vld [vmem:[%s5404_s26 + $0x2be0] sm:$0xff]  ;;  %v622_v43 = vld [vmem:[%s5404_s26 + $0x2be8] sm:$0xff] }
  0x88   : > { %v624_v44 = vld [vmem:[%s5404_s26 + $0x2c40] sm:$0xff]  ;;  %621 = vst [vmem:[%s5412_s27 + $0x750] sm:$0xff] %v620_v42  ;;  %623 = vst [vmem:[%s5412_s27 + $0x758] sm:$0xff] %v622_v43  ;;  %v626_v45 = vld [vmem:[%s5404_s26 + $0x2c48] sm:$0xff] }
  0x89   : > { %625 = vst [vmem:[%s5412_s27 + $0x760] sm:$0xff] %v624_v44  ;;  %v628_v46 = vld [vmem:[%s5404_s26 + $0x2ca0] sm:$0xff]  ;;  %v630_v47 = vld [vmem:[%s5404_s26 + $0x2ca8] sm:$0xff]  ;;  %627 = vst [vmem:[%s5412_s27 + $0x768] sm:$0xff] %v626_v45 }
  0x8a   : > { %629 = vst [vmem:[%s5412_s27 + $0x770] sm:$0xff] %v628_v46  ;;  %631 = vst [vmem:[%s5412_s27 + $0x778] sm:$0xff] %v630_v47  ;;  %v632_v48 = vld [vmem:[%s5404_s26 + $0x2d00] sm:$0xff]  ;;  %v634_v49 = vld [vmem:[%s5404_s26 + $0x2d08] sm:$0xff] }
  0x8b   : > { %v636_v50 = vld [vmem:[%s5404_s26 + $0x2d60] sm:$0xff]  ;;  %633 = vst [vmem:[%s5412_s27 + $0x780] sm:$0xff] %v632_v48  ;;  %635 = vst [vmem:[%s5412_s27 + $0x788] sm:$0xff] %v634_v49  ;;  %v638_v51 = vld [vmem:[%s5404_s26 + $0x2d68] sm:$0xff] }
  0x8c   : > { %637 = vst [vmem:[%s5412_s27 + $0x790] sm:$0xff] %v636_v50  ;;  %v640_v52 = vld [vmem:[%s5404_s26 + $0x2dc0] sm:$0xff]  ;;  %v642_v53 = vld [vmem:[%s5404_s26 + $0x2dc8] sm:$0xff]  ;;  %639 = vst [vmem:[%s5412_s27 + $0x798] sm:$0xff] %v638_v51 }
  0x8d   : > { %641 = vst [vmem:[%s5412_s27 + $0x7a0] sm:$0xff] %v640_v52  ;;  %643 = vst [vmem:[%s5412_s27 + $0x7a8] sm:$0xff] %v642_v53  ;;  %v644_v54 = vld [vmem:[%s5404_s26 + $0x2e20] sm:$0xff]  ;;  %v646_v55 = vld [vmem:[%s5404_s26 + $0x2e28] sm:$0xff] }
  0x8e   : > { %v648_v56 = vld [vmem:[%s5404_s26 + $0x2e80] sm:$0xff]  ;;  %645 = vst [vmem:[%s5412_s27 + $0x7b0] sm:$0xff] %v644_v54  ;;  %647 = vst [vmem:[%s5412_s27 + $0x7b8] sm:$0xff] %v646_v55  ;;  %v650_v57 = vld [vmem:[%s5404_s26 + $0x2e88] sm:$0xff] }
  0x8f   : > { %649 = vst [vmem:[%s5412_s27 + $0x7c0] sm:$0xff] %v648_v56  ;;  %v652_v58 = vld [vmem:[%s5404_s26 + $0x2ee0] sm:$0xff]  ;;  %v654_v59 = vld [vmem:[%s5404_s26 + $0x2ee8] sm:$0xff]  ;;  %651 = vst [vmem:[%s5412_s27 + $0x7c8] sm:$0xff] %v650_v57 }
  0x90   : > { %653 = vst [vmem:[%s5412_s27 + $0x7d0] sm:$0xff] %v652_v58  ;;  %655 = vst [vmem:[%s5412_s27 + $0x7d8] sm:$0xff] %v654_v59  ;;  %v656_v60 = vld [vmem:[%s5404_s26 + $0x2f40] sm:$0xff]  ;;  %v658_v61 = vld [vmem:[%s5404_s26 + $0x2f48] sm:$0xff] }
  0x91   : > { %v660_v62 = vld [vmem:[%s5404_s26 + $0x2fa0] sm:$0xff]  ;;  %657 = vst [vmem:[%s5412_s27 + $0x7e0] sm:$0xff] %v656_v60  ;;  %659 = vst [vmem:[%s5412_s27 + $0x7e8] sm:$0xff] %v658_v61  ;;  %v662_v63 = vld [vmem:[%s5404_s26 + $0x2fa8] sm:$0xff] }
  0x92   : > { %661 = vst [vmem:[%s5412_s27 + $0x7f0] sm:$0xff] %v660_v62  ;;  %v664_v0 = vld [vmem:[%s5404_s26 + $0x3000] sm:$0xff]  ;;  %v666_v1 = vld [vmem:[%s5404_s26 + $0x3008] sm:$0xff]  ;;  %663 = vst [vmem:[%s5412_s27 + $0x7f8] sm:$0xff] %v662_v63 }
  0x93   : > { %665 = vst [vmem:[%s5412_s27 + $0x800] sm:$0xff] %v664_v0  ;;  %667 = vst [vmem:[%s5412_s27 + $0x808] sm:$0xff] %v666_v1  ;;  %v668_v2 = vld [vmem:[%s5404_s26 + $0x3060] sm:$0xff]  ;;  %v670_v3 = vld [vmem:[%s5404_s26 + $0x3068] sm:$0xff] }
  0x94   : > { %v672_v4 = vld [vmem:[%s5404_s26 + $0x30c0] sm:$0xff]  ;;  %669 = vst [vmem:[%s5412_s27 + $0x810] sm:$0xff] %v668_v2  ;;  %671 = vst [vmem:[%s5412_s27 + $0x818] sm:$0xff] %v670_v3  ;;  %v674_v5 = vld [vmem:[%s5404_s26 + $0x30c8] sm:$0xff] }
  0x95   : > { %673 = vst [vmem:[%s5412_s27 + $0x820] sm:$0xff] %v672_v4  ;;  %v676_v6 = vld [vmem:[%s5404_s26 + $0x3120] sm:$0xff]  ;;  %v678_v7 = vld [vmem:[%s5404_s26 + $0x3128] sm:$0xff]  ;;  %675 = vst [vmem:[%s5412_s27 + $0x828] sm:$0xff] %v674_v5 }
  0x96   : > { %677 = vst [vmem:[%s5412_s27 + $0x830] sm:$0xff] %v676_v6  ;;  %679 = vst [vmem:[%s5412_s27 + $0x838] sm:$0xff] %v678_v7  ;;  %v680_v8 = vld [vmem:[%s5404_s26 + $0x3180] sm:$0xff]  ;;  %v682_v9 = vld [vmem:[%s5404_s26 + $0x3188] sm:$0xff] }
  0x97   : > { %v684_v10 = vld [vmem:[%s5404_s26 + $0x31e0] sm:$0xff]  ;;  %681 = vst [vmem:[%s5412_s27 + $0x840] sm:$0xff] %v680_v8  ;;  %683 = vst [vmem:[%s5412_s27 + $0x848] sm:$0xff] %v682_v9  ;;  %v686_v11 = vld [vmem:[%s5404_s26 + $0x31e8] sm:$0xff] }
  0x98   : > { %685 = vst [vmem:[%s5412_s27 + $0x850] sm:$0xff] %v684_v10  ;;  %v688_v12 = vld [vmem:[%s5404_s26 + $0x3240] sm:$0xff]  ;;  %v690_v13 = vld [vmem:[%s5404_s26 + $0x3248] sm:$0xff]  ;;  %687 = vst [vmem:[%s5412_s27 + $0x858] sm:$0xff] %v686_v11 }
  0x99   : > { %689 = vst [vmem:[%s5412_s27 + $0x860] sm:$0xff] %v688_v12  ;;  %691 = vst [vmem:[%s5412_s27 + $0x868] sm:$0xff] %v690_v13  ;;  %v692_v14 = vld [vmem:[%s5404_s26 + $0x32a0] sm:$0xff]  ;;  %v694_v15 = vld [vmem:[%s5404_s26 + $0x32a8] sm:$0xff] }
  0x9a   : > { %v696_v16 = vld [vmem:[%s5404_s26 + $0x3300] sm:$0xff]  ;;  %693 = vst [vmem:[%s5412_s27 + $0x870] sm:$0xff] %v692_v14  ;;  %695 = vst [vmem:[%s5412_s27 + $0x878] sm:$0xff] %v694_v15  ;;  %v698_v17 = vld [vmem:[%s5404_s26 + $0x3308] sm:$0xff] }
  0x9b   : > { %697 = vst [vmem:[%s5412_s27 + $0x880] sm:$0xff] %v696_v16  ;;  %v700_v18 = vld [vmem:[%s5404_s26 + $0x3360] sm:$0xff]  ;;  %v702_v19 = vld [vmem:[%s5404_s26 + $0x3368] sm:$0xff]  ;;  %699 = vst [vmem:[%s5412_s27 + $0x888] sm:$0xff] %v698_v17 }
  0x9c   : > { %701 = vst [vmem:[%s5412_s27 + $0x890] sm:$0xff] %v700_v18  ;;  %703 = vst [vmem:[%s5412_s27 + $0x898] sm:$0xff] %v702_v19  ;;  %v704_v20 = vld [vmem:[%s5404_s26 + $0x33c0] sm:$0xff]  ;;  %v706_v21 = vld [vmem:[%s5404_s26 + $0x33c8] sm:$0xff] }
  0x9d   : > { %v708_v22 = vld [vmem:[%s5404_s26 + $0x3420] sm:$0xff]  ;;  %705 = vst [vmem:[%s5412_s27 + $0x8a0] sm:$0xff] %v704_v20  ;;  %707 = vst [vmem:[%s5412_s27 + $0x8a8] sm:$0xff] %v706_v21  ;;  %v710_v23 = vld [vmem:[%s5404_s26 + $0x3428] sm:$0xff] }
  0x9e   : > { %709 = vst [vmem:[%s5412_s27 + $0x8b0] sm:$0xff] %v708_v22  ;;  %v712_v24 = vld [vmem:[%s5404_s26 + $0x3480] sm:$0xff]  ;;  %v714_v25 = vld [vmem:[%s5404_s26 + $0x3488] sm:$0xff]  ;;  %711 = vst [vmem:[%s5412_s27 + $0x8b8] sm:$0xff] %v710_v23 }
  0x9f   : > { %713 = vst [vmem:[%s5412_s27 + $0x8c0] sm:$0xff] %v712_v24  ;;  %715 = vst [vmem:[%s5412_s27 + $0x8c8] sm:$0xff] %v714_v25  ;;  %v716_v26 = vld [vmem:[%s5404_s26 + $0x34e0] sm:$0xff]  ;;  %v718_v27 = vld [vmem:[%s5404_s26 + $0x34e8] sm:$0xff] }
  0xa0   : > { %v720_v28 = vld [vmem:[%s5404_s26 + $0x3540] sm:$0xff]  ;;  %717 = vst [vmem:[%s5412_s27 + $0x8d0] sm:$0xff] %v716_v26  ;;  %719 = vst [vmem:[%s5412_s27 + $0x8d8] sm:$0xff] %v718_v27  ;;  %v722_v29 = vld [vmem:[%s5404_s26 + $0x3548] sm:$0xff] }
  0xa1   : > { %721 = vst [vmem:[%s5412_s27 + $0x8e0] sm:$0xff] %v720_v28  ;;  %v724_v30 = vld [vmem:[%s5404_s26 + $0x35a0] sm:$0xff]  ;;  %v726_v31 = vld [vmem:[%s5404_s26 + $0x35a8] sm:$0xff]  ;;  %723 = vst [vmem:[%s5412_s27 + $0x8e8] sm:$0xff] %v722_v29 }
  0xa2   : > { %725 = vst [vmem:[%s5412_s27 + $0x8f0] sm:$0xff] %v724_v30  ;;  %727 = vst [vmem:[%s5412_s27 + $0x8f8] sm:$0xff] %v726_v31  ;;  %v728_v32 = vld [vmem:[%s5404_s26 + $0x3600] sm:$0xff]  ;;  %v730_v33 = vld [vmem:[%s5404_s26 + $0x3608] sm:$0xff] }
  0xa3   : > { %v732_v34 = vld [vmem:[%s5404_s26 + $0x3660] sm:$0xff]  ;;  %729 = vst [vmem:[%s5412_s27 + $0x900] sm:$0xff] %v728_v32  ;;  %731 = vst [vmem:[%s5412_s27 + $0x908] sm:$0xff] %v730_v33  ;;  %v734_v35 = vld [vmem:[%s5404_s26 + $0x3668] sm:$0xff] }
  0xa4   : > { %733 = vst [vmem:[%s5412_s27 + $0x910] sm:$0xff] %v732_v34  ;;  %v736_v36 = vld [vmem:[%s5404_s26 + $0x36c0] sm:$0xff]  ;;  %v738_v37 = vld [vmem:[%s5404_s26 + $0x36c8] sm:$0xff]  ;;  %735 = vst [vmem:[%s5412_s27 + $0x918] sm:$0xff] %v734_v35 }
  0xa5   : > { %737 = vst [vmem:[%s5412_s27 + $0x920] sm:$0xff] %v736_v36  ;;  %739 = vst [vmem:[%s5412_s27 + $0x928] sm:$0xff] %v738_v37  ;;  %v740_v38 = vld [vmem:[%s5404_s26 + $0x3720] sm:$0xff]  ;;  %v742_v39 = vld [vmem:[%s5404_s26 + $0x3728] sm:$0xff] }
  0xa6   : > { %v744_v40 = vld [vmem:[%s5404_s26 + $0x3780] sm:$0xff]  ;;  %741 = vst [vmem:[%s5412_s27 + $0x930] sm:$0xff] %v740_v38  ;;  %743 = vst [vmem:[%s5412_s27 + $0x938] sm:$0xff] %v742_v39  ;;  %v746_v41 = vld [vmem:[%s5404_s26 + $0x3788] sm:$0xff] }
  0xa7   : > { %745 = vst [vmem:[%s5412_s27 + $0x940] sm:$0xff] %v744_v40  ;;  %v748_v42 = vld [vmem:[%s5404_s26 + $0x37e0] sm:$0xff]  ;;  %v750_v43 = vld [vmem:[%s5404_s26 + $0x37e8] sm:$0xff]  ;;  %747 = vst [vmem:[%s5412_s27 + $0x948] sm:$0xff] %v746_v41 }
  0xa8   : > { %749 = vst [vmem:[%s5412_s27 + $0x950] sm:$0xff] %v748_v42  ;;  %751 = vst [vmem:[%s5412_s27 + $0x958] sm:$0xff] %v750_v43  ;;  %v752_v44 = vld [vmem:[%s5404_s26 + $0x3840] sm:$0xff]  ;;  %v754_v45 = vld [vmem:[%s5404_s26 + $0x3848] sm:$0xff] }
  0xa9   : > { %v756_v46 = vld [vmem:[%s5404_s26 + $0x38a0] sm:$0xff]  ;;  %753 = vst [vmem:[%s5412_s27 + $0x960] sm:$0xff] %v752_v44  ;;  %755 = vst [vmem:[%s5412_s27 + $0x968] sm:$0xff] %v754_v45  ;;  %v758_v47 = vld [vmem:[%s5404_s26 + $0x38a8] sm:$0xff] }
  0xaa   : > { %757 = vst [vmem:[%s5412_s27 + $0x970] sm:$0xff] %v756_v46  ;;  %v760_v48 = vld [vmem:[%s5404_s26 + $0x3900] sm:$0xff]  ;;  %v762_v49 = vld [vmem:[%s5404_s26 + $0x3908] sm:$0xff]  ;;  %759 = vst [vmem:[%s5412_s27 + $0x978] sm:$0xff] %v758_v47 }
  0xab   : > { %761 = vst [vmem:[%s5412_s27 + $0x980] sm:$0xff] %v760_v48  ;;  %763 = vst [vmem:[%s5412_s27 + $0x988] sm:$0xff] %v762_v49  ;;  %v764_v50 = vld [vmem:[%s5404_s26 + $0x3960] sm:$0xff]  ;;  %v766_v51 = vld [vmem:[%s5404_s26 + $0x3968] sm:$0xff] }
  0xac   : > { %v768_v52 = vld [vmem:[%s5404_s26 + $0x39c0] sm:$0xff]  ;;  %765 = vst [vmem:[%s5412_s27 + $0x990] sm:$0xff] %v764_v50  ;;  %767 = vst [vmem:[%s5412_s27 + $0x998] sm:$0xff] %v766_v51  ;;  %v770_v53 = vld [vmem:[%s5404_s26 + $0x39c8] sm:$0xff] }
  0xad   : > { %769 = vst [vmem:[%s5412_s27 + $0x9a0] sm:$0xff] %v768_v52  ;;  %v772_v54 = vld [vmem:[%s5404_s26 + $0x3a20] sm:$0xff]  ;;  %v774_v55 = vld [vmem:[%s5404_s26 + $0x3a28] sm:$0xff]  ;;  %771 = vst [vmem:[%s5412_s27 + $0x9a8] sm:$0xff] %v770_v53 }
  0xae   : > { %773 = vst [vmem:[%s5412_s27 + $0x9b0] sm:$0xff] %v772_v54  ;;  %775 = vst [vmem:[%s5412_s27 + $0x9b8] sm:$0xff] %v774_v55  ;;  %v776_v56 = vld [vmem:[%s5404_s26 + $0x3a80] sm:$0xff]  ;;  %v778_v57 = vld [vmem:[%s5404_s26 + $0x3a88] sm:$0xff] }
  0xaf   : > { %v780_v58 = vld [vmem:[%s5404_s26 + $0x3ae0] sm:$0xff]  ;;  %777 = vst [vmem:[%s5412_s27 + $0x9c0] sm:$0xff] %v776_v56  ;;  %779 = vst [vmem:[%s5412_s27 + $0x9c8] sm:$0xff] %v778_v57  ;;  %v782_v59 = vld [vmem:[%s5404_s26 + $0x3ae8] sm:$0xff] }
  0xb0   : > { %781 = vst [vmem:[%s5412_s27 + $0x9d0] sm:$0xff] %v780_v58  ;;  %v784_v60 = vld [vmem:[%s5404_s26 + $0x3b40] sm:$0xff]  ;;  %v786_v61 = vld [vmem:[%s5404_s26 + $0x3b48] sm:$0xff]  ;;  %783 = vst [vmem:[%s5412_s27 + $0x9d8] sm:$0xff] %v782_v59 }
  0xb1   : > { %785 = vst [vmem:[%s5412_s27 + $0x9e0] sm:$0xff] %v784_v60  ;;  %787 = vst [vmem:[%s5412_s27 + $0x9e8] sm:$0xff] %v786_v61  ;;  %v788_v62 = vld [vmem:[%s5404_s26 + $0x3ba0] sm:$0xff]  ;;  %v790_v63 = vld [vmem:[%s5404_s26 + $0x3ba8] sm:$0xff] }
  0xb2   : > { %v792_v0 = vld [vmem:[%s5404_s26 + $0x3c00] sm:$0xff]  ;;  %789 = vst [vmem:[%s5412_s27 + $0x9f0] sm:$0xff] %v788_v62  ;;  %791 = vst [vmem:[%s5412_s27 + $0x9f8] sm:$0xff] %v790_v63  ;;  %v794_v1 = vld [vmem:[%s5404_s26 + $0x3c08] sm:$0xff] }
  0xb3   : > { %793 = vst [vmem:[%s5412_s27 + $0xa00] sm:$0xff] %v792_v0  ;;  %v796_v2 = vld [vmem:[%s5404_s26 + $0x3c60] sm:$0xff]  ;;  %v798_v3 = vld [vmem:[%s5404_s26 + $0x3c68] sm:$0xff]  ;;  %795 = vst [vmem:[%s5412_s27 + $0xa08] sm:$0xff] %v794_v1 }
  0xb4   : > { %797 = vst [vmem:[%s5412_s27 + $0xa10] sm:$0xff] %v796_v2  ;;  %799 = vst [vmem:[%s5412_s27 + $0xa18] sm:$0xff] %v798_v3  ;;  %v800_v4 = vld [vmem:[%s5404_s26 + $0x3cc0] sm:$0xff]  ;;  %v802_v5 = vld [vmem:[%s5404_s26 + $0x3cc8] sm:$0xff] }
  0xb5   : > { %v804_v6 = vld [vmem:[%s5404_s26 + $0x3d20] sm:$0xff]  ;;  %801 = vst [vmem:[%s5412_s27 + $0xa20] sm:$0xff] %v800_v4  ;;  %803 = vst [vmem:[%s5412_s27 + $0xa28] sm:$0xff] %v802_v5  ;;  %v806_v7 = vld [vmem:[%s5404_s26 + $0x3d28] sm:$0xff] }
  0xb6   : > { %805 = vst [vmem:[%s5412_s27 + $0xa30] sm:$0xff] %v804_v6  ;;  %v808_v8 = vld [vmem:[%s5404_s26 + $0x3d80] sm:$0xff]  ;;  %v810_v9 = vld [vmem:[%s5404_s26 + $0x3d88] sm:$0xff]  ;;  %807 = vst [vmem:[%s5412_s27 + $0xa38] sm:$0xff] %v806_v7 }
  0xb7   : > { %809 = vst [vmem:[%s5412_s27 + $0xa40] sm:$0xff] %v808_v8  ;;  %811 = vst [vmem:[%s5412_s27 + $0xa48] sm:$0xff] %v810_v9  ;;  %v812_v10 = vld [vmem:[%s5404_s26 + $0x3de0] sm:$0xff]  ;;  %v814_v11 = vld [vmem:[%s5404_s26 + $0x3de8] sm:$0xff] }
  0xb8   : > { %v816_v12 = vld [vmem:[%s5404_s26 + $0x3e40] sm:$0xff]  ;;  %813 = vst [vmem:[%s5412_s27 + $0xa50] sm:$0xff] %v812_v10  ;;  %815 = vst [vmem:[%s5412_s27 + $0xa58] sm:$0xff] %v814_v11  ;;  %v818_v13 = vld [vmem:[%s5404_s26 + $0x3e48] sm:$0xff] }
  0xb9   : > { %817 = vst [vmem:[%s5412_s27 + $0xa60] sm:$0xff] %v816_v12  ;;  %v820_v14 = vld [vmem:[%s5404_s26 + $0x3ea0] sm:$0xff]  ;;  %v822_v15 = vld [vmem:[%s5404_s26 + $0x3ea8] sm:$0xff]  ;;  %819 = vst [vmem:[%s5412_s27 + $0xa68] sm:$0xff] %v818_v13 }
  0xba   : > { %821 = vst [vmem:[%s5412_s27 + $0xa70] sm:$0xff] %v820_v14  ;;  %823 = vst [vmem:[%s5412_s27 + $0xa78] sm:$0xff] %v822_v15  ;;  %v824_v16 = vld [vmem:[%s5404_s26 + $0x3f00] sm:$0xff]  ;;  %v826_v17 = vld [vmem:[%s5404_s26 + $0x3f08] sm:$0xff] }
  0xbb   : > { %v828_v18 = vld [vmem:[%s5404_s26 + $0x3f60] sm:$0xff]  ;;  %825 = vst [vmem:[%s5412_s27 + $0xa80] sm:$0xff] %v824_v16  ;;  %827 = vst [vmem:[%s5412_s27 + $0xa88] sm:$0xff] %v826_v17  ;;  %v830_v19 = vld [vmem:[%s5404_s26 + $0x3f68] sm:$0xff] }
  0xbc   : > { %829 = vst [vmem:[%s5412_s27 + $0xa90] sm:$0xff] %v828_v18  ;;  %v832_v20 = vld [vmem:[%s5404_s26 + $0x3fc0] sm:$0xff]  ;;  %v834_v21 = vld [vmem:[%s5404_s26 + $0x3fc8] sm:$0xff]  ;;  %831 = vst [vmem:[%s5412_s27 + $0xa98] sm:$0xff] %v830_v19 }
  0xbd   : > { %833 = vst [vmem:[%s5412_s27 + $0xaa0] sm:$0xff] %v832_v20  ;;  %835 = vst [vmem:[%s5412_s27 + $0xaa8] sm:$0xff] %v834_v21  ;;  %v836_v22 = vld [vmem:[%s5404_s26 + $0x4020] sm:$0xff]  ;;  %v838_v23 = vld [vmem:[%s5404_s26 + $0x4028] sm:$0xff] }
  0xbe   : > { %v840_v24 = vld [vmem:[%s5404_s26 + $0x4080] sm:$0xff]  ;;  %837 = vst [vmem:[%s5412_s27 + $0xab0] sm:$0xff] %v836_v22  ;;  %839 = vst [vmem:[%s5412_s27 + $0xab8] sm:$0xff] %v838_v23  ;;  %v842_v25 = vld [vmem:[%s5404_s26 + $0x4088] sm:$0xff] }
  0xbf   : > { %841 = vst [vmem:[%s5412_s27 + $0xac0] sm:$0xff] %v840_v24  ;;  %v844_v26 = vld [vmem:[%s5404_s26 + $0x40e0] sm:$0xff]  ;;  %v846_v27 = vld [vmem:[%s5404_s26 + $0x40e8] sm:$0xff]  ;;  %843 = vst [vmem:[%s5412_s27 + $0xac8] sm:$0xff] %v842_v25 }
  0xc0   : > { %845 = vst [vmem:[%s5412_s27 + $0xad0] sm:$0xff] %v844_v26  ;;  %847 = vst [vmem:[%s5412_s27 + $0xad8] sm:$0xff] %v846_v27  ;;  %v848_v28 = vld [vmem:[%s5404_s26 + $0x4140] sm:$0xff]  ;;  %v850_v29 = vld [vmem:[%s5404_s26 + $0x4148] sm:$0xff] }
  0xc1   : > { %v852_v30 = vld [vmem:[%s5404_s26 + $0x41a0] sm:$0xff]  ;;  %849 = vst [vmem:[%s5412_s27 + $0xae0] sm:$0xff] %v848_v28  ;;  %851 = vst [vmem:[%s5412_s27 + $0xae8] sm:$0xff] %v850_v29  ;;  %v854_v31 = vld [vmem:[%s5404_s26 + $0x41a8] sm:$0xff] }
  0xc2   : > { %853 = vst [vmem:[%s5412_s27 + $0xaf0] sm:$0xff] %v852_v30  ;;  %v856_v32 = vld [vmem:[%s5404_s26 + $0x4200] sm:$0xff]  ;;  %v858_v33 = vld [vmem:[%s5404_s26 + $0x4208] sm:$0xff]  ;;  %855 = vst [vmem:[%s5412_s27 + $0xaf8] sm:$0xff] %v854_v31 }
  0xc3   : > { %857 = vst [vmem:[%s5412_s27 + $0xb00] sm:$0xff] %v856_v32  ;;  %859 = vst [vmem:[%s5412_s27 + $0xb08] sm:$0xff] %v858_v33  ;;  %v860_v34 = vld [vmem:[%s5404_s26 + $0x4260] sm:$0xff]  ;;  %v862_v35 = vld [vmem:[%s5404_s26 + $0x4268] sm:$0xff] }
  0xc4   : > { %v864_v36 = vld [vmem:[%s5404_s26 + $0x42c0] sm:$0xff]  ;;  %861 = vst [vmem:[%s5412_s27 + $0xb10] sm:$0xff] %v860_v34  ;;  %863 = vst [vmem:[%s5412_s27 + $0xb18] sm:$0xff] %v862_v35  ;;  %v866_v37 = vld [vmem:[%s5404_s26 + $0x42c8] sm:$0xff] }
  0xc5   : > { %865 = vst [vmem:[%s5412_s27 + $0xb20] sm:$0xff] %v864_v36  ;;  %v868_v38 = vld [vmem:[%s5404_s26 + $0x4320] sm:$0xff]  ;;  %v870_v39 = vld [vmem:[%s5404_s26 + $0x4328] sm:$0xff]  ;;  %867 = vst [vmem:[%s5412_s27 + $0xb28] sm:$0xff] %v866_v37 }
  0xc6   : > { %869 = vst [vmem:[%s5412_s27 + $0xb30] sm:$0xff] %v868_v38  ;;  %871 = vst [vmem:[%s5412_s27 + $0xb38] sm:$0xff] %v870_v39  ;;  %v872_v40 = vld [vmem:[%s5404_s26 + $0x4380] sm:$0xff]  ;;  %v874_v41 = vld [vmem:[%s5404_s26 + $0x4388] sm:$0xff] }
  0xc7   : > { %v876_v42 = vld [vmem:[%s5404_s26 + $0x43e0] sm:$0xff]  ;;  %873 = vst [vmem:[%s5412_s27 + $0xb40] sm:$0xff] %v872_v40  ;;  %875 = vst [vmem:[%s5412_s27 + $0xb48] sm:$0xff] %v874_v41  ;;  %v878_v43 = vld [vmem:[%s5404_s26 + $0x43e8] sm:$0xff] }
  0xc8   : > { %877 = vst [vmem:[%s5412_s27 + $0xb50] sm:$0xff] %v876_v42  ;;  %v880_v44 = vld [vmem:[%s5404_s26 + $0x4440] sm:$0xff]  ;;  %v882_v45 = vld [vmem:[%s5404_s26 + $0x4448] sm:$0xff]  ;;  %879 = vst [vmem:[%s5412_s27 + $0xb58] sm:$0xff] %v878_v43 }
  0xc9   : > { %881 = vst [vmem:[%s5412_s27 + $0xb60] sm:$0xff] %v880_v44  ;;  %883 = vst [vmem:[%s5412_s27 + $0xb68] sm:$0xff] %v882_v45  ;;  %v884_v46 = vld [vmem:[%s5404_s26 + $0x44a0] sm:$0xff]  ;;  %v886_v47 = vld [vmem:[%s5404_s26 + $0x44a8] sm:$0xff] }
  0xca   : > { %v888_v48 = vld [vmem:[%s5404_s26 + $0x4500] sm:$0xff]  ;;  %885 = vst [vmem:[%s5412_s27 + $0xb70] sm:$0xff] %v884_v46  ;;  %887 = vst [vmem:[%s5412_s27 + $0xb78] sm:$0xff] %v886_v47  ;;  %v890_v49 = vld [vmem:[%s5404_s26 + $0x4508] sm:$0xff] }
  0xcb   : > { %889 = vst [vmem:[%s5412_s27 + $0xb80] sm:$0xff] %v888_v48  ;;  %v892_v50 = vld [vmem:[%s5404_s26 + $0x4560] sm:$0xff]  ;;  %v894_v51 = vld [vmem:[%s5404_s26 + $0x4568] sm:$0xff]  ;;  %891 = vst [vmem:[%s5412_s27 + $0xb88] sm:$0xff] %v890_v49 }
  0xcc   : > { %893 = vst [vmem:[%s5412_s27 + $0xb90] sm:$0xff] %v892_v50  ;;  %895 = vst [vmem:[%s5412_s27 + $0xb98] sm:$0xff] %v894_v51  ;;  %v896_v52 = vld [vmem:[%s5404_s26 + $0x45c0] sm:$0xff]  ;;  %v898_v53 = vld [vmem:[%s5404_s26 + $0x45c8] sm:$0xff] }
  0xcd   : > { %v900_v54 = vld [vmem:[%s5404_s26 + $0x4620] sm:$0xff]  ;;  %897 = vst [vmem:[%s5412_s27 + $0xba0] sm:$0xff] %v896_v52  ;;  %899 = vst [vmem:[%s5412_s27 + $0xba8] sm:$0xff] %v898_v53  ;;  %v902_v55 = vld [vmem:[%s5404_s26 + $0x4628] sm:$0xff] }
  0xce   : > { %901 = vst [vmem:[%s5412_s27 + $0xbb0] sm:$0xff] %v900_v54  ;;  %v904_v56 = vld [vmem:[%s5404_s26 + $0x4680] sm:$0xff]  ;;  %v906_v57 = vld [vmem:[%s5404_s26 + $0x4688] sm:$0xff]  ;;  %903 = vst [vmem:[%s5412_s27 + $0xbb8] sm:$0xff] %v902_v55 }
  0xcf   : > { %905 = vst [vmem:[%s5412_s27 + $0xbc0] sm:$0xff] %v904_v56  ;;  %907 = vst [vmem:[%s5412_s27 + $0xbc8] sm:$0xff] %v906_v57  ;;  %v908_v58 = vld [vmem:[%s5404_s26 + $0x46e0] sm:$0xff]  ;;  %v910_v59 = vld [vmem:[%s5404_s26 + $0x46e8] sm:$0xff] }
  0xd0   : > { %v912_v60 = vld [vmem:[%s5404_s26 + $0x4740] sm:$0xff]  ;;  %909 = vst [vmem:[%s5412_s27 + $0xbd0] sm:$0xff] %v908_v58  ;;  %911 = vst [vmem:[%s5412_s27 + $0xbd8] sm:$0xff] %v910_v59  ;;  %v914_v61 = vld [vmem:[%s5404_s26 + $0x4748] sm:$0xff] }
  0xd1   : > { %913 = vst [vmem:[%s5412_s27 + $0xbe0] sm:$0xff] %v912_v60  ;;  %v916_v62 = vld [vmem:[%s5404_s26 + $0x47a0] sm:$0xff]  ;;  %v918_v63 = vld [vmem:[%s5404_s26 + $0x47a8] sm:$0xff]  ;;  %915 = vst [vmem:[%s5412_s27 + $0xbe8] sm:$0xff] %v914_v61 }
  0xd2   : > { %917 = vst [vmem:[%s5412_s27 + $0xbf0] sm:$0xff] %v916_v62  ;;  %919 = vst [vmem:[%s5412_s27 + $0xbf8] sm:$0xff] %v918_v63  ;;  %v920_v0 = vld [vmem:[%s5404_s26 + $0x4800] sm:$0xff]  ;;  %v922_v1 = vld [vmem:[%s5404_s26 + $0x4808] sm:$0xff] }
  0xd3   : > { %v924_v2 = vld [vmem:[%s5404_s26 + $0x4860] sm:$0xff]  ;;  %921 = vst [vmem:[%s5412_s27 + $0xc00] sm:$0xff] %v920_v0  ;;  %923 = vst [vmem:[%s5412_s27 + $0xc08] sm:$0xff] %v922_v1  ;;  %v926_v3 = vld [vmem:[%s5404_s26 + $0x4868] sm:$0xff] }
  0xd4   : > { %925 = vst [vmem:[%s5412_s27 + $0xc10] sm:$0xff] %v924_v2  ;;  %v928_v4 = vld [vmem:[%s5404_s26 + $0x48c0] sm:$0xff]  ;;  %v930_v5 = vld [vmem:[%s5404_s26 + $0x48c8] sm:$0xff]  ;;  %927 = vst [vmem:[%s5412_s27 + $0xc18] sm:$0xff] %v926_v3 }
  0xd5   : > { %929 = vst [vmem:[%s5412_s27 + $0xc20] sm:$0xff] %v928_v4  ;;  %931 = vst [vmem:[%s5412_s27 + $0xc28] sm:$0xff] %v930_v5  ;;  %v932_v6 = vld [vmem:[%s5404_s26 + $0x4920] sm:$0xff]  ;;  %v934_v7 = vld [vmem:[%s5404_s26 + $0x4928] sm:$0xff] }
  0xd6   : > { %v936_v8 = vld [vmem:[%s5404_s26 + $0x4980] sm:$0xff]  ;;  %933 = vst [vmem:[%s5412_s27 + $0xc30] sm:$0xff] %v932_v6  ;;  %935 = vst [vmem:[%s5412_s27 + $0xc38] sm:$0xff] %v934_v7  ;;  %v938_v9 = vld [vmem:[%s5404_s26 + $0x4988] sm:$0xff] }
  0xd7   : > { %937 = vst [vmem:[%s5412_s27 + $0xc40] sm:$0xff] %v936_v8  ;;  %939 = vst [vmem:[%s5412_s27 + $0xc48] sm:$0xff] %v938_v9 }
  0xd8 PF: > { %p4220_p7 = scmp.ge.s32.totalorder %s5339_s14, 1  ;;  %p952_p8 = scmp.lt.s32.totalorder %s5339_s14, 7 }
  0xda   : > { %p953_p9 = pnand %p4220_p7, %p952_p8 }
  0xdb   : > { %s959_s28 = sand.u32 (!%p953_p9), 1, %s5331_s12   ;;  %s4222_s14 = sshll.u32 (!%p953_p9), %s5379_s15, 2 }
  0xdc   : > { %956 = sbr.rel (%p953_p9) target bundleno = 851 (0x353), region = 51  ;;  %p987_p10 = scmp.lt.s32.totalorder (!%p953_p9), %s4222_s14, 23 }
  0xdd   : > { %s4650_s29 = smul.u32 (!%p953_p9), 3152, %s959_s28  ;;  %s4221_s27 = sshll.u32 (!%p953_p9), %s959_s28, 5 }
  0xdf   : > { %s6207_s7 = scalar_lea.vmem (!%p953_p9), [#allocation2], %s4650_s29  ;;  %s6717_s29 = scalar_lea.vmem (!%p953_p9), [#allocation3], %s4221_s27 }
  0xe1   : > { %v4775_v10 = vld [vmem:[%s6747_s0 + $0x4] ss:$52 sps:$4 sm:$0xff]   ;;  %v4778_v11 = vld [vmem:[%s6747_s0 + $0xc] ss:$52 sps:$4 sm:$0xff]   ;;  %vm3462_vm0 = vcmask 1041408   ;;  %vm3463_vm1 = vcmask 1042432  }
  0xe2   : > { %3510 = vmatprep.mubr.bf16.mxu0 %v4775_v10  ;;  %v4677_v12 = vld [vmem:[%s6207_s7 + $0xe4] ss:$16 sps:$4 sm:$0xff]   ;;  %3553 = vmatprep.mubr.bf16.mxu1 %v4778_v11  ;;  %v4681_v14 = vld [vmem:[%s6207_s7 + $0xe0] ss:$16 sps:$4 sm:$0xff]   ;;  %vm3458_vm2 = vcmask 302080   ;;  %s6756_s14 = smov (!%p987_p10, %s4222_s14), 23 }
  0xe3   : > { %v4679_v13 = vld [vmem:[%s6207_s7 + $0x2e4] ss:$16 sps:$4 sm:$0xff]   ;;  %3478 = vmatprep.subr.bf16.mxu0 %v4677_v12  ;;  %v4682_v15 = vld [vmem:[%s6207_s7 + $0x2e0] ss:$16 sps:$4 sm:$0xff]   ;;  %s989_s21 = scalar_lea.vmem %s6749_s2, %s6756_s14  ;;  %s4648_s12 = sshll.u32 (%p5394_p5), %s5379_s15, 4 }
  0xe4   : > { %3521 = vmatprep.subr.bf16.mxu1 %v4679_v13  ;;  %v4683_v16 = vld [vmem:[%s6207_s7 + $0xc4] ss:$16 sps:$4 sm:$0xff]   ;;  %3479 = vmatpush1.bf16.msra.mxu0 %v4681_v14  ;;  %v4687_v18 = vld [vmem:[%s6207_s7 + $0xc0] ss:$16 sps:$4 sm:$0xff]   ;;  %s4125_s4 = scalar_lea.vmem (%p5394_p5), %s6750_s3, %s4648_s12 }
  0xe5   : > { %3522 = vmatpush1.bf16.msra.mxu1 %v4682_v15  ;;  %v4685_v17 = vld [vmem:[%s6207_s7 + $0x2c4] ss:$16 sps:$4 sm:$0xff]   ;;  %3480 = vmatprep.subr.bf16.mxu0 %v4683_v16  ;;  %v4688_v19 = vld [vmem:[%s6207_s7 + $0x2c0] ss:$16 sps:$4 sm:$0xff]   ;;  %v4776_v15 = vld [vmem:[%s6747_s0 + $0x8] ss:$52 sps:$4 sm:$0xff]  }
  0xe6   : > { %3523 = vmatprep.subr.bf16.mxu1 %v4685_v17  ;;  %v4689_v20 = vld [vmem:[%s6207_s7 + $0xa4] ss:$16 sps:$4 sm:$0xff]   ;;  %v4693_v22 = vld [vmem:[%s6207_s7 + $0xa0] ss:$16 sps:$4 sm:$0xff]  }
  0xe7   : > { %v4691_v21 = vld [vmem:[%s6207_s7 + $0x2a4] ss:$16 sps:$4 sm:$0xff]   ;;  %v4694_v23 = vld [vmem:[%s6207_s7 + $0x2a0] ss:$16 sps:$4 sm:$0xff]  }
  0xe8   : > { %3481 = vmatpush1.bf16.msra.mxu0 %v4687_v18  ;;  %v4695_v24 = vld [vmem:[%s6207_s7 + $0x84] ss:$16 sps:$4 sm:$0xff]   ;;  %v4699_v26 = vld [vmem:[%s6207_s7 + $0x80] ss:$16 sps:$4 sm:$0xff]  }
  0xe9   : > { %3524 = vmatpush1.bf16.msra.mxu1 %v4688_v19  ;;  %3482 = vmatprep.subr.bf16.mxu0 %v4689_v20  ;;  %v4697_v25 = vld [vmem:[%s6207_s7 + $0x284] ss:$16 sps:$4 sm:$0xff]   ;;  %v4700_v27 = vld [vmem:[%s6207_s7 + $0x280] ss:$16 sps:$4 sm:$0xff]  }
  0xea   : > { %3525 = vmatprep.subr.bf16.mxu1 %v4691_v21  ;;  %v4701_v28 = vld [vmem:[%s6207_s7 + $0x64] ss:$16 sps:$4 sm:$0xff]   ;;  %v4705_v30 = vld [vmem:[%s6207_s7 + $0x60] ss:$16 sps:$4 sm:$0xff]  }
  0xeb   : > { %v4703_v29 = vld [vmem:[%s6207_s7 + $0x264] ss:$16 sps:$4 sm:$0xff]   ;;  %v4706_v31 = vld [vmem:[%s6207_s7 + $0x260] ss:$16 sps:$4 sm:$0xff]  }
  0xec   : > { %3483 = vmatpush1.bf16.msra.mxu0 %v4693_v22  ;;  %v4707_v32 = vld [vmem:[%s6207_s7 + $0x44] ss:$16 sps:$4 sm:$0xff]   ;;  %v4711_v34 = vld [vmem:[%s6207_s7 + $0x40] ss:$16 sps:$4 sm:$0xff]  }
  0xed   : > { %3526 = vmatpush1.bf16.msra.mxu1 %v4694_v23  ;;  %3484 = vmatprep.subr.bf16.mxu0 %v4695_v24  ;;  %v4709_v33 = vld [vmem:[%s6207_s7 + $0x244] ss:$16 sps:$4 sm:$0xff]   ;;  %v4712_v35 = vld [vmem:[%s6207_s7 + $0x240] ss:$16 sps:$4 sm:$0xff]  }
  0xee   : > { %3527 = vmatprep.subr.bf16.mxu1 %v4697_v25  ;;  %v4713_v36 = vld [vmem:[%s6207_s7 + $0x24] ss:$16 sps:$4 sm:$0xff]   ;;  %v4717_v38 = vld [vmem:[%s6207_s7 + $0x20] ss:$16 sps:$4 sm:$0xff]  }
  0xef   : > { %v4715_v37 = vld [vmem:[%s6207_s7 + $0x224] ss:$16 sps:$4 sm:$0xff]   ;;  %v4718_v39 = vld [vmem:[%s6207_s7 + $0x220] ss:$16 sps:$4 sm:$0xff]  }
  0xf0   : > { %3485 = vmatpush1.bf16.msra.mxu0 %v4699_v26  ;;  %v4719_v40 = vld [vmem:[%s6207_s7 + $0x4] ss:$16 sps:$4 sm:$0xff]   ;;  %v4723_v42 = vld [vmem:[%s6207_s7] ss:$16 sps:$4 sm:$0xff]  }
  0xf1   : > { %3528 = vmatpush1.bf16.msra.mxu1 %v4700_v27  ;;  %3486 = vmatprep.subr.bf16.mxu0 %v4701_v28  ;;  %v4721_v41 = vld [vmem:[%s6207_s7 + $0x204] ss:$16 sps:$4 sm:$0xff]   ;;  %v4724_v43 = vld [vmem:[%s6207_s7 + $0x200] ss:$16 sps:$4 sm:$0xff]  }
  0xf2   : > { %3529 = vmatprep.subr.bf16.mxu1 %v4703_v29  ;;  %v4725_v44 = vld [vmem:[%s6207_s7 + $0x1e4] ss:$16 sps:$4 sm:$0xff]   ;;  %v4729_v46 = vld [vmem:[%s6207_s7 + $0x1e0] ss:$16 sps:$4 sm:$0xff]  }
  0xf3   : > { %v4727_v45 = vld [vmem:[%s6207_s7 + $0x3e4] ss:$16 sps:$4 sm:$0xff]   ;;  %v4730_v47 = vld [vmem:[%s6207_s7 + $0x3e0] ss:$16 sps:$4 sm:$0xff]  }
  0xf4   : > { %3487 = vmatpush1.bf16.msra.mxu0 %v4705_v30  ;;  %v4731_v48 = vld [vmem:[%s6207_s7 + $0x1c4] ss:$16 sps:$4 sm:$0xff]   ;;  %v4735_v50 = vld [vmem:[%s6207_s7 + $0x1c0] ss:$16 sps:$4 sm:$0xff]  }
  0xf5   : > { %3530 = vmatpush1.bf16.msra.mxu1 %v4706_v31  ;;  %3488 = vmatprep.subr.bf16.mxu0 %v4707_v32  ;;  %v4733_v49 = vld [vmem:[%s6207_s7 + $0x3c4] ss:$16 sps:$4 sm:$0xff]   ;;  %v4736_v51 = vld [vmem:[%s6207_s7 + $0x3c0] ss:$16 sps:$4 sm:$0xff]  }
  0xf6   : > { %3531 = vmatprep.subr.bf16.mxu1 %v4709_v33  ;;  %v4737_v52 = vld [vmem:[%s6207_s7 + $0x1a4] ss:$16 sps:$4 sm:$0xff]   ;;  %v4741_v54 = vld [vmem:[%s6207_s7 + $0x1a0] ss:$16 sps:$4 sm:$0xff]  }
  0xf7   : > { %v4739_v53 = vld [vmem:[%s6207_s7 + $0x3a4] ss:$16 sps:$4 sm:$0xff]   ;;  %v4742_v55 = vld [vmem:[%s6207_s7 + $0x3a0] ss:$16 sps:$4 sm:$0xff]  }
  0xf8   : > { %3489 = vmatpush1.bf16.msra.mxu0 %v4711_v34  ;;  %v4743_v56 = vld [vmem:[%s6207_s7 + $0x184] ss:$16 sps:$4 sm:$0xff]   ;;  %v4747_v58 = vld [vmem:[%s6207_s7 + $0x180] ss:$16 sps:$4 sm:$0xff]  }
  0xf9   : > { %3532 = vmatpush1.bf16.msra.mxu1 %v4712_v35  ;;  %3490 = vmatprep.subr.bf16.mxu0 %v4713_v36  ;;  %v4745_v57 = vld [vmem:[%s6207_s7 + $0x384] ss:$16 sps:$4 sm:$0xff]   ;;  %v4748_v59 = vld [vmem:[%s6207_s7 + $0x380] ss:$16 sps:$4 sm:$0xff]  }
  0xfa   : > { %3533 = vmatprep.subr.bf16.mxu1 %v4715_v37  ;;  %v4749_v60 = vld [vmem:[%s6207_s7 + $0x164] ss:$16 sps:$4 sm:$0xff]   ;;  %v4753_v62 = vld [vmem:[%s6207_s7 + $0x160] ss:$16 sps:$4 sm:$0xff]  }
  0xfb   : > { %v4751_v61 = vld [vmem:[%s6207_s7 + $0x364] ss:$16 sps:$4 sm:$0xff]   ;;  %v4754_v63 = vld [vmem:[%s6207_s7 + $0x360] ss:$16 sps:$4 sm:$0xff]  }
  0xfc   : > { %3491 = vmatpush1.bf16.msra.mxu0 %v4717_v38  ;;  %v4755_v0 = vld [vmem:[%s6207_s7 + $0x144] ss:$16 sps:$4 sm:$0xff]   ;;  %v4759_v2 = vld [vmem:[%s6207_s7 + $0x140] ss:$16 sps:$4 sm:$0xff]  }
  0xfd   : > { %3534 = vmatpush1.bf16.msra.mxu1 %v4718_v39  ;;  %3492 = vmatprep.subr.bf16.mxu0 %v4719_v40  ;;  %v4757_v1 = vld [vmem:[%s6207_s7 + $0x344] ss:$16 sps:$4 sm:$0xff]   ;;  %v4760_v3 = vld [vmem:[%s6207_s7 + $0x340] ss:$16 sps:$4 sm:$0xff]  }
  0xfe   : > { %3535 = vmatprep.subr.bf16.mxu1 %v4721_v41  ;;  %v4761_v4 = vld [vmem:[%s6207_s7 + $0x124] ss:$16 sps:$4 sm:$0xff]   ;;  %v4765_v6 = vld [vmem:[%s6207_s7 + $0x120] ss:$16 sps:$4 sm:$0xff]  }
  0xff   : > { %v4763_v5 = vld [vmem:[%s6207_s7 + $0x324] ss:$16 sps:$4 sm:$0xff]   ;;  %v4766_v7 = vld [vmem:[%s6207_s7 + $0x320] ss:$16 sps:$4 sm:$0xff]  }
 0x100   : > { %3493 = vmatpush1.bf16.msra.mxu0 %v4723_v42  ;;  %v4767_v8 = vld [vmem:[%s6207_s7 + $0x104] ss:$16 sps:$4 sm:$0xff]   ;;  %v4771_v10 = vld [vmem:[%s6207_s7 + $0x100] ss:$16 sps:$4 sm:$0xff]  }
 0x101   : > { %3536 = vmatpush1.bf16.msra.mxu1 %v4724_v43  ;;  %3494 = vmatprep.subr.bf16.mxu0 %v4725_v44  ;;  %v4769_v9 = vld [vmem:[%s6207_s7 + $0x304] ss:$16 sps:$4 sm:$0xff]   ;;  %v4772_v11 = vld [vmem:[%s6207_s7 + $0x300] ss:$16 sps:$4 sm:$0xff]  }
 0x102   : > { %3537 = vmatprep.subr.bf16.mxu1 %v4727_v45  ;;  %v4781_v12 = vld [vmem:[%s6207_s7 + $0x4e4] ss:$16 sps:$4 sm:$0xff]   ;;  %v4779_v16 = vld [vmem:[%s6207_s7 + $0x4e0] ss:$16 sps:$4 sm:$0xff]  }
 0x103   : > { %v4784_v13 = vld [vmem:[%s6207_s7 + $0x6e4] ss:$16 sps:$4 sm:$0xff]   ;;  %v4782_v17 = vld [vmem:[%s6207_s7 + $0x6e0] ss:$16 sps:$4 sm:$0xff]  }
 0x104   : > { %3495 = vmatpush2.bf16.msra.mxu0 %v4729_v46  ;;  %v4773_v14 = vld [vmem:[%s6747_s0] ss:$52 sps:$4 sm:$0xff]   ;;  %v4880_v41 = vld [vmem:[%s6747_s0 + $0x1c] ss:$52 sps:$4 sm:$0xff]  }
 0x105   : > { %3538 = vmatpush2.bf16.msra.mxu1 %v4730_v47  ;;  %3496 = vmatprep.subr.bf16.mxu0 %v4731_v48  ;;  %v4787_v18 = vld [vmem:[%s6207_s7 + $0x4c4] ss:$16 sps:$4 sm:$0xff]   ;;  %v4785_v20 = vld [vmem:[%s6207_s7 + $0x4c0] ss:$16 sps:$4 sm:$0xff]  }
 0x106   : > { %3539 = vmatprep.subr.bf16.mxu1 %v4733_v49  ;;  %v4790_v19 = vld [vmem:[%s6207_s7 + $0x6c4] ss:$16 sps:$4 sm:$0xff]   ;;  %v4788_v21 = vld [vmem:[%s6207_s7 + $0x6c0] ss:$16 sps:$4 sm:$0xff]  }
 0x107   : > { %v4793_v22 = vld [vmem:[%s6207_s7 + $0x4a4] ss:$16 sps:$4 sm:$0xff]   ;;  %v4791_v24 = vld [vmem:[%s6207_s7 + $0x4a0] ss:$16 sps:$4 sm:$0xff]  }
 0x108   : > { %3497 = vmatpush2.bf16.msra.mxu0 %v4735_v50  ;;  %v4796_v23 = vld [vmem:[%s6207_s7 + $0x6a4] ss:$16 sps:$4 sm:$0xff]   ;;  %v4794_v25 = vld [vmem:[%s6207_s7 + $0x6a0] ss:$16 sps:$4 sm:$0xff]  }
 0x109   : > { %3540 = vmatpush2.bf16.msra.mxu1 %v4736_v51  ;;  %3498 = vmatprep.subr.bf16.mxu0 %v4737_v52  ;;  %v4799_v26 = vld [vmem:[%s6207_s7 + $0x484] ss:$16 sps:$4 sm:$0xff]   ;;  %v4797_v28 = vld [vmem:[%s6207_s7 + $0x480] ss:$16 sps:$4 sm:$0xff]  }
 0x10a   : > { %3541 = vmatprep.subr.bf16.mxu1 %v4739_v53  ;;  %v4802_v27 = vld [vmem:[%s6207_s7 + $0x684] ss:$16 sps:$4 sm:$0xff]   ;;  %v4800_v29 = vld [vmem:[%s6207_s7 + $0x680] ss:$16 sps:$4 sm:$0xff]  }
 0x10b   : > { %v4805_v30 = vld [vmem:[%s6207_s7 + $0x464] ss:$16 sps:$4 sm:$0xff]   ;;  %v4803_v32 = vld [vmem:[%s6207_s7 + $0x460] ss:$16 sps:$4 sm:$0xff]  }
 0x10c   : > { %3499 = vmatpush2.bf16.msra.mxu0 %v4741_v54  ;;  %v4808_v31 = vld [vmem:[%s6207_s7 + $0x664] ss:$16 sps:$4 sm:$0xff]   ;;  %v4806_v33 = vld [vmem:[%s6207_s7 + $0x660] ss:$16 sps:$4 sm:$0xff]  }
 0x10d   : > { %3542 = vmatpush2.bf16.msra.mxu1 %v4742_v55  ;;  %3500 = vmatprep.subr.bf16.mxu0 %v4743_v56  ;;  %v4811_v34 = vld [vmem:[%s6207_s7 + $0x444] ss:$16 sps:$4 sm:$0xff]   ;;  %v4809_v36 = vld [vmem:[%s6207_s7 + $0x440] ss:$16 sps:$4 sm:$0xff]  }
 0x10e   : > { %3543 = vmatprep.subr.bf16.mxu1 %v4745_v57  ;;  %v4814_v35 = vld [vmem:[%s6207_s7 + $0x644] ss:$16 sps:$4 sm:$0xff]   ;;  %v4812_v37 = vld [vmem:[%s6207_s7 + $0x640] ss:$16 sps:$4 sm:$0xff]  }
 0x10f   : > { %v4817_v38 = vld [vmem:[%s6207_s7 + $0x424] ss:$16 sps:$4 sm:$0xff]   ;;  %v4815_v42 = vld [vmem:[%s6207_s7 + $0x420] ss:$16 sps:$4 sm:$0xff]  }
 0x110   : > { %3501 = vmatpush2.bf16.msra.mxu0 %v4747_v58  ;;  %v4820_v39 = vld [vmem:[%s6207_s7 + $0x624] ss:$16 sps:$4 sm:$0xff]   ;;  %v4818_v43 = vld [vmem:[%s6207_s7 + $0x620] ss:$16 sps:$4 sm:$0xff]  }
 0x111   : > { %3544 = vmatpush2.bf16.msra.mxu1 %v4748_v59  ;;  %3502 = vmatprep.subr.bf16.mxu0 %v4749_v60  ;;  %v4877_v40 = vld [vmem:[%s6747_s0 + $0x14] ss:$52 sps:$4 sm:$0xff]   ;;  %v4821_v46 = vld [vmem:[%s6207_s7 + $0x400] ss:$16 sps:$4 sm:$0xff]  }
 0x112   : > { %3545 = vmatprep.subr.bf16.mxu1 %v4751_v61  ;;  %v4823_v44 = vld [vmem:[%s6207_s7 + $0x404] ss:$16 sps:$4 sm:$0xff]   ;;  %v4824_v47 = vld [vmem:[%s6207_s7 + $0x600] ss:$16 sps:$4 sm:$0xff]  }
 0x113   : > { %v4826_v45 = vld [vmem:[%s6207_s7 + $0x604] ss:$16 sps:$4 sm:$0xff]   ;;  %v4827_v50 = vld [vmem:[%s6207_s7 + $0x5e0] ss:$16 sps:$4 sm:$0xff]  }
 0x114   : > { %3503 = vmatpush2.bf16.msra.mxu0 %v4753_v62  ;;  %v4829_v48 = vld [vmem:[%s6207_s7 + $0x5e4] ss:$16 sps:$4 sm:$0xff]   ;;  %v4830_v51 = vld [vmem:[%s6207_s7 + $0x7e0] ss:$16 sps:$4 sm:$0xff]  }
 0x115   : > { %3546 = vmatpush2.bf16.msra.mxu1 %v4754_v63  ;;  %3504 = vmatprep.subr.bf16.mxu0 %v4755_v0  ;;  %v4832_v49 = vld [vmem:[%s6207_s7 + $0x7e4] ss:$16 sps:$4 sm:$0xff]   ;;  %v4833_v54 = vld [vmem:[%s6207_s7 + $0x5c0] ss:$16 sps:$4 sm:$0xff]  }
 0x116   : > { %3547 = vmatprep.subr.bf16.mxu1 %v4757_v1  ;;  %v4835_v52 = vld [vmem:[%s6207_s7 + $0x5c4] ss:$16 sps:$4 sm:$0xff]   ;;  %v4836_v55 = vld [vmem:[%s6207_s7 + $0x7c0] ss:$16 sps:$4 sm:$0xff]  }
 0x117   : > { %v4838_v53 = vld [vmem:[%s6207_s7 + $0x7c4] ss:$16 sps:$4 sm:$0xff]   ;;  %v4839_v58 = vld [vmem:[%s6207_s7 + $0x5a0] ss:$16 sps:$4 sm:$0xff]  }
 0x118   : > { %3505 = vmatpush2.bf16.msra.mxu0 %v4759_v2  ;;  %v4841_v56 = vld [vmem:[%s6207_s7 + $0x5a4] ss:$16 sps:$4 sm:$0xff]   ;;  %v4842_v59 = vld [vmem:[%s6207_s7 + $0x7a0] ss:$16 sps:$4 sm:$0xff]  }
 0x119   : > { %3548 = vmatpush2.bf16.msra.mxu1 %v4760_v3  ;;  %3506 = vmatprep.subr.bf16.mxu0 %v4761_v4  ;;  %v4844_v57 = vld [vmem:[%s6207_s7 + $0x7a4] ss:$16 sps:$4 sm:$0xff]   ;;  %v4845_v62 = vld [vmem:[%s6207_s7 + $0x580] ss:$16 sps:$4 sm:$0xff]  }
 0x11a   : > { %3549 = vmatprep.subr.bf16.mxu1 %v4763_v5  ;;  %v4847_v60 = vld [vmem:[%s6207_s7 + $0x584] ss:$16 sps:$4 sm:$0xff]   ;;  %v4848_v63 = vld [vmem:[%s6207_s7 + $0x780] ss:$16 sps:$4 sm:$0xff]  }
 0x11b   : > { %v4850_v61 = vld [vmem:[%s6207_s7 + $0x784] ss:$16 sps:$4 sm:$0xff]   ;;  %v4851_v2 = vld [vmem:[%s6207_s7 + $0x560] ss:$16 sps:$4 sm:$0xff]  }
 0x11c   : > { %3507 = vmatpush2.bf16.msra.mxu0 %v4765_v6  ;;  %v4853_v0 = vld [vmem:[%s6207_s7 + $0x564] ss:$16 sps:$4 sm:$0xff]   ;;  %v4854_v3 = vld [vmem:[%s6207_s7 + $0x760] ss:$16 sps:$4 sm:$0xff]  }
 0x11d   : > { %3550 = vmatpush2.bf16.msra.mxu1 %v4766_v7  ;;  %3508 = vmatprep.subr.bf16.mxu0 %v4767_v8  ;;  %v4856_v1 = vld [vmem:[%s6207_s7 + $0x764] ss:$16 sps:$4 sm:$0xff]   ;;  %v4857_v6 = vld [vmem:[%s6207_s7 + $0x540] ss:$16 sps:$4 sm:$0xff]  }
 0x11e   : > { %3551 = vmatprep.subr.bf16.mxu1 %v4769_v9  ;;  %v4859_v4 = vld [vmem:[%s6207_s7 + $0x544] ss:$16 sps:$4 sm:$0xff]   ;;  %v4860_v7 = vld [vmem:[%s6207_s7 + $0x740] ss:$16 sps:$4 sm:$0xff]  }
 0x11f   : > { %v4862_v5 = vld [vmem:[%s6207_s7 + $0x744] ss:$16 sps:$4 sm:$0xff]  }
 0x120   : > { %3509 = vmatpush2.bf16.msra.mxu0 %v4771_v10  ;;  %v4865_v8 = vld [vmem:[%s6207_s7 + $0x524] ss:$16 sps:$4 sm:$0xff]   ;;  %v4863_v10 = vld [vmem:[%s6207_s7 + $0x520] ss:$16 sps:$4 sm:$0xff]  }
 0x121   : > { %3552 = vmatpush2.bf16.msra.mxu1 %v4772_v11  ;;  %3564 = vmatprep.subr.bf16.mxu0 %v4781_v12  ;;  %v4868_v9 = vld [vmem:[%s6207_s7 + $0x724] ss:$16 sps:$4 sm:$0xff]   ;;  %v4866_v11 = vld [vmem:[%s6207_s7 + $0x720] ss:$16 sps:$4 sm:$0xff]  }
 0x122   : > { %3607 = vmatprep.subr.bf16.mxu1 %v4784_v13  ;;  %v4871_v12 = vld [vmem:[%s6207_s7 + $0x504] ss:$16 sps:$4 sm:$0xff]  }
 0x123   : > { %3511 = vmatmul.mubr.bf16.vlgmr.msra.gmra.mxu0 %v4773_v14  ;;  %v4874_v13 = vld [vmem:[%s6207_s7 + $0x704] ss:$16 sps:$4 sm:$0xff]   ;;  %v4869_v14 = vld [vmem:[%s6207_s7 + $0x500] ss:$16 sps:$4 sm:$0xff]  }
 0x124   : > { %3554 = vmatmul.mubr.bf16.vlgmr.msra.gmra.mxu1 %v4776_v15  ;;  %3565 = vmatpush1.bf16.msra.mxu0 %v4779_v16  ;;  %v4872_v15 = vld [vmem:[%s6207_s7 + $0x700] ss:$16 sps:$4 sm:$0xff]   ;;  %v4883_v16 = vld [vmem:[%s6207_s7 + $0x8e4] ss:$16 sps:$4 sm:$0xff]  }
 0x125   : > { %3608 = vmatpush1.bf16.msra.mxu1 %v4782_v17  ;;  %3566 = vmatprep.subr.bf16.mxu0 %v4787_v18  ;;  %v4886_v17 = vld [vmem:[%s6207_s7 + $0xae4] ss:$16 sps:$4 sm:$0xff]  }
 0x126   : > { %3609 = vmatprep.subr.bf16.mxu1 %v4790_v19  ;;  %3596 = vmatprep.mubr.bf16.mxu0 %v4877_v40  ;;  %v4875_v18 = vld [vmem:[%s6747_s0 + $0x10] ss:$52 sps:$4 sm:$0xff]   ;;  %v4878_v19 = vld [vmem:[%s6747_s0 + $0x18] ss:$52 sps:$4 sm:$0xff]  }
 0x127   : > { %3639 = vmatprep.mubr.bf16.mxu1 %v4880_v41  ;;  %v4913_v40 = vld [vmem:[%s6207_s7 + $0x844] ss:$16 sps:$4 sm:$0xff]  }
 0x128   : > { %3567 = vmatpush1.bf16.msra.mxu0 %v4785_v20  ;;  %v4881_v20 = vld [vmem:[%s6207_s7 + $0x8e0] ss:$16 sps:$4 sm:$0xff]   ;;  %v4916_v41 = vld [vmem:[%s6207_s7 + $0xa44] ss:$16 sps:$4 sm:$0xff]  }
 0x129   : > { %3610 = vmatpush1.bf16.msra.mxu1 %v4788_v21  ;;  %3568 = vmatprep.subr.bf16.mxu0 %v4793_v22  ;;  %v4884_v21 = vld [vmem:[%s6207_s7 + $0xae0] ss:$16 sps:$4 sm:$0xff]   ;;  %v4889_v22 = vld [vmem:[%s6207_s7 + $0x8c4] ss:$16 sps:$4 sm:$0xff]  }
 0x12a   : > { %3611 = vmatprep.subr.bf16.mxu1 %v4796_v23  ;;  %v4892_v23 = vld [vmem:[%s6207_s7 + $0xac4] ss:$16 sps:$4 sm:$0xff]  }
 0x12c   : > { %3569 = vmatpush1.bf16.msra.mxu0 %v4791_v24  ;;  %v4979_v24 = vld [vmem:[%s6747_s0 + $0x24] ss:$52 sps:$4 sm:$0xff]  }
 0x12d   : > { %3612 = vmatpush1.bf16.msra.mxu1 %v4794_v25  ;;  %3570 = vmatprep.subr.bf16.mxu0 %v4799_v26  ;;  %v4887_v25 = vld [vmem:[%s6207_s7 + $0x8c0] ss:$16 sps:$4 sm:$0xff]  }
 0x12e   : > { %3613 = vmatprep.subr.bf16.mxu1 %v4802_v27  ;;  %v4982_v26 = vld [vmem:[%s6747_s0 + $0x2c] ss:$52 sps:$4 sm:$0xff]  }
 0x12f   : > { %v4890_v27 = vld [vmem:[%s6207_s7 + $0xac0] ss:$16 sps:$4 sm:$0xff]  }
 0x130   : > { %3571 = vmatpush1.bf16.msra.mxu0 %v4797_v28  ;;  %v4895_v28 = vld [vmem:[%s6207_s7 + $0x8a4] ss:$16 sps:$4 sm:$0xff]  }
 0x131   : > { %3614 = vmatpush1.bf16.msra.mxu1 %v4800_v29  ;;  %3572 = vmatprep.subr.bf16.mxu0 %v4805_v30  ;;  %v4898_v29 = vld [vmem:[%s6207_s7 + $0xaa4] ss:$16 sps:$4 sm:$0xff]   ;;  %v4893_v30 = vld [vmem:[%s6207_s7 + $0x8a0] ss:$16 sps:$4 sm:$0xff]  }
 0x132   : > { %3615 = vmatprep.subr.bf16.mxu1 %v4808_v31  ;;  %v4896_v31 = vld [vmem:[%s6207_s7 + $0xaa0] ss:$16 sps:$4 sm:$0xff]  }
 0x134   : > { %3573 = vmatpush1.bf16.msra.mxu0 %v4803_v32  ;;  %v4901_v32 = vld [vmem:[%s6207_s7 + $0x884] ss:$16 sps:$4 sm:$0xff]  }
 0x135   : > { %3616 = vmatpush1.bf16.msra.mxu1 %v4806_v33  ;;  %3574 = vmatprep.subr.bf16.mxu0 %v4811_v34  ;;  %v4904_v33 = vld [vmem:[%s6207_s7 + $0xa84] ss:$16 sps:$4 sm:$0xff]   ;;  %v4899_v34 = vld [vmem:[%s6207_s7 + $0x880] ss:$16 sps:$4 sm:$0xff]  }
 0x136   : > { %3617 = vmatprep.subr.bf16.mxu1 %v4814_v35  ;;  %v4902_v35 = vld [vmem:[%s6207_s7 + $0xa80] ss:$16 sps:$4 sm:$0xff]  }
 0x138   : > { %3575 = vmatpush1.bf16.msra.mxu0 %v4809_v36  ;;  %v4907_v36 = vld [vmem:[%s6207_s7 + $0x864] ss:$16 sps:$4 sm:$0xff]  }
 0x139   : > { %3618 = vmatpush1.bf16.msra.mxu1 %v4812_v37  ;;  %3576 = vmatprep.subr.bf16.mxu0 %v4817_v38  ;;  %v4910_v37 = vld [vmem:[%s6207_s7 + $0xa64] ss:$16 sps:$4 sm:$0xff]   ;;  %v4905_v38 = vld [vmem:[%s6207_s7 + $0x860] ss:$16 sps:$4 sm:$0xff]  }
 0x13a   : > { %3619 = vmatprep.subr.bf16.mxu1 %v4820_v39  ;;  %v4908_v39 = vld [vmem:[%s6207_s7 + $0xa60] ss:$16 sps:$4 sm:$0xff]  }
 0x13c   : > { %3577 = vmatpush1.bf16.msra.mxu0 %v4815_v42  ;;  %v4911_v42 = vld [vmem:[%s6207_s7 + $0x840] ss:$16 sps:$4 sm:$0xff]  }
 0x13d   : > { %3620 = vmatpush1.bf16.msra.mxu1 %v4818_v43  ;;  %3578 = vmatprep.subr.bf16.mxu0 %v4823_v44  ;;  %v4914_v43 = vld [vmem:[%s6207_s7 + $0xa40] ss:$16 sps:$4 sm:$0xff]   ;;  %v4919_v44 = vld [vmem:[%s6207_s7 + $0x824] ss:$16 sps:$4 sm:$0xff]  }
 0x13e   : > { %3621 = vmatprep.subr.bf16.mxu1 %v4826_v45  ;;  %v4922_v45 = vld [vmem:[%s6207_s7 + $0xa24] ss:$16 sps:$4 sm:$0xff]  }
 0x140   : > { %3579 = vmatpush1.bf16.msra.mxu0 %v4821_v46  ;;  %v4917_v46 = vld [vmem:[%s6207_s7 + $0x820] ss:$16 sps:$4 sm:$0xff]  }
 0x141   : > { %3622 = vmatpush1.bf16.msra.mxu1 %v4824_v47  ;;  %3580 = vmatprep.subr.bf16.mxu0 %v4829_v48  ;;  %v4920_v47 = vld [vmem:[%s6207_s7 + $0xa20] ss:$16 sps:$4 sm:$0xff]   ;;  %v4925_v48 = vld [vmem:[%s6207_s7 + $0x804] ss:$16 sps:$4 sm:$0xff]  }
 0x142   : > { %3623 = vmatprep.subr.bf16.mxu1 %v4832_v49  ;;  %v4928_v49 = vld [vmem:[%s6207_s7 + $0xa04] ss:$16 sps:$4 sm:$0xff]  }
 0x144   : > { %3581 = vmatpush2.bf16.msra.mxu0 %v4827_v50  ;;  %v4923_v50 = vld [vmem:[%s6207_s7 + $0x800] ss:$16 sps:$4 sm:$0xff]  }
 0x145   : > { %3624 = vmatpush2.bf16.msra.mxu1 %v4830_v51  ;;  %3582 = vmatprep.subr.bf16.mxu0 %v4835_v52  ;;  %v4926_v51 = vld [vmem:[%s6207_s7 + $0xa00] ss:$16 sps:$4 sm:$0xff]   ;;  %v4931_v52 = vld [vmem:[%s6207_s7 + $0x9e4] ss:$16 sps:$4 sm:$0xff]  }
 0x146   : > { %3625 = vmatprep.subr.bf16.mxu1 %v4838_v53  ;;  %v4934_v53 = vld [vmem:[%s6207_s7 + $0xbe4] ss:$16 sps:$4 sm:$0xff]  }
 0x148   : > { %3583 = vmatpush2.bf16.msra.mxu0 %v4833_v54  ;;  %v4929_v54 = vld [vmem:[%s6207_s7 + $0x9e0] ss:$16 sps:$4 sm:$0xff]  }
 0x149   : > { %3626 = vmatpush2.bf16.msra.mxu1 %v4836_v55  ;;  %3584 = vmatprep.subr.bf16.mxu0 %v4841_v56  ;;  %v4932_v55 = vld [vmem:[%s6207_s7 + $0xbe0] ss:$16 sps:$4 sm:$0xff]   ;;  %v4937_v56 = vld [vmem:[%s6207_s7 + $0x9c4] ss:$16 sps:$4 sm:$0xff]  }
 0x14a   : > { %3627 = vmatprep.subr.bf16.mxu1 %v4844_v57  ;;  %v4940_v57 = vld [vmem:[%s6207_s7 + $0xbc4] ss:$16 sps:$4 sm:$0xff]  }
 0x14c   : > { %3585 = vmatpush2.bf16.msra.mxu0 %v4839_v58  ;;  %v4935_v58 = vld [vmem:[%s6207_s7 + $0x9c0] ss:$16 sps:$4 sm:$0xff]  }
 0x14d   : > { %3628 = vmatpush2.bf16.msra.mxu1 %v4842_v59  ;;  %3586 = vmatprep.subr.bf16.mxu0 %v4847_v60  ;;  %v4938_v59 = vld [vmem:[%s6207_s7 + $0xbc0] ss:$16 sps:$4 sm:$0xff]   ;;  %v4943_v60 = vld [vmem:[%s6207_s7 + $0x9a4] ss:$16 sps:$4 sm:$0xff]  }
 0x14e   : > { %3629 = vmatprep.subr.bf16.mxu1 %v4850_v61  ;;  %v4946_v61 = vld [vmem:[%s6207_s7 + $0xba4] ss:$16 sps:$4 sm:$0xff]  }
 0x150   : > { %3587 = vmatpush2.bf16.msra.mxu0 %v4845_v62  ;;  %v4941_v62 = vld [vmem:[%s6207_s7 + $0x9a0] ss:$16 sps:$4 sm:$0xff]  }
 0x151   : > { %3630 = vmatpush2.bf16.msra.mxu1 %v4848_v63  ;;  %3588 = vmatprep.subr.bf16.mxu0 %v4853_v0  ;;  %v4944_v63 = vld [vmem:[%s6207_s7 + $0xba0] ss:$16 sps:$4 sm:$0xff]   ;;  %v4949_v0 = vld [vmem:[%s6207_s7 + $0x984] ss:$16 sps:$4 sm:$0xff]  }
 0x152   : > { %3631 = vmatprep.subr.bf16.mxu1 %v4856_v1  ;;  %v4952_v1 = vld [vmem:[%s6207_s7 + $0xb84] ss:$16 sps:$4 sm:$0xff]  }
 0x154   : > { %3589 = vmatpush2.bf16.msra.mxu0 %v4851_v2  ;;  %v4947_v2 = vld [vmem:[%s6207_s7 + $0x980] ss:$16 sps:$4 sm:$0xff]  }
 0x155   : > { %3632 = vmatpush2.bf16.msra.mxu1 %v4854_v3  ;;  %3590 = vmatprep.subr.bf16.mxu0 %v4859_v4  ;;  %v4950_v3 = vld [vmem:[%s6207_s7 + $0xb80] ss:$16 sps:$4 sm:$0xff]   ;;  %v4955_v4 = vld [vmem:[%s6207_s7 + $0x964] ss:$16 sps:$4 sm:$0xff]  }
 0x156   : > { %3633 = vmatprep.subr.bf16.mxu1 %v4862_v5  ;;  %v4958_v5 = vld [vmem:[%s6207_s7 + $0xb64] ss:$16 sps:$4 sm:$0xff]  }
 0x158   : > { %3591 = vmatpush2.bf16.msra.mxu0 %v4857_v6  ;;  %v4953_v6 = vld [vmem:[%s6207_s7 + $0x960] ss:$16 sps:$4 sm:$0xff]  }
 0x159   : > { %3634 = vmatpush2.bf16.msra.mxu1 %v4860_v7  ;;  %3592 = vmatprep.subr.bf16.mxu0 %v4865_v8  ;;  %v4956_v7 = vld [vmem:[%s6207_s7 + $0xb60] ss:$16 sps:$4 sm:$0xff]   ;;  %v4961_v8 = vld [vmem:[%s6207_s7 + $0x944] ss:$16 sps:$4 sm:$0xff]  }
 0x15a   : > { %3635 = vmatprep.subr.bf16.mxu1 %v4868_v9  ;;  %v4964_v9 = vld [vmem:[%s6207_s7 + $0xb44] ss:$16 sps:$4 sm:$0xff]  }
 0x15c   : > { %3593 = vmatpush2.bf16.msra.mxu0 %v4863_v10  ;;  %v4959_v10 = vld [vmem:[%s6207_s7 + $0x940] ss:$16 sps:$4 sm:$0xff]  }
 0x15d   : > { %3636 = vmatpush2.bf16.msra.mxu1 %v4866_v11  ;;  %3594 = vmatprep.subr.bf16.mxu0 %v4871_v12  ;;  %v4962_v11 = vld [vmem:[%s6207_s7 + $0xb40] ss:$16 sps:$4 sm:$0xff]   ;;  %v4967_v12 = vld [vmem:[%s6207_s7 + $0x924] ss:$16 sps:$4 sm:$0xff]  }
 0x15e   : > { %3637 = vmatprep.subr.bf16.mxu1 %v4874_v13  ;;  %v4970_v13 = vld [vmem:[%s6207_s7 + $0xb24] ss:$16 sps:$4 sm:$0xff]  }
 0x160   : > { %3595 = vmatpush2.bf16.msra.mxu0 %v4869_v14  ;;  %v1399_v14 = vld [vmem:[%s6207_s7 + $0xc40] sm:$0x77] }
 0x161   : > { %3638 = vmatpush2.bf16.msra.mxu1 %v4872_v15  ;;  %3650 = vmatprep.subr.bf16.mxu0 %v4883_v16  ;;  %v4965_v15 = vld [vmem:[%s6207_s7 + $0x920] ss:$16 sps:$4 sm:$0xff]   ;;  %v5341_v16 = vmov 65535  }
 0x162   : > { %3693 = vmatprep.subr.bf16.mxu1 %v4886_v17  ;;  %v3464_v17 = vsel %vm3462_vm0, 4294967295, %v5341_v16  ;;  %v5057_v16 = vld [vmem:[%s6207_s7 + $0x16c] ss:$16 sps:$4 sm:$0xff]  }
 0x163   : > { %3597 = vmatmul.mubr.bf16.vlgmr.msra.gmra.mxu0 %v4875_v18  ;;  %v4968_v18 = vld [vmem:[%s6207_s7 + $0xb20] ss:$16 sps:$4 sm:$0xff]  }
 0x164   : > { %3640 = vmatmul.mubr.bf16.vlgmr.msra.gmra.mxu1 %v4878_v19  ;;  %3651 = vmatpush1.bf16.msra.mxu0 %v4881_v20  ;;  %v4973_v19 = vld [vmem:[%s6207_s7 + $0x904] ss:$16 sps:$4 sm:$0xff]  }
 0x165   : > { %3694 = vmatpush1.bf16.msra.mxu1 %v4884_v21  ;;  %3652 = vmatprep.subr.bf16.mxu0 %v4889_v22  ;;  %v4976_v20 = vld [vmem:[%s6207_s7 + $0xb04] ss:$16 sps:$4 sm:$0xff]   ;;  %v4629_v21 = vcombine.high %v1399_v14, %v1399_v14  ;;  %v6424_v22 = vsel %vm3463_vm1, %v3464_v17, 0  ;;  %v5060_v17 = vld [vmem:[%s6207_s7 + $0x3cc] ss:$16 sps:$4 sm:$0xff]  }
 0x166   : > { %3695 = vmatprep.subr.bf16.mxu1 %v4892_v23  ;;  %3682 = vmatprep.mubr.bf16.mxu0 %v4979_v24  ;;  %v4971_v23 = vld [vmem:[%s6207_s7 + $0x900] ss:$16 sps:$4 sm:$0xff]  }
 0x167   : > { %3725 = vmatprep.mubr.bf16.mxu1 %v4982_v26  ;;  %v4974_v24 = vld [vmem:[%s6207_s7 + $0xb00] ss:$16 sps:$4 sm:$0xff]   ;;  %v3470_v26 = vand.u32 %v4629_v21, %v6424_v22  ;;  %v5066_v21 = vld [vmem:[%s6207_s7 + $0x3ac] ss:$16 sps:$4 sm:$0xff]  }
 0x168   : > { %3653 = vmatpush1.bf16.msra.mxu0 %v4887_v25  ;;  %v4628_v25 = vcombine.low %v1399_v14, %v1399_v14  ;;  %v5049_v14 = vld [vmem:[%s6207_s7 + $0x188] ss:$16 sps:$4 sm:$0xff]  }
 0x169   : > { %3696 = vmatpush1.bf16.msra.mxu1 %v4890_v27  ;;  %3654 = vmatprep.subr.bf16.mxu0 %v4895_v28  ;;  %v4987_v27 = vld [vmem:[%s6207_s7 + $0xec] ss:$16 sps:$4 sm:$0xff]   ;;  %v4977_v28 = vld [vmem:[%s6747_s0 + $0x20] ss:$52 sps:$4 sm:$0xff]  }
 0x16a   : > { %3697 = vmatprep.subr.bf16.mxu1 %v4898_v29  ;;  %v4980_v29 = vld [vmem:[%s6747_s0 + $0x28] ss:$52 sps:$4 sm:$0xff]  }
 0x16c   : > { %3655 = vmatpush1.bf16.msra.mxu0 %v4893_v30  ;;  %v4985_v30 = vld [vmem:[%s6207_s7 + $0xe8] ss:$16 sps:$4 sm:$0xff]  }
 0x16d   : > { %3698 = vmatpush1.bf16.msra.mxu1 %v4896_v31  ;;  %3656 = vmatprep.subr.bf16.mxu0 %v4901_v32  ;;  %v3467_v31 = vand.u32 %v4628_v25, %v6424_v22  ;;  %v4990_v32 = vld [vmem:[%s6207_s7 + $0xc24] ss:$16 sps:$4 sm:$0xff]   ;;  %v5069_v25 = vld [vmem:[%s6207_s7 + $0x12c] ss:$16 sps:$4 sm:$0xff]  }
 0x16e   : > { %3699 = vmatprep.subr.bf16.mxu1 %v4904_v33  ;;  %v4993_v33 = vld [vmem:[%s6207_s7 + $0xcc] ss:$16 sps:$4 sm:$0xff]  }
 0x170   : > { %3657 = vmatpush1.bf16.msra.mxu0 %v4899_v34  ;;  %v4988_v34 = vld [vmem:[%s6207_s7 + $0xc20] ss:$16 sps:$4 sm:$0xff]  }
 0x171   : > { %3700 = vmatpush1.bf16.msra.mxu1 %v4902_v35  ;;  %3658 = vmatprep.subr.bf16.mxu0 %v4907_v36  ;;  %v4991_v35 = vld [vmem:[%s6207_s7 + $0xc8] ss:$16 sps:$4 sm:$0xff]   ;;  %v4996_v36 = vld [vmem:[%s6207_s7 + $0xc04] ss:$16 sps:$4 sm:$0xff]  }
 0x172   : > { %3701 = vmatprep.subr.bf16.mxu1 %v4910_v37  ;;  %v4999_v37 = vld [vmem:[%s6207_s7 + $0xac] ss:$16 sps:$4 sm:$0xff]  }
 0x174   : > { %3659 = vmatpush1.bf16.msra.mxu0 %v4905_v38  ;;  %v5342_v38 = vmov 0  }
 0x175   : > { %3702 = vmatpush1.bf16.msra.mxu1 %v4908_v39  ;;  %3660 = vmatprep.subr.bf16.mxu0 %v4913_v40  ;;  %v5304_v39 = vld [vmem:[%s6747_s0 + $0x4] ss:$52 sps:$4 sm:$0xff]   ;;  %v4994_v40 = vld [vmem:[%s6207_s7 + $0xc00] ss:$16 sps:$4 sm:$0xff]  }
 0x176   : > { %3703 = vmatprep.subr.bf16.mxu1 %v4916_v41  ;;  %v4997_v41 = vld [vmem:[%s6207_s7 + $0xa8] ss:$16 sps:$4 sm:$0xff]  }
 0x178   : > { %3661 = vmatpush1.bf16.msra.mxu0 %v4911_v42  ;;  %v5003_v42 = vld [vmem:[%s6207_s7 + $0x8c] ss:$16 sps:$4 sm:$0xff]  }
 0x179   : > { %3704 = vmatpush1.bf16.msra.mxu1 %v4914_v43  ;;  %3662 = vmatprep.subr.bf16.mxu0 %v4919_v44  ;;  %v5006_v43 = vld [vmem:[%s6207_s7 + $0x2ec] ss:$16 sps:$4 sm:$0xff]   ;;  %v5000_v44 = vld [vmem:[%s6747_s0 + $0x30] ss:$52 sps:$4 sm:$0xff]  }
 0x17a   : > { %3705 = vmatprep.subr.bf16.mxu1 %v4922_v45  ;;  %v5001_v45 = vld [vmem:[%s6207_s7 + $0x88] ss:$16 sps:$4 sm:$0xff]  }
 0x17c   : > { %3663 = vmatpush1.bf16.msra.mxu0 %v4917_v46  ;;  %v5004_v46 = vld [vmem:[%s6207_s7 + $0x2e8] ss:$16 sps:$4 sm:$0xff]  }
 0x17d   : > { %3706 = vmatpush1.bf16.msra.mxu1 %v4920_v47  ;;  %3664 = vmatprep.subr.bf16.mxu0 %v4925_v48  ;;  %v5009_v47 = vld [vmem:[%s6207_s7 + $0x6c] ss:$16 sps:$4 sm:$0xff]  }
 0x17e   : > { %3707 = vmatprep.subr.bf16.mxu1 %v4928_v49  ;;  %v5012_v48 = vld [vmem:[%s6207_s7 + $0x2cc] ss:$16 sps:$4 sm:$0xff]   ;;  %v5007_v49 = vld [vmem:[%s6207_s7 + $0x68] ss:$16 sps:$4 sm:$0xff]  }
 0x180   : > { %3665 = vmatpush1.bf16.msra.mxu0 %v4923_v50  ;;  %v5010_v50 = vld [vmem:[%s6207_s7 + $0x2c8] ss:$16 sps:$4 sm:$0xff]  }
 0x181   : > { %3708 = vmatpush1.bf16.msra.mxu1 %v4926_v51  ;;  %3666 = vmatprep.subr.bf16.mxu0 %v4931_v52  ;;  %v5015_v51 = vld [vmem:[%s6207_s7 + $0x4c] ss:$16 sps:$4 sm:$0xff]  }
 0x182   : > { %3709 = vmatprep.subr.bf16.mxu1 %v4934_v53  ;;  %v5018_v52 = vld [vmem:[%s6207_s7 + $0x2ac] ss:$16 sps:$4 sm:$0xff]  }
 0x183   : > { %v5305_v53 = vld [vmem:[%s6747_s0 + $0xc] ss:$52 sps:$4 sm:$0xff]  }
 0x184   : > { %3667 = vmatpush2.bf16.msra.mxu0 %v4929_v54  ;;  %v5013_v54 = vld [vmem:[%s6207_s7 + $0x48] ss:$16 sps:$4 sm:$0xff]  }
 0x185   : > { %3710 = vmatpush2.bf16.msra.mxu1 %v4932_v55  ;;  %3668 = vmatprep.subr.bf16.mxu0 %v4937_v56  ;;  %v5016_v55 = vld [vmem:[%s6207_s7 + $0x2a8] ss:$16 sps:$4 sm:$0xff]   ;;  %v5021_v56 = vld [vmem:[%s6207_s7 + $0x2c] ss:$16 sps:$4 sm:$0xff]  }
 0x186   : > { %3711 = vmatprep.subr.bf16.mxu1 %v4940_v57  ;;  %v5024_v57 = vld [vmem:[%s6207_s7 + $0x28c] ss:$16 sps:$4 sm:$0xff]  }
 0x188   : > { %3669 = vmatpush2.bf16.msra.mxu0 %v4935_v58  ;;  %v5019_v58 = vld [vmem:[%s6207_s7 + $0x28] ss:$16 sps:$4 sm:$0xff]  }
 0x189   : > { %3712 = vmatpush2.bf16.msra.mxu1 %v4938_v59  ;;  %3670 = vmatprep.subr.bf16.mxu0 %v4943_v60  ;;  %v5022_v59 = vld [vmem:[%s6207_s7 + $0x288] ss:$16 sps:$4 sm:$0xff]   ;;  %v5027_v60 = vld [vmem:[%s6207_s7 + $0xc] ss:$16 sps:$4 sm:$0xff]  }
 0x18a   : > { %3713 = vmatprep.subr.bf16.mxu1 %v4946_v61  ;;  %v5030_v61 = vld [vmem:[%s6207_s7 + $0x26c] ss:$16 sps:$4 sm:$0xff]  }
 0x18c   : > { %3671 = vmatpush2.bf16.msra.mxu0 %v4941_v62  ;;  %v5025_v62 = vld [vmem:[%s6207_s7 + $0x8] ss:$16 sps:$4 sm:$0xff]  }
 0x18d   : > { %3714 = vmatpush2.bf16.msra.mxu1 %v4944_v63  ;;  %3672 = vmatprep.subr.bf16.mxu0 %v4949_v0  ;;  %v5028_v63 = vld [vmem:[%s6207_s7 + $0x268] ss:$16 sps:$4 sm:$0xff]   ;;  %v5033_v0 = vld [vmem:[%s6207_s7 + $0x1ec] ss:$16 sps:$4 sm:$0xff]  }
 0x18e   : > { %3715 = vmatprep.subr.bf16.mxu1 %v4952_v1  ;;  %v5036_v1 = vld [vmem:[%s6207_s7 + $0x24c] ss:$16 sps:$4 sm:$0xff]  }
 0x190   : > { %3673 = vmatpush2.bf16.msra.mxu0 %v4947_v2  ;;  %v5031_v2 = vld [vmem:[%s6207_s7 + $0x1e8] ss:$16 sps:$4 sm:$0xff]  }
 0x191   : > { %3716 = vmatpush2.bf16.msra.mxu1 %v4950_v3  ;;  %3674 = vmatprep.subr.bf16.mxu0 %v4955_v4  ;;  %v5034_v3 = vld [vmem:[%s6207_s7 + $0x248] ss:$16 sps:$4 sm:$0xff]   ;;  %v5039_v4 = vld [vmem:[%s6207_s7 + $0x1cc] ss:$16 sps:$4 sm:$0xff]  }
 0x192   : > { %3717 = vmatprep.subr.bf16.mxu1 %v4958_v5  ;;  %v5042_v5 = vld [vmem:[%s6207_s7 + $0x22c] ss:$16 sps:$4 sm:$0xff]  }
 0x194   : > { %3675 = vmatpush2.bf16.msra.mxu0 %v4953_v6  ;;  %v5037_v6 = vld [vmem:[%s6207_s7 + $0x1c8] ss:$16 sps:$4 sm:$0xff]  }
 0x195   : > { %3718 = vmatpush2.bf16.msra.mxu1 %v4956_v7  ;;  %3676 = vmatprep.subr.bf16.mxu0 %v4961_v8  ;;  %v5040_v7 = vld [vmem:[%s6207_s7 + $0x228] ss:$16 sps:$4 sm:$0xff]   ;;  %v5045_v8 = vld [vmem:[%s6207_s7 + $0x1ac] ss:$16 sps:$4 sm:$0xff]  }
 0x196   : > { %3719 = vmatprep.subr.bf16.mxu1 %v4964_v9  ;;  %v5048_v9 = vld [vmem:[%s6207_s7 + $0x20c] ss:$16 sps:$4 sm:$0xff]  }
 0x198   : > { %3677 = vmatpush2.bf16.msra.mxu0 %v4959_v10  ;;  %v5043_v10 = vld [vmem:[%s6207_s7 + $0x1a8] ss:$16 sps:$4 sm:$0xff]  }
 0x199   : > { %3720 = vmatpush2.bf16.msra.mxu1 %v4962_v11  ;;  %3678 = vmatprep.subr.bf16.mxu0 %v4967_v12  ;;  %v5046_v11 = vld [vmem:[%s6207_s7 + $0x208] ss:$16 sps:$4 sm:$0xff]   ;;  %v5051_v12 = vld [vmem:[%s6207_s7 + $0x18c] ss:$16 sps:$4 sm:$0xff]  }
 0x19a   : > { %3721 = vmatprep.subr.bf16.mxu1 %v4970_v13  ;;  %v5054_v13 = vld [vmem:[%s6207_s7 + $0x3ec] ss:$16 sps:$4 sm:$0xff]  }
 0x19c   : > { %3679 = vmatpush2.bf16.msra.mxu0 %v4965_v15  ;;  %v5052_v15 = vld [vmem:[%s6207_s7 + $0x3e8] ss:$16 sps:$4 sm:$0xff]  }
 0x19d   : > { %3722 = vmatpush2.bf16.msra.mxu1 %v4968_v18  ;;  %3680 = vmatprep.subr.bf16.mxu0 %v4973_v19  ;;  %v5055_v18 = vld [vmem:[%s6207_s7 + $0x168] ss:$16 sps:$4 sm:$0xff]  }
 0x19e   : > { %3723 = vmatprep.subr.bf16.mxu1 %v4976_v20  ;;  %v5058_v19 = vld [vmem:[%s6207_s7 + $0x3c8] ss:$16 sps:$4 sm:$0xff]   ;;  %v5063_v20 = vld [vmem:[%s6207_s7 + $0x14c] ss:$16 sps:$4 sm:$0xff]  }
 0x1a0   : > { %3681 = vmatpush2.bf16.msra.mxu0 %v4971_v23  ;;  %v5061_v23 = vld [vmem:[%s6207_s7 + $0x148] ss:$16 sps:$4 sm:$0xff]  }
 0x1a1   : > { %3724 = vmatpush2.bf16.msra.mxu1 %v4974_v24  ;;  %3746 = vmatprep.subr.bf16.mxu0 %v3470_v26  ;;  %v5064_v24 = vld [vmem:[%s6207_s7 + $0x3a8] ss:$16 sps:$4 sm:$0xff]   ;;  %v5072_v26 = vld [vmem:[%s6207_s7 + $0x38c] ss:$16 sps:$4 sm:$0xff]  }
 0x1a2   : > { %3779 = vmatprep.subr.bf16.mxu1 %v4987_v27  ;;  %v5067_v27 = vld [vmem:[%s6207_s7 + $0x128] ss:$16 sps:$4 sm:$0xff]  }
 0x1a3   : > { %3683 = vmatmul.mubr.bf16.vlgmr.msra.gmra.mxu0 %v4977_v28  ;;  %v5070_v28 = vld [vmem:[%s6207_s7 + $0x388] ss:$16 sps:$4 sm:$0xff]  }
 0x1a4   : > { %3726 = vmatmul.mubr.bf16.vlgmr.msra.gmra.mxu1 %v4980_v29  ;;  %3747 = vmatpush1.bf16.msra.mxu0 %v3467_v31  ;;  %v5075_v29 = vld [vmem:[%s6207_s7 + $0x10c] ss:$16 sps:$4 sm:$0xff]   ;;  %v5073_v31 = vld [vmem:[%s6207_s7 + $0x108] ss:$16 sps:$4 sm:$0xff]  }
 0x1a5   : > { %3780 = vmatpush1.bf16.msra.mxu1 %v4985_v30  ;;  %3748 = vmatprep.subr.bf16.mxu0 %v4990_v32  ;;  %v5078_v30 = vld [vmem:[%s6207_s7 + $0x36c] ss:$16 sps:$4 sm:$0xff]   ;;  %v5076_v32 = vld [vmem:[%s6207_s7 + $0x368] ss:$16 sps:$4 sm:$0xff]  }
 0x1a6   : > { %3781 = vmatprep.subr.bf16.mxu1 %v4993_v33  ;;  %3768 = vmatprep.mubr.bf16.mxu0 %v5342_v38  ;;  %v5081_v33 = vld [vmem:[%s6207_s7 + $0x34c] ss:$16 sps:$4 sm:$0xff]  }
 0x1a7   : > { %3811 = vmatprep.mubr.bf16.mxu1 %v5304_v39  ;;  %v5090_v39 = vld [vmem:[%s6207_s7 + $0x4cc] ss:$16 sps:$4 sm:$0xff]  }
 0x1a8   : > { %3749 = vmatpush1.bf16.msra.mxu0 %v4988_v34  ;;  %v5084_v34 = vld [vmem:[%s6207_s7 + $0x4ec] ss:$16 sps:$4 sm:$0xff]  }
 0x1a9   : > { %3782 = vmatpush1.bf16.msra.mxu1 %v4991_v35  ;;  %3750 = vmatprep.subr.bf16.mxu0 %v4996_v36  ;;  %v5079_v35 = vld [vmem:[%s6207_s7 + $0x348] ss:$16 sps:$4 sm:$0xff]  }
 0x1aa   : > { %3783 = vmatprep.subr.bf16.mxu1 %v4999_v37  ;;  %v5082_v36 = vld [vmem:[%s6207_s7 + $0x4e8] ss:$16 sps:$4 sm:$0xff]   ;;  %v5087_v37 = vld [vmem:[%s6207_s7 + $0x32c] ss:$16 sps:$4 sm:$0xff]  }
 0x1ac   : > { %3751 = vmatpush1.bf16.msra.mxu0 %v4994_v40  ;;  %v5306_v40 = vld [vmem:[%s6747_s0] ss:$52 sps:$4 sm:$0xff]  }
 0x1ad   : > { %3784 = vmatpush1.bf16.msra.mxu1 %v4997_v41  ;;  %3822 = vmatprep.subr.bf16.mxu0 %v5006_v43  ;;  %v5085_v41 = vld [vmem:[%s6207_s7 + $0x328] ss:$16 sps:$4 sm:$0xff]   ;;  %v5093_v43 = vld [vmem:[%s6207_s7 + $0x30c] ss:$16 sps:$4 sm:$0xff]  }
 0x1ae   : > { %3785 = vmatprep.subr.bf16.mxu1 %v5003_v42  ;;  %v5088_v42 = vld [vmem:[%s6207_s7 + $0x4c8] ss:$16 sps:$4 sm:$0xff]  }
 0x1af   : > { %4632 = vmatmul.mubr.msk.bf16.vlgmr.msra.gmra.mxu0 %vm3458_vm2, %v5000_v44  ;;  %v5096_v44 = vld [vmem:[%s6207_s7 + $0x4ac] ss:$16 sps:$4 sm:$0xff]  }
 0x1b0   : > { %3823 = vmatpush1.bf16.msra.mxu0 %v5004_v46  ;;  %3854 = vmatprep.mubr.bf16.mxu0 %v5305_v53  ;;  %v5091_v46 = vld [vmem:[%s6207_s7 + $0x308] ss:$16 sps:$4 sm:$0xff]   ;;  %v5108_v53 = vld [vmem:[%s6207_s7 + $0x6cc] ss:$16 sps:$4 sm:$0xff]  }
 0x1b1   : > { %3786 = vmatpush1.bf16.msra.mxu1 %v5001_v45  ;;  %3824 = vmatprep.subr.bf16.mxu0 %v5012_v48  ;;  %v5307_v45 = vld [vmem:[%s6747_s0 + $0x14] ss:$52 sps:$4 sm:$0xff]   ;;  %v5099_v48 = vld [vmem:[%s6207_s7 + $0x48c] ss:$16 sps:$4 sm:$0xff]  }
 0x1b2   : > { %3787 = vmatprep.subr.bf16.mxu1 %v5009_v47  ;;  %v5094_v47 = vld [vmem:[%s6207_s7 + $0x4a8] ss:$16 sps:$4 sm:$0xff]  }
 0x1b4   : > { %3825 = vmatpush1.bf16.msra.mxu0 %v5010_v50  ;;  %v5097_v50 = vld [vmem:[%s6207_s7 + $0x488] ss:$16 sps:$4 sm:$0xff]  }
 0x1b5   : > { %3788 = vmatpush1.bf16.msra.mxu1 %v5007_v49  ;;  %3826 = vmatprep.subr.bf16.mxu0 %v5018_v52  ;;  %v5102_v49 = vld [vmem:[%s6207_s7 + $0x6ec] ss:$16 sps:$4 sm:$0xff]  }
 0x1b6   : > { %3789 = vmatprep.subr.bf16.mxu1 %v5015_v51  ;;  %v5100_v51 = vld [vmem:[%s6207_s7 + $0x6e8] ss:$16 sps:$4 sm:$0xff]   ;;  %v5105_v52 = vld [vmem:[%s6207_s7 + $0x46c] ss:$16 sps:$4 sm:$0xff]  }
 0x1b8   : > { %3827 = vmatpush1.bf16.msra.mxu0 %v5016_v55  ;;  %v5103_v55 = vld [vmem:[%s6207_s7 + $0x468] ss:$16 sps:$4 sm:$0xff]  }
 0x1b9   : > { %3790 = vmatpush1.bf16.msra.mxu1 %v5013_v54  ;;  %3828 = vmatprep.subr.bf16.mxu0 %v5024_v57  ;;  %v5308_v54 = vld [vmem:[%s6747_s0 + $0x8] ss:$52 sps:$4 sm:$0xff]  }
 0x1ba   : > { %3791 = vmatprep.subr.bf16.mxu1 %v5021_v56  ;;  %v5106_v56 = vld [vmem:[%s6207_s7 + $0x6c8] ss:$16 sps:$4 sm:$0xff]   ;;  %v5111_v57 = vld [vmem:[%s6207_s7 + $0x44c] ss:$16 sps:$4 sm:$0xff]  }
 0x1bc   : > { %3829 = vmatpush1.bf16.msra.mxu0 %v5022_v59  ;;  %v5309_v59 = vld [vmem:[%s6747_s0 + $0x1c] ss:$52 sps:$4 sm:$0xff]  }
 0x1bd   : > { %3792 = vmatpush1.bf16.msra.mxu1 %v5019_v58  ;;  %3830 = vmatprep.subr.bf16.mxu0 %v5030_v61  ;;  %v5114_v58 = vld [vmem:[%s6207_s7 + $0x6ac] ss:$16 sps:$4 sm:$0xff]   ;;  %v5112_v61 = vld [vmem:[%s6207_s7 + $0x6a8] ss:$16 sps:$4 sm:$0xff]  }
 0x1be   : > { %3793 = vmatprep.subr.bf16.mxu1 %v5027_v60  ;;  %v5109_v60 = vld [vmem:[%s6207_s7 + $0x448] ss:$16 sps:$4 sm:$0xff]  }
 0x1c0   : > { %3831 = vmatpush1.bf16.msra.mxu0 %v5028_v63  ;;  %v5120_v63 = vld [vmem:[%s6207_s7 + $0x68c] ss:$16 sps:$4 sm:$0xff]  }
 0x1c1   : > { %3794 = vmatpush1.bf16.msra.mxu1 %v5025_v62  ;;  %3832 = vmatprep.subr.bf16.mxu0 %v5036_v1  ;;  %v5117_v62 = vld [vmem:[%s6207_s7 + $0x42c] ss:$16 sps:$4 sm:$0xff]   ;;  %v5118_v1 = vld [vmem:[%s6207_s7 + $0x688] ss:$16 sps:$4 sm:$0xff]  }
 0x1c2   : > { %3795 = vmatprep.subr.bf16.mxu1 %v5033_v0  ;;  %v5115_v0 = vld [vmem:[%s6207_s7 + $0x428] ss:$16 sps:$4 sm:$0xff]  }
 0x1c4   : > { %3833 = vmatpush1.bf16.msra.mxu0 %v5034_v3  ;;  %v5126_v3 = vld [vmem:[%s6207_s7 + $0x66c] ss:$16 sps:$4 sm:$0xff]  }
 0x1c5   : > { %3796 = vmatpush2.bf16.msra.mxu1 %v5031_v2  ;;  %3834 = vmatprep.subr.bf16.mxu0 %v5042_v5  ;;  %v5123_v2 = vld [vmem:[%s6207_s7 + $0x40c] ss:$16 sps:$4 sm:$0xff]   ;;  %v5124_v5 = vld [vmem:[%s6207_s7 + $0x668] ss:$16 sps:$4 sm:$0xff]  }
 0x1c6   : > { %3797 = vmatprep.subr.bf16.mxu1 %v5039_v4  ;;  %v5121_v4 = vld [vmem:[%s6207_s7 + $0x408] ss:$16 sps:$4 sm:$0xff]  }
 0x1c8   : > { %3835 = vmatpush1.bf16.msra.mxu0 %v5040_v7  ;;  %v5132_v7 = vld [vmem:[%s6207_s7 + $0x64c] ss:$16 sps:$4 sm:$0xff]  }
 0x1c9   : > { %3798 = vmatpush2.bf16.msra.mxu1 %v5037_v6  ;;  %3836 = vmatprep.subr.bf16.mxu0 %v5048_v9  ;;  %v5129_v6 = vld [vmem:[%s6207_s7 + $0x5ec] ss:$16 sps:$4 sm:$0xff]   ;;  %v5130_v9 = vld [vmem:[%s6207_s7 + $0x648] ss:$16 sps:$4 sm:$0xff]  }
 0x1ca   : > { %3799 = vmatprep.subr.bf16.mxu1 %v5045_v8  ;;  %v5127_v8 = vld [vmem:[%s6207_s7 + $0x5e8] ss:$16 sps:$4 sm:$0xff]  }
 0x1cc   : > { %3837 = vmatpush1.bf16.msra.mxu0 %v5046_v11  ;;  %v5138_v11 = vld [vmem:[%s6207_s7 + $0x62c] ss:$16 sps:$4 sm:$0xff]  }
 0x1cd   : > { %3800 = vmatpush2.bf16.msra.mxu1 %v5043_v10  ;;  %3838 = vmatprep.subr.bf16.mxu0 %v5054_v13  ;;  %v5135_v10 = vld [vmem:[%s6207_s7 + $0x5cc] ss:$16 sps:$4 sm:$0xff]   ;;  %v5136_v13 = vld [vmem:[%s6207_s7 + $0x628] ss:$16 sps:$4 sm:$0xff]  }
 0x1ce   : > { %3801 = vmatprep.subr.bf16.mxu1 %v5051_v12  ;;  %v5133_v12 = vld [vmem:[%s6207_s7 + $0x5c8] ss:$16 sps:$4 sm:$0xff]  }
 0x1d0   : > { %3839 = vmatpush2.bf16.msra.mxu0 %v5052_v15  ;;  %v5144_v15 = vld [vmem:[%s6207_s7 + $0x60c] ss:$16 sps:$4 sm:$0xff]  }
 0x1d1   : > { %3802 = vmatpush2.bf16.msra.mxu1 %v5049_v14  ;;  %3840 = vmatprep.subr.bf16.mxu0 %v5060_v17  ;;  %v5141_v14 = vld [vmem:[%s6207_s7 + $0x5ac] ss:$16 sps:$4 sm:$0xff]   ;;  %v5142_v17 = vld [vmem:[%s6207_s7 + $0x608] ss:$16 sps:$4 sm:$0xff]  }
 0x1d2   : > { %3803 = vmatprep.subr.bf16.mxu1 %v5057_v16  ;;  %v5139_v16 = vld [vmem:[%s6207_s7 + $0x5a8] ss:$16 sps:$4 sm:$0xff]  }
 0x1d4   : > { %3841 = vmatpush2.bf16.msra.mxu0 %v5058_v19  ;;  %v5150_v19 = vld [vmem:[%s6207_s7 + $0x7ec] ss:$16 sps:$4 sm:$0xff]  }
 0x1d5   : > { %3804 = vmatpush2.bf16.msra.mxu1 %v5055_v18  ;;  %3842 = vmatprep.subr.bf16.mxu0 %v5066_v21  ;;  %v5147_v18 = vld [vmem:[%s6207_s7 + $0x58c] ss:$16 sps:$4 sm:$0xff]   ;;  %v5148_v21 = vld [vmem:[%s6207_s7 + $0x7e8] ss:$16 sps:$4 sm:$0xff]  }
 0x1d6   : > { %3805 = vmatprep.subr.bf16.mxu1 %v5063_v20  ;;  %v5145_v20 = vld [vmem:[%s6207_s7 + $0x588] ss:$16 sps:$4 sm:$0xff]  }
 0x1d8   : > { %3843 = vmatpush2.bf16.msra.mxu0 %v5064_v24  ;;  %v5156_v24 = vld [vmem:[%s6207_s7 + $0x7cc] ss:$16 sps:$4 sm:$0xff]  }
 0x1d9   : > { %3806 = vmatpush2.bf16.msra.mxu1 %v5061_v23  ;;  %3844 = vmatprep.subr.bf16.mxu0 %v5072_v26  ;;  %v5153_v23 = vld [vmem:[%s6207_s7 + $0x56c] ss:$16 sps:$4 sm:$0xff]   ;;  %v5154_v26 = vld [vmem:[%s6207_s7 + $0x7c8] ss:$16 sps:$4 sm:$0xff]  }
 0x1da   : > { %3807 = vmatprep.subr.bf16.mxu1 %v5069_v25  ;;  %v5151_v25 = vld [vmem:[%s6207_s7 + $0x568] ss:$16 sps:$4 sm:$0xff]  }
 0x1dc   : > { %3845 = vmatpush2.bf16.msra.mxu0 %v5070_v28  ;;  %v5162_v28 = vld [vmem:[%s6207_s7 + $0x7ac] ss:$16 sps:$4 sm:$0xff]  }
 0x1dd   : > { %3808 = vmatpush2.bf16.msra.mxu1 %v5067_v27  ;;  %3846 = vmatprep.subr.bf16.mxu0 %v5078_v30  ;;  %v5159_v27 = vld [vmem:[%s6207_s7 + $0x54c] ss:$16 sps:$4 sm:$0xff]   ;;  %v5160_v30 = vld [vmem:[%s6207_s7 + $0x7a8] ss:$16 sps:$4 sm:$0xff]  }
 0x1de   : > { %3809 = vmatprep.subr.bf16.mxu1 %v5075_v29  ;;  %v5157_v29 = vld [vmem:[%s6207_s7 + $0x548] ss:$16 sps:$4 sm:$0xff]  }
 0x1e0   : > { %3847 = vmatpush2.bf16.msra.mxu0 %v5076_v32  ;;  %v5168_v32 = vld [vmem:[%s6207_s7 + $0x78c] ss:$16 sps:$4 sm:$0xff]  }
 0x1e1   : > { %3810 = vmatpush2.bf16.msra.mxu1 %v5073_v31  ;;  %3848 = vmatprep.subr.bf16.mxu0 %v5081_v33  ;;  %v5165_v31 = vld [vmem:[%s6207_s7 + $0x52c] ss:$16 sps:$4 sm:$0xff]   ;;  %v5163_v33 = vld [vmem:[%s6207_s7 + $0x528] ss:$16 sps:$4 sm:$0xff]  }
 0x1e2   : > { %3865 = vmatprep.subr.bf16.mxu1 %v5084_v34  ;;  %v5166_v34 = vld [vmem:[%s6207_s7 + $0x788] ss:$16 sps:$4 sm:$0xff]  }
 0x1e4   : > { %3812 = vmatmul.mubr.bf16.vlgmr.msra.gmra.mxu1 %v5306_v40  ;;  %3849 = vmatpush2.bf16.msra.mxu0 %v5079_v35  ;;  %v5171_v35 = vld [vmem:[%s6207_s7 + $0x50c] ss:$16 sps:$4 sm:$0xff]  }
 0x1e5   : > { %3866 = vmatpush1.bf16.msra.mxu1 %v5082_v36  ;;  %3850 = vmatprep.subr.bf16.mxu0 %v5087_v37  ;;  %v5174_v36 = vld [vmem:[%s6207_s7 + $0x76c] ss:$16 sps:$4 sm:$0xff]   ;;  %v5169_v37 = vld [vmem:[%s6207_s7 + $0x508] ss:$16 sps:$4 sm:$0xff]  }
 0x1e6   : > { %3867 = vmatprep.subr.bf16.mxu1 %v5090_v39  ;;  %3897 = vmatprep.mubr.bf16.mxu1 %v5307_v45  ;;  %v5172_v39 = vld [vmem:[%s6207_s7 + $0x768] ss:$16 sps:$4 sm:$0xff]   ;;  %v5177_v40 = vld [vmem:[%s6207_s7 + $0x74c] ss:$16 sps:$4 sm:$0xff]  }
 0x1e7   : > { %v5186_v45 = vld [vmem:[%s6207_s7 + $0x8cc] ss:$16 sps:$4 sm:$0xff]  }
 0x1e8   : > { %3851 = vmatpush2.bf16.msra.mxu0 %v5085_v41  ;;  %v5180_v41 = vld [vmem:[%s6207_s7 + $0x8ec] ss:$16 sps:$4 sm:$0xff]  }
 0x1e9   : > { %3868 = vmatpush1.bf16.msra.mxu1 %v5088_v42  ;;  %3852 = vmatprep.subr.bf16.mxu0 %v5093_v43  ;;  %v5175_v42 = vld [vmem:[%s6207_s7 + $0x748] ss:$16 sps:$4 sm:$0xff]  }
 0x1ea   : > { %3869 = vmatprep.subr.bf16.mxu1 %v5096_v44  ;;  %v5178_v43 = vld [vmem:[%s6207_s7 + $0x8e8] ss:$16 sps:$4 sm:$0xff]   ;;  %v5183_v44 = vld [vmem:[%s6207_s7 + $0x72c] ss:$16 sps:$4 sm:$0xff]  }
 0x1ec   : > { %3853 = vmatpush2.bf16.msra.mxu0 %v5091_v46  ;;  %v5310_v46 = vld [vmem:[%s6747_s0 + $0x10] ss:$52 sps:$4 sm:$0xff]  }
 0x1ed   : > { %3870 = vmatpush1.bf16.msra.mxu1 %v5094_v47  ;;  %3908 = vmatprep.subr.bf16.mxu0 %v5102_v49  ;;  %v5181_v47 = vld [vmem:[%s6207_s7 + $0x728] ss:$16 sps:$4 sm:$0xff]   ;;  %v5189_v49 = vld [vmem:[%s6207_s7 + $0x70c] ss:$16 sps:$4 sm:$0xff]  }
 0x1ee   : > { %3871 = vmatprep.subr.bf16.mxu1 %v5099_v48  ;;  %v5184_v48 = vld [vmem:[%s6207_s7 + $0x8c8] ss:$16 sps:$4 sm:$0xff]  }
 0x1ef   : > { %3855 = vmatmul.mubr.bf16.vlgmr.msra.gmra.mxu0 %v5308_v54  ;;  %v5195_v54 = vld [vmem:[%s6207_s7 + $0x88c] ss:$16 sps:$4 sm:$0xff]  }
 0x1f0   : > { %3909 = vmatpush1.bf16.msra.mxu0 %v5100_v51  ;;  %3940 = vmatprep.mubr.bf16.mxu0 %v5309_v59  ;;  %v5311_v51 = vld [vmem:[%s6747_s0 + $0x24] ss:$52 sps:$4 sm:$0xff]   ;;  %v5204_v59 = vld [vmem:[%s6207_s7 + $0xacc] ss:$16 sps:$4 sm:$0xff]  }
 0x1f1   : > { %3872 = vmatpush1.bf16.msra.mxu1 %v5097_v50  ;;  %3910 = vmatprep.subr.bf16.mxu0 %v5108_v53  ;;  %v5192_v50 = vld [vmem:[%s6207_s7 + $0x8ac] ss:$16 sps:$4 sm:$0xff]   ;;  %v5190_v53 = vld [vmem:[%s6207_s7 + $0x8a8] ss:$16 sps:$4 sm:$0xff]  }
 0x1f2   : > { %3873 = vmatprep.subr.bf16.mxu1 %v5105_v52  ;;  %v5187_v52 = vld [vmem:[%s6207_s7 + $0x708] ss:$16 sps:$4 sm:$0xff]  }
 0x1f4   : > { %3911 = vmatpush1.bf16.msra.mxu0 %v5106_v56  ;;  %v5193_v56 = vld [vmem:[%s6207_s7 + $0x888] ss:$16 sps:$4 sm:$0xff]  }
 0x1f5   : > { %3874 = vmatpush1.bf16.msra.mxu1 %v5103_v55  ;;  %3912 = vmatprep.subr.bf16.mxu0 %v5114_v58  ;;  %v5198_v55 = vld [vmem:[%s6207_s7 + $0xaec] ss:$16 sps:$4 sm:$0xff]  }
 0x1f6   : > { %3875 = vmatprep.subr.bf16.mxu1 %v5111_v57  ;;  %v5196_v57 = vld [vmem:[%s6207_s7 + $0xae8] ss:$16 sps:$4 sm:$0xff]   ;;  %v5201_v58 = vld [vmem:[%s6207_s7 + $0x86c] ss:$16 sps:$4 sm:$0xff]  }
 0x1f8   : > { %3913 = vmatpush1.bf16.msra.mxu0 %v5112_v61  ;;  %v5199_v61 = vld [vmem:[%s6207_s7 + $0x868] ss:$16 sps:$4 sm:$0xff]  }
 0x1f9   : > { %3876 = vmatpush1.bf16.msra.mxu1 %v5109_v60  ;;  %3914 = vmatprep.subr.bf16.mxu0 %v5120_v63  ;;  %v5312_v60 = vld [vmem:[%s6747_s0 + $0x18] ss:$52 sps:$4 sm:$0xff]  }
 0x1fa   : > { %3877 = vmatprep.subr.bf16.mxu1 %v5117_v62  ;;  %v5202_v62 = vld [vmem:[%s6207_s7 + $0xac8] ss:$16 sps:$4 sm:$0xff]   ;;  %v5207_v63 = vld [vmem:[%s6207_s7 + $0x84c] ss:$16 sps:$4 sm:$0xff]  }
 0x1fc   : > { %3915 = vmatpush1.bf16.msra.mxu0 %v5118_v1  ;;  %v5313_v1 = vld [vmem:[%s6747_s0 + $0x2c] ss:$52 sps:$4 sm:$0xff]  }
 0x1fd   : > { %3878 = vmatpush1.bf16.msra.mxu1 %v5115_v0  ;;  %3916 = vmatprep.subr.bf16.mxu0 %v5126_v3  ;;  %v5210_v0 = vld [vmem:[%s6207_s7 + $0xaac] ss:$16 sps:$4 sm:$0xff]   ;;  %v5208_v3 = vld [vmem:[%s6207_s7 + $0xaa8] ss:$16 sps:$4 sm:$0xff]  }
 0x1fe   : > { %3879 = vmatprep.subr.bf16.mxu1 %v5123_v2  ;;  %v5205_v2 = vld [vmem:[%s6207_s7 + $0x848] ss:$16 sps:$4 sm:$0xff]  }
 0x200   : > { %3917 = vmatpush1.bf16.msra.mxu0 %v5124_v5  ;;  %v5216_v5 = vld [vmem:[%s6207_s7 + $0xa8c] ss:$16 sps:$4 sm:$0xff]  }
 0x201   : > { %3880 = vmatpush1.bf16.msra.mxu1 %v5121_v4  ;;  %3918 = vmatprep.subr.bf16.mxu0 %v5132_v7  ;;  %v5213_v4 = vld [vmem:[%s6207_s7 + $0x82c] ss:$16 sps:$4 sm:$0xff]   ;;  %v5214_v7 = vld [vmem:[%s6207_s7 + $0xa88] ss:$16 sps:$4 sm:$0xff]  }
 0x202   : > { %3881 = vmatprep.subr.bf16.mxu1 %v5129_v6  ;;  %v5211_v6 = vld [vmem:[%s6207_s7 + $0x828] ss:$16 sps:$4 sm:$0xff]  }
 0x204   : > { %3919 = vmatpush1.bf16.msra.mxu0 %v5130_v9  ;;  %v5222_v9 = vld [vmem:[%s6207_s7 + $0xa6c] ss:$16 sps:$4 sm:$0xff]  }
 0x205   : > { %3882 = vmatpush2.bf16.msra.mxu1 %v5127_v8  ;;  %3920 = vmatprep.subr.bf16.mxu0 %v5138_v11  ;;  %v5219_v8 = vld [vmem:[%s6207_s7 + $0x80c] ss:$16 sps:$4 sm:$0xff]   ;;  %v5220_v11 = vld [vmem:[%s6207_s7 + $0xa68] ss:$16 sps:$4 sm:$0xff]  }
 0x206   : > { %3883 = vmatprep.subr.bf16.mxu1 %v5135_v10  ;;  %v5217_v10 = vld [vmem:[%s6207_s7 + $0x808] ss:$16 sps:$4 sm:$0xff]  }
 0x208   : > { %3921 = vmatpush1.bf16.msra.mxu0 %v5136_v13  ;;  %v5228_v13 = vld [vmem:[%s6207_s7 + $0xa4c] ss:$16 sps:$4 sm:$0xff]  }
 0x209   : > { %3884 = vmatpush2.bf16.msra.mxu1 %v5133_v12  ;;  %3922 = vmatprep.subr.bf16.mxu0 %v5144_v15  ;;  %v5225_v12 = vld [vmem:[%s6207_s7 + $0x9ec] ss:$16 sps:$4 sm:$0xff]   ;;  %v5226_v15 = vld [vmem:[%s6207_s7 + $0xa48] ss:$16 sps:$4 sm:$0xff]  }
 0x20a   : > { %3885 = vmatprep.subr.bf16.mxu1 %v5141_v14  ;;  %v5223_v14 = vld [vmem:[%s6207_s7 + $0x9e8] ss:$16 sps:$4 sm:$0xff]  }
 0x20c   : > { %3923 = vmatpush1.bf16.msra.mxu0 %v5142_v17  ;;  %v5234_v17 = vld [vmem:[%s6207_s7 + $0xa2c] ss:$16 sps:$4 sm:$0xff]  }
 0x20d   : > { %3886 = vmatpush2.bf16.msra.mxu1 %v5139_v16  ;;  %3924 = vmatprep.subr.bf16.mxu0 %v5150_v19  ;;  %v5231_v16 = vld [vmem:[%s6207_s7 + $0x9cc] ss:$16 sps:$4 sm:$0xff]   ;;  %v5232_v19 = vld [vmem:[%s6207_s7 + $0xa28] ss:$16 sps:$4 sm:$0xff]  }
 0x20e   : > { %3887 = vmatprep.subr.bf16.mxu1 %v5147_v18  ;;  %v5229_v18 = vld [vmem:[%s6207_s7 + $0x9c8] ss:$16 sps:$4 sm:$0xff]  }
 0x210   : > { %3925 = vmatpush2.bf16.msra.mxu0 %v5148_v21  ;;  %v5240_v21 = vld [vmem:[%s6207_s7 + $0xa0c] ss:$16 sps:$4 sm:$0xff]  }
 0x211   : > { %3888 = vmatpush2.bf16.msra.mxu1 %v5145_v20  ;;  %3926 = vmatprep.subr.bf16.mxu0 %v5156_v24  ;;  %v5237_v20 = vld [vmem:[%s6207_s7 + $0x9ac] ss:$16 sps:$4 sm:$0xff]   ;;  %v5235_v24 = vld [vmem:[%s6207_s7 + $0x9a8] ss:$16 sps:$4 sm:$0xff]  }
 0x212   : > { %3889 = vmatprep.subr.bf16.mxu1 %v5153_v23  ;;  %v6639_v23 = vpop.f32.mrf.mxu0 }
 0x214   : > { %3927 = vmatpush2.bf16.msra.mxu0 %v5154_v26  ;;  %v5243_v26 = vld [vmem:[%s6207_s7 + $0x98c] ss:$16 sps:$4 sm:$0xff]  }
 0x215   : > { %3890 = vmatpush2.bf16.msra.mxu1 %v5151_v25  ;;  %3928 = vmatprep.subr.bf16.mxu0 %v5162_v28  ;;  %v5238_v25 = vld [vmem:[%s6207_s7 + $0xa08] ss:$16 sps:$4 sm:$0xff]   ;;  %v6646_v28 = vpop.f32.mrf.mxu1 }
 0x216   : > { %3891 = vmatprep.subr.bf16.mxu1 %v5159_v27  ;;  %v5246_v27 = vld [vmem:[%s6207_s7 + $0xbec] ss:$16 sps:$4 sm:$0xff]  }
 0x218   : > { %3929 = vmatpush2.bf16.msra.mxu0 %v5160_v30  ;;  %v5241_v30 = vld [vmem:[%s6207_s7 + $0x988] ss:$16 sps:$4 sm:$0xff]  }
 0x219   : > { %3892 = vmatpush2.bf16.msra.mxu1 %v5157_v29  ;;  %3930 = vmatprep.subr.bf16.mxu0 %v5168_v32  ;;  %v6648_v29 = vpop.f32.mrf.mxu0  ;;  %v5249_v32 = vld [vmem:[%s6207_s7 + $0x96c] ss:$16 sps:$4 sm:$0xff]  }
 0x21a   : > { %3893 = vmatprep.subr.bf16.mxu1 %v5165_v31  ;;  %v5244_v31 = vld [vmem:[%s6207_s7 + $0xbe8] ss:$16 sps:$4 sm:$0xff]  }
 0x21c   : > { %3931 = vmatpush2.bf16.msra.mxu0 %v5166_v34  ;;  %v1403_v34 = vlaneseq }
 0x21d   : > { %3894 = vmatpush2.bf16.msra.mxu1 %v5163_v33  ;;  %3932 = vmatprep.subr.bf16.mxu0 %v5174_v36  ;;  %v5252_v33 = vld [vmem:[%s6207_s7 + $0xbcc] ss:$16 sps:$4 sm:$0xff]   ;;  %v6656_v36 = vpop.f32.mrf.mxu0 }
 0x21e   : > { %3895 = vmatprep.subr.bf16.mxu1 %v5171_v35  ;;  %v6654_v35 = vpop.f32.mrf.mxu1 }
 0x220   : > { %3933 = vmatpush2.bf16.msra.mxu0 %v5172_v39  ;;  %v5250_v39 = vld [vmem:[%s6207_s7 + $0xbc8] ss:$16 sps:$4 sm:$0xff]  }
 0x221   : > { %3896 = vmatpush2.bf16.msra.mxu1 %v5169_v37  ;;  %3934 = vmatprep.subr.bf16.mxu0 %v5177_v40  ;;  %v5247_v37 = vld [vmem:[%s6207_s7 + $0x968] ss:$16 sps:$4 sm:$0xff]   ;;  %v5255_v40 = vld [vmem:[%s6207_s7 + $0x94c] ss:$16 sps:$4 sm:$0xff]  }
 0x222   : > { %3951 = vmatprep.subr.bf16.mxu1 %v5180_v41  ;;  %v5258_v41 = vld [vmem:[%s6207_s7 + $0xbac] ss:$16 sps:$4 sm:$0xff]  }
 0x224   : > { %3898 = vmatmul.mubr.bf16.vlgmr.msra.gmra.mxu1 %v5310_v46  ;;  %3935 = vmatpush2.bf16.msra.mxu0 %v5175_v42  ;;  %v6662_v42 = vshrl.u32 %v1403_v34, 7  ;;  %v5256_v46 = vld [vmem:[%s6207_s7 + $0xba8] ss:$16 sps:$4 sm:$0xff]  }
 0x225   : > { %3952 = vmatpush1.bf16.msra.mxu1 %v5178_v43  ;;  %3936 = vmatprep.subr.bf16.mxu0 %v5183_v44  ;;  %v6664_v43 = vpop.f32.mrf.mxu1  ;;  %v3518_v44 = vpop.f32.mrf.mxu0  ;;  %v5282_v34 = vld [vmem:[%s6207_s7 + $0xb08] ss:$16 sps:$4 sm:$0xff]  }
 0x226   : > { %3953 = vmatprep.subr.bf16.mxu1 %v5186_v45  ;;  %3983 = vmatprep.mubr.bf16.mxu1 %v5311_v51  ;;  %v5253_v45 = vld [vmem:[%s6207_s7 + $0x948] ss:$16 sps:$4 sm:$0xff]  }
 0x227   : > { %v1400_v51 = vld [vmem:[%s6207_s7 + $0xc48] sm:$0x77] }
 0x228   : > { %3937 = vmatpush2.bf16.msra.mxu0 %v5181_v47  ;;  %v3598_v47 = vpop.f32.mrf.mxu0 }
 0x229   : > { %3954 = vmatpush1.bf16.msra.mxu1 %v5184_v48  ;;  %3938 = vmatprep.subr.bf16.mxu0 %v5189_v49  ;;  %v5261_v48 = vld [vmem:[%s6207_s7 + $0x92c] ss:$16 sps:$4 sm:$0xff]  }
 0x22a   : > { %3955 = vmatprep.subr.bf16.mxu1 %v5192_v50  ;;  %v5264_v49 = vld [vmem:[%s6207_s7 + $0xb8c] ss:$16 sps:$4 sm:$0xff]   ;;  %v1405_v50 = vsub.s32 0, %v6662_v42 }
 0x22c   : > { %3939 = vmatpush2.bf16.msra.mxu0 %v5187_v52  ;;  %v6675_v52 = vld [vmem:[%s989_s21] sm:$0xf] }
 0x22d   : > { %3956 = vmatpush1.bf16.msra.mxu1 %v5190_v53  ;;  %3994 = vmatprep.subr.bf16.mxu0 %v5198_v55  ;;  %v3561_v53 = vpop.f32.mrf.mxu1  ;;  %v5259_v55 = vld [vmem:[%s6207_s7 + $0x928] ss:$16 sps:$4 sm:$0xff]  }
 0x22e   : > { %3957 = vmatprep.subr.bf16.mxu1 %v5195_v54  ;;  %v1409_v54 = vsub.s32 1, %v6662_v42 }
 0x22f   : > { %3941 = vmatmul.mubr.bf16.vlgmr.msra.gmra.mxu0 %v5312_v60  ;;  %v5270_v60 = vld [vmem:[%s6207_s7 + $0xb6c] ss:$16 sps:$4 sm:$0xff]  }
 0x230   : > { %3995 = vmatpush1.bf16.msra.mxu0 %v5196_v57  ;;  %4026 = vmatprep.mubr.bf16.mxu0 %v5313_v1  ;;  %v3641_v57 = vpop.f32.mrf.mxu1  ;;  %v5268_v1 = vld [vmem:[%s6207_s7 + $0xb68] ss:$16 sps:$4 sm:$0xff]  }
 0x231   : > { %3958 = vmatpush1.bf16.msra.mxu1 %v5193_v56  ;;  %3996 = vmatprep.subr.bf16.mxu0 %v5204_v59  ;;  %v5262_v56 = vld [vmem:[%s6207_s7 + $0xb88] ss:$16 sps:$4 sm:$0xff]   ;;  %v5267_v59 = vld [vmem:[%s6207_s7 + $0x90c] ss:$16 sps:$4 sm:$0xff]  }
 0x232   : > { %3959 = vmatprep.subr.bf16.mxu1 %v5201_v58  ;;  %v3600_v58 = vpop.f32.mrf.mxu0 }
 0x234   : > { %3997 = vmatpush1.bf16.msra.mxu0 %v5202_v62  ;;  %v1406_v62 = vrot.slane %v6675_v52, %v1405_v50  ;;  %v5315_v50 = vld [vmem:[%s6747_s0 + $0x28] ss:$52 sps:$4 sm:$0xff]  }
 0x235   : > { %3960 = vmatpush1.bf16.msra.mxu1 %v5199_v61  ;;  %3998 = vmatprep.subr.bf16.mxu0 %v5210_v0  ;;  %v4631_v61 = vcombine.high %v1400_v51, %v1400_v51  ;;  %v5265_v0 = vld [vmem:[%s6207_s7 + $0x908] ss:$16 sps:$4 sm:$0xff]  }
 0x236   : > { %3961 = vmatprep.subr.bf16.mxu1 %v5207_v63  ;;  %v1410_v63 = vrot.slane %v6675_v52, %v1409_v54 }
 0x238   : > { %3999 = vmatpush1.bf16.msra.mxu0 %v5208_v3  ;;  %v3643_v3 = vpop.f32.mrf.mxu1 }
 0x239   : > { %3962 = vmatpush1.bf16.msra.mxu1 %v5205_v2  ;;  %4000 = vmatprep.subr.bf16.mxu0 %v5216_v5  ;;  %v4630_v2 = vcombine.low %v1400_v51, %v1400_v51  ;;  %v5273_v5 = vld [vmem:[%s6207_s7 + $0xb4c] ss:$16 sps:$4 sm:$0xff]   ;;  %v5316_v51 = vld [vmem:[%s6747_s0 + $0x30] ss:$52 sps:$4 sm:$0xff]  }
 0x23a   : > { %3963 = vmatprep.subr.bf16.mxu1 %v5213_v4  ;;  %v3602_v4 = vpop.f32.mrf.mxu0 }
 0x23c   : > { %4001 = vmatpush1.bf16.msra.mxu0 %v5214_v7  ;;  %v3513_v7 = vadd.f32 %v6639_v23, %v1406_v62  ;;  %v5279_v23 = vld [vmem:[%s6207_s7 + $0xc28] ss:$16 sps:$4 sm:$0xff]  }
 0x23d   : > { %3964 = vmatpush1.bf16.msra.mxu1 %v5211_v6  ;;  %4002 = vmatprep.subr.bf16.mxu0 %v5222_v9  ;;  %v3476_v6 = vand.u32 %v4631_v61, %v6424_v22  ;;  %v5271_v9 = vld [vmem:[%s6207_s7 + $0xb48] ss:$16 sps:$4 sm:$0xff]  }
 0x23e   : > { %3965 = vmatprep.subr.bf16.mxu1 %v5219_v8  ;;  %v3515_v8 = vadd.f32 %v6648_v29, %v1410_v63 }
 0x240   : > { %4003 = vmatpush1.bf16.msra.mxu0 %v5220_v11  ;;  %v3645_v11 = vpop.f32.mrf.mxu1 }
 0x241   : > { %3966 = vmatpush1.bf16.msra.mxu1 %v5217_v10  ;;  %4004 = vmatprep.subr.bf16.mxu0 %v5228_v13  ;;  %v3473_v10 = vand.u32 %v4630_v2, %v6424_v22  ;;  %v5278_v13 = vld [vmem:[%s6207_s7 + $0xb2c] ss:$16 sps:$4 sm:$0xff]   ;;  %v3558_v22 = vadd.f32 %v6654_v35, %v3515_v8  ;;  %v5285_v35 = vld [vmem:[%s6207_s7 + $0xc08] ss:$16 sps:$4 sm:$0xff]  }
 0x242   : > { %3967 = vmatprep.subr.bf16.mxu1 %v5225_v12  ;;  %v3604_v12 = vpop.f32.mrf.mxu0 }
 0x243   : > { %v3601_v29 = vadd.f32 %v3600_v58, %v3558_v22  ;;  %v1417_v22 = vsub.s32 3, %v6662_v42 }
 0x244   : > { %4005 = vmatpush1.bf16.msra.mxu0 %v5226_v15  ;;  %v3556_v15 = vadd.f32 %v6646_v28, %v3513_v7 }
 0x245   : > { %3968 = vmatpush2.bf16.msra.mxu1 %v5223_v14  ;;  %4006 = vmatprep.subr.bf16.mxu0 %v5234_v17  ;;  %v5281_v14 = vld [vmem:[%s6207_s7 + $0xc2c] ss:$16 sps:$4 sm:$0xff]  }
 0x246   : > { %3969 = vmatprep.subr.bf16.mxu1 %v5231_v16  ;;  %v3517_v16 = vadd.f32 %v6656_v36, %v1406_v62 }
 0x248   : > { %4007 = vmatpush1.bf16.msra.mxu0 %v5232_v19  ;;  %v3519_v19 = vadd.f32 %v3518_v44, %v1410_v63  ;;  %v3560_v28 = vadd.f32 %v6664_v43, %v3517_v16 }
 0x249   : > { %3970 = vmatpush2.bf16.msra.mxu1 %v5229_v18  ;;  %4008 = vmatprep.subr.bf16.mxu0 %v5240_v21  ;;  %v5314_v18 = vld [vmem:[%s6747_s0 + $0x20] ss:$52 sps:$4 sm:$0xff]   ;;  %v5276_v21 = vld [vmem:[%s6207_s7 + $0xb28] ss:$16 sps:$4 sm:$0xff]  }
 0x24a   : > { %3971 = vmatprep.subr.bf16.mxu1 %v5237_v20  ;;  %v3599_v20 = vadd.f32 %v3598_v47, %v3556_v15 }
 0x24c   : > { %4009 = vmatpush1.bf16.msra.mxu0 %v5238_v25 }
 0x24d   : > { %3972 = vmatpush2.bf16.msra.mxu1 %v5235_v24  ;;  %4010 = vmatprep.subr.bf16.mxu0 %v5246_v27  ;;  %v3647_v24 = vpop.f32.mrf.mxu1  ;;  %v5287_v27 = vld [vmem:[%s6207_s7 + $0xc0c] ss:$16 sps:$4 sm:$0xff]  }
 0x24e   : > { %3973 = vmatprep.subr.bf16.mxu1 %v5243_v26  ;;  %v5284_v26 = vld [vmem:[%s6207_s7 + $0xb0c] ss:$16 sps:$4 sm:$0xff]  }
 0x250   : > { %4011 = vmatpush2.bf16.msra.mxu0 %v5244_v31  ;;  %v3562_v31 = vadd.f32 %v3561_v53, %v3519_v19 }
 0x251   : > { %3974 = vmatpush2.bf16.msra.mxu1 %v5241_v30  ;;  %4012 = vmatprep.subr.bf16.mxu0 %v5252_v33  ;;  %v3603_v33 = vadd.f32 %v3602_v4, %v3560_v28 }
 0x252   : > { %3975 = vmatprep.subr.bf16.mxu1 %v5249_v32  ;;  %v3642_v32 = vadd.f32 %v3641_v57, %v3599_v20 }
 0x253   : > { %v3646_v44 = vadd.f32 %v3645_v11, %v3603_v33 }
 0x254   : > { %4013 = vmatpush2.bf16.msra.mxu0 %v5250_v39  ;;  %v3605_v39 = vadd.f32 %v3604_v12, %v3562_v31 }
 0x255   : > { %3976 = vmatpush2.bf16.msra.mxu1 %v5247_v37  ;;  %4014 = vmatprep.subr.bf16.mxu0 %v5258_v41  ;;  %v3644_v37 = vadd.f32 %v3643_v3, %v3601_v29 }
 0x256   : > { %3977 = vmatprep.subr.bf16.mxu1 %v5255_v40 }
 0x258   : > { %4015 = vmatpush2.bf16.msra.mxu0 %v5256_v46 }
 0x259   : > { %3978 = vmatpush2.bf16.msra.mxu1 %v5253_v45  ;;  %4016 = vmatprep.subr.bf16.mxu0 %v5264_v49  ;;  %v3648_v45 = vadd.f32 %v3647_v24, %v3605_v39  ;;  %v1418_v24 = vrot.slane %v6675_v52, %v1417_v22 }
 0x25a   : > { %3979 = vmatprep.subr.bf16.mxu1 %v5261_v48 }
 0x25c   : > { %4017 = vmatpush2.bf16.msra.mxu0 %v5262_v56 }
 0x25d   : > { %3980 = vmatpush2.bf16.msra.mxu1 %v5259_v55  ;;  %4018 = vmatprep.subr.bf16.mxu0 %v5270_v60 }
 0x25e   : > { %3981 = vmatprep.subr.bf16.mxu1 %v5267_v59 }
 0x260   : > { %4019 = vmatpush2.bf16.msra.mxu0 %v5268_v1 }
 0x261   : > { %3982 = vmatpush2.bf16.msra.mxu1 %v5265_v0  ;;  %4020 = vmatprep.subr.bf16.mxu0 %v5273_v5 }
 0x262   : > { %4047 = vmatprep.subr.bf16.mxu1 %v3476_v6 }
 0x263   : > { %v3684_v17 = vpop.f32.mrf.mxu0 }
 0x264   : > { %3984 = vmatmul.mubr.bf16.vlgmr.msra.gmra.mxu1 %v5314_v18  ;;  %4021 = vmatpush2.bf16.msra.mxu0 %v5271_v9  ;;  %v3727_v30 = vpop.f32.mrf.mxu1  ;;  %v3685_v40 = vadd.f32 %v3684_v17, %v3642_v32  ;;  %v1413_v17 = vsub.s32 2, %v6662_v42 }
 0x265   : > { %4048 = vmatpush1.bf16.msra.mxu1 %v3473_v10  ;;  %v3686_v25 = vpop.f32.mrf.mxu0  ;;  %4022 = vmatprep.subr.bf16.mxu0 %v5278_v13 }
 0x266   : > { %4049 = vmatprep.subr.bf16.mxu1 %v5281_v14  ;;  %4069 = vmatprep.mubr.bf16.mxu1 %v5342_v38  ;;  %v3729_v41 = vpop.f32.mrf.mxu1  ;;  %v3687_v43 = vadd.f32 %v3686_v25, %v3644_v37  ;;  %v3728_v46 = vadd.f32 %v3727_v30, %v3685_v40 }
 0x267   : > { %v3688_v36 = vpop.f32.mrf.mxu0 }
 0x268   : > { %4023 = vmatpush2.bf16.msra.mxu0 %v5276_v21  ;;  %v3689_v47 = vadd.f32 %v3688_v36, %v3646_v44  ;;  %v3731_v48 = vpop.f32.mrf.mxu1  ;;  %v3730_v53 = vadd.f32 %v3729_v41, %v3687_v43  ;;  %v1414_v21 = vrot.slane %v6675_v52, %v1413_v17 }
 0x269   : > { %4050 = vmatpush1.bf16.msra.mxu1 %v5279_v23  ;;  %4024 = vmatprep.subr.bf16.mxu0 %v5284_v26  ;;  %v3690_v38 = vpop.f32.mrf.mxu0 }
 0x26a   : > { %4051 = vmatprep.subr.bf16.mxu1 %v5287_v27  ;;  %v3691_v54 = vadd.f32 %v3690_v38, %v3648_v45  ;;  %v3732_v57 = vadd.f32 %v3731_v48, %v3689_v47  ;;  %v3733_v59 = vpop.f32.mrf.mxu1 }
 0x26c   : > { %4025 = vmatpush2.bf16.msra.mxu0 %v5282_v34  ;;  %v3734_v61 = vadd.f32 %v3733_v59, %v3691_v54 }
 0x26d   : > { %4052 = vmatpush1.bf16.msra.mxu1 %v5285_v35 }
 0x26f   : > { %v3770_v49 = vpop.f32.mrf.mxu0  ;;  %4027 = vmatmul.mubr.bf16.vlgmr.msra.gmra.mxu0 %v5315_v50 }
 0x270   : > { %4633 = vmatmul.mubr.msk.bf16.vlgmr.msra.gmra.mxu1 %vm3458_vm2, %v5316_v51  ;;  %v3771_v55 = vadd.f32 %v3770_v49, %v3728_v46 }
 0x271   : > { %v3772_v56 = vpop.f32.mrf.mxu0 }
 0x272   : > { %v3773_v58 = vadd.f32 %v3772_v56, %v3730_v53  ;;  %5288 = vtanh.f32 %v3771_v55 }
 0x273   : > { %v3774_v60 = vpop.f32.mrf.mxu0 }
 0x274   : > { %5290 = vtanh.f32 %v3773_v58  ;;  %v3775_v62 = vadd.f32 %v3774_v60, %v3732_v57 }
 0x275   : > { %v3776_v63 = vpop.f32.mrf.mxu0 }
 0x276   : > { %v3777_v0 = vadd.f32 %v3776_v63, %v3734_v61  ;;  %5292 = vtanh.f32 %v3775_v62 }
 0x278   : > { %5294 = vtanh.f32 %v3777_v0 }
 0x27f   : > { %v5289_v1 = vpop.eup %5288 }
 0x281   : > { %v5291_v2 = vpop.eup %5290 }
 0x282   : > { %v4644_v3 = vpack.c.bf16 %v5291_v2, %v5289_v1 }
 0x283   : > { %v5293_v4 = vpop.eup %5292 }
 0x284   : > { %4112 = vst [vmem:[%s6717_s29] sm:$0xff] %v4644_v3 }
 0x285   : > { %v5295_v5 = vpop.eup %5294 }
 0x286   : > { %v4646_v6 = vpack.c.bf16 %v5295_v5, %v5293_v4 }
 0x288   : > { %4114 = vst [vmem:[%s6717_s29 + $0x10] sm:$0xff] %v4646_v6 }
 0x2a4   : > { %v3813_v7 = vpop.f32.mrf.mxu1 }
 0x2a5   : > { %v3814_v27 = vadd.f32 %v3813_v7, %v1414_v21 }
 0x2a6   : > { %v3815_v8 = vpop.f32.mrf.mxu1 }
 0x2a7   : > { %v3816_v28 = vadd.f32 %v3815_v8, %v1418_v24 }
 0x2a8   : > { %v3817_v9 = vpop.f32.mrf.mxu1 }
 0x2a9   : > { %v3818_v32 = vadd.f32 %v3817_v9, %v1414_v21  ;;  %v4138_v9 = vld [vmem:[%s6717_s29] sm:$0xff] (%p5394_p5) }
 0x2aa   : > { %v3819_v10 = vpop.f32.mrf.mxu1  ;;  %4139 = vst [vmem:[%s4125_s4] sm:$0xff] (%p5394_p5), %v4138_v9 }
 0x2ab   : > { %v3820_v35 = vadd.f32 %v3819_v10, %v1418_v24 }
 0x2af   : > { %v3856_v11 = vpop.f32.mrf.mxu0 }
 0x2b0   : > { %v3857_v29 = vadd.f32 %v3856_v11, %v3814_v27  ;;  %v4142_v11 = vld [vmem:[%s6717_s29 + $0x10] sm:$0xff] (%p5394_p5) }
 0x2b1   : > { %v3858_v13 = vpop.f32.mrf.mxu0  ;;  %4143 = vst [vmem:[%s4125_s4 + $0x60] sm:$0xff] (%p5394_p5), %v4142_v11 }
 0x2b2   : > { %v3859_v33 = vadd.f32 %v3858_v13, %v3816_v28 }
 0x2b3   : > { %v3860_v15 = vpop.f32.mrf.mxu0 }
 0x2b4   : > { %v3861_v36 = vadd.f32 %v3860_v15, %v3818_v32 }
 0x2b5   : > { %v3862_v18 = vpop.f32.mrf.mxu0 }
 0x2b6   : > { %v3863_v41 = vadd.f32 %v3862_v18, %v3820_v35 }
 0x2e4   : > { %v3899_v12 = vpop.f32.mrf.mxu1 }
 0x2e5   : > { %v3900_v34 = vadd.f32 %v3899_v12, %v3857_v29 }
 0x2e6   : > { %v3901_v14 = vpop.f32.mrf.mxu1 }
 0x2e7   : > { %v3902_v42 = vadd.f32 %v3901_v14, %v3859_v33 }
 0x2e8   : > { %v3903_v16 = vpop.f32.mrf.mxu1 }
 0x2e9   : > { %v3904_v44 = vadd.f32 %v3903_v16, %v3861_v36 }
 0x2ea   : > { %v3905_v19 = vpop.f32.mrf.mxu1 }
 0x2eb   : > { %v3906_v46 = vadd.f32 %v3905_v19, %v3863_v41 }
 0x2ef   : > { %v3942_v20 = vpop.f32.mrf.mxu0 }
 0x2f0   : > { %v3943_v37 = vadd.f32 %v3942_v20, %v3900_v34 }
 0x2f1   : > { %v3944_v25 = vpop.f32.mrf.mxu0 }
 0x2f2   : > { %v3945_v43 = vadd.f32 %v3944_v25, %v3902_v42 }
 0x2f3   : > { %v3946_v30 = vpop.f32.mrf.mxu0 }
 0x2f4   : > { %v3947_v47 = vadd.f32 %v3946_v30, %v3904_v44 }
 0x2f5   : > { %v3948_v39 = vpop.f32.mrf.mxu0 }
 0x2f6   : > { %v3949_v53 = vadd.f32 %v3948_v39, %v3906_v46 }
 0x324   : > { %v3985_v23 = vpop.f32.mrf.mxu1 }
 0x325   : > { %v3986_v52 = vadd.f32 %v3985_v23, %v3943_v37 }
 0x326   : > { %v3987_v26 = vpop.f32.mrf.mxu1 }
 0x327   : > { %v3988_v48 = vadd.f32 %v3987_v26, %v3945_v43 }
 0x328   : > { %v3989_v31 = vpop.f32.mrf.mxu1 }
 0x329   : > { %v3990_v54 = vadd.f32 %v3989_v31, %v3947_v47 }
 0x32a   : > { %v3991_v40 = vpop.f32.mrf.mxu1 }
 0x32b   : > { %v3992_v59 = vadd.f32 %v3991_v40, %v3949_v53 }
 0x32f   : > { %v4028_v38 = vpop.f32.mrf.mxu0 }
 0x330   : > { %v4071_v45 = vpop.f32.mrf.mxu1  ;;  %v4029_v49 = vadd.f32 %v4028_v38, %v3986_v52 }
 0x331   : > { %v4030_v50 = vpop.f32.mrf.mxu0 }
 0x332   : > { %v4073_v51 = vpop.f32.mrf.mxu1  ;;  %v4072_v55 = vadd.f32 %v4071_v45, %v4029_v49  ;;  %v4031_v56 = vadd.f32 %v4030_v50, %v3988_v48 }
 0x333   : > { %v4032_v57 = vpop.f32.mrf.mxu0 }
 0x334   : > { %v4075_v58 = vpop.f32.mrf.mxu1  ;;  %v4074_v60 = vadd.f32 %v4073_v51, %v4031_v56  ;;  %v4033_v61 = vadd.f32 %v4032_v57, %v3990_v54  ;;  %5296 = vtanh.f32 %v4072_v55 }
 0x335   : > { %v4034_v62 = vpop.f32.mrf.mxu0 }
 0x336   : > { %5298 = vtanh.f32 %v4074_v60  ;;  %v4076_v63 = vadd.f32 %v4075_v58, %v4033_v61  ;;  %v4035_v0 = vadd.f32 %v4034_v62, %v3992_v59  ;;  %v4077_v1 = vpop.f32.mrf.mxu1 }
 0x338   : > { %v4078_v2 = vadd.f32 %v4077_v1, %v4035_v0  ;;  %5300 = vtanh.f32 %v4076_v63 }
 0x33a   : > { %5302 = vtanh.f32 %v4078_v2 }
 0x341   : > { %v5297_v3 = vpop.eup %5296 }
 0x343   : > { %v5299_v4 = vpop.eup %5298 }
 0x344   : > { %v4645_v5 = vpack.c.bf16 %v5299_v4, %v5297_v3 }
 0x345   : > { %v5301_v6 = vpop.eup %5300 }
 0x346   : > { %4113 = vst [vmem:[%s6717_s29 + $0x8] sm:$0xff] %v4645_v5  ;;  %4122 = sbr.rel (!%p5394_p5) target bundleno = 851 (0x353), region = 59 }
 0x347   : > { %v5303_v7 = vpop.eup %5302 }
 0x348   : > { %v4647_v8 = vpack.c.bf16 %v5303_v7, %v5301_v6 }
 0x34a   : > { %4115 = vst [vmem:[%s6717_s29 + $0x18] sm:$0xff] %v4647_v8 }
 0x34d   : > { %v4140_v10 = vld [vmem:[%s6717_s29 + $0x8] sm:$0xff] }
 0x34e   : > { %4141 = vst [vmem:[%s4125_s4 + $0x8] sm:$0xff] %v4140_v10 }
 0x351   : > { %v4144_v12 = vld [vmem:[%s6717_s29 + $0x18] sm:$0xff] }
 0x352   : > { %4145 = vst [vmem:[%s4125_s4 + $0x68] sm:$0xff] %v4144_v12 }
 0x353 PF: > { %p10_p11 = scmp.ge.s32.totalorder %s5382_s16, 8   ;;  %s6752_s12 = smov %s5335_s13 }
 0x354   : > { %s6753_s13 = smov %s5392_s19  ;;  %s6754_s14 = smov %s5382_s16 }
 0x355   :  { %12 = sbr.rel (!%p10_p11) target bundleno = 2 (0x2), region = 116 }

// kernel: model_forward.5
= control target key start
LH: loop header
LB: loop body
LE: loop exit
PB: predicated region body
PF: predicated region fallthrough
CT: control target
= control target key end

     0   :  { %s9715_s12 = smov 0   ;;  %s9717_s13 = smov 0   ;;  %s12453_s0 = inlined_call_operand.vmem [shape: bf16[16,3072], index: 0, kind: input, shape index: {}]   ;;  %s12454_s1 = inlined_call_operand.vmem [shape: bf16[3072,1024], index: 1, kind: input, shape index: {}]   ;;  %s12455_s2 = inlined_call_operand.vmem [shape: f32[1,1024], index: 2, kind: input, shape index: {}]   ;;  %s12456_s3 = inlined_call_operand.vmem [shape: f32[16,1024], index: 3, kind: output, shape index: {}]  }
   0x1   :  { %s9719_s14 = smov 0  }
   0x2 LB: > { %s9731_s15 = sadd.s32 4294967295, %s9693_s14   ;;  %s9734_s16 = sadd.s32 1, %s9693_s14   ;;  %s9693_s14 = sphi %s9719_s14, %s12460_s14   ;;  %s9689_s13 = sphi %s9717_s13, %s12459_s13   ;;  %s9685_s12 = sphi %s9715_s12, %s12458_s12  }
   0x3   : > { %s38_s17 = ssub.s32 %s9693_s14, %s9734_s16  ;;  %s41_s18 = sadd.s32 1, %s9689_s13 }
   0x4   : > { %p39_p0 = scmp.eq.s32.totalorder %s38_s17, 0  ;;  %p48_p1 = scmp.ne.s32.totalorder %s9689_s13, %s9685_s12 }
   0x5   : > { %p49_p2 = scmp.eq.s32.totalorder %s9693_s14, 0  ;;  %p104_p3 = scmp.eq.s32.totalorder %s9731_s15, 1 }
   0x6   : > { %s9744_s19 = scalar_select %p39_p0, %s9689_s13, %s41_s18  }
   0x7   : > { %p50_p4 = por %p49_p2, %p48_p1  ;;  %p9746_p5 = por %p104_p3, %p48_p1 }
   0x8   : > { %p7671_p6 = scmp.ge.s32.totalorder %s9693_s14, 2 }
   0xa   : > { %129 = sbr.rel (%p7671_p6) target bundleno = 403 (0x193), region = 20 }
   0xf   : > { %132 = sbr.rel (!%p50_p4) target bundleno = 403 (0x193), region = 24  ;;  %s134_s21 = sand.u32 (%p50_p4), 1, %s9689_s13  }
  0x10   : > { %s8474_s22 = sshll.u32 (%p50_p4), %s9693_s14, 4  ;;  %s8476_s23 = smul.u32 (%p50_p4), 6144, %s134_s21 }
  0x11   : > { %s9756_s26 = scalar_lea.vmem (%p50_p4), %s12454_s1, %s8474_s22 }
  0x12   : > { %v152_v0 = vld [vmem:[%s9756_s26] sm:$0xff] (%p50_p4)  ;;  %v154_v1 = vld [vmem:[%s9756_s26 + $0x8] sm:$0xff] (%p50_p4)  ;;  %s9764_s27 = scalar_lea.vmem (%p50_p4), [#allocation2], %s8476_s23 }
  0x13   : > { %v156_v2 = vld [vmem:[%s9756_s26 + $0x20] sm:$0xff] (%p50_p4)  ;;  %v158_v3 = vld [vmem:[%s9756_s26 + $0x28] sm:$0xff] (%p50_p4)  ;;  %153 = vst [vmem:[%s9764_s27] sm:$0xff] (%p50_p4), %v152_v0  ;;  %155 = vst [vmem:[%s9764_s27 + $0x8] sm:$0xff] (%p50_p4), %v154_v1 }
  0x14   : > { %v160_v4 = vld [vmem:[%s9756_s26 + $0x40] sm:$0xff]  ;;  %v162_v5 = vld [vmem:[%s9756_s26 + $0x48] sm:$0xff]  ;;  %157 = vst [vmem:[%s9764_s27 + $0x10] sm:$0xff] %v156_v2  ;;  %159 = vst [vmem:[%s9764_s27 + $0x18] sm:$0xff] %v158_v3 }
  0x15   : > { %161 = vst [vmem:[%s9764_s27 + $0x20] sm:$0xff] %v160_v4  ;;  %163 = vst [vmem:[%s9764_s27 + $0x28] sm:$0xff] %v162_v5  ;;  %v164_v6 = vld [vmem:[%s9756_s26 + $0x60] sm:$0xff]  ;;  %v166_v7 = vld [vmem:[%s9756_s26 + $0x68] sm:$0xff] }
  0x16   : > { %v168_v8 = vld [vmem:[%s9756_s26 + $0x80] sm:$0xff]  ;;  %165 = vst [vmem:[%s9764_s27 + $0x30] sm:$0xff] %v164_v6  ;;  %167 = vst [vmem:[%s9764_s27 + $0x38] sm:$0xff] %v166_v7  ;;  %v170_v9 = vld [vmem:[%s9756_s26 + $0x88] sm:$0xff] }
  0x17   : > { %169 = vst [vmem:[%s9764_s27 + $0x40] sm:$0xff] %v168_v8  ;;  %v172_v10 = vld [vmem:[%s9756_s26 + $0xa0] sm:$0xff]  ;;  %v174_v11 = vld [vmem:[%s9756_s26 + $0xa8] sm:$0xff]  ;;  %171 = vst [vmem:[%s9764_s27 + $0x48] sm:$0xff] %v170_v9 }
  0x18   : > { %173 = vst [vmem:[%s9764_s27 + $0x50] sm:$0xff] %v172_v10  ;;  %175 = vst [vmem:[%s9764_s27 + $0x58] sm:$0xff] %v174_v11  ;;  %v176_v12 = vld [vmem:[%s9756_s26 + $0xc0] sm:$0xff]  ;;  %v178_v13 = vld [vmem:[%s9756_s26 + $0xc8] sm:$0xff] }
  0x19   : > { %v180_v14 = vld [vmem:[%s9756_s26 + $0xe0] sm:$0xff]  ;;  %177 = vst [vmem:[%s9764_s27 + $0x60] sm:$0xff] %v176_v12  ;;  %179 = vst [vmem:[%s9764_s27 + $0x68] sm:$0xff] %v178_v13  ;;  %v182_v15 = vld [vmem:[%s9756_s26 + $0xe8] sm:$0xff] }
  0x1a   : > { %181 = vst [vmem:[%s9764_s27 + $0x70] sm:$0xff] %v180_v14  ;;  %v184_v16 = vld [vmem:[%s9756_s26 + $0x100] sm:$0xff]  ;;  %v186_v17 = vld [vmem:[%s9756_s26 + $0x108] sm:$0xff]  ;;  %183 = vst [vmem:[%s9764_s27 + $0x78] sm:$0xff] %v182_v15 }
  0x1b   : > { %185 = vst [vmem:[%s9764_s27 + $0x80] sm:$0xff] %v184_v16  ;;  %187 = vst [vmem:[%s9764_s27 + $0x88] sm:$0xff] %v186_v17  ;;  %v188_v18 = vld [vmem:[%s9756_s26 + $0x120] sm:$0xff]  ;;  %v190_v19 = vld [vmem:[%s9756_s26 + $0x128] sm:$0xff] }
  0x1c   : > { %v192_v20 = vld [vmem:[%s9756_s26 + $0x140] sm:$0xff]  ;;  %189 = vst [vmem:[%s9764_s27 + $0x90] sm:$0xff] %v188_v18  ;;  %191 = vst [vmem:[%s9764_s27 + $0x98] sm:$0xff] %v190_v19  ;;  %v194_v21 = vld [vmem:[%s9756_s26 + $0x148] sm:$0xff] }
  0x1d   : > { %193 = vst [vmem:[%s9764_s27 + $0xa0] sm:$0xff] %v192_v20  ;;  %v196_v22 = vld [vmem:[%s9756_s26 + $0x160] sm:$0xff]  ;;  %v198_v23 = vld [vmem:[%s9756_s26 + $0x168] sm:$0xff]  ;;  %195 = vst [vmem:[%s9764_s27 + $0xa8] sm:$0xff] %v194_v21 }
  0x1e   : > { %197 = vst [vmem:[%s9764_s27 + $0xb0] sm:$0xff] %v196_v22  ;;  %199 = vst [vmem:[%s9764_s27 + $0xb8] sm:$0xff] %v198_v23  ;;  %v200_v24 = vld [vmem:[%s9756_s26 + $0x180] sm:$0xff]  ;;  %v202_v25 = vld [vmem:[%s9756_s26 + $0x188] sm:$0xff] }
  0x1f   : > { %v204_v26 = vld [vmem:[%s9756_s26 + $0x1a0] sm:$0xff]  ;;  %201 = vst [vmem:[%s9764_s27 + $0xc0] sm:$0xff] %v200_v24  ;;  %203 = vst [vmem:[%s9764_s27 + $0xc8] sm:$0xff] %v202_v25  ;;  %v206_v27 = vld [vmem:[%s9756_s26 + $0x1a8] sm:$0xff] }
  0x20   : > { %205 = vst [vmem:[%s9764_s27 + $0xd0] sm:$0xff] %v204_v26  ;;  %v208_v28 = vld [vmem:[%s9756_s26 + $0x1c0] sm:$0xff]  ;;  %v210_v29 = vld [vmem:[%s9756_s26 + $0x1c8] sm:$0xff]  ;;  %207 = vst [vmem:[%s9764_s27 + $0xd8] sm:$0xff] %v206_v27 }
  0x21   : > { %209 = vst [vmem:[%s9764_s27 + $0xe0] sm:$0xff] %v208_v28  ;;  %211 = vst [vmem:[%s9764_s27 + $0xe8] sm:$0xff] %v210_v29  ;;  %v212_v30 = vld [vmem:[%s9756_s26 + $0x1e0] sm:$0xff]  ;;  %v214_v31 = vld [vmem:[%s9756_s26 + $0x1e8] sm:$0xff] }
  0x22   : > { %v216_v32 = vld [vmem:[%s9756_s26 + $0x200] sm:$0xff]  ;;  %213 = vst [vmem:[%s9764_s27 + $0xf0] sm:$0xff] %v212_v30  ;;  %215 = vst [vmem:[%s9764_s27 + $0xf8] sm:$0xff] %v214_v31  ;;  %v218_v33 = vld [vmem:[%s9756_s26 + $0x208] sm:$0xff] }
  0x23   : > { %217 = vst [vmem:[%s9764_s27 + $0x100] sm:$0xff] %v216_v32  ;;  %v220_v34 = vld [vmem:[%s9756_s26 + $0x220] sm:$0xff]  ;;  %v222_v35 = vld [vmem:[%s9756_s26 + $0x228] sm:$0xff]  ;;  %219 = vst [vmem:[%s9764_s27 + $0x108] sm:$0xff] %v218_v33 }
  0x24   : > { %221 = vst [vmem:[%s9764_s27 + $0x110] sm:$0xff] %v220_v34  ;;  %223 = vst [vmem:[%s9764_s27 + $0x118] sm:$0xff] %v222_v35  ;;  %v224_v36 = vld [vmem:[%s9756_s26 + $0x240] sm:$0xff]  ;;  %v226_v37 = vld [vmem:[%s9756_s26 + $0x248] sm:$0xff] }
  0x25   : > { %v228_v38 = vld [vmem:[%s9756_s26 + $0x260] sm:$0xff]  ;;  %225 = vst [vmem:[%s9764_s27 + $0x120] sm:$0xff] %v224_v36  ;;  %227 = vst [vmem:[%s9764_s27 + $0x128] sm:$0xff] %v226_v37  ;;  %v230_v39 = vld [vmem:[%s9756_s26 + $0x268] sm:$0xff] }
  0x26   : > { %229 = vst [vmem:[%s9764_s27 + $0x130] sm:$0xff] %v228_v38  ;;  %v232_v40 = vld [vmem:[%s9756_s26 + $0x280] sm:$0xff]  ;;  %v234_v41 = vld [vmem:[%s9756_s26 + $0x288] sm:$0xff]  ;;  %231 = vst [vmem:[%s9764_s27 + $0x138] sm:$0xff] %v230_v39 }
  0x27   : > { %233 = vst [vmem:[%s9764_s27 + $0x140] sm:$0xff] %v232_v40  ;;  %235 = vst [vmem:[%s9764_s27 + $0x148] sm:$0xff] %v234_v41  ;;  %v236_v42 = vld [vmem:[%s9756_s26 + $0x2a0] sm:$0xff]  ;;  %v238_v43 = vld [vmem:[%s9756_s26 + $0x2a8] sm:$0xff] }
  0x28   : > { %v240_v44 = vld [vmem:[%s9756_s26 + $0x2c0] sm:$0xff]  ;;  %237 = vst [vmem:[%s9764_s27 + $0x150] sm:$0xff] %v236_v42  ;;  %239 = vst [vmem:[%s9764_s27 + $0x158] sm:$0xff] %v238_v43  ;;  %v242_v45 = vld [vmem:[%s9756_s26 + $0x2c8] sm:$0xff] }
  0x29   : > { %241 = vst [vmem:[%s9764_s27 + $0x160] sm:$0xff] %v240_v44  ;;  %v244_v46 = vld [vmem:[%s9756_s26 + $0x2e0] sm:$0xff]  ;;  %v246_v47 = vld [vmem:[%s9756_s26 + $0x2e8] sm:$0xff]  ;;  %243 = vst [vmem:[%s9764_s27 + $0x168] sm:$0xff] %v242_v45 }
  0x2a   : > { %245 = vst [vmem:[%s9764_s27 + $0x170] sm:$0xff] %v244_v46  ;;  %247 = vst [vmem:[%s9764_s27 + $0x178] sm:$0xff] %v246_v47  ;;  %v248_v48 = vld [vmem:[%s9756_s26 + $0x300] sm:$0xff]  ;;  %v250_v49 = vld [vmem:[%s9756_s26 + $0x308] sm:$0xff] }
  0x2b   : > { %v252_v50 = vld [vmem:[%s9756_s26 + $0x320] sm:$0xff]  ;;  %249 = vst [vmem:[%s9764_s27 + $0x180] sm:$0xff] %v248_v48  ;;  %251 = vst [vmem:[%s9764_s27 + $0x188] sm:$0xff] %v250_v49  ;;  %v254_v51 = vld [vmem:[%s9756_s26 + $0x328] sm:$0xff] }
  0x2c   : > { %253 = vst [vmem:[%s9764_s27 + $0x190] sm:$0xff] %v252_v50  ;;  %v256_v52 = vld [vmem:[%s9756_s26 + $0x340] sm:$0xff]  ;;  %v258_v53 = vld [vmem:[%s9756_s26 + $0x348] sm:$0xff]  ;;  %255 = vst [vmem:[%s9764_s27 + $0x198] sm:$0xff] %v254_v51 }
  0x2d   : > { %257 = vst [vmem:[%s9764_s27 + $0x1a0] sm:$0xff] %v256_v52  ;;  %259 = vst [vmem:[%s9764_s27 + $0x1a8] sm:$0xff] %v258_v53  ;;  %v260_v54 = vld [vmem:[%s9756_s26 + $0x360] sm:$0xff]  ;;  %v262_v55 = vld [vmem:[%s9756_s26 + $0x368] sm:$0xff] }
  0x2e   : > { %v264_v56 = vld [vmem:[%s9756_s26 + $0x380] sm:$0xff]  ;;  %261 = vst [vmem:[%s9764_s27 + $0x1b0] sm:$0xff] %v260_v54  ;;  %263 = vst [vmem:[%s9764_s27 + $0x1b8] sm:$0xff] %v262_v55  ;;  %v266_v57 = vld [vmem:[%s9756_s26 + $0x388] sm:$0xff] }
  0x2f   : > { %265 = vst [vmem:[%s9764_s27 + $0x1c0] sm:$0xff] %v264_v56  ;;  %v268_v58 = vld [vmem:[%s9756_s26 + $0x3a0] sm:$0xff]  ;;  %v270_v59 = vld [vmem:[%s9756_s26 + $0x3a8] sm:$0xff]  ;;  %267 = vst [vmem:[%s9764_s27 + $0x1c8] sm:$0xff] %v266_v57 }
  0x30   : > { %269 = vst [vmem:[%s9764_s27 + $0x1d0] sm:$0xff] %v268_v58  ;;  %271 = vst [vmem:[%s9764_s27 + $0x1d8] sm:$0xff] %v270_v59  ;;  %v272_v60 = vld [vmem:[%s9756_s26 + $0x3c0] sm:$0xff]  ;;  %v274_v61 = vld [vmem:[%s9756_s26 + $0x3c8] sm:$0xff] }
  0x31   : > { %v276_v62 = vld [vmem:[%s9756_s26 + $0x3e0] sm:$0xff]  ;;  %273 = vst [vmem:[%s9764_s27 + $0x1e0] sm:$0xff] %v272_v60  ;;  %275 = vst [vmem:[%s9764_s27 + $0x1e8] sm:$0xff] %v274_v61  ;;  %v278_v63 = vld [vmem:[%s9756_s26 + $0x3e8] sm:$0xff] }
  0x32   : > { %277 = vst [vmem:[%s9764_s27 + $0x1f0] sm:$0xff] %v276_v62  ;;  %v280_v0 = vld [vmem:[%s9756_s26 + $0x400] sm:$0xff]  ;;  %v282_v1 = vld [vmem:[%s9756_s26 + $0x408] sm:$0xff]  ;;  %279 = vst [vmem:[%s9764_s27 + $0x1f8] sm:$0xff] %v278_v63 }
  0x33   : > { %281 = vst [vmem:[%s9764_s27 + $0x200] sm:$0xff] %v280_v0  ;;  %283 = vst [vmem:[%s9764_s27 + $0x208] sm:$0xff] %v282_v1  ;;  %v284_v2 = vld [vmem:[%s9756_s26 + $0x420] sm:$0xff]  ;;  %v286_v3 = vld [vmem:[%s9756_s26 + $0x428] sm:$0xff] }
  0x34   : > { %v288_v4 = vld [vmem:[%s9756_s26 + $0x440] sm:$0xff]  ;;  %285 = vst [vmem:[%s9764_s27 + $0x210] sm:$0xff] %v284_v2  ;;  %287 = vst [vmem:[%s9764_s27 + $0x218] sm:$0xff] %v286_v3  ;;  %v290_v5 = vld [vmem:[%s9756_s26 + $0x448] sm:$0xff] }
  0x35   : > { %289 = vst [vmem:[%s9764_s27 + $0x220] sm:$0xff] %v288_v4  ;;  %v292_v6 = vld [vmem:[%s9756_s26 + $0x460] sm:$0xff]  ;;  %v294_v7 = vld [vmem:[%s9756_s26 + $0x468] sm:$0xff]  ;;  %291 = vst [vmem:[%s9764_s27 + $0x228] sm:$0xff] %v290_v5 }
  0x36   : > { %293 = vst [vmem:[%s9764_s27 + $0x230] sm:$0xff] %v292_v6  ;;  %295 = vst [vmem:[%s9764_s27 + $0x238] sm:$0xff] %v294_v7  ;;  %v296_v8 = vld [vmem:[%s9756_s26 + $0x480] sm:$0xff]  ;;  %v298_v9 = vld [vmem:[%s9756_s26 + $0x488] sm:$0xff] }
  0x37   : > { %v300_v10 = vld [vmem:[%s9756_s26 + $0x4a0] sm:$0xff]  ;;  %297 = vst [vmem:[%s9764_s27 + $0x240] sm:$0xff] %v296_v8  ;;  %299 = vst [vmem:[%s9764_s27 + $0x248] sm:$0xff] %v298_v9  ;;  %v302_v11 = vld [vmem:[%s9756_s26 + $0x4a8] sm:$0xff] }
  0x38   : > { %301 = vst [vmem:[%s9764_s27 + $0x250] sm:$0xff] %v300_v10  ;;  %v304_v12 = vld [vmem:[%s9756_s26 + $0x4c0] sm:$0xff]  ;;  %v306_v13 = vld [vmem:[%s9756_s26 + $0x4c8] sm:$0xff]  ;;  %303 = vst [vmem:[%s9764_s27 + $0x258] sm:$0xff] %v302_v11 }
  0x39   : > { %305 = vst [vmem:[%s9764_s27 + $0x260] sm:$0xff] %v304_v12  ;;  %307 = vst [vmem:[%s9764_s27 + $0x268] sm:$0xff] %v306_v13  ;;  %v308_v14 = vld [vmem:[%s9756_s26 + $0x4e0] sm:$0xff]  ;;  %v310_v15 = vld [vmem:[%s9756_s26 + $0x4e8] sm:$0xff] }
  0x3a   : > { %v312_v16 = vld [vmem:[%s9756_s26 + $0x500] sm:$0xff]  ;;  %309 = vst [vmem:[%s9764_s27 + $0x270] sm:$0xff] %v308_v14  ;;  %311 = vst [vmem:[%s9764_s27 + $0x278] sm:$0xff] %v310_v15  ;;  %v314_v17 = vld [vmem:[%s9756_s26 + $0x508] sm:$0xff] }
  0x3b   : > { %313 = vst [vmem:[%s9764_s27 + $0x280] sm:$0xff] %v312_v16  ;;  %v316_v18 = vld [vmem:[%s9756_s26 + $0x520] sm:$0xff]  ;;  %v318_v19 = vld [vmem:[%s9756_s26 + $0x528] sm:$0xff]  ;;  %315 = vst [vmem:[%s9764_s27 + $0x288] sm:$0xff] %v314_v17 }
  0x3c   : > { %317 = vst [vmem:[%s9764_s27 + $0x290] sm:$0xff] %v316_v18  ;;  %319 = vst [vmem:[%s9764_s27 + $0x298] sm:$0xff] %v318_v19  ;;  %v320_v20 = vld [vmem:[%s9756_s26 + $0x540] sm:$0xff]  ;;  %v322_v21 = vld [vmem:[%s9756_s26 + $0x548] sm:$0xff] }
  0x3d   : > { %v324_v22 = vld [vmem:[%s9756_s26 + $0x560] sm:$0xff]  ;;  %321 = vst [vmem:[%s9764_s27 + $0x2a0] sm:$0xff] %v320_v20  ;;  %323 = vst [vmem:[%s9764_s27 + $0x2a8] sm:$0xff] %v322_v21  ;;  %v326_v23 = vld [vmem:[%s9756_s26 + $0x568] sm:$0xff] }
  0x3e   : > { %325 = vst [vmem:[%s9764_s27 + $0x2b0] sm:$0xff] %v324_v22  ;;  %v328_v24 = vld [vmem:[%s9756_s26 + $0x580] sm:$0xff]  ;;  %v330_v25 = vld [vmem:[%s9756_s26 + $0x588] sm:$0xff]  ;;  %327 = vst [vmem:[%s9764_s27 + $0x2b8] sm:$0xff] %v326_v23 }
  0x3f   : > { %329 = vst [vmem:[%s9764_s27 + $0x2c0] sm:$0xff] %v328_v24  ;;  %331 = vst [vmem:[%s9764_s27 + $0x2c8] sm:$0xff] %v330_v25  ;;  %v332_v26 = vld [vmem:[%s9756_s26 + $0x5a0] sm:$0xff]  ;;  %v334_v27 = vld [vmem:[%s9756_s26 + $0x5a8] sm:$0xff] }
  0x40   : > { %v336_v28 = vld [vmem:[%s9756_s26 + $0x5c0] sm:$0xff]  ;;  %333 = vst [vmem:[%s9764_s27 + $0x2d0] sm:$0xff] %v332_v26  ;;  %335 = vst [vmem:[%s9764_s27 + $0x2d8] sm:$0xff] %v334_v27  ;;  %v338_v29 = vld [vmem:[%s9756_s26 + $0x5c8] sm:$0xff] }
  0x41   : > { %337 = vst [vmem:[%s9764_s27 + $0x2e0] sm:$0xff] %v336_v28  ;;  %v340_v30 = vld [vmem:[%s9756_s26 + $0x5e0] sm:$0xff]  ;;  %v342_v31 = vld [vmem:[%s9756_s26 + $0x5e8] sm:$0xff]  ;;  %339 = vst [vmem:[%s9764_s27 + $0x2e8] sm:$0xff] %v338_v29 }
  0x42   : > { %341 = vst [vmem:[%s9764_s27 + $0x2f0] sm:$0xff] %v340_v30  ;;  %343 = vst [vmem:[%s9764_s27 + $0x2f8] sm:$0xff] %v342_v31  ;;  %v344_v32 = vld [vmem:[%s9756_s26 + $0x600] sm:$0xff]  ;;  %v346_v33 = vld [vmem:[%s9756_s26 + $0x608] sm:$0xff] }
  0x43   : > { %v348_v34 = vld [vmem:[%s9756_s26 + $0x620] sm:$0xff]  ;;  %345 = vst [vmem:[%s9764_s27 + $0x300] sm:$0xff] %v344_v32  ;;  %347 = vst [vmem:[%s9764_s27 + $0x308] sm:$0xff] %v346_v33  ;;  %v350_v35 = vld [vmem:[%s9756_s26 + $0x628] sm:$0xff] }
  0x44   : > { %349 = vst [vmem:[%s9764_s27 + $0x310] sm:$0xff] %v348_v34  ;;  %v352_v36 = vld [vmem:[%s9756_s26 + $0x640] sm:$0xff]  ;;  %v354_v37 = vld [vmem:[%s9756_s26 + $0x648] sm:$0xff]  ;;  %351 = vst [vmem:[%s9764_s27 + $0x318] sm:$0xff] %v350_v35 }
  0x45   : > { %353 = vst [vmem:[%s9764_s27 + $0x320] sm:$0xff] %v352_v36  ;;  %355 = vst [vmem:[%s9764_s27 + $0x328] sm:$0xff] %v354_v37  ;;  %v356_v38 = vld [vmem:[%s9756_s26 + $0x660] sm:$0xff]  ;;  %v358_v39 = vld [vmem:[%s9756_s26 + $0x668] sm:$0xff] }
  0x46   : > { %v360_v40 = vld [vmem:[%s9756_s26 + $0x680] sm:$0xff]  ;;  %357 = vst [vmem:[%s9764_s27 + $0x330] sm:$0xff] %v356_v38  ;;  %359 = vst [vmem:[%s9764_s27 + $0x338] sm:$0xff] %v358_v39  ;;  %v362_v41 = vld [vmem:[%s9756_s26 + $0x688] sm:$0xff] }
  0x47   : > { %361 = vst [vmem:[%s9764_s27 + $0x340] sm:$0xff] %v360_v40  ;;  %v364_v42 = vld [vmem:[%s9756_s26 + $0x6a0] sm:$0xff]  ;;  %v366_v43 = vld [vmem:[%s9756_s26 + $0x6a8] sm:$0xff]  ;;  %363 = vst [vmem:[%s9764_s27 + $0x348] sm:$0xff] %v362_v41 }
  0x48   : > { %365 = vst [vmem:[%s9764_s27 + $0x350] sm:$0xff] %v364_v42  ;;  %367 = vst [vmem:[%s9764_s27 + $0x358] sm:$0xff] %v366_v43  ;;  %v368_v44 = vld [vmem:[%s9756_s26 + $0x6c0] sm:$0xff]  ;;  %v370_v45 = vld [vmem:[%s9756_s26 + $0x6c8] sm:$0xff] }
  0x49   : > { %v372_v46 = vld [vmem:[%s9756_s26 + $0x6e0] sm:$0xff]  ;;  %369 = vst [vmem:[%s9764_s27 + $0x360] sm:$0xff] %v368_v44  ;;  %371 = vst [vmem:[%s9764_s27 + $0x368] sm:$0xff] %v370_v45  ;;  %v374_v47 = vld [vmem:[%s9756_s26 + $0x6e8] sm:$0xff] }
  0x4a   : > { %373 = vst [vmem:[%s9764_s27 + $0x370] sm:$0xff] %v372_v46  ;;  %v376_v48 = vld [vmem:[%s9756_s26 + $0x700] sm:$0xff]  ;;  %v378_v49 = vld [vmem:[%s9756_s26 + $0x708] sm:$0xff]  ;;  %375 = vst [vmem:[%s9764_s27 + $0x378] sm:$0xff] %v374_v47 }
  0x4b   : > { %377 = vst [vmem:[%s9764_s27 + $0x380] sm:$0xff] %v376_v48  ;;  %379 = vst [vmem:[%s9764_s27 + $0x388] sm:$0xff] %v378_v49  ;;  %v380_v50 = vld [vmem:[%s9756_s26 + $0x720] sm:$0xff]  ;;  %v382_v51 = vld [vmem:[%s9756_s26 + $0x728] sm:$0xff] }
  0x4c   : > { %v384_v52 = vld [vmem:[%s9756_s26 + $0x740] sm:$0xff]  ;;  %381 = vst [vmem:[%s9764_s27 + $0x390] sm:$0xff] %v380_v50  ;;  %383 = vst [vmem:[%s9764_s27 + $0x398] sm:$0xff] %v382_v51  ;;  %v386_v53 = vld [vmem:[%s9756_s26 + $0x748] sm:$0xff] }
  0x4d   : > { %385 = vst [vmem:[%s9764_s27 + $0x3a0] sm:$0xff] %v384_v52  ;;  %v388_v54 = vld [vmem:[%s9756_s26 + $0x760] sm:$0xff]  ;;  %v390_v55 = vld [vmem:[%s9756_s26 + $0x768] sm:$0xff]  ;;  %387 = vst [vmem:[%s9764_s27 + $0x3a8] sm:$0xff] %v386_v53 }
  0x4e   : > { %389 = vst [vmem:[%s9764_s27 + $0x3b0] sm:$0xff] %v388_v54  ;;  %391 = vst [vmem:[%s9764_s27 + $0x3b8] sm:$0xff] %v390_v55  ;;  %v392_v56 = vld [vmem:[%s9756_s26 + $0x780] sm:$0xff]  ;;  %v394_v57 = vld [vmem:[%s9756_s26 + $0x788] sm:$0xff] }
  0x4f   : > { %v396_v58 = vld [vmem:[%s9756_s26 + $0x7a0] sm:$0xff]  ;;  %393 = vst [vmem:[%s9764_s27 + $0x3c0] sm:$0xff] %v392_v56  ;;  %395 = vst [vmem:[%s9764_s27 + $0x3c8] sm:$0xff] %v394_v57  ;;  %v398_v59 = vld [vmem:[%s9756_s26 + $0x7a8] sm:$0xff] }
  0x50   : > { %397 = vst [vmem:[%s9764_s27 + $0x3d0] sm:$0xff] %v396_v58  ;;  %v400_v60 = vld [vmem:[%s9756_s26 + $0x7c0] sm:$0xff]  ;;  %v402_v61 = vld [vmem:[%s9756_s26 + $0x7c8] sm:$0xff]  ;;  %399 = vst [vmem:[%s9764_s27 + $0x3d8] sm:$0xff] %v398_v59 }
  0x51   : > { %401 = vst [vmem:[%s9764_s27 + $0x3e0] sm:$0xff] %v400_v60  ;;  %403 = vst [vmem:[%s9764_s27 + $0x3e8] sm:$0xff] %v402_v61  ;;  %v404_v62 = vld [vmem:[%s9756_s26 + $0x7e0] sm:$0xff]  ;;  %v406_v63 = vld [vmem:[%s9756_s26 + $0x7e8] sm:$0xff] }
  0x52   : > { %v408_v0 = vld [vmem:[%s9756_s26 + $0x800] sm:$0xff]  ;;  %405 = vst [vmem:[%s9764_s27 + $0x3f0] sm:$0xff] %v404_v62  ;;  %407 = vst [vmem:[%s9764_s27 + $0x3f8] sm:$0xff] %v406_v63  ;;  %v410_v1 = vld [vmem:[%s9756_s26 + $0x808] sm:$0xff] }
  0x53   : > { %409 = vst [vmem:[%s9764_s27 + $0x400] sm:$0xff] %v408_v0  ;;  %v412_v2 = vld [vmem:[%s9756_s26 + $0x820] sm:$0xff]  ;;  %v414_v3 = vld [vmem:[%s9756_s26 + $0x828] sm:$0xff]  ;;  %411 = vst [vmem:[%s9764_s27 + $0x408] sm:$0xff] %v410_v1 }
  0x54   : > { %413 = vst [vmem:[%s9764_s27 + $0x410] sm:$0xff] %v412_v2  ;;  %415 = vst [vmem:[%s9764_s27 + $0x418] sm:$0xff] %v414_v3  ;;  %v416_v4 = vld [vmem:[%s9756_s26 + $0x840] sm:$0xff]  ;;  %v418_v5 = vld [vmem:[%s9756_s26 + $0x848] sm:$0xff] }
  0x55   : > { %v420_v6 = vld [vmem:[%s9756_s26 + $0x860] sm:$0xff]  ;;  %417 = vst [vmem:[%s9764_s27 + $0x420] sm:$0xff] %v416_v4  ;;  %419 = vst [vmem:[%s9764_s27 + $0x428] sm:$0xff] %v418_v5  ;;  %v422_v7 = vld [vmem:[%s9756_s26 + $0x868] sm:$0xff] }
  0x56   : > { %421 = vst [vmem:[%s9764_s27 + $0x430] sm:$0xff] %v420_v6  ;;  %v424_v8 = vld [vmem:[%s9756_s26 + $0x880] sm:$0xff]  ;;  %v426_v9 = vld [vmem:[%s9756_s26 + $0x888] sm:$0xff]  ;;  %423 = vst [vmem:[%s9764_s27 + $0x438] sm:$0xff] %v422_v7 }
  0x57   : > { %425 = vst [vmem:[%s9764_s27 + $0x440] sm:$0xff] %v424_v8  ;;  %427 = vst [vmem:[%s9764_s27 + $0x448] sm:$0xff] %v426_v9  ;;  %v428_v10 = vld [vmem:[%s9756_s26 + $0x8a0] sm:$0xff]  ;;  %v430_v11 = vld [vmem:[%s9756_s26 + $0x8a8] sm:$0xff] }
  0x58   : > { %v432_v12 = vld [vmem:[%s9756_s26 + $0x8c0] sm:$0xff]  ;;  %429 = vst [vmem:[%s9764_s27 + $0x450] sm:$0xff] %v428_v10  ;;  %431 = vst [vmem:[%s9764_s27 + $0x458] sm:$0xff] %v430_v11  ;;  %v434_v13 = vld [vmem:[%s9756_s26 + $0x8c8] sm:$0xff] }
  0x59   : > { %433 = vst [vmem:[%s9764_s27 + $0x460] sm:$0xff] %v432_v12  ;;  %v436_v14 = vld [vmem:[%s9756_s26 + $0x8e0] sm:$0xff]  ;;  %v438_v15 = vld [vmem:[%s9756_s26 + $0x8e8] sm:$0xff]  ;;  %435 = vst [vmem:[%s9764_s27 + $0x468] sm:$0xff] %v434_v13 }
  0x5a   : > { %437 = vst [vmem:[%s9764_s27 + $0x470] sm:$0xff] %v436_v14  ;;  %439 = vst [vmem:[%s9764_s27 + $0x478] sm:$0xff] %v438_v15  ;;  %v440_v16 = vld [vmem:[%s9756_s26 + $0x900] sm:$0xff]  ;;  %v442_v17 = vld [vmem:[%s9756_s26 + $0x908] sm:$0xff] }
  0x5b   : > { %v444_v18 = vld [vmem:[%s9756_s26 + $0x920] sm:$0xff]  ;;  %441 = vst [vmem:[%s9764_s27 + $0x480] sm:$0xff] %v440_v16  ;;  %443 = vst [vmem:[%s9764_s27 + $0x488] sm:$0xff] %v442_v17  ;;  %v446_v19 = vld [vmem:[%s9756_s26 + $0x928] sm:$0xff] }
  0x5c   : > { %445 = vst [vmem:[%s9764_s27 + $0x490] sm:$0xff] %v444_v18  ;;  %v448_v20 = vld [vmem:[%s9756_s26 + $0x940] sm:$0xff]  ;;  %v450_v21 = vld [vmem:[%s9756_s26 + $0x948] sm:$0xff]  ;;  %447 = vst [vmem:[%s9764_s27 + $0x498] sm:$0xff] %v446_v19 }
  0x5d   : > { %449 = vst [vmem:[%s9764_s27 + $0x4a0] sm:$0xff] %v448_v20  ;;  %451 = vst [vmem:[%s9764_s27 + $0x4a8] sm:$0xff] %v450_v21  ;;  %v452_v22 = vld [vmem:[%s9756_s26 + $0x960] sm:$0xff]  ;;  %v454_v23 = vld [vmem:[%s9756_s26 + $0x968] sm:$0xff] }
  0x5e   : > { %v456_v24 = vld [vmem:[%s9756_s26 + $0x980] sm:$0xff]  ;;  %453 = vst [vmem:[%s9764_s27 + $0x4b0] sm:$0xff] %v452_v22  ;;  %455 = vst [vmem:[%s9764_s27 + $0x4b8] sm:$0xff] %v454_v23  ;;  %v458_v25 = vld [vmem:[%s9756_s26 + $0x988] sm:$0xff] }
  0x5f   : > { %457 = vst [vmem:[%s9764_s27 + $0x4c0] sm:$0xff] %v456_v24  ;;  %v460_v26 = vld [vmem:[%s9756_s26 + $0x9a0] sm:$0xff]  ;;  %v462_v27 = vld [vmem:[%s9756_s26 + $0x9a8] sm:$0xff]  ;;  %459 = vst [vmem:[%s9764_s27 + $0x4c8] sm:$0xff] %v458_v25 }
  0x60   : > { %461 = vst [vmem:[%s9764_s27 + $0x4d0] sm:$0xff] %v460_v26  ;;  %463 = vst [vmem:[%s9764_s27 + $0x4d8] sm:$0xff] %v462_v27  ;;  %v464_v28 = vld [vmem:[%s9756_s26 + $0x9c0] sm:$0xff]  ;;  %v466_v29 = vld [vmem:[%s9756_s26 + $0x9c8] sm:$0xff] }
  0x61   : > { %v468_v30 = vld [vmem:[%s9756_s26 + $0x9e0] sm:$0xff]  ;;  %465 = vst [vmem:[%s9764_s27 + $0x4e0] sm:$0xff] %v464_v28  ;;  %467 = vst [vmem:[%s9764_s27 + $0x4e8] sm:$0xff] %v466_v29  ;;  %v470_v31 = vld [vmem:[%s9756_s26 + $0x9e8] sm:$0xff] }
  0x62   : > { %469 = vst [vmem:[%s9764_s27 + $0x4f0] sm:$0xff] %v468_v30  ;;  %v472_v32 = vld [vmem:[%s9756_s26 + $0xa00] sm:$0xff]  ;;  %v474_v33 = vld [vmem:[%s9756_s26 + $0xa08] sm:$0xff]  ;;  %471 = vst [vmem:[%s9764_s27 + $0x4f8] sm:$0xff] %v470_v31 }
  0x63   : > { %473 = vst [vmem:[%s9764_s27 + $0x500] sm:$0xff] %v472_v32  ;;  %475 = vst [vmem:[%s9764_s27 + $0x508] sm:$0xff] %v474_v33  ;;  %v476_v34 = vld [vmem:[%s9756_s26 + $0xa20] sm:$0xff]  ;;  %v478_v35 = vld [vmem:[%s9756_s26 + $0xa28] sm:$0xff] }
  0x64   : > { %v480_v36 = vld [vmem:[%s9756_s26 + $0xa40] sm:$0xff]  ;;  %477 = vst [vmem:[%s9764_s27 + $0x510] sm:$0xff] %v476_v34  ;;  %479 = vst [vmem:[%s9764_s27 + $0x518] sm:$0xff] %v478_v35  ;;  %v482_v37 = vld [vmem:[%s9756_s26 + $0xa48] sm:$0xff] }
  0x65   : > { %481 = vst [vmem:[%s9764_s27 + $0x520] sm:$0xff] %v480_v36  ;;  %v484_v38 = vld [vmem:[%s9756_s26 + $0xa60] sm:$0xff]  ;;  %v486_v39 = vld [vmem:[%s9756_s26 + $0xa68] sm:$0xff]  ;;  %483 = vst [vmem:[%s9764_s27 + $0x528] sm:$0xff] %v482_v37 }
  0x66   : > { %485 = vst [vmem:[%s9764_s27 + $0x530] sm:$0xff] %v484_v38  ;;  %487 = vst [vmem:[%s9764_s27 + $0x538] sm:$0xff] %v486_v39  ;;  %v488_v40 = vld [vmem:[%s9756_s26 + $0xa80] sm:$0xff]  ;;  %v490_v41 = vld [vmem:[%s9756_s26 + $0xa88] sm:$0xff] }
  0x67   : > { %v492_v42 = vld [vmem:[%s9756_s26 + $0xaa0] sm:$0xff]  ;;  %489 = vst [vmem:[%s9764_s27 + $0x540] sm:$0xff] %v488_v40  ;;  %491 = vst [vmem:[%s9764_s27 + $0x548] sm:$0xff] %v490_v41  ;;  %v494_v43 = vld [vmem:[%s9756_s26 + $0xaa8] sm:$0xff] }
  0x68   : > { %493 = vst [vmem:[%s9764_s27 + $0x550] sm:$0xff] %v492_v42  ;;  %v496_v44 = vld [vmem:[%s9756_s26 + $0xac0] sm:$0xff]  ;;  %v498_v45 = vld [vmem:[%s9756_s26 + $0xac8] sm:$0xff]  ;;  %495 = vst [vmem:[%s9764_s27 + $0x558] sm:$0xff] %v494_v43 }
  0x69   : > { %497 = vst [vmem:[%s9764_s27 + $0x560] sm:$0xff] %v496_v44  ;;  %499 = vst [vmem:[%s9764_s27 + $0x568] sm:$0xff] %v498_v45  ;;  %v500_v46 = vld [vmem:[%s9756_s26 + $0xae0] sm:$0xff]  ;;  %v502_v47 = vld [vmem:[%s9756_s26 + $0xae8] sm:$0xff] }
  0x6a   : > { %v504_v48 = vld [vmem:[%s9756_s26 + $0xb00] sm:$0xff]  ;;  %501 = vst [vmem:[%s9764_s27 + $0x570] sm:$0xff] %v500_v46  ;;  %503 = vst [vmem:[%s9764_s27 + $0x578] sm:$0xff] %v502_v47  ;;  %v506_v49 = vld [vmem:[%s9756_s26 + $0xb08] sm:$0xff] }
  0x6b   : > { %505 = vst [vmem:[%s9764_s27 + $0x580] sm:$0xff] %v504_v48  ;;  %v508_v50 = vld [vmem:[%s9756_s26 + $0xb20] sm:$0xff]  ;;  %v510_v51 = vld [vmem:[%s9756_s26 + $0xb28] sm:$0xff]  ;;  %507 = vst [vmem:[%s9764_s27 + $0x588] sm:$0xff] %v506_v49 }
  0x6c   : > { %509 = vst [vmem:[%s9764_s27 + $0x590] sm:$0xff] %v508_v50  ;;  %511 = vst [vmem:[%s9764_s27 + $0x598] sm:$0xff] %v510_v51  ;;  %v512_v52 = vld [vmem:[%s9756_s26 + $0xb40] sm:$0xff]  ;;  %v514_v53 = vld [vmem:[%s9756_s26 + $0xb48] sm:$0xff] }
  0x6d   : > { %v516_v54 = vld [vmem:[%s9756_s26 + $0xb60] sm:$0xff]  ;;  %513 = vst [vmem:[%s9764_s27 + $0x5a0] sm:$0xff] %v512_v52  ;;  %515 = vst [vmem:[%s9764_s27 + $0x5a8] sm:$0xff] %v514_v53  ;;  %v518_v55 = vld [vmem:[%s9756_s26 + $0xb68] sm:$0xff] }
  0x6e   : > { %517 = vst [vmem:[%s9764_s27 + $0x5b0] sm:$0xff] %v516_v54  ;;  %v520_v56 = vld [vmem:[%s9756_s26 + $0xb80] sm:$0xff]  ;;  %v522_v57 = vld [vmem:[%s9756_s26 + $0xb88] sm:$0xff]  ;;  %519 = vst [vmem:[%s9764_s27 + $0x5b8] sm:$0xff] %v518_v55 }
  0x6f   : > { %521 = vst [vmem:[%s9764_s27 + $0x5c0] sm:$0xff] %v520_v56  ;;  %523 = vst [vmem:[%s9764_s27 + $0x5c8] sm:$0xff] %v522_v57  ;;  %v524_v58 = vld [vmem:[%s9756_s26 + $0xba0] sm:$0xff]  ;;  %v526_v59 = vld [vmem:[%s9756_s26 + $0xba8] sm:$0xff] }
  0x70   : > { %v528_v60 = vld [vmem:[%s9756_s26 + $0xbc0] sm:$0xff]  ;;  %525 = vst [vmem:[%s9764_s27 + $0x5d0] sm:$0xff] %v524_v58  ;;  %527 = vst [vmem:[%s9764_s27 + $0x5d8] sm:$0xff] %v526_v59  ;;  %v530_v61 = vld [vmem:[%s9756_s26 + $0xbc8] sm:$0xff] }
  0x71   : > { %529 = vst [vmem:[%s9764_s27 + $0x5e0] sm:$0xff] %v528_v60  ;;  %v532_v62 = vld [vmem:[%s9756_s26 + $0xbe0] sm:$0xff]  ;;  %v534_v63 = vld [vmem:[%s9756_s26 + $0xbe8] sm:$0xff]  ;;  %531 = vst [vmem:[%s9764_s27 + $0x5e8] sm:$0xff] %v530_v61 }
  0x72   : > { %533 = vst [vmem:[%s9764_s27 + $0x5f0] sm:$0xff] %v532_v62  ;;  %535 = vst [vmem:[%s9764_s27 + $0x5f8] sm:$0xff] %v534_v63  ;;  %v536_v0 = vld [vmem:[%s9756_s26 + $0xc00] sm:$0xff]  ;;  %v538_v1 = vld [vmem:[%s9756_s26 + $0xc08] sm:$0xff] }
  0x73   : > { %v540_v2 = vld [vmem:[%s9756_s26 + $0xc20] sm:$0xff]  ;;  %537 = vst [vmem:[%s9764_s27 + $0x600] sm:$0xff] %v536_v0  ;;  %539 = vst [vmem:[%s9764_s27 + $0x608] sm:$0xff] %v538_v1  ;;  %v542_v3 = vld [vmem:[%s9756_s26 + $0xc28] sm:$0xff] }
  0x74   : > { %541 = vst [vmem:[%s9764_s27 + $0x610] sm:$0xff] %v540_v2  ;;  %v544_v4 = vld [vmem:[%s9756_s26 + $0xc40] sm:$0xff]  ;;  %v546_v5 = vld [vmem:[%s9756_s26 + $0xc48] sm:$0xff]  ;;  %543 = vst [vmem:[%s9764_s27 + $0x618] sm:$0xff] %v542_v3 }
  0x75   : > { %545 = vst [vmem:[%s9764_s27 + $0x620] sm:$0xff] %v544_v4  ;;  %547 = vst [vmem:[%s9764_s27 + $0x628] sm:$0xff] %v546_v5  ;;  %v548_v6 = vld [vmem:[%s9756_s26 + $0xc60] sm:$0xff]  ;;  %v550_v7 = vld [vmem:[%s9756_s26 + $0xc68] sm:$0xff] }
  0x76   : > { %v552_v8 = vld [vmem:[%s9756_s26 + $0xc80] sm:$0xff]  ;;  %549 = vst [vmem:[%s9764_s27 + $0x630] sm:$0xff] %v548_v6  ;;  %551 = vst [vmem:[%s9764_s27 + $0x638] sm:$0xff] %v550_v7  ;;  %v554_v9 = vld [vmem:[%s9756_s26 + $0xc88] sm:$0xff] }
  0x77   : > { %553 = vst [vmem:[%s9764_s27 + $0x640] sm:$0xff] %v552_v8  ;;  %v556_v10 = vld [vmem:[%s9756_s26 + $0xca0] sm:$0xff]  ;;  %v558_v11 = vld [vmem:[%s9756_s26 + $0xca8] sm:$0xff]  ;;  %555 = vst [vmem:[%s9764_s27 + $0x648] sm:$0xff] %v554_v9 }
  0x78   : > { %557 = vst [vmem:[%s9764_s27 + $0x650] sm:$0xff] %v556_v10  ;;  %559 = vst [vmem:[%s9764_s27 + $0x658] sm:$0xff] %v558_v11  ;;  %v560_v12 = vld [vmem:[%s9756_s26 + $0xcc0] sm:$0xff]  ;;  %v562_v13 = vld [vmem:[%s9756_s26 + $0xcc8] sm:$0xff] }
  0x79   : > { %v564_v14 = vld [vmem:[%s9756_s26 + $0xce0] sm:$0xff]  ;;  %561 = vst [vmem:[%s9764_s27 + $0x660] sm:$0xff] %v560_v12  ;;  %563 = vst [vmem:[%s9764_s27 + $0x668] sm:$0xff] %v562_v13  ;;  %v566_v15 = vld [vmem:[%s9756_s26 + $0xce8] sm:$0xff] }
  0x7a   : > { %565 = vst [vmem:[%s9764_s27 + $0x670] sm:$0xff] %v564_v14  ;;  %v568_v16 = vld [vmem:[%s9756_s26 + $0xd00] sm:$0xff]  ;;  %v570_v17 = vld [vmem:[%s9756_s26 + $0xd08] sm:$0xff]  ;;  %567 = vst [vmem:[%s9764_s27 + $0x678] sm:$0xff] %v566_v15 }
  0x7b   : > { %569 = vst [vmem:[%s9764_s27 + $0x680] sm:$0xff] %v568_v16  ;;  %571 = vst [vmem:[%s9764_s27 + $0x688] sm:$0xff] %v570_v17  ;;  %v572_v18 = vld [vmem:[%s9756_s26 + $0xd20] sm:$0xff]  ;;  %v574_v19 = vld [vmem:[%s9756_s26 + $0xd28] sm:$0xff] }
  0x7c   : > { %v576_v20 = vld [vmem:[%s9756_s26 + $0xd40] sm:$0xff]  ;;  %573 = vst [vmem:[%s9764_s27 + $0x690] sm:$0xff] %v572_v18  ;;  %575 = vst [vmem:[%s9764_s27 + $0x698] sm:$0xff] %v574_v19  ;;  %v578_v21 = vld [vmem:[%s9756_s26 + $0xd48] sm:$0xff] }
  0x7d   : > { %577 = vst [vmem:[%s9764_s27 + $0x6a0] sm:$0xff] %v576_v20  ;;  %v580_v22 = vld [vmem:[%s9756_s26 + $0xd60] sm:$0xff]  ;;  %v582_v23 = vld [vmem:[%s9756_s26 + $0xd68] sm:$0xff]  ;;  %579 = vst [vmem:[%s9764_s27 + $0x6a8] sm:$0xff] %v578_v21 }
  0x7e   : > { %581 = vst [vmem:[%s9764_s27 + $0x6b0] sm:$0xff] %v580_v22  ;;  %583 = vst [vmem:[%s9764_s27 + $0x6b8] sm:$0xff] %v582_v23  ;;  %v584_v24 = vld [vmem:[%s9756_s26 + $0xd80] sm:$0xff]  ;;  %v586_v25 = vld [vmem:[%s9756_s26 + $0xd88] sm:$0xff] }
  0x7f   : > { %v588_v26 = vld [vmem:[%s9756_s26 + $0xda0] sm:$0xff]  ;;  %585 = vst [vmem:[%s9764_s27 + $0x6c0] sm:$0xff] %v584_v24  ;;  %587 = vst [vmem:[%s9764_s27 + $0x6c8] sm:$0xff] %v586_v25  ;;  %v590_v27 = vld [vmem:[%s9756_s26 + $0xda8] sm:$0xff] }
  0x80   : > { %589 = vst [vmem:[%s9764_s27 + $0x6d0] sm:$0xff] %v588_v26  ;;  %v592_v28 = vld [vmem:[%s9756_s26 + $0xdc0] sm:$0xff]  ;;  %v594_v29 = vld [vmem:[%s9756_s26 + $0xdc8] sm:$0xff]  ;;  %591 = vst [vmem:[%s9764_s27 + $0x6d8] sm:$0xff] %v590_v27 }
  0x81   : > { %593 = vst [vmem:[%s9764_s27 + $0x6e0] sm:$0xff] %v592_v28  ;;  %595 = vst [vmem:[%s9764_s27 + $0x6e8] sm:$0xff] %v594_v29  ;;  %v596_v30 = vld [vmem:[%s9756_s26 + $0xde0] sm:$0xff]  ;;  %v598_v31 = vld [vmem:[%s9756_s26 + $0xde8] sm:$0xff] }
  0x82   : > { %v600_v32 = vld [vmem:[%s9756_s26 + $0xe00] sm:$0xff]  ;;  %597 = vst [vmem:[%s9764_s27 + $0x6f0] sm:$0xff] %v596_v30  ;;  %599 = vst [vmem:[%s9764_s27 + $0x6f8] sm:$0xff] %v598_v31  ;;  %v602_v33 = vld [vmem:[%s9756_s26 + $0xe08] sm:$0xff] }
  0x83   : > { %601 = vst [vmem:[%s9764_s27 + $0x700] sm:$0xff] %v600_v32  ;;  %v604_v34 = vld [vmem:[%s9756_s26 + $0xe20] sm:$0xff]  ;;  %v606_v35 = vld [vmem:[%s9756_s26 + $0xe28] sm:$0xff]  ;;  %603 = vst [vmem:[%s9764_s27 + $0x708] sm:$0xff] %v602_v33 }
  0x84   : > { %605 = vst [vmem:[%s9764_s27 + $0x710] sm:$0xff] %v604_v34  ;;  %607 = vst [vmem:[%s9764_s27 + $0x718] sm:$0xff] %v606_v35  ;;  %v608_v36 = vld [vmem:[%s9756_s26 + $0xe40] sm:$0xff]  ;;  %v610_v37 = vld [vmem:[%s9756_s26 + $0xe48] sm:$0xff] }
  0x85   : > { %v612_v38 = vld [vmem:[%s9756_s26 + $0xe60] sm:$0xff]  ;;  %609 = vst [vmem:[%s9764_s27 + $0x720] sm:$0xff] %v608_v36  ;;  %611 = vst [vmem:[%s9764_s27 + $0x728] sm:$0xff] %v610_v37  ;;  %v614_v39 = vld [vmem:[%s9756_s26 + $0xe68] sm:$0xff] }
  0x86   : > { %613 = vst [vmem:[%s9764_s27 + $0x730] sm:$0xff] %v612_v38  ;;  %v616_v40 = vld [vmem:[%s9756_s26 + $0xe80] sm:$0xff]  ;;  %v618_v41 = vld [vmem:[%s9756_s26 + $0xe88] sm:$0xff]  ;;  %615 = vst [vmem:[%s9764_s27 + $0x738] sm:$0xff] %v614_v39 }
  0x87   : > { %617 = vst [vmem:[%s9764_s27 + $0x740] sm:$0xff] %v616_v40  ;;  %619 = vst [vmem:[%s9764_s27 + $0x748] sm:$0xff] %v618_v41  ;;  %v620_v42 = vld [vmem:[%s9756_s26 + $0xea0] sm:$0xff]  ;;  %v622_v43 = vld [vmem:[%s9756_s26 + $0xea8] sm:$0xff] }
  0x88   : > { %v624_v44 = vld [vmem:[%s9756_s26 + $0xec0] sm:$0xff]  ;;  %621 = vst [vmem:[%s9764_s27 + $0x750] sm:$0xff] %v620_v42  ;;  %623 = vst [vmem:[%s9764_s27 + $0x758] sm:$0xff] %v622_v43  ;;  %v626_v45 = vld [vmem:[%s9756_s26 + $0xec8] sm:$0xff] }
  0x89   : > { %625 = vst [vmem:[%s9764_s27 + $0x760] sm:$0xff] %v624_v44  ;;  %v628_v46 = vld [vmem:[%s9756_s26 + $0xee0] sm:$0xff]  ;;  %v630_v47 = vld [vmem:[%s9756_s26 + $0xee8] sm:$0xff]  ;;  %627 = vst [vmem:[%s9764_s27 + $0x768] sm:$0xff] %v626_v45 }
  0x8a   : > { %629 = vst [vmem:[%s9764_s27 + $0x770] sm:$0xff] %v628_v46  ;;  %631 = vst [vmem:[%s9764_s27 + $0x778] sm:$0xff] %v630_v47  ;;  %v632_v48 = vld [vmem:[%s9756_s26 + $0xf00] sm:$0xff]  ;;  %v634_v49 = vld [vmem:[%s9756_s26 + $0xf08] sm:$0xff] }
  0x8b   : > { %v636_v50 = vld [vmem:[%s9756_s26 + $0xf20] sm:$0xff]  ;;  %633 = vst [vmem:[%s9764_s27 + $0x780] sm:$0xff] %v632_v48  ;;  %635 = vst [vmem:[%s9764_s27 + $0x788] sm:$0xff] %v634_v49  ;;  %v638_v51 = vld [vmem:[%s9756_s26 + $0xf28] sm:$0xff] }
  0x8c   : > { %637 = vst [vmem:[%s9764_s27 + $0x790] sm:$0xff] %v636_v50  ;;  %v640_v52 = vld [vmem:[%s9756_s26 + $0xf40] sm:$0xff]  ;;  %v642_v53 = vld [vmem:[%s9756_s26 + $0xf48] sm:$0xff]  ;;  %639 = vst [vmem:[%s9764_s27 + $0x798] sm:$0xff] %v638_v51 }
  0x8d   : > { %641 = vst [vmem:[%s9764_s27 + $0x7a0] sm:$0xff] %v640_v52  ;;  %643 = vst [vmem:[%s9764_s27 + $0x7a8] sm:$0xff] %v642_v53  ;;  %v644_v54 = vld [vmem:[%s9756_s26 + $0xf60] sm:$0xff]  ;;  %v646_v55 = vld [vmem:[%s9756_s26 + $0xf68] sm:$0xff] }
  0x8e   : > { %v648_v56 = vld [vmem:[%s9756_s26 + $0xf80] sm:$0xff]  ;;  %645 = vst [vmem:[%s9764_s27 + $0x7b0] sm:$0xff] %v644_v54  ;;  %647 = vst [vmem:[%s9764_s27 + $0x7b8] sm:$0xff] %v646_v55  ;;  %v650_v57 = vld [vmem:[%s9756_s26 + $0xf88] sm:$0xff] }
  0x8f   : > { %649 = vst [vmem:[%s9764_s27 + $0x7c0] sm:$0xff] %v648_v56  ;;  %v652_v58 = vld [vmem:[%s9756_s26 + $0xfa0] sm:$0xff]  ;;  %v654_v59 = vld [vmem:[%s9756_s26 + $0xfa8] sm:$0xff]  ;;  %651 = vst [vmem:[%s9764_s27 + $0x7c8] sm:$0xff] %v650_v57 }
  0x90   : > { %653 = vst [vmem:[%s9764_s27 + $0x7d0] sm:$0xff] %v652_v58  ;;  %655 = vst [vmem:[%s9764_s27 + $0x7d8] sm:$0xff] %v654_v59  ;;  %v656_v60 = vld [vmem:[%s9756_s26 + $0xfc0] sm:$0xff]  ;;  %v658_v61 = vld [vmem:[%s9756_s26 + $0xfc8] sm:$0xff] }
  0x91   : > { %v660_v62 = vld [vmem:[%s9756_s26 + $0xfe0] sm:$0xff]  ;;  %657 = vst [vmem:[%s9764_s27 + $0x7e0] sm:$0xff] %v656_v60  ;;  %659 = vst [vmem:[%s9764_s27 + $0x7e8] sm:$0xff] %v658_v61  ;;  %v662_v63 = vld [vmem:[%s9756_s26 + $0xfe8] sm:$0xff] }
  0x92   : > { %661 = vst [vmem:[%s9764_s27 + $0x7f0] sm:$0xff] %v660_v62  ;;  %v664_v0 = vld [vmem:[%s9756_s26 + $0x1000] sm:$0xff]  ;;  %v666_v1 = vld [vmem:[%s9756_s26 + $0x1008] sm:$0xff]  ;;  %663 = vst [vmem:[%s9764_s27 + $0x7f8] sm:$0xff] %v662_v63 }
  0x93   : > { %665 = vst [vmem:[%s9764_s27 + $0x800] sm:$0xff] %v664_v0  ;;  %667 = vst [vmem:[%s9764_s27 + $0x808] sm:$0xff] %v666_v1  ;;  %v668_v2 = vld [vmem:[%s9756_s26 + $0x1020] sm:$0xff]  ;;  %v670_v3 = vld [vmem:[%s9756_s26 + $0x1028] sm:$0xff] }
  0x94   : > { %v672_v4 = vld [vmem:[%s9756_s26 + $0x1040] sm:$0xff]  ;;  %669 = vst [vmem:[%s9764_s27 + $0x810] sm:$0xff] %v668_v2  ;;  %671 = vst [vmem:[%s9764_s27 + $0x818] sm:$0xff] %v670_v3  ;;  %v674_v5 = vld [vmem:[%s9756_s26 + $0x1048] sm:$0xff] }
  0x95   : > { %673 = vst [vmem:[%s9764_s27 + $0x820] sm:$0xff] %v672_v4  ;;  %v676_v6 = vld [vmem:[%s9756_s26 + $0x1060] sm:$0xff]  ;;  %v678_v7 = vld [vmem:[%s9756_s26 + $0x1068] sm:$0xff]  ;;  %675 = vst [vmem:[%s9764_s27 + $0x828] sm:$0xff] %v674_v5 }
  0x96   : > { %677 = vst [vmem:[%s9764_s27 + $0x830] sm:$0xff] %v676_v6  ;;  %679 = vst [vmem:[%s9764_s27 + $0x838] sm:$0xff] %v678_v7  ;;  %v680_v8 = vld [vmem:[%s9756_s26 + $0x1080] sm:$0xff]  ;;  %v682_v9 = vld [vmem:[%s9756_s26 + $0x1088] sm:$0xff] }
  0x97   : > { %v684_v10 = vld [vmem:[%s9756_s26 + $0x10a0] sm:$0xff]  ;;  %681 = vst [vmem:[%s9764_s27 + $0x840] sm:$0xff] %v680_v8  ;;  %683 = vst [vmem:[%s9764_s27 + $0x848] sm:$0xff] %v682_v9  ;;  %v686_v11 = vld [vmem:[%s9756_s26 + $0x10a8] sm:$0xff] }
  0x98   : > { %685 = vst [vmem:[%s9764_s27 + $0x850] sm:$0xff] %v684_v10  ;;  %v688_v12 = vld [vmem:[%s9756_s26 + $0x10c0] sm:$0xff]  ;;  %v690_v13 = vld [vmem:[%s9756_s26 + $0x10c8] sm:$0xff]  ;;  %687 = vst [vmem:[%s9764_s27 + $0x858] sm:$0xff] %v686_v11 }
  0x99   : > { %689 = vst [vmem:[%s9764_s27 + $0x860] sm:$0xff] %v688_v12  ;;  %691 = vst [vmem:[%s9764_s27 + $0x868] sm:$0xff] %v690_v13  ;;  %v692_v14 = vld [vmem:[%s9756_s26 + $0x10e0] sm:$0xff]  ;;  %v694_v15 = vld [vmem:[%s9756_s26 + $0x10e8] sm:$0xff] }
  0x9a   : > { %v696_v16 = vld [vmem:[%s9756_s26 + $0x1100] sm:$0xff]  ;;  %693 = vst [vmem:[%s9764_s27 + $0x870] sm:$0xff] %v692_v14  ;;  %695 = vst [vmem:[%s9764_s27 + $0x878] sm:$0xff] %v694_v15  ;;  %v698_v17 = vld [vmem:[%s9756_s26 + $0x1108] sm:$0xff] }
  0x9b   : > { %697 = vst [vmem:[%s9764_s27 + $0x880] sm:$0xff] %v696_v16  ;;  %v700_v18 = vld [vmem:[%s9756_s26 + $0x1120] sm:$0xff]  ;;  %v702_v19 = vld [vmem:[%s9756_s26 + $0x1128] sm:$0xff]  ;;  %699 = vst [vmem:[%s9764_s27 + $0x888] sm:$0xff] %v698_v17 }
  0x9c   : > { %701 = vst [vmem:[%s9764_s27 + $0x890] sm:$0xff] %v700_v18  ;;  %703 = vst [vmem:[%s9764_s27 + $0x898] sm:$0xff] %v702_v19  ;;  %v704_v20 = vld [vmem:[%s9756_s26 + $0x1140] sm:$0xff]  ;;  %v706_v21 = vld [vmem:[%s9756_s26 + $0x1148] sm:$0xff] }
  0x9d   : > { %v708_v22 = vld [vmem:[%s9756_s26 + $0x1160] sm:$0xff]  ;;  %705 = vst [vmem:[%s9764_s27 + $0x8a0] sm:$0xff] %v704_v20  ;;  %707 = vst [vmem:[%s9764_s27 + $0x8a8] sm:$0xff] %v706_v21  ;;  %v710_v23 = vld [vmem:[%s9756_s26 + $0x1168] sm:$0xff] }
  0x9e   : > { %709 = vst [vmem:[%s9764_s27 + $0x8b0] sm:$0xff] %v708_v22  ;;  %v712_v24 = vld [vmem:[%s9756_s26 + $0x1180] sm:$0xff]  ;;  %v714_v25 = vld [vmem:[%s9756_s26 + $0x1188] sm:$0xff]  ;;  %711 = vst [vmem:[%s9764_s27 + $0x8b8] sm:$0xff] %v710_v23 }
  0x9f   : > { %713 = vst [vmem:[%s9764_s27 + $0x8c0] sm:$0xff] %v712_v24  ;;  %715 = vst [vmem:[%s9764_s27 + $0x8c8] sm:$0xff] %v714_v25  ;;  %v716_v26 = vld [vmem:[%s9756_s26 + $0x11a0] sm:$0xff]  ;;  %v718_v27 = vld [vmem:[%s9756_s26 + $0x11a8] sm:$0xff] }
  0xa0   : > { %v720_v28 = vld [vmem:[%s9756_s26 + $0x11c0] sm:$0xff]  ;;  %717 = vst [vmem:[%s9764_s27 + $0x8d0] sm:$0xff] %v716_v26  ;;  %719 = vst [vmem:[%s9764_s27 + $0x8d8] sm:$0xff] %v718_v27  ;;  %v722_v29 = vld [vmem:[%s9756_s26 + $0x11c8] sm:$0xff] }
  0xa1   : > { %721 = vst [vmem:[%s9764_s27 + $0x8e0] sm:$0xff] %v720_v28  ;;  %v724_v30 = vld [vmem:[%s9756_s26 + $0x11e0] sm:$0xff]  ;;  %v726_v31 = vld [vmem:[%s9756_s26 + $0x11e8] sm:$0xff]  ;;  %723 = vst [vmem:[%s9764_s27 + $0x8e8] sm:$0xff] %v722_v29 }
  0xa2   : > { %725 = vst [vmem:[%s9764_s27 + $0x8f0] sm:$0xff] %v724_v30  ;;  %727 = vst [vmem:[%s9764_s27 + $0x8f8] sm:$0xff] %v726_v31  ;;  %v728_v32 = vld [vmem:[%s9756_s26 + $0x1200] sm:$0xff]  ;;  %v730_v33 = vld [vmem:[%s9756_s26 + $0x1208] sm:$0xff] }
  0xa3   : > { %v732_v34 = vld [vmem:[%s9756_s26 + $0x1220] sm:$0xff]  ;;  %729 = vst [vmem:[%s9764_s27 + $0x900] sm:$0xff] %v728_v32  ;;  %731 = vst [vmem:[%s9764_s27 + $0x908] sm:$0xff] %v730_v33  ;;  %v734_v35 = vld [vmem:[%s9756_s26 + $0x1228] sm:$0xff] }
  0xa4   : > { %733 = vst [vmem:[%s9764_s27 + $0x910] sm:$0xff] %v732_v34  ;;  %v736_v36 = vld [vmem:[%s9756_s26 + $0x1240] sm:$0xff]  ;;  %v738_v37 = vld [vmem:[%s9756_s26 + $0x1248] sm:$0xff]  ;;  %735 = vst [vmem:[%s9764_s27 + $0x918] sm:$0xff] %v734_v35 }
  0xa5   : > { %737 = vst [vmem:[%s9764_s27 + $0x920] sm:$0xff] %v736_v36  ;;  %739 = vst [vmem:[%s9764_s27 + $0x928] sm:$0xff] %v738_v37  ;;  %v740_v38 = vld [vmem:[%s9756_s26 + $0x1260] sm:$0xff]  ;;  %v742_v39 = vld [vmem:[%s9756_s26 + $0x1268] sm:$0xff] }
  0xa6   : > { %v744_v40 = vld [vmem:[%s9756_s26 + $0x1280] sm:$0xff]  ;;  %741 = vst [vmem:[%s9764_s27 + $0x930] sm:$0xff] %v740_v38  ;;  %743 = vst [vmem:[%s9764_s27 + $0x938] sm:$0xff] %v742_v39  ;;  %v746_v41 = vld [vmem:[%s9756_s26 + $0x1288] sm:$0xff] }
  0xa7   : > { %745 = vst [vmem:[%s9764_s27 + $0x940] sm:$0xff] %v744_v40  ;;  %v748_v42 = vld [vmem:[%s9756_s26 + $0x12a0] sm:$0xff]  ;;  %v750_v43 = vld [vmem:[%s9756_s26 + $0x12a8] sm:$0xff]  ;;  %747 = vst [vmem:[%s9764_s27 + $0x948] sm:$0xff] %v746_v41 }
  0xa8   : > { %749 = vst [vmem:[%s9764_s27 + $0x950] sm:$0xff] %v748_v42  ;;  %751 = vst [vmem:[%s9764_s27 + $0x958] sm:$0xff] %v750_v43  ;;  %v752_v44 = vld [vmem:[%s9756_s26 + $0x12c0] sm:$0xff]  ;;  %v754_v45 = vld [vmem:[%s9756_s26 + $0x12c8] sm:$0xff] }
  0xa9   : > { %v756_v46 = vld [vmem:[%s9756_s26 + $0x12e0] sm:$0xff]  ;;  %753 = vst [vmem:[%s9764_s27 + $0x960] sm:$0xff] %v752_v44  ;;  %755 = vst [vmem:[%s9764_s27 + $0x968] sm:$0xff] %v754_v45  ;;  %v758_v47 = vld [vmem:[%s9756_s26 + $0x12e8] sm:$0xff] }
  0xaa   : > { %757 = vst [vmem:[%s9764_s27 + $0x970] sm:$0xff] %v756_v46  ;;  %v760_v48 = vld [vmem:[%s9756_s26 + $0x1300] sm:$0xff]  ;;  %v762_v49 = vld [vmem:[%s9756_s26 + $0x1308] sm:$0xff]  ;;  %759 = vst [vmem:[%s9764_s27 + $0x978] sm:$0xff] %v758_v47 }
  0xab   : > { %761 = vst [vmem:[%s9764_s27 + $0x980] sm:$0xff] %v760_v48  ;;  %763 = vst [vmem:[%s9764_s27 + $0x988] sm:$0xff] %v762_v49  ;;  %v764_v50 = vld [vmem:[%s9756_s26 + $0x1320] sm:$0xff]  ;;  %v766_v51 = vld [vmem:[%s9756_s26 + $0x1328] sm:$0xff] }
  0xac   : > { %v768_v52 = vld [vmem:[%s9756_s26 + $0x1340] sm:$0xff]  ;;  %765 = vst [vmem:[%s9764_s27 + $0x990] sm:$0xff] %v764_v50  ;;  %767 = vst [vmem:[%s9764_s27 + $0x998] sm:$0xff] %v766_v51  ;;  %v770_v53 = vld [vmem:[%s9756_s26 + $0x1348] sm:$0xff] }
  0xad   : > { %769 = vst [vmem:[%s9764_s27 + $0x9a0] sm:$0xff] %v768_v52  ;;  %v772_v54 = vld [vmem:[%s9756_s26 + $0x1360] sm:$0xff]  ;;  %v774_v55 = vld [vmem:[%s9756_s26 + $0x1368] sm:$0xff]  ;;  %771 = vst [vmem:[%s9764_s27 + $0x9a8] sm:$0xff] %v770_v53 }
  0xae   : > { %773 = vst [vmem:[%s9764_s27 + $0x9b0] sm:$0xff] %v772_v54  ;;  %775 = vst [vmem:[%s9764_s27 + $0x9b8] sm:$0xff] %v774_v55  ;;  %v776_v56 = vld [vmem:[%s9756_s26 + $0x1380] sm:$0xff]  ;;  %v778_v57 = vld [vmem:[%s9756_s26 + $0x1388] sm:$0xff] }
  0xaf   : > { %v780_v58 = vld [vmem:[%s9756_s26 + $0x13a0] sm:$0xff]  ;;  %777 = vst [vmem:[%s9764_s27 + $0x9c0] sm:$0xff] %v776_v56  ;;  %779 = vst [vmem:[%s9764_s27 + $0x9c8] sm:$0xff] %v778_v57  ;;  %v782_v59 = vld [vmem:[%s9756_s26 + $0x13a8] sm:$0xff] }
  0xb0   : > { %781 = vst [vmem:[%s9764_s27 + $0x9d0] sm:$0xff] %v780_v58  ;;  %v784_v60 = vld [vmem:[%s9756_s26 + $0x13c0] sm:$0xff]  ;;  %v786_v61 = vld [vmem:[%s9756_s26 + $0x13c8] sm:$0xff]  ;;  %783 = vst [vmem:[%s9764_s27 + $0x9d8] sm:$0xff] %v782_v59 }
  0xb1   : > { %785 = vst [vmem:[%s9764_s27 + $0x9e0] sm:$0xff] %v784_v60  ;;  %787 = vst [vmem:[%s9764_s27 + $0x9e8] sm:$0xff] %v786_v61  ;;  %v788_v62 = vld [vmem:[%s9756_s26 + $0x13e0] sm:$0xff]  ;;  %v790_v63 = vld [vmem:[%s9756_s26 + $0x13e8] sm:$0xff] }
  0xb2   : > { %v792_v0 = vld [vmem:[%s9756_s26 + $0x1400] sm:$0xff]  ;;  %789 = vst [vmem:[%s9764_s27 + $0x9f0] sm:$0xff] %v788_v62  ;;  %791 = vst [vmem:[%s9764_s27 + $0x9f8] sm:$0xff] %v790_v63  ;;  %v794_v1 = vld [vmem:[%s9756_s26 + $0x1408] sm:$0xff] }
  0xb3   : > { %793 = vst [vmem:[%s9764_s27 + $0xa00] sm:$0xff] %v792_v0  ;;  %v796_v2 = vld [vmem:[%s9756_s26 + $0x1420] sm:$0xff]  ;;  %v798_v3 = vld [vmem:[%s9756_s26 + $0x1428] sm:$0xff]  ;;  %795 = vst [vmem:[%s9764_s27 + $0xa08] sm:$0xff] %v794_v1 }
  0xb4   : > { %797 = vst [vmem:[%s9764_s27 + $0xa10] sm:$0xff] %v796_v2  ;;  %799 = vst [vmem:[%s9764_s27 + $0xa18] sm:$0xff] %v798_v3  ;;  %v800_v4 = vld [vmem:[%s9756_s26 + $0x1440] sm:$0xff]  ;;  %v802_v5 = vld [vmem:[%s9756_s26 + $0x1448] sm:$0xff] }
  0xb5   : > { %v804_v6 = vld [vmem:[%s9756_s26 + $0x1460] sm:$0xff]  ;;  %801 = vst [vmem:[%s9764_s27 + $0xa20] sm:$0xff] %v800_v4  ;;  %803 = vst [vmem:[%s9764_s27 + $0xa28] sm:$0xff] %v802_v5  ;;  %v806_v7 = vld [vmem:[%s9756_s26 + $0x1468] sm:$0xff] }
  0xb6   : > { %805 = vst [vmem:[%s9764_s27 + $0xa30] sm:$0xff] %v804_v6  ;;  %v808_v8 = vld [vmem:[%s9756_s26 + $0x1480] sm:$0xff]  ;;  %v810_v9 = vld [vmem:[%s9756_s26 + $0x1488] sm:$0xff]  ;;  %807 = vst [vmem:[%s9764_s27 + $0xa38] sm:$0xff] %v806_v7 }
  0xb7   : > { %809 = vst [vmem:[%s9764_s27 + $0xa40] sm:$0xff] %v808_v8  ;;  %811 = vst [vmem:[%s9764_s27 + $0xa48] sm:$0xff] %v810_v9  ;;  %v812_v10 = vld [vmem:[%s9756_s26 + $0x14a0] sm:$0xff]  ;;  %v814_v11 = vld [vmem:[%s9756_s26 + $0x14a8] sm:$0xff] }
  0xb8   : > { %v816_v12 = vld [vmem:[%s9756_s26 + $0x14c0] sm:$0xff]  ;;  %813 = vst [vmem:[%s9764_s27 + $0xa50] sm:$0xff] %v812_v10  ;;  %815 = vst [vmem:[%s9764_s27 + $0xa58] sm:$0xff] %v814_v11  ;;  %v818_v13 = vld [vmem:[%s9756_s26 + $0x14c8] sm:$0xff] }
  0xb9   : > { %817 = vst [vmem:[%s9764_s27 + $0xa60] sm:$0xff] %v816_v12  ;;  %v820_v14 = vld [vmem:[%s9756_s26 + $0x14e0] sm:$0xff]  ;;  %v822_v15 = vld [vmem:[%s9756_s26 + $0x14e8] sm:$0xff]  ;;  %819 = vst [vmem:[%s9764_s27 + $0xa68] sm:$0xff] %v818_v13 }
  0xba   : > { %821 = vst [vmem:[%s9764_s27 + $0xa70] sm:$0xff] %v820_v14  ;;  %823 = vst [vmem:[%s9764_s27 + $0xa78] sm:$0xff] %v822_v15  ;;  %v824_v16 = vld [vmem:[%s9756_s26 + $0x1500] sm:$0xff]  ;;  %v826_v17 = vld [vmem:[%s9756_s26 + $0x1508] sm:$0xff] }
  0xbb   : > { %v828_v18 = vld [vmem:[%s9756_s26 + $0x1520] sm:$0xff]  ;;  %825 = vst [vmem:[%s9764_s27 + $0xa80] sm:$0xff] %v824_v16  ;;  %827 = vst [vmem:[%s9764_s27 + $0xa88] sm:$0xff] %v826_v17  ;;  %v830_v19 = vld [vmem:[%s9756_s26 + $0x1528] sm:$0xff] }
  0xbc   : > { %829 = vst [vmem:[%s9764_s27 + $0xa90] sm:$0xff] %v828_v18  ;;  %v832_v20 = vld [vmem:[%s9756_s26 + $0x1540] sm:$0xff]  ;;  %v834_v21 = vld [vmem:[%s9756_s26 + $0x1548] sm:$0xff]  ;;  %831 = vst [vmem:[%s9764_s27 + $0xa98] sm:$0xff] %v830_v19 }
  0xbd   : > { %833 = vst [vmem:[%s9764_s27 + $0xaa0] sm:$0xff] %v832_v20  ;;  %835 = vst [vmem:[%s9764_s27 + $0xaa8] sm:$0xff] %v834_v21  ;;  %v836_v22 = vld [vmem:[%s9756_s26 + $0x1560] sm:$0xff]  ;;  %v838_v23 = vld [vmem:[%s9756_s26 + $0x1568] sm:$0xff] }
  0xbe   : > { %v840_v24 = vld [vmem:[%s9756_s26 + $0x1580] sm:$0xff]  ;;  %837 = vst [vmem:[%s9764_s27 + $0xab0] sm:$0xff] %v836_v22  ;;  %839 = vst [vmem:[%s9764_s27 + $0xab8] sm:$0xff] %v838_v23  ;;  %v842_v25 = vld [vmem:[%s9756_s26 + $0x1588] sm:$0xff] }
  0xbf   : > { %841 = vst [vmem:[%s9764_s27 + $0xac0] sm:$0xff] %v840_v24  ;;  %v844_v26 = vld [vmem:[%s9756_s26 + $0x15a0] sm:$0xff]  ;;  %v846_v27 = vld [vmem:[%s9756_s26 + $0x15a8] sm:$0xff]  ;;  %843 = vst [vmem:[%s9764_s27 + $0xac8] sm:$0xff] %v842_v25 }
  0xc0   : > { %845 = vst [vmem:[%s9764_s27 + $0xad0] sm:$0xff] %v844_v26  ;;  %847 = vst [vmem:[%s9764_s27 + $0xad8] sm:$0xff] %v846_v27  ;;  %v848_v28 = vld [vmem:[%s9756_s26 + $0x15c0] sm:$0xff]  ;;  %v850_v29 = vld [vmem:[%s9756_s26 + $0x15c8] sm:$0xff] }
  0xc1   : > { %v852_v30 = vld [vmem:[%s9756_s26 + $0x15e0] sm:$0xff]  ;;  %849 = vst [vmem:[%s9764_s27 + $0xae0] sm:$0xff] %v848_v28  ;;  %851 = vst [vmem:[%s9764_s27 + $0xae8] sm:$0xff] %v850_v29  ;;  %v854_v31 = vld [vmem:[%s9756_s26 + $0x15e8] sm:$0xff] }
  0xc2   : > { %853 = vst [vmem:[%s9764_s27 + $0xaf0] sm:$0xff] %v852_v30  ;;  %v856_v32 = vld [vmem:[%s9756_s26 + $0x1600] sm:$0xff]  ;;  %v858_v33 = vld [vmem:[%s9756_s26 + $0x1608] sm:$0xff]  ;;  %855 = vst [vmem:[%s9764_s27 + $0xaf8] sm:$0xff] %v854_v31 }
  0xc3   : > { %857 = vst [vmem:[%s9764_s27 + $0xb00] sm:$0xff] %v856_v32  ;;  %859 = vst [vmem:[%s9764_s27 + $0xb08] sm:$0xff] %v858_v33  ;;  %v860_v34 = vld [vmem:[%s9756_s26 + $0x1620] sm:$0xff]  ;;  %v862_v35 = vld [vmem:[%s9756_s26 + $0x1628] sm:$0xff] }
  0xc4   : > { %v864_v36 = vld [vmem:[%s9756_s26 + $0x1640] sm:$0xff]  ;;  %861 = vst [vmem:[%s9764_s27 + $0xb10] sm:$0xff] %v860_v34  ;;  %863 = vst [vmem:[%s9764_s27 + $0xb18] sm:$0xff] %v862_v35  ;;  %v866_v37 = vld [vmem:[%s9756_s26 + $0x1648] sm:$0xff] }
  0xc5   : > { %865 = vst [vmem:[%s9764_s27 + $0xb20] sm:$0xff] %v864_v36  ;;  %v868_v38 = vld [vmem:[%s9756_s26 + $0x1660] sm:$0xff]  ;;  %v870_v39 = vld [vmem:[%s9756_s26 + $0x1668] sm:$0xff]  ;;  %867 = vst [vmem:[%s9764_s27 + $0xb28] sm:$0xff] %v866_v37 }
  0xc6   : > { %869 = vst [vmem:[%s9764_s27 + $0xb30] sm:$0xff] %v868_v38  ;;  %871 = vst [vmem:[%s9764_s27 + $0xb38] sm:$0xff] %v870_v39  ;;  %v872_v40 = vld [vmem:[%s9756_s26 + $0x1680] sm:$0xff]  ;;  %v874_v41 = vld [vmem:[%s9756_s26 + $0x1688] sm:$0xff] }
  0xc7   : > { %v876_v42 = vld [vmem:[%s9756_s26 + $0x16a0] sm:$0xff]  ;;  %873 = vst [vmem:[%s9764_s27 + $0xb40] sm:$0xff] %v872_v40  ;;  %875 = vst [vmem:[%s9764_s27 + $0xb48] sm:$0xff] %v874_v41  ;;  %v878_v43 = vld [vmem:[%s9756_s26 + $0x16a8] sm:$0xff] }
  0xc8   : > { %877 = vst [vmem:[%s9764_s27 + $0xb50] sm:$0xff] %v876_v42  ;;  %v880_v44 = vld [vmem:[%s9756_s26 + $0x16c0] sm:$0xff]  ;;  %v882_v45 = vld [vmem:[%s9756_s26 + $0x16c8] sm:$0xff]  ;;  %879 = vst [vmem:[%s9764_s27 + $0xb58] sm:$0xff] %v878_v43 }
  0xc9   : > { %881 = vst [vmem:[%s9764_s27 + $0xb60] sm:$0xff] %v880_v44  ;;  %883 = vst [vmem:[%s9764_s27 + $0xb68] sm:$0xff] %v882_v45  ;;  %v884_v46 = vld [vmem:[%s9756_s26 + $0x16e0] sm:$0xff]  ;;  %v886_v47 = vld [vmem:[%s9756_s26 + $0x16e8] sm:$0xff] }
  0xca   : > { %v888_v48 = vld [vmem:[%s9756_s26 + $0x1700] sm:$0xff]  ;;  %885 = vst [vmem:[%s9764_s27 + $0xb70] sm:$0xff] %v884_v46  ;;  %887 = vst [vmem:[%s9764_s27 + $0xb78] sm:$0xff] %v886_v47  ;;  %v890_v49 = vld [vmem:[%s9756_s26 + $0x1708] sm:$0xff] }
  0xcb   : > { %889 = vst [vmem:[%s9764_s27 + $0xb80] sm:$0xff] %v888_v48  ;;  %v892_v50 = vld [vmem:[%s9756_s26 + $0x1720] sm:$0xff]  ;;  %v894_v51 = vld [vmem:[%s9756_s26 + $0x1728] sm:$0xff]  ;;  %891 = vst [vmem:[%s9764_s27 + $0xb88] sm:$0xff] %v890_v49 }
  0xcc   : > { %893 = vst [vmem:[%s9764_s27 + $0xb90] sm:$0xff] %v892_v50  ;;  %895 = vst [vmem:[%s9764_s27 + $0xb98] sm:$0xff] %v894_v51  ;;  %v896_v52 = vld [vmem:[%s9756_s26 + $0x1740] sm:$0xff]  ;;  %v898_v53 = vld [vmem:[%s9756_s26 + $0x1748] sm:$0xff] }
  0xcd   : > { %v900_v54 = vld [vmem:[%s9756_s26 + $0x1760] sm:$0xff]  ;;  %897 = vst [vmem:[%s9764_s27 + $0xba0] sm:$0xff] %v896_v52  ;;  %899 = vst [vmem:[%s9764_s27 + $0xba8] sm:$0xff] %v898_v53  ;;  %v902_v55 = vld [vmem:[%s9756_s26 + $0x1768] sm:$0xff] }
  0xce   : > { %901 = vst [vmem:[%s9764_s27 + $0xbb0] sm:$0xff] %v900_v54  ;;  %v904_v56 = vld [vmem:[%s9756_s26 + $0x1780] sm:$0xff]  ;;  %v906_v57 = vld [vmem:[%s9756_s26 + $0x1788] sm:$0xff]  ;;  %903 = vst [vmem:[%s9764_s27 + $0xbb8] sm:$0xff] %v902_v55 }
  0xcf   : > { %905 = vst [vmem:[%s9764_s27 + $0xbc0] sm:$0xff] %v904_v56  ;;  %907 = vst [vmem:[%s9764_s27 + $0xbc8] sm:$0xff] %v906_v57  ;;  %v908_v58 = vld [vmem:[%s9756_s26 + $0x17a0] sm:$0xff]  ;;  %v910_v59 = vld [vmem:[%s9756_s26 + $0x17a8] sm:$0xff] }
  0xd0   : > { %v912_v60 = vld [vmem:[%s9756_s26 + $0x17c0] sm:$0xff]  ;;  %909 = vst [vmem:[%s9764_s27 + $0xbd0] sm:$0xff] %v908_v58  ;;  %911 = vst [vmem:[%s9764_s27 + $0xbd8] sm:$0xff] %v910_v59  ;;  %v914_v61 = vld [vmem:[%s9756_s26 + $0x17c8] sm:$0xff] }
  0xd1   : > { %913 = vst [vmem:[%s9764_s27 + $0xbe0] sm:$0xff] %v912_v60  ;;  %v916_v62 = vld [vmem:[%s9756_s26 + $0x17e0] sm:$0xff]  ;;  %v918_v63 = vld [vmem:[%s9756_s26 + $0x17e8] sm:$0xff]  ;;  %915 = vst [vmem:[%s9764_s27 + $0xbe8] sm:$0xff] %v914_v61 }
  0xd2   : > { %917 = vst [vmem:[%s9764_s27 + $0xbf0] sm:$0xff] %v916_v62  ;;  %919 = vst [vmem:[%s9764_s27 + $0xbf8] sm:$0xff] %v918_v63  ;;  %v920_v0 = vld [vmem:[%s9756_s26 + $0x1800] sm:$0xff]  ;;  %v922_v1 = vld [vmem:[%s9756_s26 + $0x1808] sm:$0xff] }
  0xd3   : > { %v924_v2 = vld [vmem:[%s9756_s26 + $0x1820] sm:$0xff]  ;;  %921 = vst [vmem:[%s9764_s27 + $0xc00] sm:$0xff] %v920_v0  ;;  %923 = vst [vmem:[%s9764_s27 + $0xc08] sm:$0xff] %v922_v1  ;;  %v926_v3 = vld [vmem:[%s9756_s26 + $0x1828] sm:$0xff] }
  0xd4   : > { %925 = vst [vmem:[%s9764_s27 + $0xc10] sm:$0xff] %v924_v2  ;;  %v928_v4 = vld [vmem:[%s9756_s26 + $0x1840] sm:$0xff]  ;;  %v930_v5 = vld [vmem:[%s9756_s26 + $0x1848] sm:$0xff]  ;;  %927 = vst [vmem:[%s9764_s27 + $0xc18] sm:$0xff] %v926_v3 }
  0xd5   : > { %929 = vst [vmem:[%s9764_s27 + $0xc20] sm:$0xff] %v928_v4  ;;  %931 = vst [vmem:[%s9764_s27 + $0xc28] sm:$0xff] %v930_v5  ;;  %v932_v6 = vld [vmem:[%s9756_s26 + $0x1860] sm:$0xff]  ;;  %v934_v7 = vld [vmem:[%s9756_s26 + $0x1868] sm:$0xff] }
  0xd6   : > { %v936_v8 = vld [vmem:[%s9756_s26 + $0x1880] sm:$0xff]  ;;  %933 = vst [vmem:[%s9764_s27 + $0xc30] sm:$0xff] %v932_v6  ;;  %935 = vst [vmem:[%s9764_s27 + $0xc38] sm:$0xff] %v934_v7  ;;  %v938_v9 = vld [vmem:[%s9756_s26 + $0x1888] sm:$0xff] }
  0xd7   : > { %937 = vst [vmem:[%s9764_s27 + $0xc40] sm:$0xff] %v936_v8  ;;  %v940_v10 = vld [vmem:[%s9756_s26 + $0x18a0] sm:$0xff]  ;;  %v942_v11 = vld [vmem:[%s9756_s26 + $0x18a8] sm:$0xff]  ;;  %939 = vst [vmem:[%s9764_s27 + $0xc48] sm:$0xff] %v938_v9 }
  0xd8   : > { %941 = vst [vmem:[%s9764_s27 + $0xc50] sm:$0xff] %v940_v10  ;;  %943 = vst [vmem:[%s9764_s27 + $0xc58] sm:$0xff] %v942_v11  ;;  %v944_v12 = vld [vmem:[%s9756_s26 + $0x18c0] sm:$0xff]  ;;  %v946_v13 = vld [vmem:[%s9756_s26 + $0x18c8] sm:$0xff] }
  0xd9   : > { %v948_v14 = vld [vmem:[%s9756_s26 + $0x18e0] sm:$0xff]  ;;  %945 = vst [vmem:[%s9764_s27 + $0xc60] sm:$0xff] %v944_v12  ;;  %947 = vst [vmem:[%s9764_s27 + $0xc68] sm:$0xff] %v946_v13  ;;  %v950_v15 = vld [vmem:[%s9756_s26 + $0x18e8] sm:$0xff] }
  0xda   : > { %949 = vst [vmem:[%s9764_s27 + $0xc70] sm:$0xff] %v948_v14  ;;  %v952_v16 = vld [vmem:[%s9756_s26 + $0x1900] sm:$0xff]  ;;  %v954_v17 = vld [vmem:[%s9756_s26 + $0x1908] sm:$0xff]  ;;  %951 = vst [vmem:[%s9764_s27 + $0xc78] sm:$0xff] %v950_v15 }
  0xdb   : > { %953 = vst [vmem:[%s9764_s27 + $0xc80] sm:$0xff] %v952_v16  ;;  %955 = vst [vmem:[%s9764_s27 + $0xc88] sm:$0xff] %v954_v17  ;;  %v956_v18 = vld [vmem:[%s9756_s26 + $0x1920] sm:$0xff]  ;;  %v958_v19 = vld [vmem:[%s9756_s26 + $0x1928] sm:$0xff] }
  0xdc   : > { %v960_v20 = vld [vmem:[%s9756_s26 + $0x1940] sm:$0xff]  ;;  %957 = vst [vmem:[%s9764_s27 + $0xc90] sm:$0xff] %v956_v18  ;;  %959 = vst [vmem:[%s9764_s27 + $0xc98] sm:$0xff] %v958_v19  ;;  %v962_v21 = vld [vmem:[%s9756_s26 + $0x1948] sm:$0xff] }
  0xdd   : > { %961 = vst [vmem:[%s9764_s27 + $0xca0] sm:$0xff] %v960_v20  ;;  %v964_v22 = vld [vmem:[%s9756_s26 + $0x1960] sm:$0xff]  ;;  %v966_v23 = vld [vmem:[%s9756_s26 + $0x1968] sm:$0xff]  ;;  %963 = vst [vmem:[%s9764_s27 + $0xca8] sm:$0xff] %v962_v21 }
  0xde   : > { %965 = vst [vmem:[%s9764_s27 + $0xcb0] sm:$0xff] %v964_v22  ;;  %967 = vst [vmem:[%s9764_s27 + $0xcb8] sm:$0xff] %v966_v23  ;;  %v968_v24 = vld [vmem:[%s9756_s26 + $0x1980] sm:$0xff]  ;;  %v970_v25 = vld [vmem:[%s9756_s26 + $0x1988] sm:$0xff] }
  0xdf   : > { %v972_v26 = vld [vmem:[%s9756_s26 + $0x19a0] sm:$0xff]  ;;  %969 = vst [vmem:[%s9764_s27 + $0xcc0] sm:$0xff] %v968_v24  ;;  %971 = vst [vmem:[%s9764_s27 + $0xcc8] sm:$0xff] %v970_v25  ;;  %v974_v27 = vld [vmem:[%s9756_s26 + $0x19a8] sm:$0xff] }
  0xe0   : > { %973 = vst [vmem:[%s9764_s27 + $0xcd0] sm:$0xff] %v972_v26  ;;  %v976_v28 = vld [vmem:[%s9756_s26 + $0x19c0] sm:$0xff]  ;;  %v978_v29 = vld [vmem:[%s9756_s26 + $0x19c8] sm:$0xff]  ;;  %975 = vst [vmem:[%s9764_s27 + $0xcd8] sm:$0xff] %v974_v27 }
  0xe1   : > { %977 = vst [vmem:[%s9764_s27 + $0xce0] sm:$0xff] %v976_v28  ;;  %979 = vst [vmem:[%s9764_s27 + $0xce8] sm:$0xff] %v978_v29  ;;  %v980_v30 = vld [vmem:[%s9756_s26 + $0x19e0] sm:$0xff]  ;;  %v982_v31 = vld [vmem:[%s9756_s26 + $0x19e8] sm:$0xff] }
  0xe2   : > { %v984_v32 = vld [vmem:[%s9756_s26 + $0x1a00] sm:$0xff]  ;;  %981 = vst [vmem:[%s9764_s27 + $0xcf0] sm:$0xff] %v980_v30  ;;  %983 = vst [vmem:[%s9764_s27 + $0xcf8] sm:$0xff] %v982_v31  ;;  %v986_v33 = vld [vmem:[%s9756_s26 + $0x1a08] sm:$0xff] }
  0xe3   : > { %985 = vst [vmem:[%s9764_s27 + $0xd00] sm:$0xff] %v984_v32  ;;  %v988_v34 = vld [vmem:[%s9756_s26 + $0x1a20] sm:$0xff]  ;;  %v990_v35 = vld [vmem:[%s9756_s26 + $0x1a28] sm:$0xff]  ;;  %987 = vst [vmem:[%s9764_s27 + $0xd08] sm:$0xff] %v986_v33 }
  0xe4   : > { %989 = vst [vmem:[%s9764_s27 + $0xd10] sm:$0xff] %v988_v34  ;;  %991 = vst [vmem:[%s9764_s27 + $0xd18] sm:$0xff] %v990_v35  ;;  %v992_v36 = vld [vmem:[%s9756_s26 + $0x1a40] sm:$0xff]  ;;  %v994_v37 = vld [vmem:[%s9756_s26 + $0x1a48] sm:$0xff] }
  0xe5   : > { %v996_v38 = vld [vmem:[%s9756_s26 + $0x1a60] sm:$0xff]  ;;  %993 = vst [vmem:[%s9764_s27 + $0xd20] sm:$0xff] %v992_v36  ;;  %995 = vst [vmem:[%s9764_s27 + $0xd28] sm:$0xff] %v994_v37  ;;  %v998_v39 = vld [vmem:[%s9756_s26 + $0x1a68] sm:$0xff] }
  0xe6   : > { %997 = vst [vmem:[%s9764_s27 + $0xd30] sm:$0xff] %v996_v38  ;;  %v1000_v40 = vld [vmem:[%s9756_s26 + $0x1a80] sm:$0xff]  ;;  %v1002_v41 = vld [vmem:[%s9756_s26 + $0x1a88] sm:$0xff]  ;;  %999 = vst [vmem:[%s9764_s27 + $0xd38] sm:$0xff] %v998_v39 }
  0xe7   : > { %1001 = vst [vmem:[%s9764_s27 + $0xd40] sm:$0xff] %v1000_v40  ;;  %1003 = vst [vmem:[%s9764_s27 + $0xd48] sm:$0xff] %v1002_v41  ;;  %v1004_v42 = vld [vmem:[%s9756_s26 + $0x1aa0] sm:$0xff]  ;;  %v1006_v43 = vld [vmem:[%s9756_s26 + $0x1aa8] sm:$0xff] }
  0xe8   : > { %v1008_v44 = vld [vmem:[%s9756_s26 + $0x1ac0] sm:$0xff]  ;;  %1005 = vst [vmem:[%s9764_s27 + $0xd50] sm:$0xff] %v1004_v42  ;;  %1007 = vst [vmem:[%s9764_s27 + $0xd58] sm:$0xff] %v1006_v43  ;;  %v1010_v45 = vld [vmem:[%s9756_s26 + $0x1ac8] sm:$0xff] }
  0xe9   : > { %1009 = vst [vmem:[%s9764_s27 + $0xd60] sm:$0xff] %v1008_v44  ;;  %v1012_v46 = vld [vmem:[%s9756_s26 + $0x1ae0] sm:$0xff]  ;;  %v1014_v47 = vld [vmem:[%s9756_s26 + $0x1ae8] sm:$0xff]  ;;  %1011 = vst [vmem:[%s9764_s27 + $0xd68] sm:$0xff] %v1010_v45 }
  0xea   : > { %1013 = vst [vmem:[%s9764_s27 + $0xd70] sm:$0xff] %v1012_v46  ;;  %1015 = vst [vmem:[%s9764_s27 + $0xd78] sm:$0xff] %v1014_v47  ;;  %v1016_v48 = vld [vmem:[%s9756_s26 + $0x1b00] sm:$0xff]  ;;  %v1018_v49 = vld [vmem:[%s9756_s26 + $0x1b08] sm:$0xff] }
  0xeb   : > { %v1020_v50 = vld [vmem:[%s9756_s26 + $0x1b20] sm:$0xff]  ;;  %1017 = vst [vmem:[%s9764_s27 + $0xd80] sm:$0xff] %v1016_v48  ;;  %1019 = vst [vmem:[%s9764_s27 + $0xd88] sm:$0xff] %v1018_v49  ;;  %v1022_v51 = vld [vmem:[%s9756_s26 + $0x1b28] sm:$0xff] }
  0xec   : > { %1021 = vst [vmem:[%s9764_s27 + $0xd90] sm:$0xff] %v1020_v50  ;;  %v1024_v52 = vld [vmem:[%s9756_s26 + $0x1b40] sm:$0xff]  ;;  %v1026_v53 = vld [vmem:[%s9756_s26 + $0x1b48] sm:$0xff]  ;;  %1023 = vst [vmem:[%s9764_s27 + $0xd98] sm:$0xff] %v1022_v51 }
  0xed   : > { %1025 = vst [vmem:[%s9764_s27 + $0xda0] sm:$0xff] %v1024_v52  ;;  %1027 = vst [vmem:[%s9764_s27 + $0xda8] sm:$0xff] %v1026_v53  ;;  %v1028_v54 = vld [vmem:[%s9756_s26 + $0x1b60] sm:$0xff]  ;;  %v1030_v55 = vld [vmem:[%s9756_s26 + $0x1b68] sm:$0xff] }
  0xee   : > { %v1032_v56 = vld [vmem:[%s9756_s26 + $0x1b80] sm:$0xff]  ;;  %1029 = vst [vmem:[%s9764_s27 + $0xdb0] sm:$0xff] %v1028_v54  ;;  %1031 = vst [vmem:[%s9764_s27 + $0xdb8] sm:$0xff] %v1030_v55  ;;  %v1034_v57 = vld [vmem:[%s9756_s26 + $0x1b88] sm:$0xff] }
  0xef   : > { %1033 = vst [vmem:[%s9764_s27 + $0xdc0] sm:$0xff] %v1032_v56  ;;  %v1036_v58 = vld [vmem:[%s9756_s26 + $0x1ba0] sm:$0xff]  ;;  %v1038_v59 = vld [vmem:[%s9756_s26 + $0x1ba8] sm:$0xff]  ;;  %1035 = vst [vmem:[%s9764_s27 + $0xdc8] sm:$0xff] %v1034_v57 }
  0xf0   : > { %1037 = vst [vmem:[%s9764_s27 + $0xdd0] sm:$0xff] %v1036_v58  ;;  %1039 = vst [vmem:[%s9764_s27 + $0xdd8] sm:$0xff] %v1038_v59  ;;  %v1040_v60 = vld [vmem:[%s9756_s26 + $0x1bc0] sm:$0xff]  ;;  %v1042_v61 = vld [vmem:[%s9756_s26 + $0x1bc8] sm:$0xff] }
  0xf1   : > { %v1044_v62 = vld [vmem:[%s9756_s26 + $0x1be0] sm:$0xff]  ;;  %1041 = vst [vmem:[%s9764_s27 + $0xde0] sm:$0xff] %v1040_v60  ;;  %1043 = vst [vmem:[%s9764_s27 + $0xde8] sm:$0xff] %v1042_v61  ;;  %v1046_v63 = vld [vmem:[%s9756_s26 + $0x1be8] sm:$0xff] }
  0xf2   : > { %1045 = vst [vmem:[%s9764_s27 + $0xdf0] sm:$0xff] %v1044_v62  ;;  %v1048_v0 = vld [vmem:[%s9756_s26 + $0x1c00] sm:$0xff]  ;;  %v1050_v1 = vld [vmem:[%s9756_s26 + $0x1c08] sm:$0xff]  ;;  %1047 = vst [vmem:[%s9764_s27 + $0xdf8] sm:$0xff] %v1046_v63 }
  0xf3   : > { %1049 = vst [vmem:[%s9764_s27 + $0xe00] sm:$0xff] %v1048_v0  ;;  %1051 = vst [vmem:[%s9764_s27 + $0xe08] sm:$0xff] %v1050_v1  ;;  %v1052_v2 = vld [vmem:[%s9756_s26 + $0x1c20] sm:$0xff]  ;;  %v1054_v3 = vld [vmem:[%s9756_s26 + $0x1c28] sm:$0xff] }
  0xf4   : > { %v1056_v4 = vld [vmem:[%s9756_s26 + $0x1c40] sm:$0xff]  ;;  %1053 = vst [vmem:[%s9764_s27 + $0xe10] sm:$0xff] %v1052_v2  ;;  %1055 = vst [vmem:[%s9764_s27 + $0xe18] sm:$0xff] %v1054_v3  ;;  %v1058_v5 = vld [vmem:[%s9756_s26 + $0x1c48] sm:$0xff] }
  0xf5   : > { %1057 = vst [vmem:[%s9764_s27 + $0xe20] sm:$0xff] %v1056_v4  ;;  %v1060_v6 = vld [vmem:[%s9756_s26 + $0x1c60] sm:$0xff]  ;;  %v1062_v7 = vld [vmem:[%s9756_s26 + $0x1c68] sm:$0xff]  ;;  %1059 = vst [vmem:[%s9764_s27 + $0xe28] sm:$0xff] %v1058_v5 }
  0xf6   : > { %1061 = vst [vmem:[%s9764_s27 + $0xe30] sm:$0xff] %v1060_v6  ;;  %1063 = vst [vmem:[%s9764_s27 + $0xe38] sm:$0xff] %v1062_v7  ;;  %v1064_v8 = vld [vmem:[%s9756_s26 + $0x1c80] sm:$0xff]  ;;  %v1066_v9 = vld [vmem:[%s9756_s26 + $0x1c88] sm:$0xff] }
  0xf7   : > { %v1068_v10 = vld [vmem:[%s9756_s26 + $0x1ca0] sm:$0xff]  ;;  %1065 = vst [vmem:[%s9764_s27 + $0xe40] sm:$0xff] %v1064_v8  ;;  %1067 = vst [vmem:[%s9764_s27 + $0xe48] sm:$0xff] %v1066_v9  ;;  %v1070_v11 = vld [vmem:[%s9756_s26 + $0x1ca8] sm:$0xff] }
  0xf8   : > { %1069 = vst [vmem:[%s9764_s27 + $0xe50] sm:$0xff] %v1068_v10  ;;  %v1072_v12 = vld [vmem:[%s9756_s26 + $0x1cc0] sm:$0xff]  ;;  %v1074_v13 = vld [vmem:[%s9756_s26 + $0x1cc8] sm:$0xff]  ;;  %1071 = vst [vmem:[%s9764_s27 + $0xe58] sm:$0xff] %v1070_v11 }
  0xf9   : > { %1073 = vst [vmem:[%s9764_s27 + $0xe60] sm:$0xff] %v1072_v12  ;;  %1075 = vst [vmem:[%s9764_s27 + $0xe68] sm:$0xff] %v1074_v13  ;;  %v1076_v14 = vld [vmem:[%s9756_s26 + $0x1ce0] sm:$0xff]  ;;  %v1078_v15 = vld [vmem:[%s9756_s26 + $0x1ce8] sm:$0xff] }
  0xfa   : > { %v1080_v16 = vld [vmem:[%s9756_s26 + $0x1d00] sm:$0xff]  ;;  %1077 = vst [vmem:[%s9764_s27 + $0xe70] sm:$0xff] %v1076_v14  ;;  %1079 = vst [vmem:[%s9764_s27 + $0xe78] sm:$0xff] %v1078_v15  ;;  %v1082_v17 = vld [vmem:[%s9756_s26 + $0x1d08] sm:$0xff] }
  0xfb   : > { %1081 = vst [vmem:[%s9764_s27 + $0xe80] sm:$0xff] %v1080_v16  ;;  %v1084_v18 = vld [vmem:[%s9756_s26 + $0x1d20] sm:$0xff]  ;;  %v1086_v19 = vld [vmem:[%s9756_s26 + $0x1d28] sm:$0xff]  ;;  %1083 = vst [vmem:[%s9764_s27 + $0xe88] sm:$0xff] %v1082_v17 }
  0xfc   : > { %1085 = vst [vmem:[%s9764_s27 + $0xe90] sm:$0xff] %v1084_v18  ;;  %1087 = vst [vmem:[%s9764_s27 + $0xe98] sm:$0xff] %v1086_v19  ;;  %v1088_v20 = vld [vmem:[%s9756_s26 + $0x1d40] sm:$0xff]  ;;  %v1090_v21 = vld [vmem:[%s9756_s26 + $0x1d48] sm:$0xff] }
  0xfd   : > { %v1092_v22 = vld [vmem:[%s9756_s26 + $0x1d60] sm:$0xff]  ;;  %1089 = vst [vmem:[%s9764_s27 + $0xea0] sm:$0xff] %v1088_v20  ;;  %1091 = vst [vmem:[%s9764_s27 + $0xea8] sm:$0xff] %v1090_v21  ;;  %v1094_v23 = vld [vmem:[%s9756_s26 + $0x1d68] sm:$0xff] }
  0xfe   : > { %1093 = vst [vmem:[%s9764_s27 + $0xeb0] sm:$0xff] %v1092_v22  ;;  %v1096_v24 = vld [vmem:[%s9756_s26 + $0x1d80] sm:$0xff]  ;;  %v1098_v25 = vld [vmem:[%s9756_s26 + $0x1d88] sm:$0xff]  ;;  %1095 = vst [vmem:[%s9764_s27 + $0xeb8] sm:$0xff] %v1094_v23 }
  0xff   : > { %1097 = vst [vmem:[%s9764_s27 + $0xec0] sm:$0xff] %v1096_v24  ;;  %1099 = vst [vmem:[%s9764_s27 + $0xec8] sm:$0xff] %v1098_v25  ;;  %v1100_v26 = vld [vmem:[%s9756_s26 + $0x1da0] sm:$0xff]  ;;  %v1102_v27 = vld [vmem:[%s9756_s26 + $0x1da8] sm:$0xff] }
 0x100   : > { %v1104_v28 = vld [vmem:[%s9756_s26 + $0x1dc0] sm:$0xff]  ;;  %1101 = vst [vmem:[%s9764_s27 + $0xed0] sm:$0xff] %v1100_v26  ;;  %1103 = vst [vmem:[%s9764_s27 + $0xed8] sm:$0xff] %v1102_v27  ;;  %v1106_v29 = vld [vmem:[%s9756_s26 + $0x1dc8] sm:$0xff] }
 0x101   : > { %1105 = vst [vmem:[%s9764_s27 + $0xee0] sm:$0xff] %v1104_v28  ;;  %v1108_v30 = vld [vmem:[%s9756_s26 + $0x1de0] sm:$0xff]  ;;  %v1110_v31 = vld [vmem:[%s9756_s26 + $0x1de8] sm:$0xff]  ;;  %1107 = vst [vmem:[%s9764_s27 + $0xee8] sm:$0xff] %v1106_v29 }
 0x102   : > { %1109 = vst [vmem:[%s9764_s27 + $0xef0] sm:$0xff] %v1108_v30  ;;  %1111 = vst [vmem:[%s9764_s27 + $0xef8] sm:$0xff] %v1110_v31  ;;  %v1112_v32 = vld [vmem:[%s9756_s26 + $0x1e00] sm:$0xff]  ;;  %v1114_v33 = vld [vmem:[%s9756_s26 + $0x1e08] sm:$0xff] }
 0x103   : > { %v1116_v34 = vld [vmem:[%s9756_s26 + $0x1e20] sm:$0xff]  ;;  %1113 = vst [vmem:[%s9764_s27 + $0xf00] sm:$0xff] %v1112_v32  ;;  %1115 = vst [vmem:[%s9764_s27 + $0xf08] sm:$0xff] %v1114_v33  ;;  %v1118_v35 = vld [vmem:[%s9756_s26 + $0x1e28] sm:$0xff] }
 0x104   : > { %1117 = vst [vmem:[%s9764_s27 + $0xf10] sm:$0xff] %v1116_v34  ;;  %v1120_v36 = vld [vmem:[%s9756_s26 + $0x1e40] sm:$0xff]  ;;  %v1122_v37 = vld [vmem:[%s9756_s26 + $0x1e48] sm:$0xff]  ;;  %1119 = vst [vmem:[%s9764_s27 + $0xf18] sm:$0xff] %v1118_v35 }
 0x105   : > { %1121 = vst [vmem:[%s9764_s27 + $0xf20] sm:$0xff] %v1120_v36  ;;  %1123 = vst [vmem:[%s9764_s27 + $0xf28] sm:$0xff] %v1122_v37  ;;  %v1124_v38 = vld [vmem:[%s9756_s26 + $0x1e60] sm:$0xff]  ;;  %v1126_v39 = vld [vmem:[%s9756_s26 + $0x1e68] sm:$0xff] }
 0x106   : > { %v1128_v40 = vld [vmem:[%s9756_s26 + $0x1e80] sm:$0xff]  ;;  %1125 = vst [vmem:[%s9764_s27 + $0xf30] sm:$0xff] %v1124_v38  ;;  %1127 = vst [vmem:[%s9764_s27 + $0xf38] sm:$0xff] %v1126_v39  ;;  %v1130_v41 = vld [vmem:[%s9756_s26 + $0x1e88] sm:$0xff] }
 0x107   : > { %1129 = vst [vmem:[%s9764_s27 + $0xf40] sm:$0xff] %v1128_v40  ;;  %v1132_v42 = vld [vmem:[%s9756_s26 + $0x1ea0] sm:$0xff]  ;;  %v1134_v43 = vld [vmem:[%s9756_s26 + $0x1ea8] sm:$0xff]  ;;  %1131 = vst [vmem:[%s9764_s27 + $0xf48] sm:$0xff] %v1130_v41 }
 0x108   : > { %1133 = vst [vmem:[%s9764_s27 + $0xf50] sm:$0xff] %v1132_v42  ;;  %1135 = vst [vmem:[%s9764_s27 + $0xf58] sm:$0xff] %v1134_v43  ;;  %v1136_v44 = vld [vmem:[%s9756_s26 + $0x1ec0] sm:$0xff]  ;;  %v1138_v45 = vld [vmem:[%s9756_s26 + $0x1ec8] sm:$0xff] }
 0x109   : > { %v1140_v46 = vld [vmem:[%s9756_s26 + $0x1ee0] sm:$0xff]  ;;  %1137 = vst [vmem:[%s9764_s27 + $0xf60] sm:$0xff] %v1136_v44  ;;  %1139 = vst [vmem:[%s9764_s27 + $0xf68] sm:$0xff] %v1138_v45  ;;  %v1142_v47 = vld [vmem:[%s9756_s26 + $0x1ee8] sm:$0xff] }
 0x10a   : > { %1141 = vst [vmem:[%s9764_s27 + $0xf70] sm:$0xff] %v1140_v46  ;;  %v1144_v48 = vld [vmem:[%s9756_s26 + $0x1f00] sm:$0xff]  ;;  %v1146_v49 = vld [vmem:[%s9756_s26 + $0x1f08] sm:$0xff]  ;;  %1143 = vst [vmem:[%s9764_s27 + $0xf78] sm:$0xff] %v1142_v47 }
 0x10b   : > { %1145 = vst [vmem:[%s9764_s27 + $0xf80] sm:$0xff] %v1144_v48  ;;  %1147 = vst [vmem:[%s9764_s27 + $0xf88] sm:$0xff] %v1146_v49  ;;  %v1148_v50 = vld [vmem:[%s9756_s26 + $0x1f20] sm:$0xff]  ;;  %v1150_v51 = vld [vmem:[%s9756_s26 + $0x1f28] sm:$0xff] }
 0x10c   : > { %v1152_v52 = vld [vmem:[%s9756_s26 + $0x1f40] sm:$0xff]  ;;  %1149 = vst [vmem:[%s9764_s27 + $0xf90] sm:$0xff] %v1148_v50  ;;  %1151 = vst [vmem:[%s9764_s27 + $0xf98] sm:$0xff] %v1150_v51  ;;  %v1154_v53 = vld [vmem:[%s9756_s26 + $0x1f48] sm:$0xff] }
 0x10d   : > { %1153 = vst [vmem:[%s9764_s27 + $0xfa0] sm:$0xff] %v1152_v52  ;;  %v1156_v54 = vld [vmem:[%s9756_s26 + $0x1f60] sm:$0xff]  ;;  %v1158_v55 = vld [vmem:[%s9756_s26 + $0x1f68] sm:$0xff]  ;;  %1155 = vst [vmem:[%s9764_s27 + $0xfa8] sm:$0xff] %v1154_v53 }
 0x10e   : > { %1157 = vst [vmem:[%s9764_s27 + $0xfb0] sm:$0xff] %v1156_v54  ;;  %1159 = vst [vmem:[%s9764_s27 + $0xfb8] sm:$0xff] %v1158_v55  ;;  %v1160_v56 = vld [vmem:[%s9756_s26 + $0x1f80] sm:$0xff]  ;;  %v1162_v57 = vld [vmem:[%s9756_s26 + $0x1f88] sm:$0xff] }
 0x10f   : > { %v1164_v58 = vld [vmem:[%s9756_s26 + $0x1fa0] sm:$0xff]  ;;  %1161 = vst [vmem:[%s9764_s27 + $0xfc0] sm:$0xff] %v1160_v56  ;;  %1163 = vst [vmem:[%s9764_s27 + $0xfc8] sm:$0xff] %v1162_v57  ;;  %v1166_v59 = vld [vmem:[%s9756_s26 + $0x1fa8] sm:$0xff] }
 0x110   : > { %1165 = vst [vmem:[%s9764_s27 + $0xfd0] sm:$0xff] %v1164_v58  ;;  %v1168_v60 = vld [vmem:[%s9756_s26 + $0x1fc0] sm:$0xff]  ;;  %v1170_v61 = vld [vmem:[%s9756_s26 + $0x1fc8] sm:$0xff]  ;;  %1167 = vst [vmem:[%s9764_s27 + $0xfd8] sm:$0xff] %v1166_v59 }
 0x111   : > { %1169 = vst [vmem:[%s9764_s27 + $0xfe0] sm:$0xff] %v1168_v60  ;;  %1171 = vst [vmem:[%s9764_s27 + $0xfe8] sm:$0xff] %v1170_v61  ;;  %v1172_v62 = vld [vmem:[%s9756_s26 + $0x1fe0] sm:$0xff]  ;;  %v1174_v63 = vld [vmem:[%s9756_s26 + $0x1fe8] sm:$0xff] }
 0x112   : > { %v1176_v0 = vld [vmem:[%s9756_s26 + $0x2000] sm:$0xff]  ;;  %1173 = vst [vmem:[%s9764_s27 + $0xff0] sm:$0xff] %v1172_v62  ;;  %1175 = vst [vmem:[%s9764_s27 + $0xff8] sm:$0xff] %v1174_v63  ;;  %v1178_v1 = vld [vmem:[%s9756_s26 + $0x2008] sm:$0xff] }
 0x113   : > { %1177 = vst [vmem:[%s9764_s27 + $0x1000] sm:$0xff] %v1176_v0  ;;  %v1180_v2 = vld [vmem:[%s9756_s26 + $0x2020] sm:$0xff]  ;;  %v1182_v3 = vld [vmem:[%s9756_s26 + $0x2028] sm:$0xff]  ;;  %1179 = vst [vmem:[%s9764_s27 + $0x1008] sm:$0xff] %v1178_v1 }
 0x114   : > { %1181 = vst [vmem:[%s9764_s27 + $0x1010] sm:$0xff] %v1180_v2  ;;  %1183 = vst [vmem:[%s9764_s27 + $0x1018] sm:$0xff] %v1182_v3  ;;  %v1184_v4 = vld [vmem:[%s9756_s26 + $0x2040] sm:$0xff]  ;;  %v1186_v5 = vld [vmem:[%s9756_s26 + $0x2048] sm:$0xff] }
 0x115   : > { %v1188_v6 = vld [vmem:[%s9756_s26 + $0x2060] sm:$0xff]  ;;  %1185 = vst [vmem:[%s9764_s27 + $0x1020] sm:$0xff] %v1184_v4  ;;  %1187 = vst [vmem:[%s9764_s27 + $0x1028] sm:$0xff] %v1186_v5  ;;  %v1190_v7 = vld [vmem:[%s9756_s26 + $0x2068] sm:$0xff] }
 0x116   : > { %1189 = vst [vmem:[%s9764_s27 + $0x1030] sm:$0xff] %v1188_v6  ;;  %v1192_v8 = vld [vmem:[%s9756_s26 + $0x2080] sm:$0xff]  ;;  %v1194_v9 = vld [vmem:[%s9756_s26 + $0x2088] sm:$0xff]  ;;  %1191 = vst [vmem:[%s9764_s27 + $0x1038] sm:$0xff] %v1190_v7 }
 0x117   : > { %1193 = vst [vmem:[%s9764_s27 + $0x1040] sm:$0xff] %v1192_v8  ;;  %1195 = vst [vmem:[%s9764_s27 + $0x1048] sm:$0xff] %v1194_v9  ;;  %v1196_v10 = vld [vmem:[%s9756_s26 + $0x20a0] sm:$0xff]  ;;  %v1198_v11 = vld [vmem:[%s9756_s26 + $0x20a8] sm:$0xff] }
 0x118   : > { %v1200_v12 = vld [vmem:[%s9756_s26 + $0x20c0] sm:$0xff]  ;;  %1197 = vst [vmem:[%s9764_s27 + $0x1050] sm:$0xff] %v1196_v10  ;;  %1199 = vst [vmem:[%s9764_s27 + $0x1058] sm:$0xff] %v1198_v11  ;;  %v1202_v13 = vld [vmem:[%s9756_s26 + $0x20c8] sm:$0xff] }
 0x119   : > { %1201 = vst [vmem:[%s9764_s27 + $0x1060] sm:$0xff] %v1200_v12  ;;  %v1204_v14 = vld [vmem:[%s9756_s26 + $0x20e0] sm:$0xff]  ;;  %v1206_v15 = vld [vmem:[%s9756_s26 + $0x20e8] sm:$0xff]  ;;  %1203 = vst [vmem:[%s9764_s27 + $0x1068] sm:$0xff] %v1202_v13 }
 0x11a   : > { %1205 = vst [vmem:[%s9764_s27 + $0x1070] sm:$0xff] %v1204_v14  ;;  %1207 = vst [vmem:[%s9764_s27 + $0x1078] sm:$0xff] %v1206_v15  ;;  %v1208_v16 = vld [vmem:[%s9756_s26 + $0x2100] sm:$0xff]  ;;  %v1210_v17 = vld [vmem:[%s9756_s26 + $0x2108] sm:$0xff] }
 0x11b   : > { %v1212_v18 = vld [vmem:[%s9756_s26 + $0x2120] sm:$0xff]  ;;  %1209 = vst [vmem:[%s9764_s27 + $0x1080] sm:$0xff] %v1208_v16  ;;  %1211 = vst [vmem:[%s9764_s27 + $0x1088] sm:$0xff] %v1210_v17  ;;  %v1214_v19 = vld [vmem:[%s9756_s26 + $0x2128] sm:$0xff] }
 0x11c   : > { %1213 = vst [vmem:[%s9764_s27 + $0x1090] sm:$0xff] %v1212_v18  ;;  %v1216_v20 = vld [vmem:[%s9756_s26 + $0x2140] sm:$0xff]  ;;  %v1218_v21 = vld [vmem:[%s9756_s26 + $0x2148] sm:$0xff]  ;;  %1215 = vst [vmem:[%s9764_s27 + $0x1098] sm:$0xff] %v1214_v19 }
 0x11d   : > { %1217 = vst [vmem:[%s9764_s27 + $0x10a0] sm:$0xff] %v1216_v20  ;;  %1219 = vst [vmem:[%s9764_s27 + $0x10a8] sm:$0xff] %v1218_v21  ;;  %v1220_v22 = vld [vmem:[%s9756_s26 + $0x2160] sm:$0xff]  ;;  %v1222_v23 = vld [vmem:[%s9756_s26 + $0x2168] sm:$0xff] }
 0x11e   : > { %v1224_v24 = vld [vmem:[%s9756_s26 + $0x2180] sm:$0xff]  ;;  %1221 = vst [vmem:[%s9764_s27 + $0x10b0] sm:$0xff] %v1220_v22  ;;  %1223 = vst [vmem:[%s9764_s27 + $0x10b8] sm:$0xff] %v1222_v23  ;;  %v1226_v25 = vld [vmem:[%s9756_s26 + $0x2188] sm:$0xff] }
 0x11f   : > { %1225 = vst [vmem:[%s9764_s27 + $0x10c0] sm:$0xff] %v1224_v24  ;;  %v1228_v26 = vld [vmem:[%s9756_s26 + $0x21a0] sm:$0xff]  ;;  %v1230_v27 = vld [vmem:[%s9756_s26 + $0x21a8] sm:$0xff]  ;;  %1227 = vst [vmem:[%s9764_s27 + $0x10c8] sm:$0xff] %v1226_v25 }
 0x120   : > { %1229 = vst [vmem:[%s9764_s27 + $0x10d0] sm:$0xff] %v1228_v26  ;;  %1231 = vst [vmem:[%s9764_s27 + $0x10d8] sm:$0xff] %v1230_v27  ;;  %v1232_v28 = vld [vmem:[%s9756_s26 + $0x21c0] sm:$0xff]  ;;  %v1234_v29 = vld [vmem:[%s9756_s26 + $0x21c8] sm:$0xff] }
 0x121   : > { %v1236_v30 = vld [vmem:[%s9756_s26 + $0x21e0] sm:$0xff]  ;;  %1233 = vst [vmem:[%s9764_s27 + $0x10e0] sm:$0xff] %v1232_v28  ;;  %1235 = vst [vmem:[%s9764_s27 + $0x10e8] sm:$0xff] %v1234_v29  ;;  %v1238_v31 = vld [vmem:[%s9756_s26 + $0x21e8] sm:$0xff] }
 0x122   : > { %1237 = vst [vmem:[%s9764_s27 + $0x10f0] sm:$0xff] %v1236_v30  ;;  %v1240_v32 = vld [vmem:[%s9756_s26 + $0x2200] sm:$0xff]  ;;  %v1242_v33 = vld [vmem:[%s9756_s26 + $0x2208] sm:$0xff]  ;;  %1239 = vst [vmem:[%s9764_s27 + $0x10f8] sm:$0xff] %v1238_v31 }
 0x123   : > { %1241 = vst [vmem:[%s9764_s27 + $0x1100] sm:$0xff] %v1240_v32  ;;  %1243 = vst [vmem:[%s9764_s27 + $0x1108] sm:$0xff] %v1242_v33  ;;  %v1244_v34 = vld [vmem:[%s9756_s26 + $0x2220] sm:$0xff]  ;;  %v1246_v35 = vld [vmem:[%s9756_s26 + $0x2228] sm:$0xff] }
 0x124   : > { %v1248_v36 = vld [vmem:[%s9756_s26 + $0x2240] sm:$0xff]  ;;  %1245 = vst [vmem:[%s9764_s27 + $0x1110] sm:$0xff] %v1244_v34  ;;  %1247 = vst [vmem:[%s9764_s27 + $0x1118] sm:$0xff] %v1246_v35  ;;  %v1250_v37 = vld [vmem:[%s9756_s26 + $0x2248] sm:$0xff] }
 0x125   : > { %1249 = vst [vmem:[%s9764_s27 + $0x1120] sm:$0xff] %v1248_v36  ;;  %v1252_v38 = vld [vmem:[%s9756_s26 + $0x2260] sm:$0xff]  ;;  %v1254_v39 = vld [vmem:[%s9756_s26 + $0x2268] sm:$0xff]  ;;  %1251 = vst [vmem:[%s9764_s27 + $0x1128] sm:$0xff] %v1250_v37 }
 0x126   : > { %1253 = vst [vmem:[%s9764_s27 + $0x1130] sm:$0xff] %v1252_v38  ;;  %1255 = vst [vmem:[%s9764_s27 + $0x1138] sm:$0xff] %v1254_v39  ;;  %v1256_v40 = vld [vmem:[%s9756_s26 + $0x2280] sm:$0xff]  ;;  %v1258_v41 = vld [vmem:[%s9756_s26 + $0x2288] sm:$0xff] }
 0x127   : > { %v1260_v42 = vld [vmem:[%s9756_s26 + $0x22a0] sm:$0xff]  ;;  %1257 = vst [vmem:[%s9764_s27 + $0x1140] sm:$0xff] %v1256_v40  ;;  %1259 = vst [vmem:[%s9764_s27 + $0x1148] sm:$0xff] %v1258_v41  ;;  %v1262_v43 = vld [vmem:[%s9756_s26 + $0x22a8] sm:$0xff] }
 0x128   : > { %1261 = vst [vmem:[%s9764_s27 + $0x1150] sm:$0xff] %v1260_v42  ;;  %v1264_v44 = vld [vmem:[%s9756_s26 + $0x22c0] sm:$0xff]  ;;  %v1266_v45 = vld [vmem:[%s9756_s26 + $0x22c8] sm:$0xff]  ;;  %1263 = vst [vmem:[%s9764_s27 + $0x1158] sm:$0xff] %v1262_v43 }
 0x129   : > { %1265 = vst [vmem:[%s9764_s27 + $0x1160] sm:$0xff] %v1264_v44  ;;  %1267 = vst [vmem:[%s9764_s27 + $0x1168] sm:$0xff] %v1266_v45  ;;  %v1268_v46 = vld [vmem:[%s9756_s26 + $0x22e0] sm:$0xff]  ;;  %v1270_v47 = vld [vmem:[%s9756_s26 + $0x22e8] sm:$0xff] }
 0x12a   : > { %v1272_v48 = vld [vmem:[%s9756_s26 + $0x2300] sm:$0xff]  ;;  %1269 = vst [vmem:[%s9764_s27 + $0x1170] sm:$0xff] %v1268_v46  ;;  %1271 = vst [vmem:[%s9764_s27 + $0x1178] sm:$0xff] %v1270_v47  ;;  %v1274_v49 = vld [vmem:[%s9756_s26 + $0x2308] sm:$0xff] }
 0x12b   : > { %1273 = vst [vmem:[%s9764_s27 + $0x1180] sm:$0xff] %v1272_v48  ;;  %v1276_v50 = vld [vmem:[%s9756_s26 + $0x2320] sm:$0xff]  ;;  %v1278_v51 = vld [vmem:[%s9756_s26 + $0x2328] sm:$0xff]  ;;  %1275 = vst [vmem:[%s9764_s27 + $0x1188] sm:$0xff] %v1274_v49 }
 0x12c   : > { %1277 = vst [vmem:[%s9764_s27 + $0x1190] sm:$0xff] %v1276_v50  ;;  %1279 = vst [vmem:[%s9764_s27 + $0x1198] sm:$0xff] %v1278_v51  ;;  %v1280_v52 = vld [vmem:[%s9756_s26 + $0x2340] sm:$0xff]  ;;  %v1282_v53 = vld [vmem:[%s9756_s26 + $0x2348] sm:$0xff] }
 0x12d   : > { %v1284_v54 = vld [vmem:[%s9756_s26 + $0x2360] sm:$0xff]  ;;  %1281 = vst [vmem:[%s9764_s27 + $0x11a0] sm:$0xff] %v1280_v52  ;;  %1283 = vst [vmem:[%s9764_s27 + $0x11a8] sm:$0xff] %v1282_v53  ;;  %v1286_v55 = vld [vmem:[%s9756_s26 + $0x2368] sm:$0xff] }
 0x12e   : > { %1285 = vst [vmem:[%s9764_s27 + $0x11b0] sm:$0xff] %v1284_v54  ;;  %v1288_v56 = vld [vmem:[%s9756_s26 + $0x2380] sm:$0xff]  ;;  %v1290_v57 = vld [vmem:[%s9756_s26 + $0x2388] sm:$0xff]  ;;  %1287 = vst [vmem:[%s9764_s27 + $0x11b8] sm:$0xff] %v1286_v55 }
 0x12f   : > { %1289 = vst [vmem:[%s9764_s27 + $0x11c0] sm:$0xff] %v1288_v56  ;;  %1291 = vst [vmem:[%s9764_s27 + $0x11c8] sm:$0xff] %v1290_v57  ;;  %v1292_v58 = vld [vmem:[%s9756_s26 + $0x23a0] sm:$0xff]  ;;  %v1294_v59 = vld [vmem:[%s9756_s26 + $0x23a8] sm:$0xff] }
 0x130   : > { %v1296_v60 = vld [vmem:[%s9756_s26 + $0x23c0] sm:$0xff]  ;;  %1293 = vst [vmem:[%s9764_s27 + $0x11d0] sm:$0xff] %v1292_v58  ;;  %1295 = vst [vmem:[%s9764_s27 + $0x11d8] sm:$0xff] %v1294_v59  ;;  %v1298_v61 = vld [vmem:[%s9756_s26 + $0x23c8] sm:$0xff] }
 0x131   : > { %1297 = vst [vmem:[%s9764_s27 + $0x11e0] sm:$0xff] %v1296_v60  ;;  %v1300_v62 = vld [vmem:[%s9756_s26 + $0x23e0] sm:$0xff]  ;;  %v1302_v63 = vld [vmem:[%s9756_s26 + $0x23e8] sm:$0xff]  ;;  %1299 = vst [vmem:[%s9764_s27 + $0x11e8] sm:$0xff] %v1298_v61 }
 0x132   : > { %1301 = vst [vmem:[%s9764_s27 + $0x11f0] sm:$0xff] %v1300_v62  ;;  %1303 = vst [vmem:[%s9764_s27 + $0x11f8] sm:$0xff] %v1302_v63  ;;  %v1304_v0 = vld [vmem:[%s9756_s26 + $0x2400] sm:$0xff]  ;;  %v1306_v1 = vld [vmem:[%s9756_s26 + $0x2408] sm:$0xff] }
 0x133   : > { %v1308_v2 = vld [vmem:[%s9756_s26 + $0x2420] sm:$0xff]  ;;  %1305 = vst [vmem:[%s9764_s27 + $0x1200] sm:$0xff] %v1304_v0  ;;  %1307 = vst [vmem:[%s9764_s27 + $0x1208] sm:$0xff] %v1306_v1  ;;  %v1310_v3 = vld [vmem:[%s9756_s26 + $0x2428] sm:$0xff] }
 0x134   : > { %1309 = vst [vmem:[%s9764_s27 + $0x1210] sm:$0xff] %v1308_v2  ;;  %v1312_v4 = vld [vmem:[%s9756_s26 + $0x2440] sm:$0xff]  ;;  %v1314_v5 = vld [vmem:[%s9756_s26 + $0x2448] sm:$0xff]  ;;  %1311 = vst [vmem:[%s9764_s27 + $0x1218] sm:$0xff] %v1310_v3 }
 0x135   : > { %1313 = vst [vmem:[%s9764_s27 + $0x1220] sm:$0xff] %v1312_v4  ;;  %1315 = vst [vmem:[%s9764_s27 + $0x1228] sm:$0xff] %v1314_v5  ;;  %v1316_v6 = vld [vmem:[%s9756_s26 + $0x2460] sm:$0xff]  ;;  %v1318_v7 = vld [vmem:[%s9756_s26 + $0x2468] sm:$0xff] }
 0x136   : > { %v1320_v8 = vld [vmem:[%s9756_s26 + $0x2480] sm:$0xff]  ;;  %1317 = vst [vmem:[%s9764_s27 + $0x1230] sm:$0xff] %v1316_v6  ;;  %1319 = vst [vmem:[%s9764_s27 + $0x1238] sm:$0xff] %v1318_v7  ;;  %v1322_v9 = vld [vmem:[%s9756_s26 + $0x2488] sm:$0xff] }
 0x137   : > { %1321 = vst [vmem:[%s9764_s27 + $0x1240] sm:$0xff] %v1320_v8  ;;  %v1324_v10 = vld [vmem:[%s9756_s26 + $0x24a0] sm:$0xff]  ;;  %v1326_v11 = vld [vmem:[%s9756_s26 + $0x24a8] sm:$0xff]  ;;  %1323 = vst [vmem:[%s9764_s27 + $0x1248] sm:$0xff] %v1322_v9 }
 0x138   : > { %1325 = vst [vmem:[%s9764_s27 + $0x1250] sm:$0xff] %v1324_v10  ;;  %1327 = vst [vmem:[%s9764_s27 + $0x1258] sm:$0xff] %v1326_v11  ;;  %v1328_v12 = vld [vmem:[%s9756_s26 + $0x24c0] sm:$0xff]  ;;  %v1330_v13 = vld [vmem:[%s9756_s26 + $0x24c8] sm:$0xff] }
 0x139   : > { %v1332_v14 = vld [vmem:[%s9756_s26 + $0x24e0] sm:$0xff]  ;;  %1329 = vst [vmem:[%s9764_s27 + $0x1260] sm:$0xff] %v1328_v12  ;;  %1331 = vst [vmem:[%s9764_s27 + $0x1268] sm:$0xff] %v1330_v13  ;;  %v1334_v15 = vld [vmem:[%s9756_s26 + $0x24e8] sm:$0xff] }
 0x13a   : > { %1333 = vst [vmem:[%s9764_s27 + $0x1270] sm:$0xff] %v1332_v14  ;;  %v1336_v16 = vld [vmem:[%s9756_s26 + $0x2500] sm:$0xff]  ;;  %v1338_v17 = vld [vmem:[%s9756_s26 + $0x2508] sm:$0xff]  ;;  %1335 = vst [vmem:[%s9764_s27 + $0x1278] sm:$0xff] %v1334_v15 }
 0x13b   : > { %1337 = vst [vmem:[%s9764_s27 + $0x1280] sm:$0xff] %v1336_v16  ;;  %1339 = vst [vmem:[%s9764_s27 + $0x1288] sm:$0xff] %v1338_v17  ;;  %v1340_v18 = vld [vmem:[%s9756_s26 + $0x2520] sm:$0xff]  ;;  %v1342_v19 = vld [vmem:[%s9756_s26 + $0x2528] sm:$0xff] }
 0x13c   : > { %v1344_v20 = vld [vmem:[%s9756_s26 + $0x2540] sm:$0xff]  ;;  %1341 = vst [vmem:[%s9764_s27 + $0x1290] sm:$0xff] %v1340_v18  ;;  %1343 = vst [vmem:[%s9764_s27 + $0x1298] sm:$0xff] %v1342_v19  ;;  %v1346_v21 = vld [vmem:[%s9756_s26 + $0x2548] sm:$0xff] }
 0x13d   : > { %1345 = vst [vmem:[%s9764_s27 + $0x12a0] sm:$0xff] %v1344_v20  ;;  %v1348_v22 = vld [vmem:[%s9756_s26 + $0x2560] sm:$0xff]  ;;  %v1350_v23 = vld [vmem:[%s9756_s26 + $0x2568] sm:$0xff]  ;;  %1347 = vst [vmem:[%s9764_s27 + $0x12a8] sm:$0xff] %v1346_v21 }
 0x13e   : > { %1349 = vst [vmem:[%s9764_s27 + $0x12b0] sm:$0xff] %v1348_v22  ;;  %1351 = vst [vmem:[%s9764_s27 + $0x12b8] sm:$0xff] %v1350_v23  ;;  %v1352_v24 = vld [vmem:[%s9756_s26 + $0x2580] sm:$0xff]  ;;  %v1354_v25 = vld [vmem:[%s9756_s26 + $0x2588] sm:$0xff] }
 0x13f   : > { %v1356_v26 = vld [vmem:[%s9756_s26 + $0x25a0] sm:$0xff]  ;;  %1353 = vst [vmem:[%s9764_s27 + $0x12c0] sm:$0xff] %v1352_v24  ;;  %1355 = vst [vmem:[%s9764_s27 + $0x12c8] sm:$0xff] %v1354_v25  ;;  %v1358_v27 = vld [vmem:[%s9756_s26 + $0x25a8] sm:$0xff] }
 0x140   : > { %1357 = vst [vmem:[%s9764_s27 + $0x12d0] sm:$0xff] %v1356_v26  ;;  %v1360_v28 = vld [vmem:[%s9756_s26 + $0x25c0] sm:$0xff]  ;;  %v1362_v29 = vld [vmem:[%s9756_s26 + $0x25c8] sm:$0xff]  ;;  %1359 = vst [vmem:[%s9764_s27 + $0x12d8] sm:$0xff] %v1358_v27 }
 0x141   : > { %1361 = vst [vmem:[%s9764_s27 + $0x12e0] sm:$0xff] %v1360_v28  ;;  %1363 = vst [vmem:[%s9764_s27 + $0x12e8] sm:$0xff] %v1362_v29  ;;  %v1364_v30 = vld [vmem:[%s9756_s26 + $0x25e0] sm:$0xff]  ;;  %v1366_v31 = vld [vmem:[%s9756_s26 + $0x25e8] sm:$0xff] }
 0x142   : > { %v1368_v32 = vld [vmem:[%s9756_s26 + $0x2600] sm:$0xff]  ;;  %1365 = vst [vmem:[%s9764_s27 + $0x12f0] sm:$0xff] %v1364_v30  ;;  %1367 = vst [vmem:[%s9764_s27 + $0x12f8] sm:$0xff] %v1366_v31  ;;  %v1370_v33 = vld [vmem:[%s9756_s26 + $0x2608] sm:$0xff] }
 0x143   : > { %1369 = vst [vmem:[%s9764_s27 + $0x1300] sm:$0xff] %v1368_v32  ;;  %v1372_v34 = vld [vmem:[%s9756_s26 + $0x2620] sm:$0xff]  ;;  %v1374_v35 = vld [vmem:[%s9756_s26 + $0x2628] sm:$0xff]  ;;  %1371 = vst [vmem:[%s9764_s27 + $0x1308] sm:$0xff] %v1370_v33 }
 0x144   : > { %1373 = vst [vmem:[%s9764_s27 + $0x1310] sm:$0xff] %v1372_v34  ;;  %1375 = vst [vmem:[%s9764_s27 + $0x1318] sm:$0xff] %v1374_v35  ;;  %v1376_v36 = vld [vmem:[%s9756_s26 + $0x2640] sm:$0xff]  ;;  %v1378_v37 = vld [vmem:[%s9756_s26 + $0x2648] sm:$0xff] }
 0x145   : > { %v1380_v38 = vld [vmem:[%s9756_s26 + $0x2660] sm:$0xff]  ;;  %1377 = vst [vmem:[%s9764_s27 + $0x1320] sm:$0xff] %v1376_v36  ;;  %1379 = vst [vmem:[%s9764_s27 + $0x1328] sm:$0xff] %v1378_v37  ;;  %v1382_v39 = vld [vmem:[%s9756_s26 + $0x2668] sm:$0xff] }
 0x146   : > { %1381 = vst [vmem:[%s9764_s27 + $0x1330] sm:$0xff] %v1380_v38  ;;  %v1384_v40 = vld [vmem:[%s9756_s26 + $0x2680] sm:$0xff]  ;;  %v1386_v41 = vld [vmem:[%s9756_s26 + $0x2688] sm:$0xff]  ;;  %1383 = vst [vmem:[%s9764_s27 + $0x1338] sm:$0xff] %v1382_v39 }
 0x147   : > { %1385 = vst [vmem:[%s9764_s27 + $0x1340] sm:$0xff] %v1384_v40  ;;  %1387 = vst [vmem:[%s9764_s27 + $0x1348] sm:$0xff] %v1386_v41  ;;  %v1388_v42 = vld [vmem:[%s9756_s26 + $0x26a0] sm:$0xff]  ;;  %v1390_v43 = vld [vmem:[%s9756_s26 + $0x26a8] sm:$0xff] }
 0x148   : > { %v1392_v44 = vld [vmem:[%s9756_s26 + $0x26c0] sm:$0xff]  ;;  %1389 = vst [vmem:[%s9764_s27 + $0x1350] sm:$0xff] %v1388_v42  ;;  %1391 = vst [vmem:[%s9764_s27 + $0x1358] sm:$0xff] %v1390_v43  ;;  %v1394_v45 = vld [vmem:[%s9756_s26 + $0x26c8] sm:$0xff] }
 0x149   : > { %1393 = vst [vmem:[%s9764_s27 + $0x1360] sm:$0xff] %v1392_v44  ;;  %v1396_v46 = vld [vmem:[%s9756_s26 + $0x26e0] sm:$0xff]  ;;  %v1398_v47 = vld [vmem:[%s9756_s26 + $0x26e8] sm:$0xff]  ;;  %1395 = vst [vmem:[%s9764_s27 + $0x1368] sm:$0xff] %v1394_v45 }
 0x14a   : > { %1397 = vst [vmem:[%s9764_s27 + $0x1370] sm:$0xff] %v1396_v46  ;;  %1399 = vst [vmem:[%s9764_s27 + $0x1378] sm:$0xff] %v1398_v47  ;;  %v1400_v48 = vld [vmem:[%s9756_s26 + $0x2700] sm:$0xff]  ;;  %v1402_v49 = vld [vmem:[%s9756_s26 + $0x2708] sm:$0xff] }
 0x14b   : > { %v1404_v50 = vld [vmem:[%s9756_s26 + $0x2720] sm:$0xff]  ;;  %1401 = vst [vmem:[%s9764_s27 + $0x1380] sm:$0xff] %v1400_v48  ;;  %1403 = vst [vmem:[%s9764_s27 + $0x1388] sm:$0xff] %v1402_v49  ;;  %v1406_v51 = vld [vmem:[%s9756_s26 + $0x2728] sm:$0xff] }
 0x14c   : > { %1405 = vst [vmem:[%s9764_s27 + $0x1390] sm:$0xff] %v1404_v50  ;;  %v1408_v52 = vld [vmem:[%s9756_s26 + $0x2740] sm:$0xff]  ;;  %v1410_v53 = vld [vmem:[%s9756_s26 + $0x2748] sm:$0xff]  ;;  %1407 = vst [vmem:[%s9764_s27 + $0x1398] sm:$0xff] %v1406_v51 }
 0x14d   : > { %1409 = vst [vmem:[%s9764_s27 + $0x13a0] sm:$0xff] %v1408_v52  ;;  %1411 = vst [vmem:[%s9764_s27 + $0x13a8] sm:$0xff] %v1410_v53  ;;  %v1412_v54 = vld [vmem:[%s9756_s26 + $0x2760] sm:$0xff]  ;;  %v1414_v55 = vld [vmem:[%s9756_s26 + $0x2768] sm:$0xff] }
 0x14e   : > { %v1416_v56 = vld [vmem:[%s9756_s26 + $0x2780] sm:$0xff]  ;;  %1413 = vst [vmem:[%s9764_s27 + $0x13b0] sm:$0xff] %v1412_v54  ;;  %1415 = vst [vmem:[%s9764_s27 + $0x13b8] sm:$0xff] %v1414_v55  ;;  %v1418_v57 = vld [vmem:[%s9756_s26 + $0x2788] sm:$0xff] }
 0x14f   : > { %1417 = vst [vmem:[%s9764_s27 + $0x13c0] sm:$0xff] %v1416_v56  ;;  %v1420_v58 = vld [vmem:[%s9756_s26 + $0x27a0] sm:$0xff]  ;;  %v1422_v59 = vld [vmem:[%s9756_s26 + $0x27a8] sm:$0xff]  ;;  %1419 = vst [vmem:[%s9764_s27 + $0x13c8] sm:$0xff] %v1418_v57 }
 0x150   : > { %1421 = vst [vmem:[%s9764_s27 + $0x13d0] sm:$0xff] %v1420_v58  ;;  %1423 = vst [vmem:[%s9764_s27 + $0x13d8] sm:$0xff] %v1422_v59  ;;  %v1424_v60 = vld [vmem:[%s9756_s26 + $0x27c0] sm:$0xff]  ;;  %v1426_v61 = vld [vmem:[%s9756_s26 + $0x27c8] sm:$0xff] }
 0x151   : > { %v1428_v62 = vld [vmem:[%s9756_s26 + $0x27e0] sm:$0xff]  ;;  %1425 = vst [vmem:[%s9764_s27 + $0x13e0] sm:$0xff] %v1424_v60  ;;  %1427 = vst [vmem:[%s9764_s27 + $0x13e8] sm:$0xff] %v1426_v61  ;;  %v1430_v63 = vld [vmem:[%s9756_s26 + $0x27e8] sm:$0xff] }
 0x152   : > { %1429 = vst [vmem:[%s9764_s27 + $0x13f0] sm:$0xff] %v1428_v62  ;;  %v1432_v0 = vld [vmem:[%s9756_s26 + $0x2800] sm:$0xff]  ;;  %v1434_v1 = vld [vmem:[%s9756_s26 + $0x2808] sm:$0xff]  ;;  %1431 = vst [vmem:[%s9764_s27 + $0x13f8] sm:$0xff] %v1430_v63 }
 0x153   : > { %1433 = vst [vmem:[%s9764_s27 + $0x1400] sm:$0xff] %v1432_v0  ;;  %1435 = vst [vmem:[%s9764_s27 + $0x1408] sm:$0xff] %v1434_v1  ;;  %v1436_v2 = vld [vmem:[%s9756_s26 + $0x2820] sm:$0xff]  ;;  %v1438_v3 = vld [vmem:[%s9756_s26 + $0x2828] sm:$0xff] }
 0x154   : > { %v1440_v4 = vld [vmem:[%s9756_s26 + $0x2840] sm:$0xff]  ;;  %1437 = vst [vmem:[%s9764_s27 + $0x1410] sm:$0xff] %v1436_v2  ;;  %1439 = vst [vmem:[%s9764_s27 + $0x1418] sm:$0xff] %v1438_v3  ;;  %v1442_v5 = vld [vmem:[%s9756_s26 + $0x2848] sm:$0xff] }
 0x155   : > { %1441 = vst [vmem:[%s9764_s27 + $0x1420] sm:$0xff] %v1440_v4  ;;  %v1444_v6 = vld [vmem:[%s9756_s26 + $0x2860] sm:$0xff]  ;;  %v1446_v7 = vld [vmem:[%s9756_s26 + $0x2868] sm:$0xff]  ;;  %1443 = vst [vmem:[%s9764_s27 + $0x1428] sm:$0xff] %v1442_v5 }
 0x156   : > { %1445 = vst [vmem:[%s9764_s27 + $0x1430] sm:$0xff] %v1444_v6  ;;  %1447 = vst [vmem:[%s9764_s27 + $0x1438] sm:$0xff] %v1446_v7  ;;  %v1448_v8 = vld [vmem:[%s9756_s26 + $0x2880] sm:$0xff]  ;;  %v1450_v9 = vld [vmem:[%s9756_s26 + $0x2888] sm:$0xff] }
 0x157   : > { %v1452_v10 = vld [vmem:[%s9756_s26 + $0x28a0] sm:$0xff]  ;;  %1449 = vst [vmem:[%s9764_s27 + $0x1440] sm:$0xff] %v1448_v8  ;;  %1451 = vst [vmem:[%s9764_s27 + $0x1448] sm:$0xff] %v1450_v9  ;;  %v1454_v11 = vld [vmem:[%s9756_s26 + $0x28a8] sm:$0xff] }
 0x158   : > { %1453 = vst [vmem:[%s9764_s27 + $0x1450] sm:$0xff] %v1452_v10  ;;  %v1456_v12 = vld [vmem:[%s9756_s26 + $0x28c0] sm:$0xff]  ;;  %v1458_v13 = vld [vmem:[%s9756_s26 + $0x28c8] sm:$0xff]  ;;  %1455 = vst [vmem:[%s9764_s27 + $0x1458] sm:$0xff] %v1454_v11 }
 0x159   : > { %1457 = vst [vmem:[%s9764_s27 + $0x1460] sm:$0xff] %v1456_v12  ;;  %1459 = vst [vmem:[%s9764_s27 + $0x1468] sm:$0xff] %v1458_v13  ;;  %v1460_v14 = vld [vmem:[%s9756_s26 + $0x28e0] sm:$0xff]  ;;  %v1462_v15 = vld [vmem:[%s9756_s26 + $0x28e8] sm:$0xff] }
 0x15a   : > { %v1464_v16 = vld [vmem:[%s9756_s26 + $0x2900] sm:$0xff]  ;;  %1461 = vst [vmem:[%s9764_s27 + $0x1470] sm:$0xff] %v1460_v14  ;;  %1463 = vst [vmem:[%s9764_s27 + $0x1478] sm:$0xff] %v1462_v15  ;;  %v1466_v17 = vld [vmem:[%s9756_s26 + $0x2908] sm:$0xff] }
 0x15b   : > { %1465 = vst [vmem:[%s9764_s27 + $0x1480] sm:$0xff] %v1464_v16  ;;  %v1468_v18 = vld [vmem:[%s9756_s26 + $0x2920] sm:$0xff]  ;;  %v1470_v19 = vld [vmem:[%s9756_s26 + $0x2928] sm:$0xff]  ;;  %1467 = vst [vmem:[%s9764_s27 + $0x1488] sm:$0xff] %v1466_v17 }
 0x15c   : > { %1469 = vst [vmem:[%s9764_s27 + $0x1490] sm:$0xff] %v1468_v18  ;;  %1471 = vst [vmem:[%s9764_s27 + $0x1498] sm:$0xff] %v1470_v19  ;;  %v1472_v20 = vld [vmem:[%s9756_s26 + $0x2940] sm:$0xff]  ;;  %v1474_v21 = vld [vmem:[%s9756_s26 + $0x2948] sm:$0xff] }
 0x15d   : > { %v1476_v22 = vld [vmem:[%s9756_s26 + $0x2960] sm:$0xff]  ;;  %1473 = vst [vmem:[%s9764_s27 + $0x14a0] sm:$0xff] %v1472_v20  ;;  %1475 = vst [vmem:[%s9764_s27 + $0x14a8] sm:$0xff] %v1474_v21  ;;  %v1478_v23 = vld [vmem:[%s9756_s26 + $0x2968] sm:$0xff] }
 0x15e   : > { %1477 = vst [vmem:[%s9764_s27 + $0x14b0] sm:$0xff] %v1476_v22  ;;  %v1480_v24 = vld [vmem:[%s9756_s26 + $0x2980] sm:$0xff]  ;;  %v1482_v25 = vld [vmem:[%s9756_s26 + $0x2988] sm:$0xff]  ;;  %1479 = vst [vmem:[%s9764_s27 + $0x14b8] sm:$0xff] %v1478_v23 }
 0x15f   : > { %1481 = vst [vmem:[%s9764_s27 + $0x14c0] sm:$0xff] %v1480_v24  ;;  %1483 = vst [vmem:[%s9764_s27 + $0x14c8] sm:$0xff] %v1482_v25  ;;  %v1484_v26 = vld [vmem:[%s9756_s26 + $0x29a0] sm:$0xff]  ;;  %v1486_v27 = vld [vmem:[%s9756_s26 + $0x29a8] sm:$0xff] }
 0x160   : > { %v1488_v28 = vld [vmem:[%s9756_s26 + $0x29c0] sm:$0xff]  ;;  %1485 = vst [vmem:[%s9764_s27 + $0x14d0] sm:$0xff] %v1484_v26  ;;  %1487 = vst [vmem:[%s9764_s27 + $0x14d8] sm:$0xff] %v1486_v27  ;;  %v1490_v29 = vld [vmem:[%s9756_s26 + $0x29c8] sm:$0xff] }
 0x161   : > { %1489 = vst [vmem:[%s9764_s27 + $0x14e0] sm:$0xff] %v1488_v28  ;;  %v1492_v30 = vld [vmem:[%s9756_s26 + $0x29e0] sm:$0xff]  ;;  %v1494_v31 = vld [vmem:[%s9756_s26 + $0x29e8] sm:$0xff]  ;;  %1491 = vst [vmem:[%s9764_s27 + $0x14e8] sm:$0xff] %v1490_v29 }
 0x162   : > { %1493 = vst [vmem:[%s9764_s27 + $0x14f0] sm:$0xff] %v1492_v30  ;;  %1495 = vst [vmem:[%s9764_s27 + $0x14f8] sm:$0xff] %v1494_v31  ;;  %v1496_v32 = vld [vmem:[%s9756_s26 + $0x2a00] sm:$0xff]  ;;  %v1498_v33 = vld [vmem:[%s9756_s26 + $0x2a08] sm:$0xff] }
 0x163   : > { %v1500_v34 = vld [vmem:[%s9756_s26 + $0x2a20] sm:$0xff]  ;;  %1497 = vst [vmem:[%s9764_s27 + $0x1500] sm:$0xff] %v1496_v32  ;;  %1499 = vst [vmem:[%s9764_s27 + $0x1508] sm:$0xff] %v1498_v33  ;;  %v1502_v35 = vld [vmem:[%s9756_s26 + $0x2a28] sm:$0xff] }
 0x164   : > { %1501 = vst [vmem:[%s9764_s27 + $0x1510] sm:$0xff] %v1500_v34  ;;  %v1504_v36 = vld [vmem:[%s9756_s26 + $0x2a40] sm:$0xff]  ;;  %v1506_v37 = vld [vmem:[%s9756_s26 + $0x2a48] sm:$0xff]  ;;  %1503 = vst [vmem:[%s9764_s27 + $0x1518] sm:$0xff] %v1502_v35 }
 0x165   : > { %1505 = vst [vmem:[%s9764_s27 + $0x1520] sm:$0xff] %v1504_v36  ;;  %1507 = vst [vmem:[%s9764_s27 + $0x1528] sm:$0xff] %v1506_v37  ;;  %v1508_v38 = vld [vmem:[%s9756_s26 + $0x2a60] sm:$0xff]  ;;  %v1510_v39 = vld [vmem:[%s9756_s26 + $0x2a68] sm:$0xff] }
 0x166   : > { %v1512_v40 = vld [vmem:[%s9756_s26 + $0x2a80] sm:$0xff]  ;;  %1509 = vst [vmem:[%s9764_s27 + $0x1530] sm:$0xff] %v1508_v38  ;;  %1511 = vst [vmem:[%s9764_s27 + $0x1538] sm:$0xff] %v1510_v39  ;;  %v1514_v41 = vld [vmem:[%s9756_s26 + $0x2a88] sm:$0xff] }
 0x167   : > { %1513 = vst [vmem:[%s9764_s27 + $0x1540] sm:$0xff] %v1512_v40  ;;  %v1516_v42 = vld [vmem:[%s9756_s26 + $0x2aa0] sm:$0xff]  ;;  %v1518_v43 = vld [vmem:[%s9756_s26 + $0x2aa8] sm:$0xff]  ;;  %1515 = vst [vmem:[%s9764_s27 + $0x1548] sm:$0xff] %v1514_v41 }
 0x168   : > { %1517 = vst [vmem:[%s9764_s27 + $0x1550] sm:$0xff] %v1516_v42  ;;  %1519 = vst [vmem:[%s9764_s27 + $0x1558] sm:$0xff] %v1518_v43  ;;  %v1520_v44 = vld [vmem:[%s9756_s26 + $0x2ac0] sm:$0xff]  ;;  %v1522_v45 = vld [vmem:[%s9756_s26 + $0x2ac8] sm:$0xff] }
 0x169   : > { %v1524_v46 = vld [vmem:[%s9756_s26 + $0x2ae0] sm:$0xff]  ;;  %1521 = vst [vmem:[%s9764_s27 + $0x1560] sm:$0xff] %v1520_v44  ;;  %1523 = vst [vmem:[%s9764_s27 + $0x1568] sm:$0xff] %v1522_v45  ;;  %v1526_v47 = vld [vmem:[%s9756_s26 + $0x2ae8] sm:$0xff] }
 0x16a   : > { %1525 = vst [vmem:[%s9764_s27 + $0x1570] sm:$0xff] %v1524_v46  ;;  %v1528_v48 = vld [vmem:[%s9756_s26 + $0x2b00] sm:$0xff]  ;;  %v1530_v49 = vld [vmem:[%s9756_s26 + $0x2b08] sm:$0xff]  ;;  %1527 = vst [vmem:[%s9764_s27 + $0x1578] sm:$0xff] %v1526_v47 }
 0x16b   : > { %1529 = vst [vmem:[%s9764_s27 + $0x1580] sm:$0xff] %v1528_v48  ;;  %1531 = vst [vmem:[%s9764_s27 + $0x1588] sm:$0xff] %v1530_v49  ;;  %v1532_v50 = vld [vmem:[%s9756_s26 + $0x2b20] sm:$0xff]  ;;  %v1534_v51 = vld [vmem:[%s9756_s26 + $0x2b28] sm:$0xff] }
 0x16c   : > { %v1536_v52 = vld [vmem:[%s9756_s26 + $0x2b40] sm:$0xff]  ;;  %1533 = vst [vmem:[%s9764_s27 + $0x1590] sm:$0xff] %v1532_v50  ;;  %1535 = vst [vmem:[%s9764_s27 + $0x1598] sm:$0xff] %v1534_v51  ;;  %v1538_v53 = vld [vmem:[%s9756_s26 + $0x2b48] sm:$0xff] }
 0x16d   : > { %1537 = vst [vmem:[%s9764_s27 + $0x15a0] sm:$0xff] %v1536_v52  ;;  %v1540_v54 = vld [vmem:[%s9756_s26 + $0x2b60] sm:$0xff]  ;;  %v1542_v55 = vld [vmem:[%s9756_s26 + $0x2b68] sm:$0xff]  ;;  %1539 = vst [vmem:[%s9764_s27 + $0x15a8] sm:$0xff] %v1538_v53 }
 0x16e   : > { %1541 = vst [vmem:[%s9764_s27 + $0x15b0] sm:$0xff] %v1540_v54  ;;  %1543 = vst [vmem:[%s9764_s27 + $0x15b8] sm:$0xff] %v1542_v55  ;;  %v1544_v56 = vld [vmem:[%s9756_s26 + $0x2b80] sm:$0xff]  ;;  %v1546_v57 = vld [vmem:[%s9756_s26 + $0x2b88] sm:$0xff] }
 0x16f   : > { %v1548_v58 = vld [vmem:[%s9756_s26 + $0x2ba0] sm:$0xff]  ;;  %1545 = vst [vmem:[%s9764_s27 + $0x15c0] sm:$0xff] %v1544_v56  ;;  %1547 = vst [vmem:[%s9764_s27 + $0x15c8] sm:$0xff] %v1546_v57  ;;  %v1550_v59 = vld [vmem:[%s9756_s26 + $0x2ba8] sm:$0xff] }
 0x170   : > { %1549 = vst [vmem:[%s9764_s27 + $0x15d0] sm:$0xff] %v1548_v58  ;;  %v1552_v60 = vld [vmem:[%s9756_s26 + $0x2bc0] sm:$0xff]  ;;  %v1554_v61 = vld [vmem:[%s9756_s26 + $0x2bc8] sm:$0xff]  ;;  %1551 = vst [vmem:[%s9764_s27 + $0x15d8] sm:$0xff] %v1550_v59 }
 0x171   : > { %1553 = vst [vmem:[%s9764_s27 + $0x15e0] sm:$0xff] %v1552_v60  ;;  %1555 = vst [vmem:[%s9764_s27 + $0x15e8] sm:$0xff] %v1554_v61  ;;  %v1556_v62 = vld [vmem:[%s9756_s26 + $0x2be0] sm:$0xff]  ;;  %v1558_v63 = vld [vmem:[%s9756_s26 + $0x2be8] sm:$0xff] }
 0x172   : > { %v1560_v0 = vld [vmem:[%s9756_s26 + $0x2c00] sm:$0xff]  ;;  %1557 = vst [vmem:[%s9764_s27 + $0x15f0] sm:$0xff] %v1556_v62  ;;  %1559 = vst [vmem:[%s9764_s27 + $0x15f8] sm:$0xff] %v1558_v63  ;;  %v1562_v1 = vld [vmem:[%s9756_s26 + $0x2c08] sm:$0xff] }
 0x173   : > { %1561 = vst [vmem:[%s9764_s27 + $0x1600] sm:$0xff] %v1560_v0  ;;  %v1564_v2 = vld [vmem:[%s9756_s26 + $0x2c20] sm:$0xff]  ;;  %v1566_v3 = vld [vmem:[%s9756_s26 + $0x2c28] sm:$0xff]  ;;  %1563 = vst [vmem:[%s9764_s27 + $0x1608] sm:$0xff] %v1562_v1 }
 0x174   : > { %1565 = vst [vmem:[%s9764_s27 + $0x1610] sm:$0xff] %v1564_v2  ;;  %1567 = vst [vmem:[%s9764_s27 + $0x1618] sm:$0xff] %v1566_v3  ;;  %v1568_v4 = vld [vmem:[%s9756_s26 + $0x2c40] sm:$0xff]  ;;  %v1570_v5 = vld [vmem:[%s9756_s26 + $0x2c48] sm:$0xff] }
 0x175   : > { %v1572_v6 = vld [vmem:[%s9756_s26 + $0x2c60] sm:$0xff]  ;;  %1569 = vst [vmem:[%s9764_s27 + $0x1620] sm:$0xff] %v1568_v4  ;;  %1571 = vst [vmem:[%s9764_s27 + $0x1628] sm:$0xff] %v1570_v5  ;;  %v1574_v7 = vld [vmem:[%s9756_s26 + $0x2c68] sm:$0xff] }
 0x176   : > { %1573 = vst [vmem:[%s9764_s27 + $0x1630] sm:$0xff] %v1572_v6  ;;  %v1576_v8 = vld [vmem:[%s9756_s26 + $0x2c80] sm:$0xff]  ;;  %v1578_v9 = vld [vmem:[%s9756_s26 + $0x2c88] sm:$0xff]  ;;  %1575 = vst [vmem:[%s9764_s27 + $0x1638] sm:$0xff] %v1574_v7 }
 0x177   : > { %1577 = vst [vmem:[%s9764_s27 + $0x1640] sm:$0xff] %v1576_v8  ;;  %1579 = vst [vmem:[%s9764_s27 + $0x1648] sm:$0xff] %v1578_v9  ;;  %v1580_v10 = vld [vmem:[%s9756_s26 + $0x2ca0] sm:$0xff]  ;;  %v1582_v11 = vld [vmem:[%s9756_s26 + $0x2ca8] sm:$0xff] }
 0x178   : > { %v1584_v12 = vld [vmem:[%s9756_s26 + $0x2cc0] sm:$0xff]  ;;  %1581 = vst [vmem:[%s9764_s27 + $0x1650] sm:$0xff] %v1580_v10  ;;  %1583 = vst [vmem:[%s9764_s27 + $0x1658] sm:$0xff] %v1582_v11  ;;  %v1586_v13 = vld [vmem:[%s9756_s26 + $0x2cc8] sm:$0xff] }
 0x179   : > { %1585 = vst [vmem:[%s9764_s27 + $0x1660] sm:$0xff] %v1584_v12  ;;  %v1588_v14 = vld [vmem:[%s9756_s26 + $0x2ce0] sm:$0xff]  ;;  %v1590_v15 = vld [vmem:[%s9756_s26 + $0x2ce8] sm:$0xff]  ;;  %1587 = vst [vmem:[%s9764_s27 + $0x1668] sm:$0xff] %v1586_v13 }
 0x17a   : > { %1589 = vst [vmem:[%s9764_s27 + $0x1670] sm:$0xff] %v1588_v14  ;;  %1591 = vst [vmem:[%s9764_s27 + $0x1678] sm:$0xff] %v1590_v15  ;;  %v1592_v16 = vld [vmem:[%s9756_s26 + $0x2d00] sm:$0xff]  ;;  %v1594_v17 = vld [vmem:[%s9756_s26 + $0x2d08] sm:$0xff] }
 0x17b   : > { %v1596_v18 = vld [vmem:[%s9756_s26 + $0x2d20] sm:$0xff]  ;;  %1593 = vst [vmem:[%s9764_s27 + $0x1680] sm:$0xff] %v1592_v16  ;;  %1595 = vst [vmem:[%s9764_s27 + $0x1688] sm:$0xff] %v1594_v17  ;;  %v1598_v19 = vld [vmem:[%s9756_s26 + $0x2d28] sm:$0xff] }
 0x17c   : > { %1597 = vst [vmem:[%s9764_s27 + $0x1690] sm:$0xff] %v1596_v18  ;;  %v1600_v20 = vld [vmem:[%s9756_s26 + $0x2d40] sm:$0xff]  ;;  %v1602_v21 = vld [vmem:[%s9756_s26 + $0x2d48] sm:$0xff]  ;;  %1599 = vst [vmem:[%s9764_s27 + $0x1698] sm:$0xff] %v1598_v19 }
 0x17d   : > { %1601 = vst [vmem:[%s9764_s27 + $0x16a0] sm:$0xff] %v1600_v20  ;;  %1603 = vst [vmem:[%s9764_s27 + $0x16a8] sm:$0xff] %v1602_v21  ;;  %v1604_v22 = vld [vmem:[%s9756_s26 + $0x2d60] sm:$0xff]  ;;  %v1606_v23 = vld [vmem:[%s9756_s26 + $0x2d68] sm:$0xff] }
 0x17e   : > { %v1608_v24 = vld [vmem:[%s9756_s26 + $0x2d80] sm:$0xff]  ;;  %1605 = vst [vmem:[%s9764_s27 + $0x16b0] sm:$0xff] %v1604_v22  ;;  %1607 = vst [vmem:[%s9764_s27 + $0x16b8] sm:$0xff] %v1606_v23  ;;  %v1610_v25 = vld [vmem:[%s9756_s26 + $0x2d88] sm:$0xff] }
 0x17f   : > { %1609 = vst [vmem:[%s9764_s27 + $0x16c0] sm:$0xff] %v1608_v24  ;;  %v1612_v26 = vld [vmem:[%s9756_s26 + $0x2da0] sm:$0xff]  ;;  %v1614_v27 = vld [vmem:[%s9756_s26 + $0x2da8] sm:$0xff]  ;;  %1611 = vst [vmem:[%s9764_s27 + $0x16c8] sm:$0xff] %v1610_v25 }
 0x180   : > { %1613 = vst [vmem:[%s9764_s27 + $0x16d0] sm:$0xff] %v1612_v26  ;;  %1615 = vst [vmem:[%s9764_s27 + $0x16d8] sm:$0xff] %v1614_v27  ;;  %v1616_v28 = vld [vmem:[%s9756_s26 + $0x2dc0] sm:$0xff]  ;;  %v1618_v29 = vld [vmem:[%s9756_s26 + $0x2dc8] sm:$0xff] }
 0x181   : > { %v1620_v30 = vld [vmem:[%s9756_s26 + $0x2de0] sm:$0xff]  ;;  %1617 = vst [vmem:[%s9764_s27 + $0x16e0] sm:$0xff] %v1616_v28  ;;  %1619 = vst [vmem:[%s9764_s27 + $0x16e8] sm:$0xff] %v1618_v29  ;;  %v1622_v31 = vld [vmem:[%s9756_s26 + $0x2de8] sm:$0xff] }
 0x182   : > { %1621 = vst [vmem:[%s9764_s27 + $0x16f0] sm:$0xff] %v1620_v30  ;;  %v1624_v32 = vld [vmem:[%s9756_s26 + $0x2e00] sm:$0xff]  ;;  %v1626_v33 = vld [vmem:[%s9756_s26 + $0x2e08] sm:$0xff]  ;;  %1623 = vst [vmem:[%s9764_s27 + $0x16f8] sm:$0xff] %v1622_v31 }
 0x183   : > { %1625 = vst [vmem:[%s9764_s27 + $0x1700] sm:$0xff] %v1624_v32  ;;  %1627 = vst [vmem:[%s9764_s27 + $0x1708] sm:$0xff] %v1626_v33  ;;  %v1628_v34 = vld [vmem:[%s9756_s26 + $0x2e20] sm:$0xff]  ;;  %v1630_v35 = vld [vmem:[%s9756_s26 + $0x2e28] sm:$0xff] }
 0x184   : > { %v1632_v36 = vld [vmem:[%s9756_s26 + $0x2e40] sm:$0xff]  ;;  %1629 = vst [vmem:[%s9764_s27 + $0x1710] sm:$0xff] %v1628_v34  ;;  %1631 = vst [vmem:[%s9764_s27 + $0x1718] sm:$0xff] %v1630_v35  ;;  %v1634_v37 = vld [vmem:[%s9756_s26 + $0x2e48] sm:$0xff] }
 0x185   : > { %1633 = vst [vmem:[%s9764_s27 + $0x1720] sm:$0xff] %v1632_v36  ;;  %v1636_v38 = vld [vmem:[%s9756_s26 + $0x2e60] sm:$0xff]  ;;  %v1638_v39 = vld [vmem:[%s9756_s26 + $0x2e68] sm:$0xff]  ;;  %1635 = vst [vmem:[%s9764_s27 + $0x1728] sm:$0xff] %v1634_v37 }
 0x186   : > { %1637 = vst [vmem:[%s9764_s27 + $0x1730] sm:$0xff] %v1636_v38  ;;  %1639 = vst [vmem:[%s9764_s27 + $0x1738] sm:$0xff] %v1638_v39  ;;  %v1640_v40 = vld [vmem:[%s9756_s26 + $0x2e80] sm:$0xff]  ;;  %v1642_v41 = vld [vmem:[%s9756_s26 + $0x2e88] sm:$0xff] }
 0x187   : > { %v1644_v42 = vld [vmem:[%s9756_s26 + $0x2ea0] sm:$0xff]  ;;  %1641 = vst [vmem:[%s9764_s27 + $0x1740] sm:$0xff] %v1640_v40  ;;  %1643 = vst [vmem:[%s9764_s27 + $0x1748] sm:$0xff] %v1642_v41  ;;  %v1646_v43 = vld [vmem:[%s9756_s26 + $0x2ea8] sm:$0xff] }
 0x188   : > { %1645 = vst [vmem:[%s9764_s27 + $0x1750] sm:$0xff] %v1644_v42  ;;  %v1648_v44 = vld [vmem:[%s9756_s26 + $0x2ec0] sm:$0xff]  ;;  %v1650_v45 = vld [vmem:[%s9756_s26 + $0x2ec8] sm:$0xff]  ;;  %1647 = vst [vmem:[%s9764_s27 + $0x1758] sm:$0xff] %v1646_v43 }
 0x189   : > { %1649 = vst [vmem:[%s9764_s27 + $0x1760] sm:$0xff] %v1648_v44  ;;  %1651 = vst [vmem:[%s9764_s27 + $0x1768] sm:$0xff] %v1650_v45  ;;  %v1652_v46 = vld [vmem:[%s9756_s26 + $0x2ee0] sm:$0xff]  ;;  %v1654_v47 = vld [vmem:[%s9756_s26 + $0x2ee8] sm:$0xff] }
 0x18a   : > { %v1656_v48 = vld [vmem:[%s9756_s26 + $0x2f00] sm:$0xff]  ;;  %1653 = vst [vmem:[%s9764_s27 + $0x1770] sm:$0xff] %v1652_v46  ;;  %1655 = vst [vmem:[%s9764_s27 + $0x1778] sm:$0xff] %v1654_v47  ;;  %v1658_v49 = vld [vmem:[%s9756_s26 + $0x2f08] sm:$0xff] }
 0x18b   : > { %1657 = vst [vmem:[%s9764_s27 + $0x1780] sm:$0xff] %v1656_v48  ;;  %v1660_v50 = vld [vmem:[%s9756_s26 + $0x2f20] sm:$0xff]  ;;  %v1662_v51 = vld [vmem:[%s9756_s26 + $0x2f28] sm:$0xff]  ;;  %1659 = vst [vmem:[%s9764_s27 + $0x1788] sm:$0xff] %v1658_v49 }
 0x18c   : > { %1661 = vst [vmem:[%s9764_s27 + $0x1790] sm:$0xff] %v1660_v50  ;;  %1663 = vst [vmem:[%s9764_s27 + $0x1798] sm:$0xff] %v1662_v51  ;;  %v1664_v52 = vld [vmem:[%s9756_s26 + $0x2f40] sm:$0xff]  ;;  %v1666_v53 = vld [vmem:[%s9756_s26 + $0x2f48] sm:$0xff] }
 0x18d   : > { %v1668_v54 = vld [vmem:[%s9756_s26 + $0x2f60] sm:$0xff]  ;;  %1665 = vst [vmem:[%s9764_s27 + $0x17a0] sm:$0xff] %v1664_v52  ;;  %1667 = vst [vmem:[%s9764_s27 + $0x17a8] sm:$0xff] %v1666_v53  ;;  %v1670_v55 = vld [vmem:[%s9756_s26 + $0x2f68] sm:$0xff] }
 0x18e   : > { %1669 = vst [vmem:[%s9764_s27 + $0x17b0] sm:$0xff] %v1668_v54  ;;  %v1672_v56 = vld [vmem:[%s9756_s26 + $0x2f80] sm:$0xff]  ;;  %v1674_v57 = vld [vmem:[%s9756_s26 + $0x2f88] sm:$0xff]  ;;  %1671 = vst [vmem:[%s9764_s27 + $0x17b8] sm:$0xff] %v1670_v55 }
 0x18f   : > { %1673 = vst [vmem:[%s9764_s27 + $0x17c0] sm:$0xff] %v1672_v56  ;;  %1675 = vst [vmem:[%s9764_s27 + $0x17c8] sm:$0xff] %v1674_v57  ;;  %v1676_v58 = vld [vmem:[%s9756_s26 + $0x2fa0] sm:$0xff]  ;;  %v1678_v59 = vld [vmem:[%s9756_s26 + $0x2fa8] sm:$0xff] }
 0x190   : > { %v1680_v60 = vld [vmem:[%s9756_s26 + $0x2fc0] sm:$0xff]  ;;  %1677 = vst [vmem:[%s9764_s27 + $0x17d0] sm:$0xff] %v1676_v58  ;;  %1679 = vst [vmem:[%s9764_s27 + $0x17d8] sm:$0xff] %v1678_v59  ;;  %v1682_v61 = vld [vmem:[%s9756_s26 + $0x2fc8] sm:$0xff] }
 0x191   : > { %1681 = vst [vmem:[%s9764_s27 + $0x17e0] sm:$0xff] %v1680_v60  ;;  %v1684_v62 = vld [vmem:[%s9756_s26 + $0x2fe0] sm:$0xff]  ;;  %v1686_v63 = vld [vmem:[%s9756_s26 + $0x2fe8] sm:$0xff]  ;;  %1683 = vst [vmem:[%s9764_s27 + $0x17e8] sm:$0xff] %v1682_v61 }
 0x192   : > { %1685 = vst [vmem:[%s9764_s27 + $0x17f0] sm:$0xff] %v1684_v62  ;;  %1687 = vst [vmem:[%s9764_s27 + $0x17f8] sm:$0xff] %v1686_v63 }
 0x193 PF: > { %p7674_p7 = scmp.ge.s32.totalorder %s9693_s14, 1  ;;  %p1700_p8 = scmp.lt.s32.totalorder %s9693_s14, 3 }
 0x195   : > { %p1701_p9 = pnand %p7674_p7, %p1700_p8 }
 0x196   : > { %s1707_s28 = sand.u32 (!%p1701_p9), 1, %s9685_s12   ;;  %s7676_s18 = sshll.u32 (!%p1701_p9), %s9731_s15, 2 }
 0x197   : > { %1704 = sbr.rel (%p1701_p9) target bundleno = 1410 (0x582), region = 51  ;;  %p1735_p10 = scmp.lt.s32.totalorder (!%p1701_p9), %s7676_s18, 7 }
 0x198   : > { %s8477_s8 = smul.u32 (!%p1701_p9), 6144, %s1707_s28  ;;  %s7675_s24 = sshll.u32 (!%p1701_p9), %s1707_s28, 6 }
 0x199   : > { %s12240_s12 = scalar_lea.vmem (!%p1701_p9), [#allocation3], %s7675_s24 }
 0x19a   : > { %s11322_s11 = scalar_lea.vmem (!%p1701_p9), [#allocation2], %s8477_s8 }
 0x19c   : > { %v1740_v0 = vld [vmem:[%s12453_s0] sm:$0xff]  ;;  %v1741_v2 = vld [vmem:[%s12453_s0 + $0x8] sm:$0xff]  ;;  %s12462_s18 = smov (!%p1735_p10, %s7676_s18), 7  ;;  %s8475_s28 = sshll.u32 (%p9746_p5), %s9731_s15, 5 }
 0x19d   : > { %v1752_v1 = vld [vmem:[%s12453_s0 + $0x60] sm:$0xff]  ;;  %v1753_v5 = vld [vmem:[%s12453_s0 + $0x68] sm:$0xff]  ;;  %s12121_s23 = scalar_lea.vmem %s12455_s2, %s12462_s18  ;;  %s7571_s26 = scalar_lea.vmem (%p9746_p5), %s12456_s3, %s8475_s28 }
 0x19e   : > { %v11310_v3 = vcombine.low %v1740_v0, %v1752_v1  ;;  %v11312_v4 = vcombine.high %v1740_v0, %v1752_v1  ;;  %v11317_v6 = vcombine.low %v1741_v2, %v1753_v5  ;;  %v11319_v7 = vcombine.high %v1741_v2, %v1753_v5  ;;  %v8502_v8 = vld [vmem:[%s11322_s11 + $0xe4] ss:$16 sps:$4 sm:$0xff]   ;;  %v8506_v10 = vld [vmem:[%s11322_s11 + $0xe0] ss:$16 sps:$4 sm:$0xff]  }
 0x19f   : > { %v8504_v9 = vld [vmem:[%s11322_s11 + $0x2e4] ss:$16 sps:$4 sm:$0xff]   ;;  %6514 = vmatprep.subr.bf16.mxu0 %v8502_v8  ;;  %v8507_v11 = vld [vmem:[%s11322_s11 + $0x2e0] ss:$16 sps:$4 sm:$0xff]  }
 0x1a0   : > { %6546 = vmatprep.mubr.bf16.mxu0 %v11312_v4  ;;  %6589 = vmatprep.mubr.bf16.mxu1 %v11319_v7  ;;  %v8508_v12 = vld [vmem:[%s11322_s11 + $0xc4] ss:$16 sps:$4 sm:$0xff]   ;;  %v8512_v14 = vld [vmem:[%s11322_s11 + $0xc0] ss:$16 sps:$4 sm:$0xff]  }
 0x1a1   : > { %6557 = vmatprep.subr.bf16.mxu1 %v8504_v9  ;;  %6515 = vmatpush1.bf16.msra.mxu0 %v8506_v10  ;;  %v8510_v13 = vld [vmem:[%s11322_s11 + $0x2c4] ss:$16 sps:$4 sm:$0xff]   ;;  %v8513_v15 = vld [vmem:[%s11322_s11 + $0x2c0] ss:$16 sps:$4 sm:$0xff]  }
 0x1a2   : > { %6558 = vmatpush1.bf16.msra.mxu1 %v8507_v11  ;;  %6516 = vmatprep.subr.bf16.mxu0 %v8508_v12  ;;  %v8514_v16 = vld [vmem:[%s11322_s11 + $0xa4] ss:$16 sps:$4 sm:$0xff]   ;;  %v8518_v18 = vld [vmem:[%s11322_s11 + $0xa0] ss:$16 sps:$4 sm:$0xff]  }
 0x1a3   : > { %6559 = vmatprep.subr.bf16.mxu1 %v8510_v13  ;;  %v8516_v17 = vld [vmem:[%s11322_s11 + $0x2a4] ss:$16 sps:$4 sm:$0xff]   ;;  %v8519_v19 = vld [vmem:[%s11322_s11 + $0x2a0] ss:$16 sps:$4 sm:$0xff]  }
 0x1a4   : > { %v8520_v20 = vld [vmem:[%s11322_s11 + $0x84] ss:$16 sps:$4 sm:$0xff]   ;;  %v8524_v22 = vld [vmem:[%s11322_s11 + $0x80] ss:$16 sps:$4 sm:$0xff]  }
 0x1a5   : > { %6517 = vmatpush1.bf16.msra.mxu0 %v8512_v14  ;;  %v8522_v21 = vld [vmem:[%s11322_s11 + $0x284] ss:$16 sps:$4 sm:$0xff]   ;;  %v8525_v23 = vld [vmem:[%s11322_s11 + $0x280] ss:$16 sps:$4 sm:$0xff]  }
 0x1a6   : > { %6560 = vmatpush1.bf16.msra.mxu1 %v8513_v15  ;;  %6518 = vmatprep.subr.bf16.mxu0 %v8514_v16  ;;  %v8526_v24 = vld [vmem:[%s11322_s11 + $0x64] ss:$16 sps:$4 sm:$0xff]   ;;  %v8530_v26 = vld [vmem:[%s11322_s11 + $0x60] ss:$16 sps:$4 sm:$0xff]  }
 0x1a7   : > { %6561 = vmatprep.subr.bf16.mxu1 %v8516_v17  ;;  %v8528_v25 = vld [vmem:[%s11322_s11 + $0x264] ss:$16 sps:$4 sm:$0xff]   ;;  %v8531_v27 = vld [vmem:[%s11322_s11 + $0x260] ss:$16 sps:$4 sm:$0xff]  }
 0x1a8   : > { %v8532_v28 = vld [vmem:[%s11322_s11 + $0x44] ss:$16 sps:$4 sm:$0xff]   ;;  %v8536_v30 = vld [vmem:[%s11322_s11 + $0x40] ss:$16 sps:$4 sm:$0xff]  }
 0x1a9   : > { %6519 = vmatpush1.bf16.msra.mxu0 %v8518_v18  ;;  %v8534_v29 = vld [vmem:[%s11322_s11 + $0x244] ss:$16 sps:$4 sm:$0xff]   ;;  %v8537_v31 = vld [vmem:[%s11322_s11 + $0x240] ss:$16 sps:$4 sm:$0xff]  }
 0x1aa   : > { %6562 = vmatpush1.bf16.msra.mxu1 %v8519_v19  ;;  %6520 = vmatprep.subr.bf16.mxu0 %v8520_v20  ;;  %v8538_v32 = vld [vmem:[%s11322_s11 + $0x24] ss:$16 sps:$4 sm:$0xff]   ;;  %v8542_v34 = vld [vmem:[%s11322_s11 + $0x20] ss:$16 sps:$4 sm:$0xff]  }
 0x1ab   : > { %6563 = vmatprep.subr.bf16.mxu1 %v8522_v21  ;;  %v8540_v33 = vld [vmem:[%s11322_s11 + $0x224] ss:$16 sps:$4 sm:$0xff]   ;;  %v8543_v35 = vld [vmem:[%s11322_s11 + $0x220] ss:$16 sps:$4 sm:$0xff]  }
 0x1ac   : > { %v8544_v36 = vld [vmem:[%s11322_s11 + $0x4] ss:$16 sps:$4 sm:$0xff]   ;;  %v8548_v38 = vld [vmem:[%s11322_s11] ss:$16 sps:$4 sm:$0xff]  }
 0x1ad   : > { %6521 = vmatpush1.bf16.msra.mxu0 %v8524_v22  ;;  %v8546_v37 = vld [vmem:[%s11322_s11 + $0x204] ss:$16 sps:$4 sm:$0xff]   ;;  %v8549_v39 = vld [vmem:[%s11322_s11 + $0x200] ss:$16 sps:$4 sm:$0xff]  }
 0x1ae   : > { %6564 = vmatpush1.bf16.msra.mxu1 %v8525_v23  ;;  %6522 = vmatprep.subr.bf16.mxu0 %v8526_v24  ;;  %v8550_v40 = vld [vmem:[%s11322_s11 + $0x1e4] ss:$16 sps:$4 sm:$0xff]   ;;  %v8554_v42 = vld [vmem:[%s11322_s11 + $0x1e0] ss:$16 sps:$4 sm:$0xff]  }
 0x1af   : > { %6565 = vmatprep.subr.bf16.mxu1 %v8528_v25  ;;  %v8552_v41 = vld [vmem:[%s11322_s11 + $0x3e4] ss:$16 sps:$4 sm:$0xff]   ;;  %v8555_v43 = vld [vmem:[%s11322_s11 + $0x3e0] ss:$16 sps:$4 sm:$0xff]  }
 0x1b0   : > { %v8556_v44 = vld [vmem:[%s11322_s11 + $0x1c4] ss:$16 sps:$4 sm:$0xff]   ;;  %v8560_v46 = vld [vmem:[%s11322_s11 + $0x1c0] ss:$16 sps:$4 sm:$0xff]  }
 0x1b1   : > { %6523 = vmatpush1.bf16.msra.mxu0 %v8530_v26  ;;  %v8558_v45 = vld [vmem:[%s11322_s11 + $0x3c4] ss:$16 sps:$4 sm:$0xff]   ;;  %v8561_v47 = vld [vmem:[%s11322_s11 + $0x3c0] ss:$16 sps:$4 sm:$0xff]  }
 0x1b2   : > { %6566 = vmatpush1.bf16.msra.mxu1 %v8531_v27  ;;  %6524 = vmatprep.subr.bf16.mxu0 %v8532_v28  ;;  %v8562_v48 = vld [vmem:[%s11322_s11 + $0x1a4] ss:$16 sps:$4 sm:$0xff]   ;;  %v8566_v50 = vld [vmem:[%s11322_s11 + $0x1a0] ss:$16 sps:$4 sm:$0xff]  }
 0x1b3   : > { %6567 = vmatprep.subr.bf16.mxu1 %v8534_v29  ;;  %v8564_v49 = vld [vmem:[%s11322_s11 + $0x3a4] ss:$16 sps:$4 sm:$0xff]   ;;  %v8567_v51 = vld [vmem:[%s11322_s11 + $0x3a0] ss:$16 sps:$4 sm:$0xff]  }
 0x1b4   : > { %v8568_v52 = vld [vmem:[%s11322_s11 + $0x184] ss:$16 sps:$4 sm:$0xff]   ;;  %v8572_v54 = vld [vmem:[%s11322_s11 + $0x180] ss:$16 sps:$4 sm:$0xff]  }
 0x1b5   : > { %6525 = vmatpush1.bf16.msra.mxu0 %v8536_v30  ;;  %v8570_v53 = vld [vmem:[%s11322_s11 + $0x384] ss:$16 sps:$4 sm:$0xff]   ;;  %v8573_v55 = vld [vmem:[%s11322_s11 + $0x380] ss:$16 sps:$4 sm:$0xff]  }
 0x1b6   : > { %6568 = vmatpush1.bf16.msra.mxu1 %v8537_v31  ;;  %6526 = vmatprep.subr.bf16.mxu0 %v8538_v32  ;;  %v8574_v56 = vld [vmem:[%s11322_s11 + $0x164] ss:$16 sps:$4 sm:$0xff]   ;;  %v8578_v58 = vld [vmem:[%s11322_s11 + $0x160] ss:$16 sps:$4 sm:$0xff]  }
 0x1b7   : > { %6569 = vmatprep.subr.bf16.mxu1 %v8540_v33  ;;  %v8576_v57 = vld [vmem:[%s11322_s11 + $0x364] ss:$16 sps:$4 sm:$0xff]   ;;  %v8579_v59 = vld [vmem:[%s11322_s11 + $0x360] ss:$16 sps:$4 sm:$0xff]  }
 0x1b8   : > { %v8580_v60 = vld [vmem:[%s11322_s11 + $0x144] ss:$16 sps:$4 sm:$0xff]   ;;  %v8584_v62 = vld [vmem:[%s11322_s11 + $0x140] ss:$16 sps:$4 sm:$0xff]  }
 0x1b9   : > { %6527 = vmatpush1.bf16.msra.mxu0 %v8542_v34  ;;  %v8582_v61 = vld [vmem:[%s11322_s11 + $0x344] ss:$16 sps:$4 sm:$0xff]   ;;  %v8585_v63 = vld [vmem:[%s11322_s11 + $0x340] ss:$16 sps:$4 sm:$0xff]  }
 0x1ba   : > { %6570 = vmatpush1.bf16.msra.mxu1 %v8543_v35  ;;  %6528 = vmatprep.subr.bf16.mxu0 %v8544_v36  ;;  %v8586_v0 = vld [vmem:[%s11322_s11 + $0x124] ss:$16 sps:$4 sm:$0xff]   ;;  %v8590_v2 = vld [vmem:[%s11322_s11 + $0x120] ss:$16 sps:$4 sm:$0xff]  }
 0x1bb   : > { %6571 = vmatprep.subr.bf16.mxu1 %v8546_v37  ;;  %v8588_v1 = vld [vmem:[%s11322_s11 + $0x324] ss:$16 sps:$4 sm:$0xff]   ;;  %v8591_v5 = vld [vmem:[%s11322_s11 + $0x320] ss:$16 sps:$4 sm:$0xff]   ;;  %v11431_v37 = vld [vmem:[%s12453_s0 + $0x18] sm:$0xff] }
 0x1bc   : > { %v8592_v8 = vld [vmem:[%s11322_s11 + $0x104] ss:$16 sps:$4 sm:$0xff]   ;;  %v8596_v10 = vld [vmem:[%s11322_s11 + $0x100] ss:$16 sps:$4 sm:$0xff]  }
 0x1bd   : > { %6529 = vmatpush1.bf16.msra.mxu0 %v8548_v38  ;;  %v8594_v9 = vld [vmem:[%s11322_s11 + $0x304] ss:$16 sps:$4 sm:$0xff]   ;;  %v8597_v11 = vld [vmem:[%s11322_s11 + $0x300] ss:$16 sps:$4 sm:$0xff]  }
 0x1be   : > { %6572 = vmatpush1.bf16.msra.mxu1 %v8549_v39  ;;  %6530 = vmatprep.subr.bf16.mxu0 %v8550_v40  ;;  %v8600_v12 = vld [vmem:[%s11322_s11 + $0x4e4] ss:$16 sps:$4 sm:$0xff]   ;;  %v8598_v16 = vld [vmem:[%s11322_s11 + $0x4e0] ss:$16 sps:$4 sm:$0xff]  }
 0x1bf   : > { %6573 = vmatprep.subr.bf16.mxu1 %v8552_v41  ;;  %v8603_v13 = vld [vmem:[%s11322_s11 + $0x6e4] ss:$16 sps:$4 sm:$0xff]   ;;  %v8601_v17 = vld [vmem:[%s11322_s11 + $0x6e0] ss:$16 sps:$4 sm:$0xff]  }
 0x1c0   : > { %v11394_v14 = vld [vmem:[%s12453_s0 + $0x10] sm:$0xff] }
 0x1c1   : > { %6531 = vmatpush2.bf16.msra.mxu0 %v8554_v42  ;;  %v11399_v15 = vld [vmem:[%s12453_s0 + $0x70] sm:$0xff]  ;;  %v11440_v42 = vld [vmem:[%s12453_s0 + $0x78] sm:$0xff] }
 0x1c2   : > { %6574 = vmatpush2.bf16.msra.mxu1 %v8555_v43  ;;  %6532 = vmatprep.subr.bf16.mxu0 %v8556_v44  ;;  %v8606_v18 = vld [vmem:[%s11322_s11 + $0x4c4] ss:$16 sps:$4 sm:$0xff]   ;;  %v11407_v20 = vcombine.high %v11394_v14, %v11399_v15  ;;  %v8604_v21 = vld [vmem:[%s11322_s11 + $0x4c0] ss:$16 sps:$4 sm:$0xff]   ;;  %v11444_v43 = vcombine.high %v11431_v37, %v11440_v42 }
 0x1c3   : > { %6575 = vmatprep.subr.bf16.mxu1 %v8558_v45  ;;  %v8609_v19 = vld [vmem:[%s11322_s11 + $0x6c4] ss:$16 sps:$4 sm:$0xff]   ;;  %v8607_v22 = vld [vmem:[%s11322_s11 + $0x6c0] ss:$16 sps:$4 sm:$0xff]  }
 0x1c4   : > { %v8612_v23 = vld [vmem:[%s11322_s11 + $0x4a4] ss:$16 sps:$4 sm:$0xff]   ;;  %v8610_v25 = vld [vmem:[%s11322_s11 + $0x4a0] ss:$16 sps:$4 sm:$0xff]  }
 0x1c5   : > { %6533 = vmatpush2.bf16.msra.mxu0 %v8560_v46  ;;  %v8615_v24 = vld [vmem:[%s11322_s11 + $0x6a4] ss:$16 sps:$4 sm:$0xff]   ;;  %v8613_v26 = vld [vmem:[%s11322_s11 + $0x6a0] ss:$16 sps:$4 sm:$0xff]  }
 0x1c6   : > { %6576 = vmatpush2.bf16.msra.mxu1 %v8561_v47  ;;  %6534 = vmatprep.subr.bf16.mxu0 %v8562_v48  ;;  %v8618_v27 = vld [vmem:[%s11322_s11 + $0x484] ss:$16 sps:$4 sm:$0xff]   ;;  %v8616_v29 = vld [vmem:[%s11322_s11 + $0x480] ss:$16 sps:$4 sm:$0xff]  }
 0x1c7   : > { %6577 = vmatprep.subr.bf16.mxu1 %v8564_v49  ;;  %v8621_v28 = vld [vmem:[%s11322_s11 + $0x684] ss:$16 sps:$4 sm:$0xff]   ;;  %v8619_v30 = vld [vmem:[%s11322_s11 + $0x680] ss:$16 sps:$4 sm:$0xff]  }
 0x1c8   : > { %v8624_v31 = vld [vmem:[%s11322_s11 + $0x464] ss:$16 sps:$4 sm:$0xff]   ;;  %v8622_v33 = vld [vmem:[%s11322_s11 + $0x460] ss:$16 sps:$4 sm:$0xff]  }
 0x1c9   : > { %6535 = vmatpush2.bf16.msra.mxu0 %v8566_v50  ;;  %v8627_v32 = vld [vmem:[%s11322_s11 + $0x664] ss:$16 sps:$4 sm:$0xff]   ;;  %v8625_v34 = vld [vmem:[%s11322_s11 + $0x660] ss:$16 sps:$4 sm:$0xff]  }
 0x1ca   : > { %6578 = vmatpush2.bf16.msra.mxu1 %v8567_v51  ;;  %6536 = vmatprep.subr.bf16.mxu0 %v8568_v52  ;;  %v8630_v35 = vld [vmem:[%s11322_s11 + $0x444] ss:$16 sps:$4 sm:$0xff]   ;;  %v8628_v38 = vld [vmem:[%s11322_s11 + $0x440] ss:$16 sps:$4 sm:$0xff]  }
 0x1cb   : > { %6579 = vmatprep.subr.bf16.mxu1 %v8570_v53  ;;  %v8633_v36 = vld [vmem:[%s11322_s11 + $0x644] ss:$16 sps:$4 sm:$0xff]   ;;  %v8631_v39 = vld [vmem:[%s11322_s11 + $0x640] ss:$16 sps:$4 sm:$0xff]  }
 0x1cc   : > { %v8636_v40 = vld [vmem:[%s11322_s11 + $0x424] ss:$16 sps:$4 sm:$0xff]   ;;  %v8634_v44 = vld [vmem:[%s11322_s11 + $0x420] ss:$16 sps:$4 sm:$0xff]  }
 0x1cd   : > { %6537 = vmatpush2.bf16.msra.mxu0 %v8572_v54  ;;  %v8639_v41 = vld [vmem:[%s11322_s11 + $0x624] ss:$16 sps:$4 sm:$0xff]   ;;  %v8637_v45 = vld [vmem:[%s11322_s11 + $0x620] ss:$16 sps:$4 sm:$0xff]  }
 0x1ce   : > { %6580 = vmatpush2.bf16.msra.mxu1 %v8573_v55  ;;  %6538 = vmatprep.subr.bf16.mxu0 %v8574_v56  ;;  %v8642_v46 = vld [vmem:[%s11322_s11 + $0x404] ss:$16 sps:$4 sm:$0xff]   ;;  %v8640_v48 = vld [vmem:[%s11322_s11 + $0x400] ss:$16 sps:$4 sm:$0xff]  }
 0x1cf   : > { %6581 = vmatprep.subr.bf16.mxu1 %v8576_v57  ;;  %v8645_v47 = vld [vmem:[%s11322_s11 + $0x604] ss:$16 sps:$4 sm:$0xff]   ;;  %v8643_v49 = vld [vmem:[%s11322_s11 + $0x600] ss:$16 sps:$4 sm:$0xff]  }
 0x1d0   : > { %v8648_v50 = vld [vmem:[%s11322_s11 + $0x5e4] ss:$16 sps:$4 sm:$0xff]   ;;  %v8646_v52 = vld [vmem:[%s11322_s11 + $0x5e0] ss:$16 sps:$4 sm:$0xff]  }
 0x1d1   : > { %6539 = vmatpush2.bf16.msra.mxu0 %v8578_v58  ;;  %v8651_v51 = vld [vmem:[%s11322_s11 + $0x7e4] ss:$16 sps:$4 sm:$0xff]   ;;  %v8649_v53 = vld [vmem:[%s11322_s11 + $0x7e0] ss:$16 sps:$4 sm:$0xff]  }
 0x1d2   : > { %6582 = vmatpush2.bf16.msra.mxu1 %v8579_v59  ;;  %6540 = vmatprep.subr.bf16.mxu0 %v8580_v60  ;;  %v8654_v54 = vld [vmem:[%s11322_s11 + $0x5c4] ss:$16 sps:$4 sm:$0xff]   ;;  %v8652_v56 = vld [vmem:[%s11322_s11 + $0x5c0] ss:$16 sps:$4 sm:$0xff]  }
 0x1d3   : > { %6583 = vmatprep.subr.bf16.mxu1 %v8582_v61  ;;  %v8657_v55 = vld [vmem:[%s11322_s11 + $0x7c4] ss:$16 sps:$4 sm:$0xff]   ;;  %v8655_v57 = vld [vmem:[%s11322_s11 + $0x7c0] ss:$16 sps:$4 sm:$0xff]  }
 0x1d4   : > { %v8660_v58 = vld [vmem:[%s11322_s11 + $0x5a4] ss:$16 sps:$4 sm:$0xff]   ;;  %v8658_v60 = vld [vmem:[%s11322_s11 + $0x5a0] ss:$16 sps:$4 sm:$0xff]  }
 0x1d5   : > { %6541 = vmatpush2.bf16.msra.mxu0 %v8584_v62  ;;  %v8663_v59 = vld [vmem:[%s11322_s11 + $0x7a4] ss:$16 sps:$4 sm:$0xff]   ;;  %v8661_v61 = vld [vmem:[%s11322_s11 + $0x7a0] ss:$16 sps:$4 sm:$0xff]  }
 0x1d6   : > { %6584 = vmatpush2.bf16.msra.mxu1 %v8585_v63  ;;  %6542 = vmatprep.subr.bf16.mxu0 %v8586_v0  ;;  %v8666_v62 = vld [vmem:[%s11322_s11 + $0x584] ss:$16 sps:$4 sm:$0xff]   ;;  %v8664_v0 = vld [vmem:[%s11322_s11 + $0x580] ss:$16 sps:$4 sm:$0xff]  }
 0x1d7   : > { %6585 = vmatprep.subr.bf16.mxu1 %v8588_v1  ;;  %v8669_v63 = vld [vmem:[%s11322_s11 + $0x784] ss:$16 sps:$4 sm:$0xff]   ;;  %v8667_v1 = vld [vmem:[%s11322_s11 + $0x780] ss:$16 sps:$4 sm:$0xff]  }
 0x1d9   : > { %6543 = vmatpush2.bf16.msra.mxu0 %v8590_v2  ;;  %v8672_v2 = vld [vmem:[%s11322_s11 + $0x564] ss:$16 sps:$4 sm:$0xff]  }
 0x1da   : > { %6586 = vmatpush2.bf16.msra.mxu1 %v8591_v5  ;;  %6544 = vmatprep.subr.bf16.mxu0 %v8592_v8  ;;  %v8675_v5 = vld [vmem:[%s11322_s11 + $0x764] ss:$16 sps:$4 sm:$0xff]   ;;  %v8670_v8 = vld [vmem:[%s11322_s11 + $0x560] ss:$16 sps:$4 sm:$0xff]  }
 0x1db   : > { %6587 = vmatprep.subr.bf16.mxu1 %v8594_v9  ;;  %v8673_v9 = vld [vmem:[%s11322_s11 + $0x760] ss:$16 sps:$4 sm:$0xff]  }
 0x1dd   : > { %6545 = vmatpush2.bf16.msra.mxu0 %v8596_v10  ;;  %v8678_v10 = vld [vmem:[%s11322_s11 + $0x544] ss:$16 sps:$4 sm:$0xff]  }
 0x1de   : > { %6588 = vmatpush2.bf16.msra.mxu1 %v8597_v11  ;;  %6600 = vmatprep.subr.bf16.mxu0 %v8600_v12  ;;  %v8681_v11 = vld [vmem:[%s11322_s11 + $0x744] ss:$16 sps:$4 sm:$0xff]   ;;  %v8676_v12 = vld [vmem:[%s11322_s11 + $0x540] ss:$16 sps:$4 sm:$0xff]  }
 0x1df   : > { %6643 = vmatprep.subr.bf16.mxu1 %v8603_v13  ;;  %v8679_v13 = vld [vmem:[%s11322_s11 + $0x740] ss:$16 sps:$4 sm:$0xff]  }
 0x1e0   : > { %6547 = vmatmul.mubr.bf16.vlgmr.msra.gmra.mxu0 %v11310_v3 }
 0x1e1   : > { %6590 = vmatmul.mubr.bf16.vlgmr.msra.gmra.mxu1 %v11317_v6  ;;  %6601 = vmatpush1.bf16.msra.mxu0 %v8598_v16  ;;  %v8684_v16 = vld [vmem:[%s11322_s11 + $0x524] ss:$16 sps:$4 sm:$0xff]  }
 0x1e2   : > { %6644 = vmatpush1.bf16.msra.mxu1 %v8601_v17  ;;  %6602 = vmatprep.subr.bf16.mxu0 %v8606_v18  ;;  %v8687_v17 = vld [vmem:[%s11322_s11 + $0x724] ss:$16 sps:$4 sm:$0xff]   ;;  %v8682_v18 = vld [vmem:[%s11322_s11 + $0x520] ss:$16 sps:$4 sm:$0xff]  }
 0x1e3   : > { %6645 = vmatprep.subr.bf16.mxu1 %v8609_v19  ;;  %6632 = vmatprep.mubr.bf16.mxu0 %v11407_v20  ;;  %v8685_v19 = vld [vmem:[%s11322_s11 + $0x720] ss:$16 sps:$4 sm:$0xff]  }
 0x1e4   : > { %6675 = vmatprep.mubr.bf16.mxu1 %v11444_v43 }
 0x1e5   : > { %6603 = vmatpush1.bf16.msra.mxu0 %v8604_v21  ;;  %v8690_v21 = vld [vmem:[%s11322_s11 + $0x504] ss:$16 sps:$4 sm:$0xff]  }
 0x1e6   : > { %6646 = vmatpush1.bf16.msra.mxu1 %v8607_v22  ;;  %6604 = vmatprep.subr.bf16.mxu0 %v8612_v23  ;;  %v8693_v22 = vld [vmem:[%s11322_s11 + $0x704] ss:$16 sps:$4 sm:$0xff]   ;;  %v8688_v23 = vld [vmem:[%s11322_s11 + $0x500] ss:$16 sps:$4 sm:$0xff]  }
 0x1e7   : > { %6647 = vmatprep.subr.bf16.mxu1 %v8615_v24  ;;  %v8691_v24 = vld [vmem:[%s11322_s11 + $0x700] ss:$16 sps:$4 sm:$0xff]  }
 0x1e9   : > { %6605 = vmatpush1.bf16.msra.mxu0 %v8610_v25  ;;  %v8696_v25 = vld [vmem:[%s11322_s11 + $0x8e4] ss:$16 sps:$4 sm:$0xff]  }
 0x1ea   : > { %6648 = vmatpush1.bf16.msra.mxu1 %v8613_v26  ;;  %6606 = vmatprep.subr.bf16.mxu0 %v8618_v27  ;;  %v8699_v26 = vld [vmem:[%s11322_s11 + $0xae4] ss:$16 sps:$4 sm:$0xff]   ;;  %v8694_v27 = vld [vmem:[%s11322_s11 + $0x8e0] ss:$16 sps:$4 sm:$0xff]  }
 0x1eb   : > { %6649 = vmatprep.subr.bf16.mxu1 %v8621_v28  ;;  %v8697_v28 = vld [vmem:[%s11322_s11 + $0xae0] ss:$16 sps:$4 sm:$0xff]  }
 0x1ed   : > { %6607 = vmatpush1.bf16.msra.mxu0 %v8616_v29  ;;  %v11491_v29 = vcombine.low %v11394_v14, %v11399_v15  ;;  %v11507_v14 = vld [vmem:[%s12453_s0 + $0x80] sm:$0xff]  ;;  %v11512_v15 = vld [vmem:[%s12453_s0 + $0x28] sm:$0xff] }
 0x1ee   : > { %6650 = vmatpush1.bf16.msra.mxu1 %v8619_v30  ;;  %6608 = vmatprep.subr.bf16.mxu0 %v8624_v31  ;;  %v11495_v30 = vcombine.low %v11431_v37, %v11440_v42  ;;  %v8702_v31 = vld [vmem:[%s11322_s11 + $0x8c4] ss:$16 sps:$4 sm:$0xff]   ;;  %v8700_v37 = vld [vmem:[%s11322_s11 + $0x8c0] ss:$16 sps:$4 sm:$0xff]  }
 0x1ef   : > { %6651 = vmatprep.subr.bf16.mxu1 %v8627_v32  ;;  %v8705_v32 = vld [vmem:[%s11322_s11 + $0xac4] ss:$16 sps:$4 sm:$0xff]   ;;  %v8709_v42 = vld [vmem:[%s11322_s11 + $0xaa0] ss:$16 sps:$4 sm:$0xff]  }
 0x1f1   : > { %6609 = vmatpush1.bf16.msra.mxu0 %v8622_v33  ;;  %v11502_v33 = vld [vmem:[%s12453_s0 + $0x20] sm:$0xff] }
 0x1f2   : > { %6652 = vmatpush1.bf16.msra.mxu1 %v8625_v34  ;;  %6610 = vmatprep.subr.bf16.mxu0 %v8630_v35  ;;  %v11517_v34 = vld [vmem:[%s12453_s0 + $0x88] sm:$0xff]  ;;  %v11521_v35 = vcombine.high %v11502_v33, %v11507_v14 }
 0x1f3   : > { %6653 = vmatprep.subr.bf16.mxu1 %v8633_v36  ;;  %v11525_v36 = vcombine.high %v11512_v15, %v11517_v34 }
 0x1f5   : > { %6611 = vmatpush1.bf16.msra.mxu0 %v8628_v38  ;;  %v8703_v38 = vld [vmem:[%s11322_s11 + $0xac0] ss:$16 sps:$4 sm:$0xff]  }
 0x1f6   : > { %6654 = vmatpush1.bf16.msra.mxu1 %v8631_v39  ;;  %6612 = vmatprep.subr.bf16.mxu0 %v8636_v40  ;;  %v8708_v39 = vld [vmem:[%s11322_s11 + $0x8a4] ss:$16 sps:$4 sm:$0xff]  }
 0x1f7   : > { %6655 = vmatprep.subr.bf16.mxu1 %v8639_v41  ;;  %v8711_v40 = vld [vmem:[%s11322_s11 + $0xaa4] ss:$16 sps:$4 sm:$0xff]   ;;  %v8706_v41 = vld [vmem:[%s11322_s11 + $0x8a0] ss:$16 sps:$4 sm:$0xff]  }
 0x1f9   : > { %6613 = vmatpush1.bf16.msra.mxu0 %v8634_v44  ;;  %v8714_v44 = vld [vmem:[%s11322_s11 + $0x884] ss:$16 sps:$4 sm:$0xff]  }
 0x1fa   : > { %6656 = vmatpush1.bf16.msra.mxu1 %v8637_v45  ;;  %6614 = vmatprep.subr.bf16.mxu0 %v8642_v46  ;;  %v8717_v45 = vld [vmem:[%s11322_s11 + $0xa84] ss:$16 sps:$4 sm:$0xff]   ;;  %v8712_v46 = vld [vmem:[%s11322_s11 + $0x880] ss:$16 sps:$4 sm:$0xff]  }
 0x1fb   : > { %6657 = vmatprep.subr.bf16.mxu1 %v8645_v47  ;;  %v8715_v47 = vld [vmem:[%s11322_s11 + $0xa80] ss:$16 sps:$4 sm:$0xff]  }
 0x1fd   : > { %6615 = vmatpush1.bf16.msra.mxu0 %v8640_v48  ;;  %v8720_v48 = vld [vmem:[%s11322_s11 + $0x864] ss:$16 sps:$4 sm:$0xff]  }
 0x1fe   : > { %6658 = vmatpush1.bf16.msra.mxu1 %v8643_v49  ;;  %6616 = vmatprep.subr.bf16.mxu0 %v8648_v50  ;;  %v8723_v49 = vld [vmem:[%s11322_s11 + $0xa64] ss:$16 sps:$4 sm:$0xff]   ;;  %v8718_v50 = vld [vmem:[%s11322_s11 + $0x860] ss:$16 sps:$4 sm:$0xff]  }
 0x1ff   : > { %6659 = vmatprep.subr.bf16.mxu1 %v8651_v51  ;;  %v8721_v51 = vld [vmem:[%s11322_s11 + $0xa60] ss:$16 sps:$4 sm:$0xff]  }
 0x201   : > { %6617 = vmatpush2.bf16.msra.mxu0 %v8646_v52  ;;  %v8726_v52 = vld [vmem:[%s11322_s11 + $0x844] ss:$16 sps:$4 sm:$0xff]  }
 0x202   : > { %6660 = vmatpush2.bf16.msra.mxu1 %v8649_v53  ;;  %6618 = vmatprep.subr.bf16.mxu0 %v8654_v54  ;;  %v8729_v53 = vld [vmem:[%s11322_s11 + $0xa44] ss:$16 sps:$4 sm:$0xff]   ;;  %v8724_v54 = vld [vmem:[%s11322_s11 + $0x840] ss:$16 sps:$4 sm:$0xff]  }
 0x203   : > { %6661 = vmatprep.subr.bf16.mxu1 %v8657_v55  ;;  %v8727_v55 = vld [vmem:[%s11322_s11 + $0xa40] ss:$16 sps:$4 sm:$0xff]  }
 0x205   : > { %6619 = vmatpush2.bf16.msra.mxu0 %v8652_v56  ;;  %v8732_v56 = vld [vmem:[%s11322_s11 + $0x824] ss:$16 sps:$4 sm:$0xff]  }
 0x206   : > { %6662 = vmatpush2.bf16.msra.mxu1 %v8655_v57  ;;  %6620 = vmatprep.subr.bf16.mxu0 %v8660_v58  ;;  %v8735_v57 = vld [vmem:[%s11322_s11 + $0xa24] ss:$16 sps:$4 sm:$0xff]   ;;  %v8730_v58 = vld [vmem:[%s11322_s11 + $0x820] ss:$16 sps:$4 sm:$0xff]  }
 0x207   : > { %6663 = vmatprep.subr.bf16.mxu1 %v8663_v59  ;;  %v8733_v59 = vld [vmem:[%s11322_s11 + $0xa20] ss:$16 sps:$4 sm:$0xff]  }
 0x209   : > { %6621 = vmatpush2.bf16.msra.mxu0 %v8658_v60  ;;  %v8738_v60 = vld [vmem:[%s11322_s11 + $0x804] ss:$16 sps:$4 sm:$0xff]  }
 0x20a   : > { %6664 = vmatpush2.bf16.msra.mxu1 %v8661_v61  ;;  %6622 = vmatprep.subr.bf16.mxu0 %v8666_v62  ;;  %v8741_v61 = vld [vmem:[%s11322_s11 + $0xa04] ss:$16 sps:$4 sm:$0xff]   ;;  %v8736_v62 = vld [vmem:[%s11322_s11 + $0x800] ss:$16 sps:$4 sm:$0xff]  }
 0x20b   : > { %6665 = vmatprep.subr.bf16.mxu1 %v8669_v63  ;;  %v8739_v63 = vld [vmem:[%s11322_s11 + $0xa00] ss:$16 sps:$4 sm:$0xff]  }
 0x20d   : > { %6623 = vmatpush2.bf16.msra.mxu0 %v8664_v0  ;;  %v8744_v0 = vld [vmem:[%s11322_s11 + $0x9e4] ss:$16 sps:$4 sm:$0xff]  }
 0x20e   : > { %6666 = vmatpush2.bf16.msra.mxu1 %v8667_v1  ;;  %6624 = vmatprep.subr.bf16.mxu0 %v8672_v2  ;;  %v8747_v1 = vld [vmem:[%s11322_s11 + $0xbe4] ss:$16 sps:$4 sm:$0xff]   ;;  %v8742_v2 = vld [vmem:[%s11322_s11 + $0x9e0] ss:$16 sps:$4 sm:$0xff]  }
 0x20f   : > { %6667 = vmatprep.subr.bf16.mxu1 %v8675_v5  ;;  %v8745_v5 = vld [vmem:[%s11322_s11 + $0xbe0] ss:$16 sps:$4 sm:$0xff]  }
 0x211   : > { %6625 = vmatpush2.bf16.msra.mxu0 %v8670_v8  ;;  %v8750_v8 = vld [vmem:[%s11322_s11 + $0x9c4] ss:$16 sps:$4 sm:$0xff]  }
 0x212   : > { %6668 = vmatpush2.bf16.msra.mxu1 %v8673_v9  ;;  %6626 = vmatprep.subr.bf16.mxu0 %v8678_v10  ;;  %v8753_v9 = vld [vmem:[%s11322_s11 + $0xbc4] ss:$16 sps:$4 sm:$0xff]   ;;  %v8748_v10 = vld [vmem:[%s11322_s11 + $0x9c0] ss:$16 sps:$4 sm:$0xff]  }
 0x213   : > { %6669 = vmatprep.subr.bf16.mxu1 %v8681_v11  ;;  %v8751_v11 = vld [vmem:[%s11322_s11 + $0xbc0] ss:$16 sps:$4 sm:$0xff]  }
 0x215   : > { %6627 = vmatpush2.bf16.msra.mxu0 %v8676_v12  ;;  %v8756_v12 = vld [vmem:[%s11322_s11 + $0x9a4] ss:$16 sps:$4 sm:$0xff]  }
 0x216   : > { %6670 = vmatpush2.bf16.msra.mxu1 %v8679_v13  ;;  %6628 = vmatprep.subr.bf16.mxu0 %v8684_v16  ;;  %v8759_v13 = vld [vmem:[%s11322_s11 + $0xba4] ss:$16 sps:$4 sm:$0xff]   ;;  %v8754_v16 = vld [vmem:[%s11322_s11 + $0x9a0] ss:$16 sps:$4 sm:$0xff]  }
 0x217   : > { %6671 = vmatprep.subr.bf16.mxu1 %v8687_v17  ;;  %v8757_v17 = vld [vmem:[%s11322_s11 + $0xba0] ss:$16 sps:$4 sm:$0xff]  }
 0x219   : > { %6629 = vmatpush2.bf16.msra.mxu0 %v8682_v18  ;;  %v8762_v18 = vld [vmem:[%s11322_s11 + $0x984] ss:$16 sps:$4 sm:$0xff]  }
 0x21a   : > { %6672 = vmatpush2.bf16.msra.mxu1 %v8685_v19  ;;  %6630 = vmatprep.subr.bf16.mxu0 %v8690_v21  ;;  %v8765_v19 = vld [vmem:[%s11322_s11 + $0xb84] ss:$16 sps:$4 sm:$0xff]   ;;  %v8760_v21 = vld [vmem:[%s11322_s11 + $0x980] ss:$16 sps:$4 sm:$0xff]  }
 0x21b   : > { %6673 = vmatprep.subr.bf16.mxu1 %v8693_v22  ;;  %v8763_v22 = vld [vmem:[%s11322_s11 + $0xb80] ss:$16 sps:$4 sm:$0xff]  }
 0x21d   : > { %6631 = vmatpush2.bf16.msra.mxu0 %v8688_v23  ;;  %v8768_v23 = vld [vmem:[%s11322_s11 + $0x964] ss:$16 sps:$4 sm:$0xff]  }
 0x21e   : > { %6674 = vmatpush2.bf16.msra.mxu1 %v8691_v24  ;;  %6686 = vmatprep.subr.bf16.mxu0 %v8696_v25  ;;  %v8771_v24 = vld [vmem:[%s11322_s11 + $0xb64] ss:$16 sps:$4 sm:$0xff]   ;;  %v8766_v25 = vld [vmem:[%s11322_s11 + $0x960] ss:$16 sps:$4 sm:$0xff]  }
 0x21f   : > { %6729 = vmatprep.subr.bf16.mxu1 %v8699_v26  ;;  %v8769_v26 = vld [vmem:[%s11322_s11 + $0xb60] ss:$16 sps:$4 sm:$0xff]  }
 0x220   : > { %6633 = vmatmul.mubr.bf16.vlgmr.msra.gmra.mxu0 %v11491_v29 }
 0x221   : > { %6676 = vmatmul.mubr.bf16.vlgmr.msra.gmra.mxu1 %v11495_v30  ;;  %6687 = vmatpush1.bf16.msra.mxu0 %v8694_v27  ;;  %v8774_v27 = vld [vmem:[%s11322_s11 + $0x944] ss:$16 sps:$4 sm:$0xff]  }
 0x222   : > { %6730 = vmatpush1.bf16.msra.mxu1 %v8697_v28  ;;  %6688 = vmatprep.subr.bf16.mxu0 %v8702_v31  ;;  %v8777_v28 = vld [vmem:[%s11322_s11 + $0xb44] ss:$16 sps:$4 sm:$0xff]   ;;  %v8772_v31 = vld [vmem:[%s11322_s11 + $0x940] ss:$16 sps:$4 sm:$0xff]  }
 0x223   : > { %6731 = vmatprep.subr.bf16.mxu1 %v8705_v32  ;;  %6718 = vmatprep.mubr.bf16.mxu0 %v11521_v35  ;;  %v8775_v32 = vld [vmem:[%s11322_s11 + $0xb40] ss:$16 sps:$4 sm:$0xff]  }
 0x224   : > { %6761 = vmatprep.mubr.bf16.mxu1 %v11525_v36 }
 0x225   : > { %6689 = vmatpush1.bf16.msra.mxu0 %v8700_v37  ;;  %v8780_v37 = vld [vmem:[%s11322_s11 + $0x924] ss:$16 sps:$4 sm:$0xff]  }
 0x226   : > { %6732 = vmatpush1.bf16.msra.mxu1 %v8703_v38  ;;  %6690 = vmatprep.subr.bf16.mxu0 %v8708_v39  ;;  %v8783_v38 = vld [vmem:[%s11322_s11 + $0xb24] ss:$16 sps:$4 sm:$0xff]   ;;  %v8778_v39 = vld [vmem:[%s11322_s11 + $0x920] ss:$16 sps:$4 sm:$0xff]  }
 0x227   : > { %6733 = vmatprep.subr.bf16.mxu1 %v8711_v40  ;;  %v8781_v40 = vld [vmem:[%s11322_s11 + $0xb20] ss:$16 sps:$4 sm:$0xff]  }
 0x229   : > { %6691 = vmatpush1.bf16.msra.mxu0 %v8706_v41  ;;  %v8786_v41 = vld [vmem:[%s11322_s11 + $0x904] ss:$16 sps:$4 sm:$0xff]  }
 0x22a   : > { %6734 = vmatpush1.bf16.msra.mxu1 %v8709_v42  ;;  %6692 = vmatprep.subr.bf16.mxu0 %v8714_v44  ;;  %v8789_v42 = vld [vmem:[%s11322_s11 + $0xb04] ss:$16 sps:$4 sm:$0xff]   ;;  %v8784_v44 = vld [vmem:[%s11322_s11 + $0x900] ss:$16 sps:$4 sm:$0xff]  }
 0x22b   : > { %6735 = vmatprep.subr.bf16.mxu1 %v8717_v45  ;;  %v8787_v45 = vld [vmem:[%s11322_s11 + $0xb00] ss:$16 sps:$4 sm:$0xff]  }
 0x22d   : > { %6693 = vmatpush1.bf16.msra.mxu0 %v8712_v46  ;;  %v8792_v46 = vld [vmem:[%s11322_s11 + $0xce4] ss:$16 sps:$4 sm:$0xff]  }
 0x22e   : > { %6736 = vmatpush1.bf16.msra.mxu1 %v8715_v47  ;;  %6694 = vmatprep.subr.bf16.mxu0 %v8720_v48  ;;  %v8795_v47 = vld [vmem:[%s11322_s11 + $0xee4] ss:$16 sps:$4 sm:$0xff]  }
 0x22f   : > { %6737 = vmatprep.subr.bf16.mxu1 %v8723_v49  ;;  %v11594_v48 = vld [vmem:[%s12453_s0 + $0x30] sm:$0xff] }
 0x230   : > { %v11599_v49 = vld [vmem:[%s12453_s0 + $0x90] sm:$0xff] }
 0x231   : > { %6695 = vmatpush1.bf16.msra.mxu0 %v8718_v50  ;;  %v11604_v50 = vld [vmem:[%s12453_s0 + $0x38] sm:$0xff] }
 0x232   : > { %6738 = vmatpush1.bf16.msra.mxu1 %v8721_v51  ;;  %6696 = vmatprep.subr.bf16.mxu0 %v8726_v52  ;;  %v11608_v51 = vcombine.low %v11502_v33, %v11507_v14  ;;  %v11612_v52 = vcombine.low %v11512_v15, %v11517_v34  ;;  %v8798_v33 = vld [vmem:[%s11322_s11 + $0xcc4] ss:$16 sps:$4 sm:$0xff]   ;;  %v11625_v15 = vcombine.high %v11594_v48, %v11599_v49 }
 0x233   : > { %6739 = vmatprep.subr.bf16.mxu1 %v8729_v53  ;;  %v11617_v53 = vld [vmem:[%s12453_s0 + $0x98] sm:$0xff]  ;;  %v8801_v14 = vld [vmem:[%s11322_s11 + $0xec4] ss:$16 sps:$4 sm:$0xff]  }
 0x234   : > { %v11629_v34 = vcombine.high %v11604_v50, %v11617_v53 }
 0x235   : > { %6697 = vmatpush1.bf16.msra.mxu0 %v8724_v54  ;;  %v8790_v54 = vld [vmem:[%s11322_s11 + $0xce0] ss:$16 sps:$4 sm:$0xff]  }
 0x236   : > { %6740 = vmatpush1.bf16.msra.mxu1 %v8727_v55  ;;  %6698 = vmatprep.subr.bf16.mxu0 %v8732_v56  ;;  %v8793_v55 = vld [vmem:[%s11322_s11 + $0xee0] ss:$16 sps:$4 sm:$0xff]  }
 0x237   : > { %6741 = vmatprep.subr.bf16.mxu1 %v8735_v57  ;;  %v8796_v56 = vld [vmem:[%s11322_s11 + $0xcc0] ss:$16 sps:$4 sm:$0xff]  }
 0x238   : > { %v8799_v57 = vld [vmem:[%s11322_s11 + $0xec0] ss:$16 sps:$4 sm:$0xff]  }
 0x239   : > { %6699 = vmatpush1.bf16.msra.mxu0 %v8730_v58  ;;  %v8804_v58 = vld [vmem:[%s11322_s11 + $0xca4] ss:$16 sps:$4 sm:$0xff]  }
 0x23a   : > { %6742 = vmatpush1.bf16.msra.mxu1 %v8733_v59  ;;  %6700 = vmatprep.subr.bf16.mxu0 %v8738_v60  ;;  %v8807_v59 = vld [vmem:[%s11322_s11 + $0xea4] ss:$16 sps:$4 sm:$0xff]   ;;  %v8802_v60 = vld [vmem:[%s11322_s11 + $0xca0] ss:$16 sps:$4 sm:$0xff]  }
 0x23b   : > { %6743 = vmatprep.subr.bf16.mxu1 %v8741_v61  ;;  %v8805_v61 = vld [vmem:[%s11322_s11 + $0xea0] ss:$16 sps:$4 sm:$0xff]  }
 0x23d   : > { %6701 = vmatpush1.bf16.msra.mxu0 %v8736_v62  ;;  %v8810_v62 = vld [vmem:[%s11322_s11 + $0xc84] ss:$16 sps:$4 sm:$0xff]  }
 0x23e   : > { %6744 = vmatpush1.bf16.msra.mxu1 %v8739_v63  ;;  %6702 = vmatprep.subr.bf16.mxu0 %v8744_v0  ;;  %v8813_v63 = vld [vmem:[%s11322_s11 + $0xe84] ss:$16 sps:$4 sm:$0xff]   ;;  %v8808_v0 = vld [vmem:[%s11322_s11 + $0xc80] ss:$16 sps:$4 sm:$0xff]  }
 0x23f   : > { %6745 = vmatprep.subr.bf16.mxu1 %v8747_v1  ;;  %v8811_v1 = vld [vmem:[%s11322_s11 + $0xe80] ss:$16 sps:$4 sm:$0xff]  }
 0x241   : > { %6703 = vmatpush2.bf16.msra.mxu0 %v8742_v2  ;;  %v8816_v2 = vld [vmem:[%s11322_s11 + $0xc64] ss:$16 sps:$4 sm:$0xff]  }
 0x242   : > { %6746 = vmatpush2.bf16.msra.mxu1 %v8745_v5  ;;  %6704 = vmatprep.subr.bf16.mxu0 %v8750_v8  ;;  %v8819_v5 = vld [vmem:[%s11322_s11 + $0xe64] ss:$16 sps:$4 sm:$0xff]   ;;  %v8814_v8 = vld [vmem:[%s11322_s11 + $0xc60] ss:$16 sps:$4 sm:$0xff]  }
 0x243   : > { %6747 = vmatprep.subr.bf16.mxu1 %v8753_v9  ;;  %v8817_v9 = vld [vmem:[%s11322_s11 + $0xe60] ss:$16 sps:$4 sm:$0xff]  }
 0x245   : > { %6705 = vmatpush2.bf16.msra.mxu0 %v8748_v10  ;;  %v8822_v10 = vld [vmem:[%s11322_s11 + $0xc44] ss:$16 sps:$4 sm:$0xff]  }
 0x246   : > { %6748 = vmatpush2.bf16.msra.mxu1 %v8751_v11  ;;  %6706 = vmatprep.subr.bf16.mxu0 %v8756_v12  ;;  %v8825_v11 = vld [vmem:[%s11322_s11 + $0xe44] ss:$16 sps:$4 sm:$0xff]   ;;  %v8820_v12 = vld [vmem:[%s11322_s11 + $0xc40] ss:$16 sps:$4 sm:$0xff]  }
 0x247   : > { %6749 = vmatprep.subr.bf16.mxu1 %v8759_v13  ;;  %v8823_v13 = vld [vmem:[%s11322_s11 + $0xe40] ss:$16 sps:$4 sm:$0xff]  }
 0x249   : > { %6707 = vmatpush2.bf16.msra.mxu0 %v8754_v16  ;;  %v8828_v16 = vld [vmem:[%s11322_s11 + $0xc24] ss:$16 sps:$4 sm:$0xff]  }
 0x24a   : > { %6750 = vmatpush2.bf16.msra.mxu1 %v8757_v17  ;;  %6708 = vmatprep.subr.bf16.mxu0 %v8762_v18  ;;  %v8831_v17 = vld [vmem:[%s11322_s11 + $0xe24] ss:$16 sps:$4 sm:$0xff]   ;;  %v8826_v18 = vld [vmem:[%s11322_s11 + $0xc20] ss:$16 sps:$4 sm:$0xff]  }
 0x24b   : > { %6751 = vmatprep.subr.bf16.mxu1 %v8765_v19  ;;  %v8829_v19 = vld [vmem:[%s11322_s11 + $0xe20] ss:$16 sps:$4 sm:$0xff]  }
 0x24d   : > { %6709 = vmatpush2.bf16.msra.mxu0 %v8760_v21  ;;  %v8834_v21 = vld [vmem:[%s11322_s11 + $0xc04] ss:$16 sps:$4 sm:$0xff]  }
 0x24e   : > { %6752 = vmatpush2.bf16.msra.mxu1 %v8763_v22  ;;  %6710 = vmatprep.subr.bf16.mxu0 %v8768_v23  ;;  %v8837_v22 = vld [vmem:[%s11322_s11 + $0xe04] ss:$16 sps:$4 sm:$0xff]   ;;  %v8832_v23 = vld [vmem:[%s11322_s11 + $0xc00] ss:$16 sps:$4 sm:$0xff]  }
 0x24f   : > { %6753 = vmatprep.subr.bf16.mxu1 %v8771_v24  ;;  %v8835_v24 = vld [vmem:[%s11322_s11 + $0xe00] ss:$16 sps:$4 sm:$0xff]  }
 0x251   : > { %6711 = vmatpush2.bf16.msra.mxu0 %v8766_v25  ;;  %v8840_v25 = vld [vmem:[%s11322_s11 + $0xde4] ss:$16 sps:$4 sm:$0xff]  }
 0x252   : > { %6754 = vmatpush2.bf16.msra.mxu1 %v8769_v26  ;;  %6712 = vmatprep.subr.bf16.mxu0 %v8774_v27  ;;  %v8843_v26 = vld [vmem:[%s11322_s11 + $0xfe4] ss:$16 sps:$4 sm:$0xff]   ;;  %v8838_v27 = vld [vmem:[%s11322_s11 + $0xde0] ss:$16 sps:$4 sm:$0xff]  }
 0x253   : > { %6755 = vmatprep.subr.bf16.mxu1 %v8777_v28  ;;  %v8841_v28 = vld [vmem:[%s11322_s11 + $0xfe0] ss:$16 sps:$4 sm:$0xff]  }
 0x255   : > { %6713 = vmatpush2.bf16.msra.mxu0 %v8772_v31  ;;  %v8846_v31 = vld [vmem:[%s11322_s11 + $0xdc4] ss:$16 sps:$4 sm:$0xff]  }
 0x256   : > { %6756 = vmatpush2.bf16.msra.mxu1 %v8775_v32  ;;  %6714 = vmatprep.subr.bf16.mxu0 %v8780_v37  ;;  %v8849_v32 = vld [vmem:[%s11322_s11 + $0xfc4] ss:$16 sps:$4 sm:$0xff]   ;;  %v8844_v37 = vld [vmem:[%s11322_s11 + $0xdc0] ss:$16 sps:$4 sm:$0xff]  }
 0x257   : > { %6757 = vmatprep.subr.bf16.mxu1 %v8783_v38  ;;  %v8847_v38 = vld [vmem:[%s11322_s11 + $0xfc0] ss:$16 sps:$4 sm:$0xff]  }
 0x259   : > { %6715 = vmatpush2.bf16.msra.mxu0 %v8778_v39  ;;  %v8852_v39 = vld [vmem:[%s11322_s11 + $0xda4] ss:$16 sps:$4 sm:$0xff]  }
 0x25a   : > { %6758 = vmatpush2.bf16.msra.mxu1 %v8781_v40  ;;  %6716 = vmatprep.subr.bf16.mxu0 %v8786_v41  ;;  %v8855_v40 = vld [vmem:[%s11322_s11 + $0xfa4] ss:$16 sps:$4 sm:$0xff]   ;;  %v8850_v41 = vld [vmem:[%s11322_s11 + $0xda0] ss:$16 sps:$4 sm:$0xff]  }
 0x25b   : > { %6759 = vmatprep.subr.bf16.mxu1 %v8789_v42  ;;  %v8853_v42 = vld [vmem:[%s11322_s11 + $0xfa0] ss:$16 sps:$4 sm:$0xff]  }
 0x25d   : > { %6717 = vmatpush2.bf16.msra.mxu0 %v8784_v44  ;;  %v8858_v44 = vld [vmem:[%s11322_s11 + $0xd84] ss:$16 sps:$4 sm:$0xff]  }
 0x25e   : > { %6760 = vmatpush2.bf16.msra.mxu1 %v8787_v45  ;;  %6772 = vmatprep.subr.bf16.mxu0 %v8792_v46  ;;  %v8861_v45 = vld [vmem:[%s11322_s11 + $0xf84] ss:$16 sps:$4 sm:$0xff]   ;;  %v8856_v46 = vld [vmem:[%s11322_s11 + $0xd80] ss:$16 sps:$4 sm:$0xff]  }
 0x25f   : > { %6815 = vmatprep.subr.bf16.mxu1 %v8795_v47  ;;  %v8859_v47 = vld [vmem:[%s11322_s11 + $0xf80] ss:$16 sps:$4 sm:$0xff]  }
 0x260   : > { %6719 = vmatmul.mubr.bf16.vlgmr.msra.gmra.mxu0 %v11608_v51 }
 0x261   : > { %6762 = vmatmul.mubr.bf16.vlgmr.msra.gmra.mxu1 %v11612_v52  ;;  %6773 = vmatpush1.bf16.msra.mxu0 %v8790_v54  ;;  %v8864_v54 = vld [vmem:[%s11322_s11 + $0xd64] ss:$16 sps:$4 sm:$0xff]  }
 0x262   : > { %6816 = vmatpush1.bf16.msra.mxu1 %v8793_v55  ;;  %6774 = vmatprep.subr.bf16.mxu0 %v8798_v33  ;;  %v8867_v55 = vld [vmem:[%s11322_s11 + $0xf64] ss:$16 sps:$4 sm:$0xff]   ;;  %v8862_v33 = vld [vmem:[%s11322_s11 + $0xd60] ss:$16 sps:$4 sm:$0xff]  }
 0x263   : > { %6817 = vmatprep.subr.bf16.mxu1 %v8801_v14  ;;  %6804 = vmatprep.mubr.bf16.mxu0 %v11625_v15  ;;  %v8865_v14 = vld [vmem:[%s11322_s11 + $0xf60] ss:$16 sps:$4 sm:$0xff]  }
 0x264   : > { %6847 = vmatprep.mubr.bf16.mxu1 %v11629_v34 }
 0x265   : > { %6775 = vmatpush1.bf16.msra.mxu0 %v8796_v56  ;;  %v8870_v56 = vld [vmem:[%s11322_s11 + $0xd44] ss:$16 sps:$4 sm:$0xff]  }
 0x266   : > { %6818 = vmatpush1.bf16.msra.mxu1 %v8799_v57  ;;  %6776 = vmatprep.subr.bf16.mxu0 %v8804_v58  ;;  %v8873_v57 = vld [vmem:[%s11322_s11 + $0xf44] ss:$16 sps:$4 sm:$0xff]   ;;  %v8868_v58 = vld [vmem:[%s11322_s11 + $0xd40] ss:$16 sps:$4 sm:$0xff]  }
 0x267   : > { %6819 = vmatprep.subr.bf16.mxu1 %v8807_v59  ;;  %v8871_v59 = vld [vmem:[%s11322_s11 + $0xf40] ss:$16 sps:$4 sm:$0xff]  }
 0x269   : > { %6777 = vmatpush1.bf16.msra.mxu0 %v8802_v60  ;;  %v8876_v60 = vld [vmem:[%s11322_s11 + $0xd24] ss:$16 sps:$4 sm:$0xff]  }
 0x26a   : > { %6820 = vmatpush1.bf16.msra.mxu1 %v8805_v61  ;;  %6778 = vmatprep.subr.bf16.mxu0 %v8810_v62  ;;  %v8879_v61 = vld [vmem:[%s11322_s11 + $0xf24] ss:$16 sps:$4 sm:$0xff]   ;;  %v8874_v62 = vld [vmem:[%s11322_s11 + $0xd20] ss:$16 sps:$4 sm:$0xff]  }
 0x26b   : > { %6821 = vmatprep.subr.bf16.mxu1 %v8813_v63  ;;  %v8877_v63 = vld [vmem:[%s11322_s11 + $0xf20] ss:$16 sps:$4 sm:$0xff]  }
 0x26d   : > { %6779 = vmatpush1.bf16.msra.mxu0 %v8808_v0  ;;  %v8882_v0 = vld [vmem:[%s11322_s11 + $0xd04] ss:$16 sps:$4 sm:$0xff]  }
 0x26e   : > { %6822 = vmatpush1.bf16.msra.mxu1 %v8811_v1  ;;  %6780 = vmatprep.subr.bf16.mxu0 %v8816_v2  ;;  %v8885_v1 = vld [vmem:[%s11322_s11 + $0xf04] ss:$16 sps:$4 sm:$0xff]   ;;  %v8880_v2 = vld [vmem:[%s11322_s11 + $0xd00] ss:$16 sps:$4 sm:$0xff]  }
 0x26f   : > { %6823 = vmatprep.subr.bf16.mxu1 %v8819_v5  ;;  %v8883_v5 = vld [vmem:[%s11322_s11 + $0xf00] ss:$16 sps:$4 sm:$0xff]  }
 0x271   : > { %6781 = vmatpush1.bf16.msra.mxu0 %v8814_v8  ;;  %v8888_v8 = vld [vmem:[%s11322_s11 + $0x10e4] ss:$16 sps:$4 sm:$0xff]  }
 0x272   : > { %6824 = vmatpush1.bf16.msra.mxu1 %v8817_v9  ;;  %6782 = vmatprep.subr.bf16.mxu0 %v8822_v10  ;;  %v8891_v9 = vld [vmem:[%s11322_s11 + $0x12e4] ss:$16 sps:$4 sm:$0xff]  }
 0x273   : > { %6825 = vmatprep.subr.bf16.mxu1 %v8825_v11  ;;  %v11698_v10 = vld [vmem:[%s12453_s0 + $0x40] sm:$0xff] }
 0x274   : > { %v11703_v11 = vld [vmem:[%s12453_s0 + $0xa0] sm:$0xff] }
 0x275   : > { %6783 = vmatpush1.bf16.msra.mxu0 %v8820_v12  ;;  %v11708_v12 = vld [vmem:[%s12453_s0 + $0x48] sm:$0xff] }
 0x276   : > { %6826 = vmatpush1.bf16.msra.mxu1 %v8823_v13  ;;  %6784 = vmatprep.subr.bf16.mxu0 %v8828_v16  ;;  %v11712_v13 = vcombine.low %v11594_v48, %v11599_v49  ;;  %v11716_v16 = vcombine.low %v11604_v50, %v11617_v53  ;;  %v8894_v48 = vld [vmem:[%s11322_s11 + $0x10c4] ss:$16 sps:$4 sm:$0xff]   ;;  %v11729_v50 = vcombine.high %v11698_v10, %v11703_v11 }
 0x277   : > { %6827 = vmatprep.subr.bf16.mxu1 %v8831_v17  ;;  %v11721_v17 = vld [vmem:[%s12453_s0 + $0xa8] sm:$0xff]  ;;  %v8897_v49 = vld [vmem:[%s11322_s11 + $0x12c4] ss:$16 sps:$4 sm:$0xff]  }
 0x278   : > { %v11733_v53 = vcombine.high %v11708_v12, %v11721_v17 }
 0x279   : > { %6785 = vmatpush1.bf16.msra.mxu0 %v8826_v18  ;;  %v8886_v18 = vld [vmem:[%s11322_s11 + $0x10e0] ss:$16 sps:$4 sm:$0xff]  }
 0x27a   : > { %6828 = vmatpush1.bf16.msra.mxu1 %v8829_v19  ;;  %6786 = vmatprep.subr.bf16.mxu0 %v8834_v21  ;;  %v8889_v19 = vld [vmem:[%s11322_s11 + $0x12e0] ss:$16 sps:$4 sm:$0xff]  }
 0x27b   : > { %6829 = vmatprep.subr.bf16.mxu1 %v8837_v22  ;;  %v8892_v21 = vld [vmem:[%s11322_s11 + $0x10c0] ss:$16 sps:$4 sm:$0xff]  }
 0x27c   : > { %v8895_v22 = vld [vmem:[%s11322_s11 + $0x12c0] ss:$16 sps:$4 sm:$0xff]  }
 0x27d   : > { %6787 = vmatpush1.bf16.msra.mxu0 %v8832_v23  ;;  %v8900_v23 = vld [vmem:[%s11322_s11 + $0x10a4] ss:$16 sps:$4 sm:$0xff]  }
 0x27e   : > { %6830 = vmatpush1.bf16.msra.mxu1 %v8835_v24  ;;  %6788 = vmatprep.subr.bf16.mxu0 %v8840_v25  ;;  %v8903_v24 = vld [vmem:[%s11322_s11 + $0x12a4] ss:$16 sps:$4 sm:$0xff]   ;;  %v8898_v25 = vld [vmem:[%s11322_s11 + $0x10a0] ss:$16 sps:$4 sm:$0xff]  }
 0x27f   : > { %6831 = vmatprep.subr.bf16.mxu1 %v8843_v26  ;;  %v8901_v26 = vld [vmem:[%s11322_s11 + $0x12a0] ss:$16 sps:$4 sm:$0xff]  }
 0x281   : > { %6789 = vmatpush2.bf16.msra.mxu0 %v8838_v27  ;;  %v8906_v27 = vld [vmem:[%s11322_s11 + $0x1084] ss:$16 sps:$4 sm:$0xff]  }
 0x282   : > { %6832 = vmatpush2.bf16.msra.mxu1 %v8841_v28  ;;  %6790 = vmatprep.subr.bf16.mxu0 %v8846_v31  ;;  %v8909_v28 = vld [vmem:[%s11322_s11 + $0x1284] ss:$16 sps:$4 sm:$0xff]   ;;  %v8904_v31 = vld [vmem:[%s11322_s11 + $0x1080] ss:$16 sps:$4 sm:$0xff]  }
 0x283   : > { %6833 = vmatprep.subr.bf16.mxu1 %v8849_v32  ;;  %v8907_v32 = vld [vmem:[%s11322_s11 + $0x1280] ss:$16 sps:$4 sm:$0xff]  }
 0x285   : > { %6791 = vmatpush2.bf16.msra.mxu0 %v8844_v37  ;;  %v8912_v37 = vld [vmem:[%s11322_s11 + $0x1064] ss:$16 sps:$4 sm:$0xff]  }
 0x286   : > { %6834 = vmatpush2.bf16.msra.mxu1 %v8847_v38  ;;  %6792 = vmatprep.subr.bf16.mxu0 %v8852_v39  ;;  %v8915_v38 = vld [vmem:[%s11322_s11 + $0x1264] ss:$16 sps:$4 sm:$0xff]   ;;  %v8910_v39 = vld [vmem:[%s11322_s11 + $0x1060] ss:$16 sps:$4 sm:$0xff]  }
 0x287   : > { %6835 = vmatprep.subr.bf16.mxu1 %v8855_v40  ;;  %v8913_v40 = vld [vmem:[%s11322_s11 + $0x1260] ss:$16 sps:$4 sm:$0xff]  }
 0x289   : > { %6793 = vmatpush2.bf16.msra.mxu0 %v8850_v41  ;;  %v8918_v41 = vld [vmem:[%s11322_s11 + $0x1044] ss:$16 sps:$4 sm:$0xff]  }
 0x28a   : > { %6836 = vmatpush2.bf16.msra.mxu1 %v8853_v42  ;;  %6794 = vmatprep.subr.bf16.mxu0 %v8858_v44  ;;  %v8921_v42 = vld [vmem:[%s11322_s11 + $0x1244] ss:$16 sps:$4 sm:$0xff]   ;;  %v8916_v44 = vld [vmem:[%s11322_s11 + $0x1040] ss:$16 sps:$4 sm:$0xff]  }
 0x28b   : > { %6837 = vmatprep.subr.bf16.mxu1 %v8861_v45  ;;  %v8919_v45 = vld [vmem:[%s11322_s11 + $0x1240] ss:$16 sps:$4 sm:$0xff]  }
 0x28d   : > { %6795 = vmatpush2.bf16.msra.mxu0 %v8856_v46  ;;  %v8924_v46 = vld [vmem:[%s11322_s11 + $0x1024] ss:$16 sps:$4 sm:$0xff]  }
 0x28e   : > { %6838 = vmatpush2.bf16.msra.mxu1 %v8859_v47  ;;  %6796 = vmatprep.subr.bf16.mxu0 %v8864_v54  ;;  %v8927_v47 = vld [vmem:[%s11322_s11 + $0x1224] ss:$16 sps:$4 sm:$0xff]   ;;  %v8922_v54 = vld [vmem:[%s11322_s11 + $0x1020] ss:$16 sps:$4 sm:$0xff]  }
 0x28f   : > { %6839 = vmatprep.subr.bf16.mxu1 %v8867_v55  ;;  %v8925_v55 = vld [vmem:[%s11322_s11 + $0x1220] ss:$16 sps:$4 sm:$0xff]  }
 0x291   : > { %6797 = vmatpush2.bf16.msra.mxu0 %v8862_v33  ;;  %v8930_v33 = vld [vmem:[%s11322_s11 + $0x1004] ss:$16 sps:$4 sm:$0xff]  }
 0x292   : > { %6840 = vmatpush2.bf16.msra.mxu1 %v8865_v14  ;;  %6798 = vmatprep.subr.bf16.mxu0 %v8870_v56  ;;  %v8933_v14 = vld [vmem:[%s11322_s11 + $0x1204] ss:$16 sps:$4 sm:$0xff]   ;;  %v8928_v56 = vld [vmem:[%s11322_s11 + $0x1000] ss:$16 sps:$4 sm:$0xff]  }
 0x293   : > { %6841 = vmatprep.subr.bf16.mxu1 %v8873_v57  ;;  %v8931_v57 = vld [vmem:[%s11322_s11 + $0x1200] ss:$16 sps:$4 sm:$0xff]  }
 0x295   : > { %6799 = vmatpush2.bf16.msra.mxu0 %v8868_v58  ;;  %v8936_v58 = vld [vmem:[%s11322_s11 + $0x11e4] ss:$16 sps:$4 sm:$0xff]  }
 0x296   : > { %6842 = vmatpush2.bf16.msra.mxu1 %v8871_v59  ;;  %6800 = vmatprep.subr.bf16.mxu0 %v8876_v60  ;;  %v8939_v59 = vld [vmem:[%s11322_s11 + $0x13e4] ss:$16 sps:$4 sm:$0xff]   ;;  %v8934_v60 = vld [vmem:[%s11322_s11 + $0x11e0] ss:$16 sps:$4 sm:$0xff]  }
 0x297   : > { %6843 = vmatprep.subr.bf16.mxu1 %v8879_v61  ;;  %v8937_v61 = vld [vmem:[%s11322_s11 + $0x13e0] ss:$16 sps:$4 sm:$0xff]  }
 0x299   : > { %6801 = vmatpush2.bf16.msra.mxu0 %v8874_v62  ;;  %v8942_v62 = vld [vmem:[%s11322_s11 + $0x11c4] ss:$16 sps:$4 sm:$0xff]  }
 0x29a   : > { %6844 = vmatpush2.bf16.msra.mxu1 %v8877_v63  ;;  %6802 = vmatprep.subr.bf16.mxu0 %v8882_v0  ;;  %v8945_v63 = vld [vmem:[%s11322_s11 + $0x13c4] ss:$16 sps:$4 sm:$0xff]   ;;  %v8940_v0 = vld [vmem:[%s11322_s11 + $0x11c0] ss:$16 sps:$4 sm:$0xff]  }
 0x29b   : > { %6845 = vmatprep.subr.bf16.mxu1 %v8885_v1  ;;  %v8943_v1 = vld [vmem:[%s11322_s11 + $0x13c0] ss:$16 sps:$4 sm:$0xff]  }
 0x29d   : > { %6803 = vmatpush2.bf16.msra.mxu0 %v8880_v2  ;;  %v8948_v2 = vld [vmem:[%s11322_s11 + $0x11a4] ss:$16 sps:$4 sm:$0xff]  }
 0x29e   : > { %6846 = vmatpush2.bf16.msra.mxu1 %v8883_v5  ;;  %6858 = vmatprep.subr.bf16.mxu0 %v8888_v8  ;;  %v8951_v5 = vld [vmem:[%s11322_s11 + $0x13a4] ss:$16 sps:$4 sm:$0xff]   ;;  %v8946_v8 = vld [vmem:[%s11322_s11 + $0x11a0] ss:$16 sps:$4 sm:$0xff]  }
 0x29f   : > { %6901 = vmatprep.subr.bf16.mxu1 %v8891_v9  ;;  %v8949_v9 = vld [vmem:[%s11322_s11 + $0x13a0] ss:$16 sps:$4 sm:$0xff]  }
 0x2a0   : > { %6805 = vmatmul.mubr.bf16.vlgmr.msra.gmra.mxu0 %v11712_v13 }
 0x2a1   : > { %6848 = vmatmul.mubr.bf16.vlgmr.msra.gmra.mxu1 %v11716_v16  ;;  %6859 = vmatpush1.bf16.msra.mxu0 %v8886_v18  ;;  %v8954_v18 = vld [vmem:[%s11322_s11 + $0x1184] ss:$16 sps:$4 sm:$0xff]  }
 0x2a2   : > { %6902 = vmatpush1.bf16.msra.mxu1 %v8889_v19  ;;  %6860 = vmatprep.subr.bf16.mxu0 %v8894_v48  ;;  %v8957_v19 = vld [vmem:[%s11322_s11 + $0x1384] ss:$16 sps:$4 sm:$0xff]   ;;  %v8952_v48 = vld [vmem:[%s11322_s11 + $0x1180] ss:$16 sps:$4 sm:$0xff]  }
 0x2a3   : > { %6903 = vmatprep.subr.bf16.mxu1 %v8897_v49  ;;  %6890 = vmatprep.mubr.bf16.mxu0 %v11729_v50  ;;  %v8955_v49 = vld [vmem:[%s11322_s11 + $0x1380] ss:$16 sps:$4 sm:$0xff]  }
 0x2a4   : > { %6933 = vmatprep.mubr.bf16.mxu1 %v11733_v53 }
 0x2a5   : > { %6861 = vmatpush1.bf16.msra.mxu0 %v8892_v21  ;;  %v8960_v21 = vld [vmem:[%s11322_s11 + $0x1164] ss:$16 sps:$4 sm:$0xff]  }
 0x2a6   : > { %6904 = vmatpush1.bf16.msra.mxu1 %v8895_v22  ;;  %6862 = vmatprep.subr.bf16.mxu0 %v8900_v23  ;;  %v8963_v22 = vld [vmem:[%s11322_s11 + $0x1364] ss:$16 sps:$4 sm:$0xff]   ;;  %v8958_v23 = vld [vmem:[%s11322_s11 + $0x1160] ss:$16 sps:$4 sm:$0xff]  }
 0x2a7   : > { %6905 = vmatprep.subr.bf16.mxu1 %v8903_v24  ;;  %v8961_v24 = vld [vmem:[%s11322_s11 + $0x1360] ss:$16 sps:$4 sm:$0xff]  }
 0x2a9   : > { %6863 = vmatpush1.bf16.msra.mxu0 %v8898_v25  ;;  %v8966_v25 = vld [vmem:[%s11322_s11 + $0x1144] ss:$16 sps:$4 sm:$0xff]  }
 0x2aa   : > { %6906 = vmatpush1.bf16.msra.mxu1 %v8901_v26  ;;  %6864 = vmatprep.subr.bf16.mxu0 %v8906_v27  ;;  %v8969_v26 = vld [vmem:[%s11322_s11 + $0x1344] ss:$16 sps:$4 sm:$0xff]   ;;  %v8964_v27 = vld [vmem:[%s11322_s11 + $0x1140] ss:$16 sps:$4 sm:$0xff]  }
 0x2ab   : > { %6907 = vmatprep.subr.bf16.mxu1 %v8909_v28  ;;  %v8967_v28 = vld [vmem:[%s11322_s11 + $0x1340] ss:$16 sps:$4 sm:$0xff]  }
 0x2ad   : > { %6865 = vmatpush1.bf16.msra.mxu0 %v8904_v31  ;;  %v8972_v31 = vld [vmem:[%s11322_s11 + $0x1124] ss:$16 sps:$4 sm:$0xff]  }
 0x2ae   : > { %6908 = vmatpush1.bf16.msra.mxu1 %v8907_v32  ;;  %6866 = vmatprep.subr.bf16.mxu0 %v8912_v37  ;;  %v8975_v32 = vld [vmem:[%s11322_s11 + $0x1324] ss:$16 sps:$4 sm:$0xff]   ;;  %v8970_v37 = vld [vmem:[%s11322_s11 + $0x1120] ss:$16 sps:$4 sm:$0xff]  }
 0x2af   : > { %6909 = vmatprep.subr.bf16.mxu1 %v8915_v38  ;;  %v8973_v38 = vld [vmem:[%s11322_s11 + $0x1320] ss:$16 sps:$4 sm:$0xff]  }
 0x2b1   : > { %6867 = vmatpush1.bf16.msra.mxu0 %v8910_v39  ;;  %v8978_v39 = vld [vmem:[%s11322_s11 + $0x1104] ss:$16 sps:$4 sm:$0xff]  }
 0x2b2   : > { %6910 = vmatpush1.bf16.msra.mxu1 %v8913_v40  ;;  %6868 = vmatprep.subr.bf16.mxu0 %v8918_v41  ;;  %v8981_v40 = vld [vmem:[%s11322_s11 + $0x1304] ss:$16 sps:$4 sm:$0xff]   ;;  %v8976_v41 = vld [vmem:[%s11322_s11 + $0x1100] ss:$16 sps:$4 sm:$0xff]  }
 0x2b3   : > { %6911 = vmatprep.subr.bf16.mxu1 %v8921_v42  ;;  %v8979_v42 = vld [vmem:[%s11322_s11 + $0x1300] ss:$16 sps:$4 sm:$0xff]  }
 0x2b5   : > { %6869 = vmatpush1.bf16.msra.mxu0 %v8916_v44  ;;  %v8984_v44 = vld [vmem:[%s11322_s11 + $0x14e4] ss:$16 sps:$4 sm:$0xff]  }
 0x2b6   : > { %6912 = vmatpush1.bf16.msra.mxu1 %v8919_v45  ;;  %6870 = vmatprep.subr.bf16.mxu0 %v8924_v46  ;;  %v8987_v45 = vld [vmem:[%s11322_s11 + $0x16e4] ss:$16 sps:$4 sm:$0xff]  }
 0x2b7   : > { %6913 = vmatprep.subr.bf16.mxu1 %v8927_v47  ;;  %v11802_v46 = vld [vmem:[%s12453_s0 + $0x50] sm:$0xff] }
 0x2b8   : > { %v11807_v47 = vld [vmem:[%s12453_s0 + $0xb0] sm:$0xff] }
 0x2b9   : > { %6871 = vmatpush1.bf16.msra.mxu0 %v8922_v54  ;;  %v11812_v54 = vld [vmem:[%s12453_s0 + $0x58] sm:$0xff] }
 0x2ba   : > { %6914 = vmatpush1.bf16.msra.mxu1 %v8925_v55  ;;  %6872 = vmatprep.subr.bf16.mxu0 %v8930_v33  ;;  %v11817_v55 = vld [vmem:[%s12453_s0 + $0xb8] sm:$0xff]  ;;  %v8982_v33 = vld [vmem:[%s11322_s11 + $0x14e0] ss:$16 sps:$4 sm:$0xff]  }
 0x2bb   : > { %6915 = vmatprep.subr.bf16.mxu1 %v8933_v14  ;;  %v8985_v14 = vld [vmem:[%s11322_s11 + $0x16e0] ss:$16 sps:$4 sm:$0xff]  }
 0x2bd   : > { %6873 = vmatpush1.bf16.msra.mxu0 %v8928_v56  ;;  %v11823_v56 = vcombine.low %v11698_v10, %v11703_v11  ;;  %v11835_v10 = vcombine.high %v11802_v46, %v11807_v47  ;;  %v11839_v11 = vcombine.high %v11812_v54, %v11817_v55 }
 0x2be   : > { %6916 = vmatpush1.bf16.msra.mxu1 %v8931_v57  ;;  %6874 = vmatprep.subr.bf16.mxu0 %v8936_v58  ;;  %v11827_v57 = vcombine.low %v11708_v12, %v11721_v17  ;;  %v8990_v58 = vld [vmem:[%s11322_s11 + $0x14c4] ss:$16 sps:$4 sm:$0xff]  }
 0x2bf   : > { %6917 = vmatprep.subr.bf16.mxu1 %v8939_v59  ;;  %v8993_v59 = vld [vmem:[%s11322_s11 + $0x16c4] ss:$16 sps:$4 sm:$0xff]  }
 0x2c0   : > { %v8996_v12 = vld [vmem:[%s11322_s11 + $0x14a4] ss:$16 sps:$4 sm:$0xff]  }
 0x2c1   : > { %6875 = vmatpush2.bf16.msra.mxu0 %v8934_v60  ;;  %v8988_v60 = vld [vmem:[%s11322_s11 + $0x14c0] ss:$16 sps:$4 sm:$0xff]   ;;  %v8999_v17 = vld [vmem:[%s11322_s11 + $0x16a4] ss:$16 sps:$4 sm:$0xff]  }
 0x2c2   : > { %6918 = vmatpush2.bf16.msra.mxu1 %v8937_v61  ;;  %6876 = vmatprep.subr.bf16.mxu0 %v8942_v62  ;;  %v8991_v61 = vld [vmem:[%s11322_s11 + $0x16c0] ss:$16 sps:$4 sm:$0xff]  }
 0x2c3   : > { %6919 = vmatprep.subr.bf16.mxu1 %v8945_v63  ;;  %v8994_v62 = vld [vmem:[%s11322_s11 + $0x14a0] ss:$16 sps:$4 sm:$0xff]  }
 0x2c4   : > { %v8997_v63 = vld [vmem:[%s11322_s11 + $0x16a0] ss:$16 sps:$4 sm:$0xff]  }
 0x2c5   : > { %6877 = vmatpush2.bf16.msra.mxu0 %v8940_v0  ;;  %v9002_v0 = vld [vmem:[%s11322_s11 + $0x1484] ss:$16 sps:$4 sm:$0xff]  }
 0x2c6   : > { %6920 = vmatpush2.bf16.msra.mxu1 %v8943_v1  ;;  %6878 = vmatprep.subr.bf16.mxu0 %v8948_v2  ;;  %v9005_v1 = vld [vmem:[%s11322_s11 + $0x1684] ss:$16 sps:$4 sm:$0xff]   ;;  %v9000_v2 = vld [vmem:[%s11322_s11 + $0x1480] ss:$16 sps:$4 sm:$0xff]  }
 0x2c7   : > { %6921 = vmatprep.subr.bf16.mxu1 %v8951_v5  ;;  %v9003_v5 = vld [vmem:[%s11322_s11 + $0x1680] ss:$16 sps:$4 sm:$0xff]  }
 0x2c9   : > { %6879 = vmatpush2.bf16.msra.mxu0 %v8946_v8  ;;  %v9008_v8 = vld [vmem:[%s11322_s11 + $0x1464] ss:$16 sps:$4 sm:$0xff]  }
 0x2ca   : > { %6922 = vmatpush2.bf16.msra.mxu1 %v8949_v9  ;;  %6880 = vmatprep.subr.bf16.mxu0 %v8954_v18  ;;  %v9011_v9 = vld [vmem:[%s11322_s11 + $0x1664] ss:$16 sps:$4 sm:$0xff]   ;;  %v9006_v18 = vld [vmem:[%s11322_s11 + $0x1460] ss:$16 sps:$4 sm:$0xff]  }
 0x2cb   : > { %6923 = vmatprep.subr.bf16.mxu1 %v8957_v19  ;;  %v9009_v19 = vld [vmem:[%s11322_s11 + $0x1660] ss:$16 sps:$4 sm:$0xff]  }
 0x2cd   : > { %6881 = vmatpush2.bf16.msra.mxu0 %v8952_v48  ;;  %v9014_v48 = vld [vmem:[%s11322_s11 + $0x1444] ss:$16 sps:$4 sm:$0xff]  }
 0x2ce   : > { %6924 = vmatpush2.bf16.msra.mxu1 %v8955_v49  ;;  %6882 = vmatprep.subr.bf16.mxu0 %v8960_v21  ;;  %v9017_v49 = vld [vmem:[%s11322_s11 + $0x1644] ss:$16 sps:$4 sm:$0xff]   ;;  %v9012_v21 = vld [vmem:[%s11322_s11 + $0x1440] ss:$16 sps:$4 sm:$0xff]  }
 0x2cf   : > { %6925 = vmatprep.subr.bf16.mxu1 %v8963_v22  ;;  %v9015_v22 = vld [vmem:[%s11322_s11 + $0x1640] ss:$16 sps:$4 sm:$0xff]  }
 0x2d1   : > { %6883 = vmatpush2.bf16.msra.mxu0 %v8958_v23  ;;  %v9020_v23 = vld [vmem:[%s11322_s11 + $0x1424] ss:$16 sps:$4 sm:$0xff]  }
 0x2d2   : > { %6926 = vmatpush2.bf16.msra.mxu1 %v8961_v24  ;;  %6884 = vmatprep.subr.bf16.mxu0 %v8966_v25  ;;  %v9023_v24 = vld [vmem:[%s11322_s11 + $0x1624] ss:$16 sps:$4 sm:$0xff]   ;;  %v9018_v25 = vld [vmem:[%s11322_s11 + $0x1420] ss:$16 sps:$4 sm:$0xff]  }
 0x2d3   : > { %6927 = vmatprep.subr.bf16.mxu1 %v8969_v26  ;;  %v9021_v26 = vld [vmem:[%s11322_s11 + $0x1620] ss:$16 sps:$4 sm:$0xff]  }
 0x2d5   : > { %6885 = vmatpush2.bf16.msra.mxu0 %v8964_v27  ;;  %v9026_v27 = vld [vmem:[%s11322_s11 + $0x1404] ss:$16 sps:$4 sm:$0xff]  }
 0x2d6   : > { %6928 = vmatpush2.bf16.msra.mxu1 %v8967_v28  ;;  %6886 = vmatprep.subr.bf16.mxu0 %v8972_v31  ;;  %v9029_v28 = vld [vmem:[%s11322_s11 + $0x1604] ss:$16 sps:$4 sm:$0xff]   ;;  %v9024_v31 = vld [vmem:[%s11322_s11 + $0x1400] ss:$16 sps:$4 sm:$0xff]  }
 0x2d7   : > { %6929 = vmatprep.subr.bf16.mxu1 %v8975_v32  ;;  %v9027_v32 = vld [vmem:[%s11322_s11 + $0x1600] ss:$16 sps:$4 sm:$0xff]  }
 0x2d9   : > { %6887 = vmatpush2.bf16.msra.mxu0 %v8970_v37  ;;  %v9032_v37 = vld [vmem:[%s11322_s11 + $0x15e4] ss:$16 sps:$4 sm:$0xff]  }
 0x2da   : > { %6930 = vmatpush2.bf16.msra.mxu1 %v8973_v38  ;;  %6888 = vmatprep.subr.bf16.mxu0 %v8978_v39  ;;  %v9035_v38 = vld [vmem:[%s11322_s11 + $0x17e4] ss:$16 sps:$4 sm:$0xff]   ;;  %v9030_v39 = vld [vmem:[%s11322_s11 + $0x15e0] ss:$16 sps:$4 sm:$0xff]  }
 0x2db   : > { %6931 = vmatprep.subr.bf16.mxu1 %v8981_v40  ;;  %v9033_v40 = vld [vmem:[%s11322_s11 + $0x17e0] ss:$16 sps:$4 sm:$0xff]  }
 0x2dd   : > { %6889 = vmatpush2.bf16.msra.mxu0 %v8976_v41  ;;  %v9038_v41 = vld [vmem:[%s11322_s11 + $0x15c4] ss:$16 sps:$4 sm:$0xff]  }
 0x2de   : > { %6932 = vmatpush2.bf16.msra.mxu1 %v8979_v42  ;;  %6944 = vmatprep.subr.bf16.mxu0 %v8984_v44  ;;  %v9041_v42 = vld [vmem:[%s11322_s11 + $0x17c4] ss:$16 sps:$4 sm:$0xff]   ;;  %v9036_v44 = vld [vmem:[%s11322_s11 + $0x15c0] ss:$16 sps:$4 sm:$0xff]  }
 0x2df   : > { %6987 = vmatprep.subr.bf16.mxu1 %v8987_v45  ;;  %v9039_v45 = vld [vmem:[%s11322_s11 + $0x17c0] ss:$16 sps:$4 sm:$0xff]  }
 0x2e0   : > { %6891 = vmatmul.mubr.bf16.vlgmr.msra.gmra.mxu0 %v11823_v56 }
 0x2e1   : > { %6934 = vmatmul.mubr.bf16.vlgmr.msra.gmra.mxu1 %v11827_v57  ;;  %6945 = vmatpush1.bf16.msra.mxu0 %v8982_v33  ;;  %v9044_v33 = vld [vmem:[%s11322_s11 + $0x15a4] ss:$16 sps:$4 sm:$0xff]  }
 0x2e2   : > { %6988 = vmatpush1.bf16.msra.mxu1 %v8985_v14  ;;  %6946 = vmatprep.subr.bf16.mxu0 %v8990_v58  ;;  %v9047_v14 = vld [vmem:[%s11322_s11 + $0x17a4] ss:$16 sps:$4 sm:$0xff]   ;;  %v9042_v58 = vld [vmem:[%s11322_s11 + $0x15a0] ss:$16 sps:$4 sm:$0xff]  }
 0x2e3   : > { %6989 = vmatprep.subr.bf16.mxu1 %v8993_v59  ;;  %6976 = vmatprep.mubr.bf16.mxu0 %v11835_v10  ;;  %v9045_v59 = vld [vmem:[%s11322_s11 + $0x17a0] ss:$16 sps:$4 sm:$0xff]  }
 0x2e4   : > { %7019 = vmatprep.mubr.bf16.mxu1 %v11839_v11 }
 0x2e5   : > { %6947 = vmatpush1.bf16.msra.mxu0 %v8988_v60  ;;  %v9050_v60 = vld [vmem:[%s11322_s11 + $0x1584] ss:$16 sps:$4 sm:$0xff]  }
 0x2e6   : > { %6990 = vmatpush1.bf16.msra.mxu1 %v8991_v61  ;;  %6948 = vmatprep.subr.bf16.mxu0 %v8996_v12  ;;  %v9053_v61 = vld [vmem:[%s11322_s11 + $0x1784] ss:$16 sps:$4 sm:$0xff]   ;;  %v9048_v12 = vld [vmem:[%s11322_s11 + $0x1580] ss:$16 sps:$4 sm:$0xff]  }
 0x2e7   : > { %6991 = vmatprep.subr.bf16.mxu1 %v8999_v17  ;;  %v9051_v17 = vld [vmem:[%s11322_s11 + $0x1780] ss:$16 sps:$4 sm:$0xff]  }
 0x2e9   : > { %6949 = vmatpush1.bf16.msra.mxu0 %v8994_v62  ;;  %v9056_v62 = vld [vmem:[%s11322_s11 + $0x1564] ss:$16 sps:$4 sm:$0xff]  }
 0x2ea   : > { %6992 = vmatpush1.bf16.msra.mxu1 %v8997_v63  ;;  %6950 = vmatprep.subr.bf16.mxu0 %v9002_v0  ;;  %v9059_v63 = vld [vmem:[%s11322_s11 + $0x1764] ss:$16 sps:$4 sm:$0xff]   ;;  %v9054_v0 = vld [vmem:[%s11322_s11 + $0x1560] ss:$16 sps:$4 sm:$0xff]  }
 0x2eb   : > { %6993 = vmatprep.subr.bf16.mxu1 %v9005_v1  ;;  %v9057_v1 = vld [vmem:[%s11322_s11 + $0x1760] ss:$16 sps:$4 sm:$0xff]  }
 0x2ed   : > { %6951 = vmatpush1.bf16.msra.mxu0 %v9000_v2  ;;  %v9062_v2 = vld [vmem:[%s11322_s11 + $0x1544] ss:$16 sps:$4 sm:$0xff]  }
 0x2ee   : > { %6994 = vmatpush1.bf16.msra.mxu1 %v9003_v5  ;;  %6952 = vmatprep.subr.bf16.mxu0 %v9008_v8  ;;  %v9065_v5 = vld [vmem:[%s11322_s11 + $0x1744] ss:$16 sps:$4 sm:$0xff]   ;;  %v9060_v8 = vld [vmem:[%s11322_s11 + $0x1540] ss:$16 sps:$4 sm:$0xff]  }
 0x2ef   : > { %6995 = vmatprep.subr.bf16.mxu1 %v9011_v9  ;;  %v9063_v9 = vld [vmem:[%s11322_s11 + $0x1740] ss:$16 sps:$4 sm:$0xff]  }
 0x2f1   : > { %6953 = vmatpush1.bf16.msra.mxu0 %v9006_v18  ;;  %v9068_v18 = vld [vmem:[%s11322_s11 + $0x1524] ss:$16 sps:$4 sm:$0xff]  }
 0x2f2   : > { %6996 = vmatpush1.bf16.msra.mxu1 %v9009_v19  ;;  %6954 = vmatprep.subr.bf16.mxu0 %v9014_v48  ;;  %v9071_v19 = vld [vmem:[%s11322_s11 + $0x1724] ss:$16 sps:$4 sm:$0xff]   ;;  %v9066_v48 = vld [vmem:[%s11322_s11 + $0x1520] ss:$16 sps:$4 sm:$0xff]  }
 0x2f3   : > { %6997 = vmatprep.subr.bf16.mxu1 %v9017_v49  ;;  %v9069_v49 = vld [vmem:[%s11322_s11 + $0x1720] ss:$16 sps:$4 sm:$0xff]  }
 0x2f5   : > { %6955 = vmatpush1.bf16.msra.mxu0 %v9012_v21  ;;  %v9074_v21 = vld [vmem:[%s11322_s11 + $0x1504] ss:$16 sps:$4 sm:$0xff]  }
 0x2f6   : > { %6998 = vmatpush1.bf16.msra.mxu1 %v9015_v22  ;;  %6956 = vmatprep.subr.bf16.mxu0 %v9020_v23  ;;  %v9077_v22 = vld [vmem:[%s11322_s11 + $0x1704] ss:$16 sps:$4 sm:$0xff]   ;;  %v9072_v23 = vld [vmem:[%s11322_s11 + $0x1500] ss:$16 sps:$4 sm:$0xff]  }
 0x2f7   : > { %6999 = vmatprep.subr.bf16.mxu1 %v9023_v24  ;;  %v9075_v24 = vld [vmem:[%s11322_s11 + $0x1700] ss:$16 sps:$4 sm:$0xff]  }
 0x2f9   : > { %6957 = vmatpush1.bf16.msra.mxu0 %v9018_v25  ;;  %v9080_v25 = vld [vmem:[%s11322_s11 + $0xec] ss:$16 sps:$4 sm:$0xff]  }
 0x2fa   : > { %7000 = vmatpush1.bf16.msra.mxu1 %v9021_v26  ;;  %6958 = vmatprep.subr.bf16.mxu0 %v9026_v27  ;;  %v9083_v26 = vld [vmem:[%s11322_s11 + $0x2ec] ss:$16 sps:$4 sm:$0xff]   ;;  %v9078_v27 = vld [vmem:[%s11322_s11 + $0xe8] ss:$16 sps:$4 sm:$0xff]  }
 0x2fb   : > { %7001 = vmatprep.subr.bf16.mxu1 %v9029_v28  ;;  %v9081_v28 = vld [vmem:[%s11322_s11 + $0x2e8] ss:$16 sps:$4 sm:$0xff]  }
 0x2fd   : > { %6959 = vmatpush1.bf16.msra.mxu0 %v9024_v31  ;;  %v11907_v31 = vcombine.low %v11802_v46, %v11807_v47  ;;  %v9092_v46 = vld [vmem:[%s11322_s11 + $0xac] ss:$16 sps:$4 sm:$0xff]  }
 0x2fe   : > { %7002 = vmatpush1.bf16.msra.mxu1 %v9027_v32  ;;  %6960 = vmatprep.subr.bf16.mxu0 %v9032_v37  ;;  %v11911_v32 = vcombine.low %v11812_v54, %v11817_v55  ;;  %v9086_v37 = vld [vmem:[%s11322_s11 + $0xcc] ss:$16 sps:$4 sm:$0xff]   ;;  %v9090_v54 = vld [vmem:[%s11322_s11 + $0xa8] ss:$16 sps:$4 sm:$0xff]  }
 0x2ff   : > { %7003 = vmatprep.subr.bf16.mxu1 %v9035_v38  ;;  %v9089_v38 = vld [vmem:[%s11322_s11 + $0x2cc] ss:$16 sps:$4 sm:$0xff]   ;;  %v9093_v55 = vld [vmem:[%s11322_s11 + $0x2a8] ss:$16 sps:$4 sm:$0xff]  }
 0x300   : > { %v9095_v47 = vld [vmem:[%s11322_s11 + $0x2ac] ss:$16 sps:$4 sm:$0xff]  }
 0x301   : > { %6961 = vmatpush2.bf16.msra.mxu0 %v9030_v39  ;;  %v9084_v39 = vld [vmem:[%s11322_s11 + $0xc8] ss:$16 sps:$4 sm:$0xff]  }
 0x302   : > { %7004 = vmatpush2.bf16.msra.mxu1 %v9033_v40  ;;  %6962 = vmatprep.subr.bf16.mxu0 %v9038_v41  ;;  %v9087_v40 = vld [vmem:[%s11322_s11 + $0x2c8] ss:$16 sps:$4 sm:$0xff]   ;;  %v9098_v41 = vld [vmem:[%s11322_s11 + $0x8c] ss:$16 sps:$4 sm:$0xff]  }
 0x303   : > { %7005 = vmatprep.subr.bf16.mxu1 %v9041_v42  ;;  %v9101_v42 = vld [vmem:[%s11322_s11 + $0x28c] ss:$16 sps:$4 sm:$0xff]  }
 0x305   : > { %6963 = vmatpush2.bf16.msra.mxu0 %v9036_v44  ;;  %v9096_v44 = vld [vmem:[%s11322_s11 + $0x88] ss:$16 sps:$4 sm:$0xff]  }
 0x306   : > { %7006 = vmatpush2.bf16.msra.mxu1 %v9039_v45  ;;  %6964 = vmatprep.subr.bf16.mxu0 %v9044_v33  ;;  %v9099_v45 = vld [vmem:[%s11322_s11 + $0x288] ss:$16 sps:$4 sm:$0xff]  }
 0x307   : > { %7007 = vmatprep.subr.bf16.mxu1 %v9047_v14  ;;  %v9102_v33 = vld [vmem:[%s11322_s11 + $0x68] ss:$16 sps:$4 sm:$0xff]  }
 0x308   : > { %v9105_v14 = vld [vmem:[%s11322_s11 + $0x268] ss:$16 sps:$4 sm:$0xff]  }
 0x309   : > { %6965 = vmatpush2.bf16.msra.mxu0 %v9042_v58  ;;  %v9110_v58 = vld [vmem:[%s11322_s11 + $0x4c] ss:$16 sps:$4 sm:$0xff]  }
 0x30a   : > { %7008 = vmatpush2.bf16.msra.mxu1 %v9045_v59  ;;  %6966 = vmatprep.subr.bf16.mxu0 %v9050_v60  ;;  %v9113_v59 = vld [vmem:[%s11322_s11 + $0x24c] ss:$16 sps:$4 sm:$0xff]   ;;  %v9108_v60 = vld [vmem:[%s11322_s11 + $0x48] ss:$16 sps:$4 sm:$0xff]  }
 0x30b   : > { %7009 = vmatprep.subr.bf16.mxu1 %v9053_v61  ;;  %v9111_v61 = vld [vmem:[%s11322_s11 + $0x248] ss:$16 sps:$4 sm:$0xff]  }
 0x30d   : > { %6967 = vmatpush2.bf16.msra.mxu0 %v9048_v12  ;;  %v9116_v12 = vld [vmem:[%s11322_s11 + $0x2c] ss:$16 sps:$4 sm:$0xff]  }
 0x30e   : > { %7010 = vmatpush2.bf16.msra.mxu1 %v9051_v17  ;;  %6968 = vmatprep.subr.bf16.mxu0 %v9056_v62  ;;  %v9119_v17 = vld [vmem:[%s11322_s11 + $0x22c] ss:$16 sps:$4 sm:$0xff]   ;;  %v9114_v62 = vld [vmem:[%s11322_s11 + $0x28] ss:$16 sps:$4 sm:$0xff]  }
 0x30f   : > { %7011 = vmatprep.subr.bf16.mxu1 %v9059_v63  ;;  %v9117_v63 = vld [vmem:[%s11322_s11 + $0x228] ss:$16 sps:$4 sm:$0xff]  }
 0x311   : > { %6969 = vmatpush2.bf16.msra.mxu0 %v9054_v0  ;;  %v9122_v0 = vld [vmem:[%s11322_s11 + $0xc] ss:$16 sps:$4 sm:$0xff]  }
 0x312   : > { %7012 = vmatpush2.bf16.msra.mxu1 %v9057_v1  ;;  %6970 = vmatprep.subr.bf16.mxu0 %v9062_v2  ;;  %v9125_v1 = vld [vmem:[%s11322_s11 + $0x20c] ss:$16 sps:$4 sm:$0xff]   ;;  %v9120_v2 = vld [vmem:[%s11322_s11 + $0x8] ss:$16 sps:$4 sm:$0xff]  }
 0x313   : > { %7013 = vmatprep.subr.bf16.mxu1 %v9065_v5  ;;  %v9123_v5 = vld [vmem:[%s11322_s11 + $0x208] ss:$16 sps:$4 sm:$0xff]  }
 0x315   : > { %6971 = vmatpush2.bf16.msra.mxu0 %v9060_v8  ;;  %v9128_v8 = vld [vmem:[%s11322_s11 + $0x1ec] ss:$16 sps:$4 sm:$0xff]  }
 0x316   : > { %7014 = vmatpush2.bf16.msra.mxu1 %v9063_v9  ;;  %6972 = vmatprep.subr.bf16.mxu0 %v9068_v18  ;;  %v9131_v9 = vld [vmem:[%s11322_s11 + $0x3ec] ss:$16 sps:$4 sm:$0xff]   ;;  %v9126_v18 = vld [vmem:[%s11322_s11 + $0x1e8] ss:$16 sps:$4 sm:$0xff]  }
 0x317   : > { %7015 = vmatprep.subr.bf16.mxu1 %v9071_v19  ;;  %v9129_v19 = vld [vmem:[%s11322_s11 + $0x3e8] ss:$16 sps:$4 sm:$0xff]  }
 0x319   : > { %6973 = vmatpush2.bf16.msra.mxu0 %v9066_v48  ;;  %v9134_v48 = vld [vmem:[%s11322_s11 + $0x1cc] ss:$16 sps:$4 sm:$0xff]  }
 0x31a   : > { %7016 = vmatpush2.bf16.msra.mxu1 %v9069_v49  ;;  %6974 = vmatprep.subr.bf16.mxu0 %v9074_v21  ;;  %v9137_v49 = vld [vmem:[%s11322_s11 + $0x3cc] ss:$16 sps:$4 sm:$0xff]   ;;  %v9132_v21 = vld [vmem:[%s11322_s11 + $0x1c8] ss:$16 sps:$4 sm:$0xff]  }
 0x31b   : > { %7017 = vmatprep.subr.bf16.mxu1 %v9077_v22  ;;  %v9135_v22 = vld [vmem:[%s11322_s11 + $0x3c8] ss:$16 sps:$4 sm:$0xff]  }
 0x31d   : > { %6975 = vmatpush2.bf16.msra.mxu0 %v9072_v23  ;;  %v9140_v23 = vld [vmem:[%s11322_s11 + $0x1ac] ss:$16 sps:$4 sm:$0xff]  }
 0x31e   : > { %7018 = vmatpush2.bf16.msra.mxu1 %v9075_v24  ;;  %7030 = vmatprep.subr.bf16.mxu0 %v9080_v25  ;;  %v9143_v24 = vld [vmem:[%s11322_s11 + $0x3ac] ss:$16 sps:$4 sm:$0xff]   ;;  %v9138_v25 = vld [vmem:[%s11322_s11 + $0x1a8] ss:$16 sps:$4 sm:$0xff]  }
 0x31f   : > { %7073 = vmatprep.subr.bf16.mxu1 %v9083_v26  ;;  %v9141_v26 = vld [vmem:[%s11322_s11 + $0x3a8] ss:$16 sps:$4 sm:$0xff]  }
 0x320   : > { %6977 = vmatmul.mubr.bf16.vlgmr.msra.gmra.mxu0 %v11907_v31 }
 0x321   : > { %7020 = vmatmul.mubr.bf16.vlgmr.msra.gmra.mxu1 %v11911_v32  ;;  %7031 = vmatpush1.bf16.msra.mxu0 %v9078_v27  ;;  %v9146_v27 = vld [vmem:[%s11322_s11 + $0x18c] ss:$16 sps:$4 sm:$0xff]  }
 0x322   : > { %7074 = vmatpush1.bf16.msra.mxu1 %v9081_v28  ;;  %7032 = vmatprep.subr.bf16.mxu0 %v9086_v37  ;;  %v9149_v28 = vld [vmem:[%s11322_s11 + $0x38c] ss:$16 sps:$4 sm:$0xff]   ;;  %v9144_v37 = vld [vmem:[%s11322_s11 + $0x188] ss:$16 sps:$4 sm:$0xff]  }
 0x323   : > { %7075 = vmatprep.subr.bf16.mxu1 %v9089_v38  ;;  %7062 = vmatprep.mubr.bf16.mxu0 %v11312_v4  ;;  %v9104_v4 = vld [vmem:[%s11322_s11 + $0x6c] ss:$16 sps:$4 sm:$0xff]   ;;  %v9147_v38 = vld [vmem:[%s11322_s11 + $0x388] ss:$16 sps:$4 sm:$0xff]  }
 0x324   : > { %7105 = vmatprep.mubr.bf16.mxu1 %v11319_v7  ;;  %v9107_v7 = vld [vmem:[%s11322_s11 + $0x26c] ss:$16 sps:$4 sm:$0xff]  }
 0x325   : > { %7033 = vmatpush1.bf16.msra.mxu0 %v9084_v39  ;;  %v9152_v39 = vld [vmem:[%s11322_s11 + $0x16c] ss:$16 sps:$4 sm:$0xff]  }
 0x326   : > { %7076 = vmatpush1.bf16.msra.mxu1 %v9087_v40  ;;  %7034 = vmatprep.subr.bf16.mxu0 %v9092_v46  ;;  %v9155_v40 = vld [vmem:[%s11322_s11 + $0x36c] ss:$16 sps:$4 sm:$0xff]   ;;  %v9150_v46 = vld [vmem:[%s11322_s11 + $0x168] ss:$16 sps:$4 sm:$0xff]  }
 0x327   : > { %7077 = vmatprep.subr.bf16.mxu1 %v9095_v47  ;;  %v9153_v47 = vld [vmem:[%s11322_s11 + $0x368] ss:$16 sps:$4 sm:$0xff]  }
 0x329   : > { %7035 = vmatpush1.bf16.msra.mxu0 %v9090_v54  ;;  %v9158_v54 = vld [vmem:[%s11322_s11 + $0x14c] ss:$16 sps:$4 sm:$0xff]  }
 0x32a   : > { %7078 = vmatpush1.bf16.msra.mxu1 %v9093_v55  ;;  %7036 = vmatprep.subr.bf16.mxu0 %v9098_v41  ;;  %v9161_v55 = vld [vmem:[%s11322_s11 + $0x34c] ss:$16 sps:$4 sm:$0xff]   ;;  %v9156_v41 = vld [vmem:[%s11322_s11 + $0x148] ss:$16 sps:$4 sm:$0xff]  }
 0x32b   : > { %7079 = vmatprep.subr.bf16.mxu1 %v9101_v42  ;;  %v9159_v42 = vld [vmem:[%s11322_s11 + $0x348] ss:$16 sps:$4 sm:$0xff]  }
 0x32d   : > { %7037 = vmatpush1.bf16.msra.mxu0 %v9096_v44  ;;  %v9164_v44 = vld [vmem:[%s11322_s11 + $0x12c] ss:$16 sps:$4 sm:$0xff]  }
 0x32e   : > { %7080 = vmatpush1.bf16.msra.mxu1 %v9099_v45  ;;  %7038 = vmatprep.subr.bf16.mxu0 %v9104_v4  ;;  %v9167_v45 = vld [vmem:[%s11322_s11 + $0x32c] ss:$16 sps:$4 sm:$0xff]   ;;  %v9162_v4 = vld [vmem:[%s11322_s11 + $0x128] ss:$16 sps:$4 sm:$0xff]  }
 0x32f   : > { %7081 = vmatprep.subr.bf16.mxu1 %v9107_v7  ;;  %v9165_v7 = vld [vmem:[%s11322_s11 + $0x328] ss:$16 sps:$4 sm:$0xff]  }
 0x331   : > { %7039 = vmatpush1.bf16.msra.mxu0 %v9102_v33  ;;  %v9170_v33 = vld [vmem:[%s11322_s11 + $0x10c] ss:$16 sps:$4 sm:$0xff]  }
 0x332   : > { %7082 = vmatpush1.bf16.msra.mxu1 %v9105_v14  ;;  %7040 = vmatprep.subr.bf16.mxu0 %v9110_v58  ;;  %v9173_v14 = vld [vmem:[%s11322_s11 + $0x30c] ss:$16 sps:$4 sm:$0xff]   ;;  %v9168_v58 = vld [vmem:[%s11322_s11 + $0x108] ss:$16 sps:$4 sm:$0xff]  }
 0x333   : > { %7083 = vmatprep.subr.bf16.mxu1 %v9113_v59  ;;  %v9171_v59 = vld [vmem:[%s11322_s11 + $0x308] ss:$16 sps:$4 sm:$0xff]  }
 0x335   : > { %7041 = vmatpush1.bf16.msra.mxu0 %v9108_v60  ;;  %v9176_v60 = vld [vmem:[%s11322_s11 + $0x4ec] ss:$16 sps:$4 sm:$0xff]  }
 0x336   : > { %7084 = vmatpush1.bf16.msra.mxu1 %v9111_v61  ;;  %7042 = vmatprep.subr.bf16.mxu0 %v9116_v12  ;;  %v9179_v61 = vld [vmem:[%s11322_s11 + $0x6ec] ss:$16 sps:$4 sm:$0xff]   ;;  %v9174_v12 = vld [vmem:[%s11322_s11 + $0x4e8] ss:$16 sps:$4 sm:$0xff]  }
 0x337   : > { %7085 = vmatprep.subr.bf16.mxu1 %v9119_v17  ;;  %v9177_v17 = vld [vmem:[%s11322_s11 + $0x6e8] ss:$16 sps:$4 sm:$0xff]  }
 0x339   : > { %7043 = vmatpush1.bf16.msra.mxu0 %v9114_v62  ;;  %v9182_v62 = vld [vmem:[%s11322_s11 + $0x4cc] ss:$16 sps:$4 sm:$0xff]  }
 0x33a   : > { %7086 = vmatpush1.bf16.msra.mxu1 %v9117_v63  ;;  %7044 = vmatprep.subr.bf16.mxu0 %v9122_v0  ;;  %v9185_v63 = vld [vmem:[%s11322_s11 + $0x6cc] ss:$16 sps:$4 sm:$0xff]   ;;  %v9180_v0 = vld [vmem:[%s11322_s11 + $0x4c8] ss:$16 sps:$4 sm:$0xff]  }
 0x33b   : > { %7087 = vmatprep.subr.bf16.mxu1 %v9125_v1  ;;  %v9183_v1 = vld [vmem:[%s11322_s11 + $0x6c8] ss:$16 sps:$4 sm:$0xff]  }
 0x33d   : > { %7045 = vmatpush1.bf16.msra.mxu0 %v9120_v2  ;;  %v9188_v2 = vld [vmem:[%s11322_s11 + $0x4ac] ss:$16 sps:$4 sm:$0xff]  }
 0x33e   : > { %7088 = vmatpush1.bf16.msra.mxu1 %v9123_v5  ;;  %7046 = vmatprep.subr.bf16.mxu0 %v9128_v8  ;;  %v9191_v5 = vld [vmem:[%s11322_s11 + $0x6ac] ss:$16 sps:$4 sm:$0xff]   ;;  %v9186_v8 = vld [vmem:[%s11322_s11 + $0x4a8] ss:$16 sps:$4 sm:$0xff]  }
 0x33f   : > { %7089 = vmatprep.subr.bf16.mxu1 %v9131_v9  ;;  %v9197_v9 = vld [vmem:[%s11322_s11 + $0x68c] ss:$16 sps:$4 sm:$0xff]  }
 0x341   : > { %7047 = vmatpush2.bf16.msra.mxu0 %v9126_v18  ;;  %v9192_v18 = vld [vmem:[%s11322_s11 + $0x488] ss:$16 sps:$4 sm:$0xff]  }
 0x342   : > { %7090 = vmatpush2.bf16.msra.mxu1 %v9129_v19  ;;  %7048 = vmatprep.subr.bf16.mxu0 %v9134_v48  ;;  %v9195_v19 = vld [vmem:[%s11322_s11 + $0x688] ss:$16 sps:$4 sm:$0xff]  }
 0x343   : > { %7091 = vmatprep.subr.bf16.mxu1 %v9137_v49  ;;  %v9198_v48 = vld [vmem:[%s11322_s11 + $0x468] ss:$16 sps:$4 sm:$0xff]  }
 0x344   : > { %v9201_v49 = vld [vmem:[%s11322_s11 + $0x668] ss:$16 sps:$4 sm:$0xff]  }
 0x345   : > { %7049 = vmatpush2.bf16.msra.mxu0 %v9132_v21  ;;  %v9206_v21 = vld [vmem:[%s11322_s11 + $0x44c] ss:$16 sps:$4 sm:$0xff]  }
 0x346   : > { %7092 = vmatpush2.bf16.msra.mxu1 %v9135_v22  ;;  %7050 = vmatprep.subr.bf16.mxu0 %v9140_v23  ;;  %v9209_v22 = vld [vmem:[%s11322_s11 + $0x64c] ss:$16 sps:$4 sm:$0xff]   ;;  %v9204_v23 = vld [vmem:[%s11322_s11 + $0x448] ss:$16 sps:$4 sm:$0xff]  }
 0x347   : > { %7093 = vmatprep.subr.bf16.mxu1 %v9143_v24  ;;  %v9207_v24 = vld [vmem:[%s11322_s11 + $0x648] ss:$16 sps:$4 sm:$0xff]  }
 0x349   : > { %7051 = vmatpush2.bf16.msra.mxu0 %v9138_v25  ;;  %v9212_v25 = vld [vmem:[%s11322_s11 + $0x42c] ss:$16 sps:$4 sm:$0xff]  }
 0x34a   : > { %7094 = vmatpush2.bf16.msra.mxu1 %v9141_v26  ;;  %7052 = vmatprep.subr.bf16.mxu0 %v9146_v27  ;;  %v9215_v26 = vld [vmem:[%s11322_s11 + $0x62c] ss:$16 sps:$4 sm:$0xff]   ;;  %v9210_v27 = vld [vmem:[%s11322_s11 + $0x428] ss:$16 sps:$4 sm:$0xff]  }
 0x34b   : > { %7095 = vmatprep.subr.bf16.mxu1 %v9149_v28  ;;  %v9213_v28 = vld [vmem:[%s11322_s11 + $0x628] ss:$16 sps:$4 sm:$0xff]  }
 0x34d   : > { %7053 = vmatpush2.bf16.msra.mxu0 %v9144_v37  ;;  %v9218_v37 = vld [vmem:[%s11322_s11 + $0x40c] ss:$16 sps:$4 sm:$0xff]  }
 0x34e   : > { %7096 = vmatpush2.bf16.msra.mxu1 %v9147_v38  ;;  %7054 = vmatprep.subr.bf16.mxu0 %v9152_v39  ;;  %v9221_v38 = vld [vmem:[%s11322_s11 + $0x60c] ss:$16 sps:$4 sm:$0xff]   ;;  %v9216_v39 = vld [vmem:[%s11322_s11 + $0x408] ss:$16 sps:$4 sm:$0xff]  }
 0x34f   : > { %7097 = vmatprep.subr.bf16.mxu1 %v9155_v40  ;;  %v9219_v40 = vld [vmem:[%s11322_s11 + $0x608] ss:$16 sps:$4 sm:$0xff]  }
 0x351   : > { %7055 = vmatpush2.bf16.msra.mxu0 %v9150_v46  ;;  %v9224_v46 = vld [vmem:[%s11322_s11 + $0x5ec] ss:$16 sps:$4 sm:$0xff]  }
 0x352   : > { %7098 = vmatpush2.bf16.msra.mxu1 %v9153_v47  ;;  %7056 = vmatprep.subr.bf16.mxu0 %v9158_v54  ;;  %v9227_v47 = vld [vmem:[%s11322_s11 + $0x7ec] ss:$16 sps:$4 sm:$0xff]   ;;  %v9222_v54 = vld [vmem:[%s11322_s11 + $0x5e8] ss:$16 sps:$4 sm:$0xff]  }
 0x353   : > { %7099 = vmatprep.subr.bf16.mxu1 %v9161_v55  ;;  %v9225_v55 = vld [vmem:[%s11322_s11 + $0x7e8] ss:$16 sps:$4 sm:$0xff]  }
 0x355   : > { %7057 = vmatpush2.bf16.msra.mxu0 %v9156_v41  ;;  %v9230_v41 = vld [vmem:[%s11322_s11 + $0x5cc] ss:$16 sps:$4 sm:$0xff]  }
 0x356   : > { %7100 = vmatpush2.bf16.msra.mxu1 %v9159_v42  ;;  %7058 = vmatprep.subr.bf16.mxu0 %v9164_v44  ;;  %v9233_v42 = vld [vmem:[%s11322_s11 + $0x7cc] ss:$16 sps:$4 sm:$0xff]   ;;  %v9228_v44 = vld [vmem:[%s11322_s11 + $0x5c8] ss:$16 sps:$4 sm:$0xff]  }
 0x357   : > { %7101 = vmatprep.subr.bf16.mxu1 %v9167_v45  ;;  %v9231_v45 = vld [vmem:[%s11322_s11 + $0x7c8] ss:$16 sps:$4 sm:$0xff]  }
 0x359   : > { %7059 = vmatpush2.bf16.msra.mxu0 %v9162_v4  ;;  %v9236_v4 = vld [vmem:[%s11322_s11 + $0x5ac] ss:$16 sps:$4 sm:$0xff]  }
 0x35a   : > { %7102 = vmatpush2.bf16.msra.mxu1 %v9165_v7  ;;  %7060 = vmatprep.subr.bf16.mxu0 %v9170_v33  ;;  %v9239_v7 = vld [vmem:[%s11322_s11 + $0x7ac] ss:$16 sps:$4 sm:$0xff]   ;;  %v9234_v33 = vld [vmem:[%s11322_s11 + $0x5a8] ss:$16 sps:$4 sm:$0xff]  }
 0x35b   : > { %7103 = vmatprep.subr.bf16.mxu1 %v9173_v14  ;;  %v9237_v14 = vld [vmem:[%s11322_s11 + $0x7a8] ss:$16 sps:$4 sm:$0xff]  }
 0x35d   : > { %7061 = vmatpush2.bf16.msra.mxu0 %v9168_v58  ;;  %v9242_v58 = vld [vmem:[%s11322_s11 + $0x58c] ss:$16 sps:$4 sm:$0xff]  }
 0x35e   : > { %7104 = vmatpush2.bf16.msra.mxu1 %v9171_v59  ;;  %7116 = vmatprep.subr.bf16.mxu0 %v9176_v60  ;;  %v9245_v59 = vld [vmem:[%s11322_s11 + $0x78c] ss:$16 sps:$4 sm:$0xff]   ;;  %v9240_v60 = vld [vmem:[%s11322_s11 + $0x588] ss:$16 sps:$4 sm:$0xff]  }
 0x35f   : > { %7159 = vmatprep.subr.bf16.mxu1 %v9179_v61  ;;  %v9243_v61 = vld [vmem:[%s11322_s11 + $0x788] ss:$16 sps:$4 sm:$0xff]  }
 0x360   : > { %7063 = vmatmul.mubr.bf16.vlgmr.msra.gmra.mxu0 %v11310_v3  ;;  %v9189_v3 = vld [vmem:[%s11322_s11 + $0x6a8] ss:$16 sps:$4 sm:$0xff]  }
 0x361   : > { %7106 = vmatmul.mubr.bf16.vlgmr.msra.gmra.mxu1 %v11317_v6  ;;  %7117 = vmatpush1.bf16.msra.mxu0 %v9174_v12  ;;  %v9194_v6 = vld [vmem:[%s11322_s11 + $0x48c] ss:$16 sps:$4 sm:$0xff]  }
 0x362   : > { %7160 = vmatpush1.bf16.msra.mxu1 %v9177_v17  ;;  %7118 = vmatprep.subr.bf16.mxu0 %v9182_v62  ;;  %v9248_v12 = vld [vmem:[%s11322_s11 + $0x56c] ss:$16 sps:$4 sm:$0xff]   ;;  %v9246_v62 = vld [vmem:[%s11322_s11 + $0x568] ss:$16 sps:$4 sm:$0xff]  }
 0x363   : > { %7161 = vmatprep.subr.bf16.mxu1 %v9185_v63  ;;  %7148 = vmatprep.mubr.bf16.mxu0 %v11407_v20  ;;  %v9200_v20 = vld [vmem:[%s11322_s11 + $0x46c] ss:$16 sps:$4 sm:$0xff]   ;;  %v9249_v63 = vld [vmem:[%s11322_s11 + $0x768] ss:$16 sps:$4 sm:$0xff]  }
 0x364   : > { %7191 = vmatprep.mubr.bf16.mxu1 %v11444_v43  ;;  %v9203_v43 = vld [vmem:[%s11322_s11 + $0x66c] ss:$16 sps:$4 sm:$0xff]  }
 0x365   : > { %7119 = vmatpush1.bf16.msra.mxu0 %v9180_v0  ;;  %v9251_v17 = vld [vmem:[%s11322_s11 + $0x76c] ss:$16 sps:$4 sm:$0xff]  }
 0x366   : > { %7162 = vmatpush1.bf16.msra.mxu1 %v9183_v1  ;;  %7120 = vmatprep.subr.bf16.mxu0 %v9188_v2  ;;  %v9254_v0 = vld [vmem:[%s11322_s11 + $0x54c] ss:$16 sps:$4 sm:$0xff]   ;;  %v9252_v2 = vld [vmem:[%s11322_s11 + $0x548] ss:$16 sps:$4 sm:$0xff]  }
 0x367   : > { %7163 = vmatprep.subr.bf16.mxu1 %v9191_v5  ;;  %v9257_v1 = vld [vmem:[%s11322_s11 + $0x74c] ss:$16 sps:$4 sm:$0xff]   ;;  %v9255_v5 = vld [vmem:[%s11322_s11 + $0x748] ss:$16 sps:$4 sm:$0xff]  }
 0x369   : > { %7121 = vmatpush1.bf16.msra.mxu0 %v9186_v8  ;;  %v9260_v8 = vld [vmem:[%s11322_s11 + $0x52c] ss:$16 sps:$4 sm:$0xff]  }
 0x36a   : > { %7164 = vmatpush1.bf16.msra.mxu1 %v9189_v3  ;;  %7122 = vmatprep.subr.bf16.mxu0 %v9194_v6  ;;  %v9263_v3 = vld [vmem:[%s11322_s11 + $0x72c] ss:$16 sps:$4 sm:$0xff]   ;;  %v9258_v6 = vld [vmem:[%s11322_s11 + $0x528] ss:$16 sps:$4 sm:$0xff]  }
 0x36b   : > { %7165 = vmatprep.subr.bf16.mxu1 %v9197_v9  ;;  %v9261_v9 = vld [vmem:[%s11322_s11 + $0x728] ss:$16 sps:$4 sm:$0xff]  }
 0x36d   : > { %7123 = vmatpush1.bf16.msra.mxu0 %v9192_v18  ;;  %v9266_v18 = vld [vmem:[%s11322_s11 + $0x50c] ss:$16 sps:$4 sm:$0xff]  }
 0x36e   : > { %7166 = vmatpush1.bf16.msra.mxu1 %v9195_v19  ;;  %7124 = vmatprep.subr.bf16.mxu0 %v9200_v20  ;;  %v9269_v19 = vld [vmem:[%s11322_s11 + $0x70c] ss:$16 sps:$4 sm:$0xff]   ;;  %v9264_v20 = vld [vmem:[%s11322_s11 + $0x508] ss:$16 sps:$4 sm:$0xff]  }
 0x36f   : > { %7167 = vmatprep.subr.bf16.mxu1 %v9203_v43  ;;  %v9267_v43 = vld [vmem:[%s11322_s11 + $0x708] ss:$16 sps:$4 sm:$0xff]  }
 0x371   : > { %7125 = vmatpush1.bf16.msra.mxu0 %v9198_v48  ;;  %v12045_v48 = vpop.f32.mrf.mxu0 }
 0x372   : > { %7168 = vmatpush1.bf16.msra.mxu1 %v9201_v49  ;;  %7126 = vmatprep.subr.bf16.mxu0 %v9206_v21  ;;  %v12047_v49 = vpop.f32.mrf.mxu1  ;;  %v9272_v21 = vld [vmem:[%s11322_s11 + $0x8ec] ss:$16 sps:$4 sm:$0xff]  }
 0x373   : > { %7169 = vmatprep.subr.bf16.mxu1 %v9209_v22  ;;  %v9275_v22 = vld [vmem:[%s11322_s11 + $0xaec] ss:$16 sps:$4 sm:$0xff]  }
 0x375   : > { %7127 = vmatpush1.bf16.msra.mxu0 %v9204_v23  ;;  %v9270_v23 = vld [vmem:[%s11322_s11 + $0x8e8] ss:$16 sps:$4 sm:$0xff]  }
 0x376   : > { %7170 = vmatpush1.bf16.msra.mxu1 %v9207_v24  ;;  %7128 = vmatprep.subr.bf16.mxu0 %v9212_v25  ;;  %v9273_v24 = vld [vmem:[%s11322_s11 + $0xae8] ss:$16 sps:$4 sm:$0xff]   ;;  %v12053_v25 = vpop.f32.mrf.mxu0 }
 0x377   : > { %7171 = vmatprep.subr.bf16.mxu1 %v9215_v26  ;;  %v12055_v26 = vpop.f32.mrf.mxu1 }
 0x379   : > { %7129 = vmatpush1.bf16.msra.mxu0 %v9210_v27  ;;  %v9278_v27 = vld [vmem:[%s11322_s11 + $0x8cc] ss:$16 sps:$4 sm:$0xff]  }
 0x37a   : > { %7172 = vmatpush1.bf16.msra.mxu1 %v9213_v28  ;;  %7130 = vmatprep.subr.bf16.mxu0 %v9218_v37  ;;  %v9281_v28 = vld [vmem:[%s11322_s11 + $0xacc] ss:$16 sps:$4 sm:$0xff]   ;;  %v9276_v37 = vld [vmem:[%s11322_s11 + $0x8c8] ss:$16 sps:$4 sm:$0xff]  }
 0x37b   : > { %7173 = vmatprep.subr.bf16.mxu1 %v9221_v38  ;;  %v9279_v38 = vld [vmem:[%s11322_s11 + $0xac8] ss:$16 sps:$4 sm:$0xff]  }
 0x37d   : > { %7131 = vmatpush1.bf16.msra.mxu0 %v9216_v39  ;;  %v12063_v39 = vpop.f32.mrf.mxu0 }
 0x37e   : > { %7174 = vmatpush1.bf16.msra.mxu1 %v9219_v40  ;;  %7132 = vmatprep.subr.bf16.mxu0 %v9224_v46  ;;  %v12065_v40 = vpop.f32.mrf.mxu1  ;;  %v9284_v46 = vld [vmem:[%s11322_s11 + $0x8ac] ss:$16 sps:$4 sm:$0xff]  }
 0x37f   : > { %7175 = vmatprep.subr.bf16.mxu1 %v9227_v47  ;;  %v9287_v47 = vld [vmem:[%s11322_s11 + $0xaac] ss:$16 sps:$4 sm:$0xff]  }
 0x381   : > { %7133 = vmatpush2.bf16.msra.mxu0 %v9222_v54  ;;  %v12073_v54 = vpop.f32.mrf.mxu0 }
 0x382   : > { %7176 = vmatpush2.bf16.msra.mxu1 %v9225_v55  ;;  %7134 = vmatprep.subr.bf16.mxu0 %v9230_v41  ;;  %v12075_v55 = vpop.f32.mrf.mxu1  ;;  %v9290_v41 = vld [vmem:[%s11322_s11 + $0x88c] ss:$16 sps:$4 sm:$0xff]  }
 0x383   : > { %7177 = vmatprep.subr.bf16.mxu1 %v9233_v42  ;;  %v9293_v42 = vld [vmem:[%s11322_s11 + $0xa8c] ss:$16 sps:$4 sm:$0xff]  }
 0x385   : > { %7135 = vmatpush2.bf16.msra.mxu0 %v9228_v44  ;;  %v9288_v44 = vld [vmem:[%s11322_s11 + $0x888] ss:$16 sps:$4 sm:$0xff]  }
 0x386   : > { %7178 = vmatpush2.bf16.msra.mxu1 %v9231_v45  ;;  %7136 = vmatprep.subr.bf16.mxu0 %v9236_v4  ;;  %v9291_v45 = vld [vmem:[%s11322_s11 + $0xa88] ss:$16 sps:$4 sm:$0xff]   ;;  %v9296_v4 = vld [vmem:[%s11322_s11 + $0x86c] ss:$16 sps:$4 sm:$0xff]  }
 0x387   : > { %7179 = vmatprep.subr.bf16.mxu1 %v9239_v7  ;;  %v9299_v7 = vld [vmem:[%s11322_s11 + $0xa6c] ss:$16 sps:$4 sm:$0xff]  }
 0x389   : > { %7137 = vmatpush2.bf16.msra.mxu0 %v9234_v33 }
 0x38a   : > { %7180 = vmatpush2.bf16.msra.mxu1 %v9237_v14  ;;  %7138 = vmatprep.subr.bf16.mxu0 %v9242_v58  ;;  %v9294_v58 = vld [vmem:[%s11322_s11 + $0x868] ss:$16 sps:$4 sm:$0xff]  }
 0x38b   : > { %7181 = vmatprep.subr.bf16.mxu1 %v9245_v59  ;;  %v9297_v59 = vld [vmem:[%s11322_s11 + $0xa68] ss:$16 sps:$4 sm:$0xff]  }
 0x38d   : > { %7139 = vmatpush2.bf16.msra.mxu0 %v9240_v60  ;;  %v9302_v60 = vld [vmem:[%s11322_s11 + $0x84c] ss:$16 sps:$4 sm:$0xff]  }
 0x38e   : > { %7182 = vmatpush2.bf16.msra.mxu1 %v9243_v61  ;;  %7140 = vmatprep.subr.bf16.mxu0 %v9248_v12  ;;  %v9305_v61 = vld [vmem:[%s11322_s11 + $0xa4c] ss:$16 sps:$4 sm:$0xff]  }
 0x38f   : > { %7183 = vmatprep.subr.bf16.mxu1 %v9251_v17 }
 0x391   : > { %7141 = vmatpush2.bf16.msra.mxu0 %v9246_v62  ;;  %v9300_v62 = vld [vmem:[%s11322_s11 + $0x848] ss:$16 sps:$4 sm:$0xff]  }
 0x392   : > { %7184 = vmatpush2.bf16.msra.mxu1 %v9249_v63  ;;  %7142 = vmatprep.subr.bf16.mxu0 %v9254_v0  ;;  %v9303_v63 = vld [vmem:[%s11322_s11 + $0xa48] ss:$16 sps:$4 sm:$0xff]   ;;  %v9308_v0 = vld [vmem:[%s11322_s11 + $0x82c] ss:$16 sps:$4 sm:$0xff]  }
 0x393   : > { %7185 = vmatprep.subr.bf16.mxu1 %v9257_v1  ;;  %v9311_v1 = vld [vmem:[%s11322_s11 + $0xa2c] ss:$16 sps:$4 sm:$0xff]  }
 0x395   : > { %7143 = vmatpush2.bf16.msra.mxu0 %v9252_v2  ;;  %v2534_v2 = vlaneseq }
 0x396   : > { %7186 = vmatpush2.bf16.msra.mxu1 %v9255_v5  ;;  %7144 = vmatprep.subr.bf16.mxu0 %v9260_v8 }
 0x397   : > { %7187 = vmatprep.subr.bf16.mxu1 %v9263_v3  ;;  %v9306_v3 = vld [vmem:[%s11322_s11 + $0x828] ss:$16 sps:$4 sm:$0xff]  }
 0x399   : > { %7145 = vmatpush2.bf16.msra.mxu0 %v9258_v6  ;;  %v9309_v6 = vld [vmem:[%s11322_s11 + $0xa28] ss:$16 sps:$4 sm:$0xff]  }
 0x39a   : > { %7188 = vmatpush2.bf16.msra.mxu1 %v9261_v9  ;;  %7146 = vmatprep.subr.bf16.mxu0 %v9266_v18 }
 0x39b   : > { %7189 = vmatprep.subr.bf16.mxu1 %v9269_v19  ;;  %v9314_v19 = vld [vmem:[%s11322_s11 + $0x80c] ss:$16 sps:$4 sm:$0xff]  }
 0x39d   : > { %7147 = vmatpush2.bf16.msra.mxu0 %v9264_v20  ;;  %v9317_v20 = vld [vmem:[%s11322_s11 + $0xa0c] ss:$16 sps:$4 sm:$0xff]  }
 0x39e   : > { %7190 = vmatpush2.bf16.msra.mxu1 %v9267_v43  ;;  %7202 = vmatprep.subr.bf16.mxu0 %v9272_v21  ;;  %v12116_v43 = vshrl.u32 %v2534_v2, 7  ;;  %v9312_v21 = vld [vmem:[%s11322_s11 + $0x808] ss:$16 sps:$4 sm:$0xff]  }
 0x39f   : > { %7245 = vmatprep.subr.bf16.mxu1 %v9275_v22  ;;  %v9315_v22 = vld [vmem:[%s11322_s11 + $0xa08] ss:$16 sps:$4 sm:$0xff]  }
 0x3a0   : > { %7149 = vmatmul.mubr.bf16.vlgmr.msra.gmra.mxu0 %v11491_v29  ;;  %v9282_v29 = vld [vmem:[%s11322_s11 + $0x8a8] ss:$16 sps:$4 sm:$0xff]  }
 0x3a1   : > { %7192 = vmatmul.mubr.bf16.vlgmr.msra.gmra.mxu1 %v11495_v30  ;;  %7203 = vmatpush1.bf16.msra.mxu0 %v9270_v23  ;;  %v9285_v30 = vld [vmem:[%s11322_s11 + $0xaa8] ss:$16 sps:$4 sm:$0xff]  }
 0x3a2   : > { %7246 = vmatpush1.bf16.msra.mxu1 %v9273_v24  ;;  %7204 = vmatprep.subr.bf16.mxu0 %v9278_v27  ;;  %v9320_v27 = vld [vmem:[%s11322_s11 + $0x9ec] ss:$16 sps:$4 sm:$0xff]  }
 0x3a3   : > { %7247 = vmatprep.subr.bf16.mxu1 %v9281_v28  ;;  %7234 = vmatprep.mubr.bf16.mxu0 %v11521_v35  ;;  %v12079_v35 = vpop.f32.mrf.mxu0  ;;  %v9323_v28 = vld [vmem:[%s11322_s11 + $0xbec] ss:$16 sps:$4 sm:$0xff]  }
 0x3a4   : > { %7277 = vmatprep.mubr.bf16.mxu1 %v11525_v36  ;;  %v12081_v36 = vpop.f32.mrf.mxu1 }
 0x3a5   : > { %7205 = vmatpush1.bf16.msra.mxu0 %v9276_v37  ;;  %v12087_v33 = vpop.f32.mrf.mxu0  ;;  %v2536_v37 = vsub.s32 0, %v12116_v43 }
 0x3a6   : > { %7248 = vmatpush1.bf16.msra.mxu1 %v9279_v38  ;;  %7206 = vmatprep.subr.bf16.mxu0 %v9284_v46  ;;  %v12089_v14 = vpop.f32.mrf.mxu1  ;;  %v2532_v38 = vld [vmem:[%s12121_s23] sm:$0xf]  ;;  %v2540_v46 = vsub.s32 1, %v12116_v43 }
 0x3a7   : > { %7249 = vmatprep.subr.bf16.mxu1 %v9287_v47  ;;  %v12096_v12 = vpop.f32.mrf.mxu0  ;;  %v9318_v47 = vld [vmem:[%s11322_s11 + $0x9e8] ss:$16 sps:$4 sm:$0xff]  }
 0x3a8   : > { %v12098_v17 = vpop.f32.mrf.mxu1 }
 0x3a9   : > { %7207 = vmatpush1.bf16.msra.mxu0 %v9282_v29  ;;  %v12104_v5 = vpop.f32.mrf.mxu0  ;;  %v9321_v29 = vld [vmem:[%s11322_s11 + $0xbe8] ss:$16 sps:$4 sm:$0xff]  }
 0x3aa   : > { %7250 = vmatpush1.bf16.msra.mxu1 %v9285_v30  ;;  %7208 = vmatprep.subr.bf16.mxu0 %v9290_v41  ;;  %v12106_v8 = vpop.f32.mrf.mxu1 }
 0x3ab   : > { %7251 = vmatprep.subr.bf16.mxu1 %v9293_v42  ;;  %v12110_v9 = vpop.f32.mrf.mxu0  ;;  %v9326_v42 = vld [vmem:[%s11322_s11 + $0x9cc] ss:$16 sps:$4 sm:$0xff]  }
 0x3ac   : > { %v12112_v18 = vpop.f32.mrf.mxu1 }
 0x3ad   : > { %7209 = vmatpush1.bf16.msra.mxu0 %v9288_v44  ;;  %v12125_v23 = vpop.f32.mrf.mxu0  ;;  %v9329_v44 = vld [vmem:[%s11322_s11 + $0xbcc] ss:$16 sps:$4 sm:$0xff]  }
 0x3ae   : > { %7252 = vmatpush1.bf16.msra.mxu1 %v9291_v45  ;;  %7210 = vmatprep.subr.bf16.mxu0 %v9296_v4  ;;  %v12127_v24 = vpop.f32.mrf.mxu1  ;;  %v2537_v45 = vrot.slane %v2532_v38, %v2536_v37  ;;  %v2541_v4 = vrot.slane %v2532_v38, %v2540_v46  ;;  %v9336_v38 = vld [vmem:[%s11322_s11 + $0x988] ss:$16 sps:$4 sm:$0xff]  }
 0x3af   : > { %7253 = vmatprep.subr.bf16.mxu1 %v9299_v7  ;;  %v12136_v30 = vpop.f32.mrf.mxu0  ;;  %v9324_v7 = vld [vmem:[%s11322_s11 + $0x9c8] ss:$16 sps:$4 sm:$0xff]  }
 0x3b0   : > { %v12138_v41 = vpop.f32.mrf.mxu1  ;;  %v6551_v2 = vadd.f32 %v12053_v25, %v2541_v4  ;;  %v9339_v46 = vld [vmem:[%s11322_s11 + $0xb88] ss:$16 sps:$4 sm:$0xff]  }
 0x3b1   : > { %7211 = vmatpush1.bf16.msra.mxu0 %v9294_v58  ;;  %v9327_v58 = vld [vmem:[%s11322_s11 + $0xbc8] ss:$16 sps:$4 sm:$0xff]  }
 0x3b2   : > { %7254 = vmatpush1.bf16.msra.mxu1 %v9297_v59  ;;  %7212 = vmatprep.subr.bf16.mxu0 %v9302_v60  ;;  %v12144_v59 = vpop.f32.mrf.mxu0  ;;  %v12146_v60 = vpop.f32.mrf.mxu1  ;;  %v6594_v25 = vadd.f32 %v12055_v26, %v6551_v2  ;;  %v9351_v2 = vld [vmem:[%s11322_s11 + $0xb48] ss:$16 sps:$4 sm:$0xff]  }
 0x3b3   : > { %7255 = vmatprep.subr.bf16.mxu1 %v9305_v61  ;;  %v9332_v61 = vld [vmem:[%s11322_s11 + $0x9ac] ss:$16 sps:$4 sm:$0xff]  }
 0x3b4   : > { %v6637_v26 = vadd.f32 %v12087_v33, %v6594_v25  ;;  %v9357_v25 = vld [vmem:[%s11322_s11 + $0xb28] ss:$16 sps:$4 sm:$0xff]  }
 0x3b5   : > { %7213 = vmatpush1.bf16.msra.mxu0 %v9300_v62  ;;  %v9335_v62 = vld [vmem:[%s11322_s11 + $0xbac] ss:$16 sps:$4 sm:$0xff]  }
 0x3b6   : > { %7256 = vmatpush1.bf16.msra.mxu1 %v9303_v63  ;;  %7214 = vmatprep.subr.bf16.mxu0 %v9308_v0  ;;  %v6549_v63 = vadd.f32 %v12045_v48, %v2537_v45  ;;  %v12151_v0 = vpop.f32.mrf.mxu0  ;;  %v6680_v33 = vadd.f32 %v12089_v14, %v6637_v26  ;;  %v9356_v14 = vld [vmem:[%s11322_s11 + $0x92c] ss:$16 sps:$4 sm:$0xff]  }
 0x3b7   : > { %7257 = vmatprep.subr.bf16.mxu1 %v9311_v1  ;;  %v12153_v1 = vpop.f32.mrf.mxu1  ;;  %v9368_v26 = vld [vmem:[%s11322_s11 + $0xcec] ss:$16 sps:$4 sm:$0xff]  }
 0x3b8   : > { %v6592_v48 = vadd.f32 %v12047_v49, %v6549_v63  ;;  %v9344_v49 = vld [vmem:[%s11322_s11 + $0x96c] ss:$16 sps:$4 sm:$0xff]   ;;  %v9348_v63 = vld [vmem:[%s11322_s11 + $0x948] ss:$16 sps:$4 sm:$0xff]  }
 0x3b9   : > { %7215 = vmatpush1.bf16.msra.mxu0 %v9306_v3  ;;  %v9330_v3 = vld [vmem:[%s11322_s11 + $0x9a8] ss:$16 sps:$4 sm:$0xff]  }
 0x3ba   : > { %7258 = vmatpush1.bf16.msra.mxu1 %v9309_v6  ;;  %7216 = vmatprep.subr.bf16.mxu0 %v9314_v19  ;;  %v9333_v6 = vld [vmem:[%s11322_s11 + $0xba8] ss:$16 sps:$4 sm:$0xff]   ;;  %v9338_v19 = vld [vmem:[%s11322_s11 + $0x98c] ss:$16 sps:$4 sm:$0xff]   ;;  %v6635_v37 = vadd.f32 %v12079_v35, %v6592_v48 }
 0x3bb   : > { %7259 = vmatprep.subr.bf16.mxu1 %v9317_v20  ;;  %v9341_v20 = vld [vmem:[%s11322_s11 + $0xb8c] ss:$16 sps:$4 sm:$0xff]  }
 0x3bd   : > { %7217 = vmatpush1.bf16.msra.mxu0 %v9312_v21  ;;  %v6553_v21 = vadd.f32 %v12063_v39, %v2537_v45  ;;  %v9347_v39 = vld [vmem:[%s11322_s11 + $0xb6c] ss:$16 sps:$4 sm:$0xff]   ;;  %v9342_v45 = vld [vmem:[%s11322_s11 + $0x968] ss:$16 sps:$4 sm:$0xff]  }
 0x3be   : > { %7260 = vmatpush1.bf16.msra.mxu1 %v9315_v22  ;;  %7218 = vmatprep.subr.bf16.mxu0 %v9320_v27  ;;  %v6808_v22 = vpop.f32.mrf.mxu0  ;;  %v12162_v27 = vpop.f32.mrf.mxu1 }
 0x3bf   : > { %7261 = vmatprep.subr.bf16.mxu1 %v9323_v28  ;;  %v6555_v28 = vadd.f32 %v12073_v54, %v2541_v4  ;;  %v9345_v4 = vld [vmem:[%s11322_s11 + $0xb68] ss:$16 sps:$4 sm:$0xff]  }
 0x3c0   : > { %v12173_v54 = vpop.f32.mrf.mxu1 }
 0x3c1   : > { %7219 = vmatpush2.bf16.msra.mxu0 %v9318_v47  ;;  %v6596_v47 = vadd.f32 %v12065_v40, %v6553_v21  ;;  %v6598_v35 = vadd.f32 %v12075_v55, %v6555_v28  ;;  %v9350_v40 = vld [vmem:[%s11322_s11 + $0x94c] ss:$16 sps:$4 sm:$0xff]   ;;  %v9354_v21 = vld [vmem:[%s11322_s11 + $0x928] ss:$16 sps:$4 sm:$0xff]  }
 0x3c2   : > { %7262 = vmatpush2.bf16.msra.mxu1 %v9321_v29  ;;  %7220 = vmatprep.subr.bf16.mxu0 %v9326_v42  ;;  %v6810_v29 = vpop.f32.mrf.mxu0  ;;  %v6678_v42 = vadd.f32 %v12081_v36, %v6635_v37 }
 0x3c3   : > { %7263 = vmatprep.subr.bf16.mxu1 %v9329_v44  ;;  %v6639_v44 = vadd.f32 %v12096_v12, %v6596_v47  ;;  %v6641_v55 = vadd.f32 %v12104_v5, %v6598_v35  ;;  %v6855_v12 = vpop.f32.mrf.mxu1  ;;  %v9359_v5 = vld [vmem:[%s11322_s11 + $0xb2c] ss:$16 sps:$4 sm:$0xff]  }
 0x3c4   : > { %v6721_v36 = vadd.f32 %v12110_v9, %v6678_v42  ;;  %v9366_v42 = vld [vmem:[%s11322_s11 + $0xce8] ss:$16 sps:$4 sm:$0xff]  }
 0x3c5   : > { %7221 = vmatpush2.bf16.msra.mxu0 %v9324_v7  ;;  %v9353_v7 = vld [vmem:[%s11322_s11 + $0xb4c] ss:$16 sps:$4 sm:$0xff]   ;;  %v6684_v9 = vadd.f32 %v12106_v8, %v6641_v55 }
 0x3c6   : > { %7264 = vmatpush2.bf16.msra.mxu1 %v9327_v58  ;;  %7222 = vmatprep.subr.bf16.mxu0 %v9332_v61  ;;  %v6812_v58 = vpop.f32.mrf.mxu0  ;;  %v6682_v61 = vadd.f32 %v12098_v17, %v6639_v44  ;;  %v6764_v17 = vadd.f32 %v12112_v18, %v6721_v36  ;;  %v9362_v8 = vld [vmem:[%s11322_s11 + $0x90c] ss:$16 sps:$4 sm:$0xff]   ;;  %v9369_v44 = vld [vmem:[%s11322_s11 + $0xee8] ss:$16 sps:$4 sm:$0xff]  }
 0x3c7   : > { %7265 = vmatprep.subr.bf16.mxu1 %v9335_v62  ;;  %v6723_v62 = vadd.f32 %v12125_v23, %v6680_v33  ;;  %v9365_v18 = vld [vmem:[%s11322_s11 + $0xb0c] ss:$16 sps:$4 sm:$0xff]  }
 0x3c8   : > { %v6725_v23 = vadd.f32 %v12136_v30, %v6682_v61  ;;  %v6807_v48 = vadd.f32 %v12151_v0, %v6764_v17 }
 0x3c9   : > { %7223 = vmatpush2.bf16.msra.mxu0 %v9330_v3  ;;  %v6892_v3 = vpop.f32.mrf.mxu0 }
 0x3ca   : > { %7266 = vmatpush2.bf16.msra.mxu1 %v9333_v6  ;;  %7224 = vmatprep.subr.bf16.mxu0 %v9338_v19  ;;  %v6935_v6 = vpop.f32.mrf.mxu1  ;;  %v6766_v19 = vadd.f32 %v12127_v24, %v6723_v62  ;;  %v6768_v24 = vadd.f32 %v12138_v41, %v6725_v23  ;;  %v6850_v0 = vadd.f32 %v12153_v1, %v6807_v48  ;;  %v9371_v41 = vld [vmem:[%s11322_s11 + $0xeec] ss:$16 sps:$4 sm:$0xff]   ;;  %v9378_v48 = vld [vmem:[%s11322_s11 + $0xca8] ss:$16 sps:$4 sm:$0xff]  }
 0x3cb   : > { %7267 = vmatprep.subr.bf16.mxu1 %v9341_v20  ;;  %v6727_v20 = vadd.f32 %v12144_v59, %v6684_v9  ;;  %v6894_v28 = vpop.f32.mrf.mxu0 }
 0x3cc   : > { %v6937_v37 = vpop.f32.mrf.mxu1  ;;  %v6809_v30 = vadd.f32 %v6808_v22, %v6766_v19  ;;  %v6893_v35 = vadd.f32 %v6892_v3, %v6850_v0  ;;  %v9395_v0 = vld [vmem:[%s11322_s11 + $0xe6c] ss:$16 sps:$4 sm:$0xff]  }
 0x3cd   : > { %7225 = vmatpush2.bf16.msra.mxu0 %v9336_v38  ;;  %v6770_v59 = vadd.f32 %v12146_v60, %v6727_v20  ;;  %v6811_v38 = vadd.f32 %v6810_v29, %v6768_v24  ;;  %v9384_v24 = vld [vmem:[%s11322_s11 + $0xc88] ss:$16 sps:$4 sm:$0xff]  }
 0x3ce   : > { %7268 = vmatpush2.bf16.msra.mxu1 %v9339_v46  ;;  %7226 = vmatprep.subr.bf16.mxu0 %v9344_v49  ;;  %v9360_v46 = vld [vmem:[%s11322_s11 + $0x908] ss:$16 sps:$4 sm:$0xff]   ;;  %v6939_v47 = vpop.f32.mrf.mxu1  ;;  %v6852_v22 = vadd.f32 %v12162_v27, %v6809_v30  ;;  %v6936_v55 = vadd.f32 %v6935_v6, %v6893_v35  ;;  %v9383_v6 = vld [vmem:[%s11322_s11 + $0xeac] ss:$16 sps:$4 sm:$0xff]  }
 0x3cf   : > { %7269 = vmatprep.subr.bf16.mxu1 %v9347_v39  ;;  %v9363_v49 = vld [vmem:[%s11322_s11 + $0xb08] ss:$16 sps:$4 sm:$0xff]   ;;  %v6896_v39 = vpop.f32.mrf.mxu0  ;;  %v6813_v60 = vadd.f32 %v6812_v58, %v6770_v59  ;;  %v6854_v1 = vadd.f32 %v12173_v54, %v6811_v38  ;;  %v9392_v59 = vld [vmem:[%s11322_s11 + $0xc6c] ss:$16 sps:$4 sm:$0xff]  }
 0x3d0   : > { %v6895_v29 = vadd.f32 %v6894_v28, %v6852_v22  ;;  %v9389_v28 = vld [vmem:[%s11322_s11 + $0xe8c] ss:$16 sps:$4 sm:$0xff]   ;;  %v9387_v30 = vld [vmem:[%s11322_s11 + $0xe88] ss:$16 sps:$4 sm:$0xff]  }
 0x3d1   : > { %7227 = vmatpush2.bf16.msra.mxu0 %v9342_v45  ;;  %v6898_v45 = vpop.f32.mrf.mxu0  ;;  %v6856_v33 = vadd.f32 %v6855_v12, %v6813_v60  ;;  %v6897_v27 = vadd.f32 %v6896_v39, %v6854_v1  ;;  %v9380_v12 = vld [vmem:[%s11322_s11 + $0xcac] ss:$16 sps:$4 sm:$0xff]   ;;  %v9390_v38 = vld [vmem:[%s11322_s11 + $0xc68] ss:$16 sps:$4 sm:$0xff]  }
 0x3d2   : > { %7270 = vmatpush2.bf16.msra.mxu1 %v9345_v4  ;;  %7228 = vmatprep.subr.bf16.mxu0 %v9350_v40  ;;  %v6941_v4 = vpop.f32.mrf.mxu1  ;;  %v9374_v40 = vld [vmem:[%s11322_s11 + $0xccc] ss:$16 sps:$4 sm:$0xff]   ;;  %v6938_v58 = vadd.f32 %v6937_v37, %v6895_v29  ;;  %v9402_v1 = vld [vmem:[%s11322_s11 + $0xc28] ss:$16 sps:$4 sm:$0xff]  }
 0x3d3   : > { %7271 = vmatprep.subr.bf16.mxu1 %v9353_v7  ;;  %v9377_v7 = vld [vmem:[%s11322_s11 + $0xecc] ss:$16 sps:$4 sm:$0xff]   ;;  %v6899_v61 = vadd.f32 %v6898_v45, %v6856_v33  ;;  %v9405_v29 = vld [vmem:[%s11322_s11 + $0xe28] ss:$16 sps:$4 sm:$0xff]  }
 0x3d4   : > { %v9401_v39 = vld [vmem:[%s11322_s11 + $0xe4c] ss:$16 sps:$4 sm:$0xff]  }
 0x3d5   : > { %7229 = vmatpush2.bf16.msra.mxu0 %v9348_v63  ;;  %v9372_v63 = vld [vmem:[%s11322_s11 + $0xcc8] ss:$16 sps:$4 sm:$0xff]   ;;  %v6942_v23 = vadd.f32 %v6941_v4, %v6899_v61  ;;  %v9404_v22 = vld [vmem:[%s11322_s11 + $0xc2c] ss:$16 sps:$4 sm:$0xff]  }
 0x3d6   : > { %7272 = vmatpush2.bf16.msra.mxu1 %v9351_v2  ;;  %7230 = vmatprep.subr.bf16.mxu0 %v9356_v14  ;;  %v9375_v2 = vld [vmem:[%s11322_s11 + $0xec8] ss:$16 sps:$4 sm:$0xff]   ;;  %v9407_v60 = vld [vmem:[%s11322_s11 + $0xe2c] ss:$16 sps:$4 sm:$0xff]  }
 0x3d7   : > { %7273 = vmatprep.subr.bf16.mxu1 %v9359_v5  ;;  %v6940_v5 = vadd.f32 %v6939_v47, %v6897_v27  ;;  %v9396_v47 = vld [vmem:[%s11322_s11 + $0xc48] ss:$16 sps:$4 sm:$0xff]   ;;  %v9413_v45 = vld [vmem:[%s11322_s11 + $0xe0c] ss:$16 sps:$4 sm:$0xff]  }
 0x3d8   : > { %v9416_v33 = vld [vmem:[%s11322_s11 + $0xdec] ss:$16 sps:$4 sm:$0xff]   ;;  %v9414_v27 = vld [vmem:[%s11322_s11 + $0xde8] ss:$16 sps:$4 sm:$0xff]  }
 0x3d9   : > { %7231 = vmatpush2.bf16.msra.mxu0 %v9354_v21  ;;  %v9381_v21 = vld [vmem:[%s11322_s11 + $0xea8] ss:$16 sps:$4 sm:$0xff]  }
 0x3da   : > { %7274 = vmatpush2.bf16.msra.mxu1 %v9357_v25  ;;  %7232 = vmatprep.subr.bf16.mxu0 %v9362_v8  ;;  %v9420_v61 = vld [vmem:[%s11322_s11 + $0xdc8] ss:$16 sps:$4 sm:$0xff]  }
 0x3db   : > { %7275 = vmatprep.subr.bf16.mxu1 %v9365_v18 }
 0x3dd   : > { %7233 = vmatpush2.bf16.msra.mxu0 %v9360_v46  ;;  %v9393_v46 = vld [vmem:[%s11322_s11 + $0xe68] ss:$16 sps:$4 sm:$0xff]  }
 0x3de   : > { %7276 = vmatpush2.bf16.msra.mxu1 %v9363_v49  ;;  %7288 = vmatprep.subr.bf16.mxu0 %v9368_v26  ;;  %v9398_v49 = vld [vmem:[%s11322_s11 + $0xc4c] ss:$16 sps:$4 sm:$0xff]   ;;  %v9399_v26 = vld [vmem:[%s11322_s11 + $0xe48] ss:$16 sps:$4 sm:$0xff]  }
 0x3df   : > { %7331 = vmatprep.subr.bf16.mxu1 %v9371_v41 }
 0x3e0   : > { %v6978_v36 = vpop.f32.mrf.mxu0  ;;  %7235 = vmatmul.mubr.bf16.vlgmr.msra.gmra.mxu0 %v11608_v51 }
 0x3e1   : > { %v7021_v54 = vpop.f32.mrf.mxu1  ;;  %7278 = vmatmul.mubr.bf16.vlgmr.msra.gmra.mxu1 %v11612_v52  ;;  %v6979_v62 = vadd.f32 %v6978_v36, %v6936_v55  ;;  %7289 = vmatpush1.bf16.msra.mxu0 %v9366_v42  ;;  %v9419_v55 = vld [vmem:[%s11322_s11 + $0xfec] ss:$16 sps:$4 sm:$0xff]   ;;  %v9417_v36 = vld [vmem:[%s11322_s11 + $0xfe8] ss:$16 sps:$4 sm:$0xff]  }
 0x3e2   : > { %7332 = vmatpush1.bf16.msra.mxu1 %v9369_v44  ;;  %v6980_v3 = vpop.f32.mrf.mxu0  ;;  %7290 = vmatprep.subr.bf16.mxu0 %v9374_v40  ;;  %v9410_v44 = vld [vmem:[%s11322_s11 + $0xc0c] ss:$16 sps:$4 sm:$0xff]   ;;  %v9408_v40 = vld [vmem:[%s11322_s11 + $0xc08] ss:$16 sps:$4 sm:$0xff]  }
 0x3e3   : > { %v7023_v14 = vpop.f32.mrf.mxu1  ;;  %7333 = vmatprep.subr.bf16.mxu1 %v9377_v7  ;;  %v7022_v9 = vadd.f32 %v7021_v54, %v6979_v62  ;;  %v6981_v51 = vadd.f32 %v6980_v3, %v6938_v58  ;;  %7320 = vmatprep.mubr.bf16.mxu0 %v11625_v15  ;;  %v9386_v15 = vld [vmem:[%s11322_s11 + $0xc8c] ss:$16 sps:$4 sm:$0xff]   ;;  %v9411_v7 = vld [vmem:[%s11322_s11 + $0xe08] ss:$16 sps:$4 sm:$0xff]  }
 0x3e4   : > { %7363 = vmatprep.mubr.bf16.mxu1 %v11629_v34  ;;  %v6982_v52 = vpop.f32.mrf.mxu0  ;;  %v9422_v54 = vld [vmem:[%s11322_s11 + $0xdcc] ss:$16 sps:$4 sm:$0xff]   ;;  %v9423_v62 = vld [vmem:[%s11322_s11 + $0xfc8] ss:$16 sps:$4 sm:$0xff]  }
 0x3e5   : > { %v7025_v17 = vpop.f32.mrf.mxu1  ;;  %9654 = vtanh.f32 %v7022_v9  ;;  %v7024_v19 = vadd.f32 %v7023_v14, %v6981_v51  ;;  %v6983_v20 = vadd.f32 %v6982_v52, %v6940_v5  ;;  %7291 = vmatpush1.bf16.msra.mxu0 %v9372_v63  ;;  %v9425_v58 = vld [vmem:[%s11322_s11 + $0xfcc] ss:$16 sps:$4 sm:$0xff]   ;;  %v9426_v3 = vld [vmem:[%s11322_s11 + $0xda8] ss:$16 sps:$4 sm:$0xff]  }
 0x3e6   : > { %7334 = vmatpush1.bf16.msra.mxu1 %v9375_v2  ;;  %v6984_v25 = vpop.f32.mrf.mxu0  ;;  %7292 = vmatprep.subr.bf16.mxu0 %v9380_v12  ;;  %v9428_v63 = vld [vmem:[%s11322_s11 + $0xdac] ss:$16 sps:$4 sm:$0xff]   ;;  %v9429_v14 = vld [vmem:[%s11322_s11 + $0xfa8] ss:$16 sps:$4 sm:$0xff]  }
 0x3e7   : > { %7335 = vmatprep.subr.bf16.mxu1 %v9383_v6  ;;  %9656 = vtanh.f32 %v7024_v19  ;;  %v7026_v34 = vadd.f32 %v7025_v17, %v6983_v20  ;;  %v6985_v37 = vadd.f32 %v6984_v25, %v6942_v23  ;;  %v7027_v8 = vpop.f32.mrf.mxu1  ;;  %v9431_v2 = vld [vmem:[%s11322_s11 + $0xfac] ss:$16 sps:$4 sm:$0xff]   ;;  %v9432_v5 = vld [vmem:[%s11322_s11 + $0xd88] ss:$16 sps:$4 sm:$0xff]  }
 0x3e8   : > { %v9434_v12 = vld [vmem:[%s11322_s11 + $0xd8c] ss:$16 sps:$4 sm:$0xff]   ;;  %v9435_v9 = vld [vmem:[%s11322_s11 + $0xf88] ss:$16 sps:$4 sm:$0xff]  }
 0x3e9   : > { %9658 = vtanh.f32 %v7026_v34  ;;  %v7028_v18 = vadd.f32 %v7027_v8, %v6985_v37  ;;  %7293 = vmatpush1.bf16.msra.mxu0 %v9378_v48  ;;  %v9437_v6 = vld [vmem:[%s11322_s11 + $0xf8c] ss:$16 sps:$4 sm:$0xff]   ;;  %v9438_v17 = vld [vmem:[%s11322_s11 + $0xd68] ss:$16 sps:$4 sm:$0xff]  }
 0x3ea   : > { %7336 = vmatpush1.bf16.msra.mxu1 %v9381_v21  ;;  %7294 = vmatprep.subr.bf16.mxu0 %v9386_v15  ;;  %v9440_v51 = vld [vmem:[%s11322_s11 + $0xd6c] ss:$16 sps:$4 sm:$0xff]   ;;  %v9441_v23 = vld [vmem:[%s11322_s11 + $0xf68] ss:$16 sps:$4 sm:$0xff]  }
 0x3eb   : > { %7337 = vmatprep.subr.bf16.mxu1 %v9389_v28  ;;  %9660 = vtanh.f32 %v7028_v18  ;;  %v9443_v52 = vld [vmem:[%s11322_s11 + $0xf6c] ss:$16 sps:$4 sm:$0xff]   ;;  %v9444_v48 = vld [vmem:[%s11322_s11 + $0xd48] ss:$16 sps:$4 sm:$0xff]  }
 0x3ec   : > { %v9446_v19 = vld [vmem:[%s11322_s11 + $0xd4c] ss:$16 sps:$4 sm:$0xff]   ;;  %v9447_v21 = vld [vmem:[%s11322_s11 + $0xf48] ss:$16 sps:$4 sm:$0xff]  }
 0x3ed   : > { %7295 = vmatpush1.bf16.msra.mxu0 %v9384_v24  ;;  %v9449_v20 = vld [vmem:[%s11322_s11 + $0xf4c] ss:$16 sps:$4 sm:$0xff]   ;;  %v9450_v28 = vld [vmem:[%s11322_s11 + $0xd28] ss:$16 sps:$4 sm:$0xff]  }
 0x3ee   : > { %7338 = vmatpush1.bf16.msra.mxu1 %v9387_v30  ;;  %7296 = vmatprep.subr.bf16.mxu0 %v9392_v59  ;;  %v9452_v25 = vld [vmem:[%s11322_s11 + $0xd2c] ss:$16 sps:$4 sm:$0xff]   ;;  %v9453_v34 = vld [vmem:[%s11322_s11 + $0xf28] ss:$16 sps:$4 sm:$0xff]  }
 0x3ef   : > { %7339 = vmatprep.subr.bf16.mxu1 %v9395_v0  ;;  %v9455_v15 = vld [vmem:[%s11322_s11 + $0xf2c] ss:$16 sps:$4 sm:$0xff]   ;;  %v9456_v18 = vld [vmem:[%s11322_s11 + $0xd08] ss:$16 sps:$4 sm:$0xff]  }
 0x3f0   : > { %v9458_v37 = vld [vmem:[%s11322_s11 + $0xd0c] ss:$16 sps:$4 sm:$0xff]   ;;  %v9459_v24 = vld [vmem:[%s11322_s11 + $0xf08] ss:$16 sps:$4 sm:$0xff]  }
 0x3f1   : > { %7297 = vmatpush1.bf16.msra.mxu0 %v9390_v38  ;;  %v9461_v8 = vld [vmem:[%s11322_s11 + $0xf0c] ss:$16 sps:$4 sm:$0xff]   ;;  %v9462_v0 = vld [vmem:[%s11322_s11 + $0x10e8] ss:$16 sps:$4 sm:$0xff]  }
 0x3f2   : > { %7340 = vmatpush1.bf16.msra.mxu1 %v9393_v46  ;;  %v9655_v41 = vpop.eup %9654  ;;  %7298 = vmatprep.subr.bf16.mxu0 %v9398_v49  ;;  %v9464_v30 = vld [vmem:[%s11322_s11 + $0x10ec] ss:$16 sps:$4 sm:$0xff]   ;;  %v9465_v38 = vld [vmem:[%s11322_s11 + $0x12e8] ss:$16 sps:$4 sm:$0xff]  }
 0x3f3   : > { %7341 = vmatprep.subr.bf16.mxu1 %v9401_v39  ;;  %7554 = vst [vmem:[%s12240_s12] sm:$0xff] %v9655_v41  ;;  %v9467_v59 = vld [vmem:[%s11322_s11 + $0x12ec] ss:$16 sps:$4 sm:$0xff]   ;;  %v9468_v39 = vld [vmem:[%s11322_s11 + $0x10c8] ss:$16 sps:$4 sm:$0xff]  }
 0x3f4   : > { %v9657_v35 = vpop.eup %9656  ;;  %v9470_v46 = vld [vmem:[%s11322_s11 + $0x10cc] ss:$16 sps:$4 sm:$0xff]  }
 0x3f5   : > { %7555 = vst [vmem:[%s12240_s12 + $0x8] sm:$0xff] %v9657_v35  ;;  %7299 = vmatpush1.bf16.msra.mxu0 %v9396_v47  ;;  %v9473_v49 = vld [vmem:[%s11322_s11 + $0x12cc] ss:$16 sps:$4 sm:$0xff]   ;;  %v9471_v47 = vld [vmem:[%s11322_s11 + $0x12c8] ss:$16 sps:$4 sm:$0xff]  }
 0x3f6   : > { %7342 = vmatpush1.bf16.msra.mxu1 %v9399_v26  ;;  %v9659_v42 = vpop.eup %9658  ;;  %7300 = vmatprep.subr.bf16.mxu0 %v9404_v22  ;;  %v9476_v26 = vld [vmem:[%s11322_s11 + $0x10ac] ss:$16 sps:$4 sm:$0xff]   ;;  %v9480_v35 = vld [vmem:[%s11322_s11 + $0x1088] ss:$16 sps:$4 sm:$0xff]  }
 0x3f7   : > { %7343 = vmatprep.subr.bf16.mxu1 %v9407_v60  ;;  %7558 = vst [vmem:[%s12240_s12 + $0x20] sm:$0xff] %v9659_v42  ;;  %v9479_v41 = vld [vmem:[%s11322_s11 + $0x12ac] ss:$16 sps:$4 sm:$0xff]   ;;  %v9489_v42 = vld [vmem:[%s11322_s11 + $0x1268] ss:$16 sps:$4 sm:$0xff]  }
 0x3f8   : > { %v9661_v4 = vpop.eup %9660  ;;  %v9482_v22 = vld [vmem:[%s11322_s11 + $0x108c] ss:$16 sps:$4 sm:$0xff]  }
 0x3f9   : > { %7559 = vst [vmem:[%s12240_s12 + $0x28] sm:$0xff] %v9661_v4  ;;  %7301 = vmatpush1.bf16.msra.mxu0 %v9402_v1  ;;  %v9485_v60 = vld [vmem:[%s11322_s11 + $0x128c] ss:$16 sps:$4 sm:$0xff]   ;;  %v9492_v4 = vld [vmem:[%s11322_s11 + $0x1048] ss:$16 sps:$4 sm:$0xff]  }
 0x3fa   : > { %7344 = vmatpush1.bf16.msra.mxu1 %v9405_v29  ;;  %7302 = vmatprep.subr.bf16.mxu0 %v9410_v44  ;;  %v9491_v1 = vld [vmem:[%s11322_s11 + $0x126c] ss:$16 sps:$4 sm:$0xff]   ;;  %v9486_v29 = vld [vmem:[%s11322_s11 + $0x1068] ss:$16 sps:$4 sm:$0xff]  }
 0x3fb   : > { %7345 = vmatprep.subr.bf16.mxu1 %v9413_v45  ;;  %v9494_v44 = vld [vmem:[%s11322_s11 + $0x104c] ss:$16 sps:$4 sm:$0xff]  }
 0x3fc   : > { %v9497_v45 = vld [vmem:[%s11322_s11 + $0x124c] ss:$16 sps:$4 sm:$0xff]  }
 0x3fd   : > { %7303 = vmatpush1.bf16.msra.mxu0 %v9408_v40  ;;  %v9495_v40 = vld [vmem:[%s11322_s11 + $0x1248] ss:$16 sps:$4 sm:$0xff]  }
 0x3fe   : > { %7346 = vmatpush1.bf16.msra.mxu1 %v9411_v7  ;;  %7304 = vmatprep.subr.bf16.mxu0 %v9416_v33  ;;  %v9500_v7 = vld [vmem:[%s11322_s11 + $0x102c] ss:$16 sps:$4 sm:$0xff]  }
 0x3ff   : > { %7347 = vmatprep.subr.bf16.mxu1 %v9419_v55  ;;  %v9503_v33 = vld [vmem:[%s11322_s11 + $0x122c] ss:$16 sps:$4 sm:$0xff]   ;;  %v9498_v55 = vld [vmem:[%s11322_s11 + $0x1028] ss:$16 sps:$4 sm:$0xff]  }
 0x401   : > { %7305 = vmatpush2.bf16.msra.mxu0 %v9414_v27  ;;  %v9501_v27 = vld [vmem:[%s11322_s11 + $0x1228] ss:$16 sps:$4 sm:$0xff]  }
 0x402   : > { %7348 = vmatpush2.bf16.msra.mxu1 %v9417_v36  ;;  %7306 = vmatprep.subr.bf16.mxu0 %v9422_v54  ;;  %v9506_v36 = vld [vmem:[%s11322_s11 + $0x100c] ss:$16 sps:$4 sm:$0xff]  }
 0x403   : > { %7349 = vmatprep.subr.bf16.mxu1 %v9425_v58  ;;  %v9509_v54 = vld [vmem:[%s11322_s11 + $0x120c] ss:$16 sps:$4 sm:$0xff]   ;;  %v9504_v58 = vld [vmem:[%s11322_s11 + $0x1008] ss:$16 sps:$4 sm:$0xff]  }
 0x405   : > { %7307 = vmatpush2.bf16.msra.mxu0 %v9420_v61  ;;  %v9507_v61 = vld [vmem:[%s11322_s11 + $0x1208] ss:$16 sps:$4 sm:$0xff]  }
 0x406   : > { %7350 = vmatpush2.bf16.msra.mxu1 %v9423_v62  ;;  %7308 = vmatprep.subr.bf16.mxu0 %v9428_v63  ;;  %v9512_v62 = vld [vmem:[%s11322_s11 + $0x11ec] ss:$16 sps:$4 sm:$0xff]  }
 0x407   : > { %7351 = vmatprep.subr.bf16.mxu1 %v9431_v2  ;;  %v9515_v63 = vld [vmem:[%s11322_s11 + $0x13ec] ss:$16 sps:$4 sm:$0xff]   ;;  %v9510_v2 = vld [vmem:[%s11322_s11 + $0x11e8] ss:$16 sps:$4 sm:$0xff]  }
 0x409   : > { %7309 = vmatpush2.bf16.msra.mxu0 %v9426_v3  ;;  %v9513_v3 = vld [vmem:[%s11322_s11 + $0x13e8] ss:$16 sps:$4 sm:$0xff]  }
 0x40a   : > { %7352 = vmatpush2.bf16.msra.mxu1 %v9429_v14  ;;  %7310 = vmatprep.subr.bf16.mxu0 %v9434_v12  ;;  %v9518_v14 = vld [vmem:[%s11322_s11 + $0x11cc] ss:$16 sps:$4 sm:$0xff]  }
 0x40b   : > { %7353 = vmatprep.subr.bf16.mxu1 %v9437_v6  ;;  %v9521_v12 = vld [vmem:[%s11322_s11 + $0x13cc] ss:$16 sps:$4 sm:$0xff]   ;;  %v9516_v6 = vld [vmem:[%s11322_s11 + $0x11c8] ss:$16 sps:$4 sm:$0xff]  }
 0x40d   : > { %7311 = vmatpush2.bf16.msra.mxu0 %v9432_v5  ;;  %v9519_v5 = vld [vmem:[%s11322_s11 + $0x13c8] ss:$16 sps:$4 sm:$0xff]  }
 0x40e   : > { %7354 = vmatpush2.bf16.msra.mxu1 %v9435_v9  ;;  %7312 = vmatprep.subr.bf16.mxu0 %v9440_v51  ;;  %v9524_v9 = vld [vmem:[%s11322_s11 + $0x11ac] ss:$16 sps:$4 sm:$0xff]  }
 0x40f   : > { %7355 = vmatprep.subr.bf16.mxu1 %v9443_v52  ;;  %v9527_v51 = vld [vmem:[%s11322_s11 + $0x13ac] ss:$16 sps:$4 sm:$0xff]   ;;  %v9522_v52 = vld [vmem:[%s11322_s11 + $0x11a8] ss:$16 sps:$4 sm:$0xff]  }
 0x411   : > { %7313 = vmatpush2.bf16.msra.mxu0 %v9438_v17  ;;  %v9525_v17 = vld [vmem:[%s11322_s11 + $0x13a8] ss:$16 sps:$4 sm:$0xff]  }
 0x412   : > { %7356 = vmatpush2.bf16.msra.mxu1 %v9441_v23  ;;  %7314 = vmatprep.subr.bf16.mxu0 %v9446_v19  ;;  %v9530_v23 = vld [vmem:[%s11322_s11 + $0x118c] ss:$16 sps:$4 sm:$0xff]  }
 0x413   : > { %7357 = vmatprep.subr.bf16.mxu1 %v9449_v20  ;;  %v9533_v19 = vld [vmem:[%s11322_s11 + $0x138c] ss:$16 sps:$4 sm:$0xff]   ;;  %v9528_v20 = vld [vmem:[%s11322_s11 + $0x1188] ss:$16 sps:$4 sm:$0xff]  }
 0x415   : > { %7315 = vmatpush2.bf16.msra.mxu0 %v9444_v48  ;;  %v9531_v48 = vld [vmem:[%s11322_s11 + $0x1388] ss:$16 sps:$4 sm:$0xff]  }
 0x416   : > { %7358 = vmatpush2.bf16.msra.mxu1 %v9447_v21  ;;  %7316 = vmatprep.subr.bf16.mxu0 %v9452_v25  ;;  %v9536_v21 = vld [vmem:[%s11322_s11 + $0x116c] ss:$16 sps:$4 sm:$0xff]  }
 0x417   : > { %7359 = vmatprep.subr.bf16.mxu1 %v9455_v15  ;;  %v9539_v25 = vld [vmem:[%s11322_s11 + $0x136c] ss:$16 sps:$4 sm:$0xff]   ;;  %v9534_v15 = vld [vmem:[%s11322_s11 + $0x1168] ss:$16 sps:$4 sm:$0xff]  }
 0x419   : > { %7317 = vmatpush2.bf16.msra.mxu0 %v9450_v28  ;;  %v9537_v28 = vld [vmem:[%s11322_s11 + $0x1368] ss:$16 sps:$4 sm:$0xff]  }
 0x41a   : > { %7360 = vmatpush2.bf16.msra.mxu1 %v9453_v34  ;;  %7318 = vmatprep.subr.bf16.mxu0 %v9458_v37  ;;  %v9542_v34 = vld [vmem:[%s11322_s11 + $0x114c] ss:$16 sps:$4 sm:$0xff]  }
 0x41b   : > { %7361 = vmatprep.subr.bf16.mxu1 %v9461_v8  ;;  %v9545_v37 = vld [vmem:[%s11322_s11 + $0x134c] ss:$16 sps:$4 sm:$0xff]   ;;  %v9540_v8 = vld [vmem:[%s11322_s11 + $0x1148] ss:$16 sps:$4 sm:$0xff]  }
 0x41d   : > { %7319 = vmatpush2.bf16.msra.mxu0 %v9456_v18  ;;  %v9543_v18 = vld [vmem:[%s11322_s11 + $0x1348] ss:$16 sps:$4 sm:$0xff]  }
 0x41e   : > { %7362 = vmatpush2.bf16.msra.mxu1 %v9459_v24  ;;  %7374 = vmatprep.subr.bf16.mxu0 %v9464_v30  ;;  %v9548_v24 = vld [vmem:[%s11322_s11 + $0x112c] ss:$16 sps:$4 sm:$0xff]  }
 0x41f   : > { %7417 = vmatprep.subr.bf16.mxu1 %v9467_v59  ;;  %v9551_v30 = vld [vmem:[%s11322_s11 + $0x132c] ss:$16 sps:$4 sm:$0xff]   ;;  %v9546_v59 = vld [vmem:[%s11322_s11 + $0x1128] ss:$16 sps:$4 sm:$0xff]  }
 0x420   : > { %7321 = vmatmul.mubr.bf16.vlgmr.msra.gmra.mxu0 %v11712_v13  ;;  %v9474_v13 = vld [vmem:[%s11322_s11 + $0x10a8] ss:$16 sps:$4 sm:$0xff]  }
 0x421   : > { %7364 = vmatmul.mubr.bf16.vlgmr.msra.gmra.mxu1 %v11716_v16  ;;  %7375 = vmatpush1.bf16.msra.mxu0 %v9462_v0  ;;  %v9477_v16 = vld [vmem:[%s11322_s11 + $0x12a8] ss:$16 sps:$4 sm:$0xff]  }
 0x422   : > { %7418 = vmatpush1.bf16.msra.mxu1 %v9465_v38  ;;  %7376 = vmatprep.subr.bf16.mxu0 %v9470_v46  ;;  %v9549_v0 = vld [vmem:[%s11322_s11 + $0x1328] ss:$16 sps:$4 sm:$0xff]   ;;  %v9554_v38 = vld [vmem:[%s11322_s11 + $0x110c] ss:$16 sps:$4 sm:$0xff]  }
 0x423   : > { %7419 = vmatprep.subr.bf16.mxu1 %v9473_v49  ;;  %7406 = vmatprep.mubr.bf16.mxu0 %v11729_v50  ;;  %v9483_v50 = vld [vmem:[%s11322_s11 + $0x1288] ss:$16 sps:$4 sm:$0xff]   ;;  %v9557_v46 = vld [vmem:[%s11322_s11 + $0x130c] ss:$16 sps:$4 sm:$0xff]  }
 0x424   : > { %7449 = vmatprep.mubr.bf16.mxu1 %v11733_v53  ;;  %v9488_v53 = vld [vmem:[%s11322_s11 + $0x106c] ss:$16 sps:$4 sm:$0xff]   ;;  %v9552_v49 = vld [vmem:[%s11322_s11 + $0x1108] ss:$16 sps:$4 sm:$0xff]  }
 0x425   : > { %7377 = vmatpush1.bf16.msra.mxu0 %v9468_v39  ;;  %v9555_v39 = vld [vmem:[%s11322_s11 + $0x1308] ss:$16 sps:$4 sm:$0xff]  }
 0x426   : > { %7420 = vmatpush1.bf16.msra.mxu1 %v9471_v47  ;;  %7378 = vmatprep.subr.bf16.mxu0 %v9476_v26  ;;  %v9560_v47 = vld [vmem:[%s11322_s11 + $0x14ec] ss:$16 sps:$4 sm:$0xff]  }
 0x427   : > { %7421 = vmatprep.subr.bf16.mxu1 %v9479_v41  ;;  %v9563_v26 = vld [vmem:[%s11322_s11 + $0x16ec] ss:$16 sps:$4 sm:$0xff]   ;;  %v9558_v41 = vld [vmem:[%s11322_s11 + $0x14e8] ss:$16 sps:$4 sm:$0xff]  }
 0x429   : > { %7379 = vmatpush1.bf16.msra.mxu0 %v9474_v13  ;;  %v9561_v13 = vld [vmem:[%s11322_s11 + $0x16e8] ss:$16 sps:$4 sm:$0xff]  }
 0x42a   : > { %7422 = vmatpush1.bf16.msra.mxu1 %v9477_v16  ;;  %7380 = vmatprep.subr.bf16.mxu0 %v9482_v22  ;;  %v9566_v16 = vld [vmem:[%s11322_s11 + $0x14cc] ss:$16 sps:$4 sm:$0xff]  }
 0x42b   : > { %7423 = vmatprep.subr.bf16.mxu1 %v9485_v60  ;;  %v9569_v22 = vld [vmem:[%s11322_s11 + $0x16cc] ss:$16 sps:$4 sm:$0xff]   ;;  %v9564_v60 = vld [vmem:[%s11322_s11 + $0x14c8] ss:$16 sps:$4 sm:$0xff]  }
 0x42d   : > { %7381 = vmatpush1.bf16.msra.mxu0 %v9480_v35  ;;  %v9567_v35 = vld [vmem:[%s11322_s11 + $0x16c8] ss:$16 sps:$4 sm:$0xff]  }
 0x42e   : > { %7424 = vmatpush1.bf16.msra.mxu1 %v9483_v50  ;;  %7382 = vmatprep.subr.bf16.mxu0 %v9488_v53  ;;  %v9572_v50 = vld [vmem:[%s11322_s11 + $0x14ac] ss:$16 sps:$4 sm:$0xff]  }
 0x42f   : > { %7425 = vmatprep.subr.bf16.mxu1 %v9491_v1  ;;  %v9575_v53 = vld [vmem:[%s11322_s11 + $0x16ac] ss:$16 sps:$4 sm:$0xff]  }
 0x430   : > { %v9578_v1 = vld [vmem:[%s11322_s11 + $0x148c] ss:$16 sps:$4 sm:$0xff]  }
 0x431   : > { %7383 = vmatpush1.bf16.msra.mxu0 %v9486_v29  ;;  %v9581_v29 = vld [vmem:[%s11322_s11 + $0x168c] ss:$16 sps:$4 sm:$0xff]  }
 0x432   : > { %7426 = vmatpush1.bf16.msra.mxu1 %v9489_v42  ;;  %7384 = vmatprep.subr.bf16.mxu0 %v9494_v44  ;;  %v9576_v42 = vld [vmem:[%s11322_s11 + $0x1488] ss:$16 sps:$4 sm:$0xff]   ;;  %v9587_v44 = vld [vmem:[%s11322_s11 + $0x166c] ss:$16 sps:$4 sm:$0xff]  }
 0x433   : > { %7427 = vmatprep.subr.bf16.mxu1 %v9497_v45  ;;  %v9582_v45 = vld [vmem:[%s11322_s11 + $0x1468] ss:$16 sps:$4 sm:$0xff]  }
 0x435   : > { %7385 = vmatpush1.bf16.msra.mxu0 %v9492_v4  ;;  %v9585_v4 = vld [vmem:[%s11322_s11 + $0x1668] ss:$16 sps:$4 sm:$0xff]  }
 0x436   : > { %7428 = vmatpush1.bf16.msra.mxu1 %v9495_v40  ;;  %7386 = vmatprep.subr.bf16.mxu0 %v9500_v7  ;;  %v9590_v40 = vld [vmem:[%s11322_s11 + $0x144c] ss:$16 sps:$4 sm:$0xff]  }
 0x437   : > { %7429 = vmatprep.subr.bf16.mxu1 %v9503_v33  ;;  %v9593_v7 = vld [vmem:[%s11322_s11 + $0x164c] ss:$16 sps:$4 sm:$0xff]   ;;  %v9588_v33 = vld [vmem:[%s11322_s11 + $0x1448] ss:$16 sps:$4 sm:$0xff]  }
 0x439   : > { %7387 = vmatpush1.bf16.msra.mxu0 %v9498_v55  ;;  %v9591_v55 = vld [vmem:[%s11322_s11 + $0x1648] ss:$16 sps:$4 sm:$0xff]  }
 0x43a   : > { %7430 = vmatpush1.bf16.msra.mxu1 %v9501_v27  ;;  %7388 = vmatprep.subr.bf16.mxu0 %v9506_v36  ;;  %v9596_v27 = vld [vmem:[%s11322_s11 + $0x142c] ss:$16 sps:$4 sm:$0xff]  }
 0x43b   : > { %7431 = vmatprep.subr.bf16.mxu1 %v9509_v54  ;;  %v9599_v36 = vld [vmem:[%s11322_s11 + $0x162c] ss:$16 sps:$4 sm:$0xff]   ;;  %v9594_v54 = vld [vmem:[%s11322_s11 + $0x1428] ss:$16 sps:$4 sm:$0xff]  }
 0x43d   : > { %7389 = vmatpush1.bf16.msra.mxu0 %v9504_v58  ;;  %v9597_v58 = vld [vmem:[%s11322_s11 + $0x1628] ss:$16 sps:$4 sm:$0xff]  }
 0x43e   : > { %7432 = vmatpush1.bf16.msra.mxu1 %v9507_v61  ;;  %7390 = vmatprep.subr.bf16.mxu0 %v9512_v62  ;;  %v9602_v61 = vld [vmem:[%s11322_s11 + $0x140c] ss:$16 sps:$4 sm:$0xff]  }
 0x43f   : > { %7433 = vmatprep.subr.bf16.mxu1 %v9515_v63  ;;  %v9605_v62 = vld [vmem:[%s11322_s11 + $0x160c] ss:$16 sps:$4 sm:$0xff]   ;;  %v9600_v63 = vld [vmem:[%s11322_s11 + $0x1408] ss:$16 sps:$4 sm:$0xff]  }
 0x441   : > { %7391 = vmatpush2.bf16.msra.mxu0 %v9510_v2  ;;  %v9603_v2 = vld [vmem:[%s11322_s11 + $0x1608] ss:$16 sps:$4 sm:$0xff]  }
 0x442   : > { %7434 = vmatpush2.bf16.msra.mxu1 %v9513_v3  ;;  %7392 = vmatprep.subr.bf16.mxu0 %v9518_v14  ;;  %v9608_v3 = vld [vmem:[%s11322_s11 + $0x15ec] ss:$16 sps:$4 sm:$0xff]  }
 0x443   : > { %7435 = vmatprep.subr.bf16.mxu1 %v9521_v12  ;;  %v9611_v14 = vld [vmem:[%s11322_s11 + $0x17ec] ss:$16 sps:$4 sm:$0xff]   ;;  %v9606_v12 = vld [vmem:[%s11322_s11 + $0x15e8] ss:$16 sps:$4 sm:$0xff]  }
 0x445   : > { %7393 = vmatpush2.bf16.msra.mxu0 %v9516_v6  ;;  %v9609_v6 = vld [vmem:[%s11322_s11 + $0x17e8] ss:$16 sps:$4 sm:$0xff]  }
 0x446   : > { %7436 = vmatpush2.bf16.msra.mxu1 %v9519_v5  ;;  %7394 = vmatprep.subr.bf16.mxu0 %v9524_v9  ;;  %v9614_v5 = vld [vmem:[%s11322_s11 + $0x15cc] ss:$16 sps:$4 sm:$0xff]  }
 0x447   : > { %7437 = vmatprep.subr.bf16.mxu1 %v9527_v51  ;;  %v9617_v9 = vld [vmem:[%s11322_s11 + $0x17cc] ss:$16 sps:$4 sm:$0xff]   ;;  %v9612_v51 = vld [vmem:[%s11322_s11 + $0x15c8] ss:$16 sps:$4 sm:$0xff]  }
 0x449   : > { %7395 = vmatpush2.bf16.msra.mxu0 %v9522_v52  ;;  %v9615_v52 = vld [vmem:[%s11322_s11 + $0x17c8] ss:$16 sps:$4 sm:$0xff]  }
 0x44a   : > { %7438 = vmatpush2.bf16.msra.mxu1 %v9525_v17  ;;  %7396 = vmatprep.subr.bf16.mxu0 %v9530_v23  ;;  %v9620_v17 = vld [vmem:[%s11322_s11 + $0x15ac] ss:$16 sps:$4 sm:$0xff]  }
 0x44b   : > { %7439 = vmatprep.subr.bf16.mxu1 %v9533_v19  ;;  %v9623_v23 = vld [vmem:[%s11322_s11 + $0x17ac] ss:$16 sps:$4 sm:$0xff]   ;;  %v9618_v19 = vld [vmem:[%s11322_s11 + $0x15a8] ss:$16 sps:$4 sm:$0xff]  }
 0x44d   : > { %7397 = vmatpush2.bf16.msra.mxu0 %v9528_v20  ;;  %v9621_v20 = vld [vmem:[%s11322_s11 + $0x17a8] ss:$16 sps:$4 sm:$0xff]  }
 0x44e   : > { %7440 = vmatpush2.bf16.msra.mxu1 %v9531_v48  ;;  %7398 = vmatprep.subr.bf16.mxu0 %v9536_v21  ;;  %v9626_v48 = vld [vmem:[%s11322_s11 + $0x158c] ss:$16 sps:$4 sm:$0xff]  }
 0x44f   : > { %7441 = vmatprep.subr.bf16.mxu1 %v9539_v25  ;;  %v9629_v21 = vld [vmem:[%s11322_s11 + $0x178c] ss:$16 sps:$4 sm:$0xff]   ;;  %v9624_v25 = vld [vmem:[%s11322_s11 + $0x1588] ss:$16 sps:$4 sm:$0xff]  }
 0x451   : > { %7399 = vmatpush2.bf16.msra.mxu0 %v9534_v15  ;;  %v9627_v15 = vld [vmem:[%s11322_s11 + $0x1788] ss:$16 sps:$4 sm:$0xff]  }
 0x452   : > { %7442 = vmatpush2.bf16.msra.mxu1 %v9537_v28  ;;  %7400 = vmatprep.subr.bf16.mxu0 %v9542_v34  ;;  %v9632_v28 = vld [vmem:[%s11322_s11 + $0x156c] ss:$16 sps:$4 sm:$0xff]  }
 0x453   : > { %7443 = vmatprep.subr.bf16.mxu1 %v9545_v37  ;;  %v9635_v34 = vld [vmem:[%s11322_s11 + $0x176c] ss:$16 sps:$4 sm:$0xff]   ;;  %v9630_v37 = vld [vmem:[%s11322_s11 + $0x1568] ss:$16 sps:$4 sm:$0xff]  }
 0x455   : > { %7401 = vmatpush2.bf16.msra.mxu0 %v9540_v8  ;;  %v9633_v8 = vld [vmem:[%s11322_s11 + $0x1768] ss:$16 sps:$4 sm:$0xff]  }
 0x456   : > { %7444 = vmatpush2.bf16.msra.mxu1 %v9543_v18  ;;  %7402 = vmatprep.subr.bf16.mxu0 %v9548_v24  ;;  %v9638_v18 = vld [vmem:[%s11322_s11 + $0x154c] ss:$16 sps:$4 sm:$0xff]  }
 0x457   : > { %7445 = vmatprep.subr.bf16.mxu1 %v9551_v30  ;;  %v9641_v24 = vld [vmem:[%s11322_s11 + $0x174c] ss:$16 sps:$4 sm:$0xff]   ;;  %v9636_v30 = vld [vmem:[%s11322_s11 + $0x1548] ss:$16 sps:$4 sm:$0xff]  }
 0x459   : > { %7403 = vmatpush2.bf16.msra.mxu0 %v9546_v59  ;;  %v9639_v59 = vld [vmem:[%s11322_s11 + $0x1748] ss:$16 sps:$4 sm:$0xff]  }
 0x45a   : > { %7446 = vmatpush2.bf16.msra.mxu1 %v9549_v0  ;;  %7404 = vmatprep.subr.bf16.mxu0 %v9554_v38  ;;  %v9644_v0 = vld [vmem:[%s11322_s11 + $0x152c] ss:$16 sps:$4 sm:$0xff]  }
 0x45b   : > { %7447 = vmatprep.subr.bf16.mxu1 %v9557_v46  ;;  %v9647_v38 = vld [vmem:[%s11322_s11 + $0x172c] ss:$16 sps:$4 sm:$0xff]   ;;  %v9642_v46 = vld [vmem:[%s11322_s11 + $0x1528] ss:$16 sps:$4 sm:$0xff]  }
 0x45d   : > { %7405 = vmatpush2.bf16.msra.mxu0 %v9552_v49  ;;  %v9645_v49 = vld [vmem:[%s11322_s11 + $0x1728] ss:$16 sps:$4 sm:$0xff]  }
 0x45e   : > { %7448 = vmatpush2.bf16.msra.mxu1 %v9555_v39  ;;  %7460 = vmatprep.subr.bf16.mxu0 %v9560_v47  ;;  %v9650_v39 = vld [vmem:[%s11322_s11 + $0x150c] ss:$16 sps:$4 sm:$0xff]  }
 0x45f   : > { %7503 = vmatprep.subr.bf16.mxu1 %v9563_v26  ;;  %v9653_v47 = vld [vmem:[%s11322_s11 + $0x170c] ss:$16 sps:$4 sm:$0xff]   ;;  %v9648_v26 = vld [vmem:[%s11322_s11 + $0x1508] ss:$16 sps:$4 sm:$0xff]  }
 0x460   : > { %7407 = vmatmul.mubr.bf16.vlgmr.msra.gmra.mxu0 %v11823_v56  ;;  %v9570_v56 = vld [vmem:[%s11322_s11 + $0x14a8] ss:$16 sps:$4 sm:$0xff]  }
 0x461   : > { %7450 = vmatmul.mubr.bf16.vlgmr.msra.gmra.mxu1 %v11827_v57  ;;  %7461 = vmatpush1.bf16.msra.mxu0 %v9558_v41  ;;  %v9573_v57 = vld [vmem:[%s11322_s11 + $0x16a8] ss:$16 sps:$4 sm:$0xff]  }
 0x462   : > { %7504 = vmatpush1.bf16.msra.mxu1 %v9561_v13  ;;  %7462 = vmatprep.subr.bf16.mxu0 %v9566_v16  ;;  %v9651_v41 = vld [vmem:[%s11322_s11 + $0x1708] ss:$16 sps:$4 sm:$0xff]   ;;  %v7064_v13 = vpop.f32.mrf.mxu0  ;;  %v7107_v16 = vpop.f32.mrf.mxu1 }
 0x463   : > { %7505 = vmatprep.subr.bf16.mxu1 %v9569_v22  ;;  %7492 = vmatprep.mubr.bf16.mxu0 %v11835_v10  ;;  %v9579_v10 = vld [vmem:[%s11322_s11 + $0x1688] ss:$16 sps:$4 sm:$0xff]  }
 0x464   : > { %7535 = vmatprep.mubr.bf16.mxu1 %v11839_v11  ;;  %v9584_v11 = vld [vmem:[%s11322_s11 + $0x146c] ss:$16 sps:$4 sm:$0xff]   ;;  %v7066_v22 = vpop.f32.mrf.mxu0 }
 0x465   : > { %7463 = vmatpush1.bf16.msra.mxu0 %v9564_v60  ;;  %v7109_v60 = vpop.f32.mrf.mxu1 }
 0x466   : > { %7506 = vmatpush1.bf16.msra.mxu1 %v9567_v35  ;;  %7464 = vmatprep.subr.bf16.mxu0 %v9572_v50  ;;  %v7068_v35 = vpop.f32.mrf.mxu0 }
 0x467   : > { %7507 = vmatprep.subr.bf16.mxu1 %v9575_v53  ;;  %v7111_v50 = vpop.f32.mrf.mxu1 }
 0x468   : > { %v7070_v53 = vpop.f32.mrf.mxu0 }
 0x469   : > { %7465 = vmatpush1.bf16.msra.mxu0 %v9570_v56  ;;  %v7113_v56 = vpop.f32.mrf.mxu1 }
 0x46a   : > { %7508 = vmatpush1.bf16.msra.mxu1 %v9573_v57  ;;  %7466 = vmatprep.subr.bf16.mxu0 %v9578_v1  ;;  %v7150_v57 = vpop.f32.mrf.mxu0 }
 0x46b   : > { %7509 = vmatprep.subr.bf16.mxu1 %v9581_v29  ;;  %v7193_v1 = vpop.f32.mrf.mxu1 }
 0x46c   : > { %v7152_v29 = vpop.f32.mrf.mxu0 }
 0x46d   : > { %7467 = vmatpush1.bf16.msra.mxu0 %v9576_v42  ;;  %v7195_v42 = vpop.f32.mrf.mxu1 }
 0x46e   : > { %7510 = vmatpush1.bf16.msra.mxu1 %v9579_v10  ;;  %7468 = vmatprep.subr.bf16.mxu0 %v9584_v11  ;;  %v7154_v10 = vpop.f32.mrf.mxu0 }
 0x46f   : > { %7511 = vmatprep.subr.bf16.mxu1 %v9587_v44  ;;  %v7197_v11 = vpop.f32.mrf.mxu1 }
 0x470   : > { %v7156_v44 = vpop.f32.mrf.mxu0 }
 0x471   : > { %7469 = vmatpush1.bf16.msra.mxu0 %v9582_v45  ;;  %v7199_v45 = vpop.f32.mrf.mxu1 }
 0x472   : > { %7512 = vmatpush1.bf16.msra.mxu1 %v9585_v4  ;;  %7470 = vmatprep.subr.bf16.mxu0 %v9590_v40 }
 0x473   : > { %7513 = vmatprep.subr.bf16.mxu1 %v9593_v7  ;;  %v2544_v7 = vsub.s32 2, %v12116_v43 }
 0x475   : > { %7471 = vmatpush1.bf16.msra.mxu0 %v9588_v33  ;;  %v2548_v33 = vsub.s32 3, %v12116_v43 }
 0x476   : > { %7514 = vmatpush1.bf16.msra.mxu1 %v9591_v55  ;;  %7472 = vmatprep.subr.bf16.mxu0 %v9596_v27 }
 0x477   : > { %7515 = vmatprep.subr.bf16.mxu1 %v9599_v36  ;;  %v9670_v36 = vld [vmem:[%s12121_s23] sm:$0xf] }
 0x479   : > { %7473 = vmatpush1.bf16.msra.mxu0 %v9594_v54  ;;  %v2545_v54 = vrot.slane %v9670_v36, %v2544_v7 }
 0x47a   : > { %7516 = vmatpush1.bf16.msra.mxu1 %v9597_v58  ;;  %7474 = vmatprep.subr.bf16.mxu0 %v9602_v61  ;;  %v2549_v58 = vrot.slane %v9670_v36, %v2548_v33 }
 0x47b   : > { %7517 = vmatprep.subr.bf16.mxu1 %v9605_v62 }
 0x47d   : > { %7475 = vmatpush1.bf16.msra.mxu0 %v9600_v63  ;;  %v7065_v63 = vadd.f32 %v7064_v13, %v2545_v54 }
 0x47e   : > { %7518 = vmatpush1.bf16.msra.mxu1 %v9603_v2  ;;  %7476 = vmatprep.subr.bf16.mxu0 %v9608_v3 }
 0x47f   : > { %7519 = vmatprep.subr.bf16.mxu1 %v9611_v14  ;;  %v7067_v14 = vadd.f32 %v7066_v22, %v2549_v58 }
 0x481   : > { %7477 = vmatpush2.bf16.msra.mxu0 %v9606_v12  ;;  %v7108_v12 = vadd.f32 %v7107_v16, %v7065_v63 }
 0x482   : > { %7520 = vmatpush2.bf16.msra.mxu1 %v9609_v6  ;;  %7478 = vmatprep.subr.bf16.mxu0 %v9614_v5  ;;  %v7069_v6 = vadd.f32 %v7068_v35, %v2545_v54 }
 0x483   : > { %7521 = vmatprep.subr.bf16.mxu1 %v9617_v9 }
 0x485   : > { %7479 = vmatpush2.bf16.msra.mxu0 %v9612_v51  ;;  %v7110_v51 = vadd.f32 %v7109_v60, %v7067_v14 }
 0x486   : > { %7522 = vmatpush2.bf16.msra.mxu1 %v9615_v52  ;;  %7480 = vmatprep.subr.bf16.mxu0 %v9620_v17  ;;  %v7071_v52 = vadd.f32 %v7070_v53, %v2549_v58  ;;  %v7151_v17 = vadd.f32 %v7150_v57, %v7108_v12 }
 0x487   : > { %7523 = vmatprep.subr.bf16.mxu1 %v9623_v23  ;;  %v7112_v23 = vadd.f32 %v7111_v50, %v7069_v6  ;;  %v7153_v43 = vadd.f32 %v7152_v29, %v7110_v51 }
 0x489   : > { %7481 = vmatpush2.bf16.msra.mxu0 %v9618_v19 }
 0x48a   : > { %7524 = vmatpush2.bf16.msra.mxu1 %v9621_v20  ;;  %7482 = vmatprep.subr.bf16.mxu0 %v9626_v48  ;;  %v7114_v48 = vadd.f32 %v7113_v56, %v7071_v52 }
 0x48b   : > { %7525 = vmatprep.subr.bf16.mxu1 %v9629_v21  ;;  %v7194_v21 = vadd.f32 %v7193_v1, %v7151_v17 }
 0x48d   : > { %7483 = vmatpush2.bf16.msra.mxu0 %v9624_v25  ;;  %v7155_v25 = vadd.f32 %v7154_v10, %v7112_v23 }
 0x48e   : > { %7526 = vmatpush2.bf16.msra.mxu1 %v9627_v15  ;;  %7484 = vmatprep.subr.bf16.mxu0 %v9632_v28  ;;  %v7196_v15 = vadd.f32 %v7195_v42, %v7153_v43  ;;  %v7157_v28 = vadd.f32 %v7156_v44, %v7114_v48  ;;  %v7584_v43 = vld [vmem:[%s12240_s12] sm:$0xff] (%p9746_p5) }
 0x48f   : > { %7527 = vmatprep.subr.bf16.mxu1 %v9635_v34  ;;  %7585 = vst [vmem:[%s7571_s26] sm:$0xff] (%p9746_p5), %v7584_v43 }
 0x491   : > { %7485 = vmatpush2.bf16.msra.mxu0 %v9630_v37 }
 0x492   : > { %7528 = vmatpush2.bf16.msra.mxu1 %v9633_v8  ;;  %7486 = vmatprep.subr.bf16.mxu0 %v9638_v18  ;;  %v7198_v18 = vadd.f32 %v7197_v11, %v7155_v25  ;;  %v7594_v25 = vld [vmem:[%s12240_s12 + $0x28] sm:$0xff] (%p9746_p5) }
 0x493   : > { %7529 = vmatprep.subr.bf16.mxu1 %v9641_v24  ;;  %7595 = vst [vmem:[%s7571_s26 + $0x48] sm:$0xff] (%p9746_p5), %v7594_v25 }
 0x495   : > { %7487 = vmatpush2.bf16.msra.mxu0 %v9636_v30 }
 0x496   : > { %7530 = vmatpush2.bf16.msra.mxu1 %v9639_v59  ;;  %7488 = vmatprep.subr.bf16.mxu0 %v9644_v0  ;;  %v7200_v0 = vadd.f32 %v7199_v45, %v7157_v28 }
 0x497   : > { %7531 = vmatprep.subr.bf16.mxu1 %v9647_v38 }
 0x499   : > { %7489 = vmatpush2.bf16.msra.mxu0 %v9642_v46 }
 0x49a   : > { %7532 = vmatpush2.bf16.msra.mxu1 %v9645_v49  ;;  %7490 = vmatprep.subr.bf16.mxu0 %v9650_v39 }
 0x49b   : > { %7533 = vmatprep.subr.bf16.mxu1 %v9653_v47 }
 0x49d   : > { %7491 = vmatpush2.bf16.msra.mxu0 %v9648_v26 }
 0x49e   : > { %7534 = vmatpush2.bf16.msra.mxu1 %v9651_v41 }
 0x4a0   : > { %7493 = vmatmul.mubr.bf16.vlgmr.msra.gmra.mxu0 %v11907_v31  ;;  %v7236_v31 = vpop.f32.mrf.mxu0 }
 0x4a1   : > { %7536 = vmatmul.mubr.bf16.vlgmr.msra.gmra.mxu1 %v11911_v32  ;;  %v7279_v4 = vpop.f32.mrf.mxu1  ;;  %v7237_v34 = vadd.f32 %v7236_v31, %v7194_v21  ;;  %v7592_v21 = vld [vmem:[%s12240_s12 + $0x20] sm:$0xff] (%p9746_p5) }
 0x4a2   : > { %v7238_v32 = vpop.f32.mrf.mxu0  ;;  %7593 = vst [vmem:[%s7571_s26 + $0x40] sm:$0xff] (%p9746_p5), %v7592_v21 }
 0x4a3   : > { %v7281_v40 = vpop.f32.mrf.mxu1  ;;  %v7239_v24 = vadd.f32 %v7238_v32, %v7196_v15  ;;  %v7280_v38 = vadd.f32 %v7279_v4, %v7237_v34 }
 0x4a4   : > { %v7240_v55 = vpop.f32.mrf.mxu0 }
 0x4a5   : > { %v7283_v27 = vpop.f32.mrf.mxu1  ;;  %v7241_v46 = vadd.f32 %v7240_v55, %v7198_v18  ;;  %v7282_v49 = vadd.f32 %v7281_v40, %v7239_v24 }
 0x4a6   : > { %v7242_v61 = vpop.f32.mrf.mxu0 }
 0x4a7   : > { %v7285_v62 = vpop.f32.mrf.mxu1  ;;  %v7243_v39 = vadd.f32 %v7242_v61, %v7200_v0  ;;  %v7284_v13 = vadd.f32 %v7283_v27, %v7241_v46 }
 0x4a9   : > { %v7286_v22 = vadd.f32 %v7285_v62, %v7243_v39 }
 0x4e0   : > { %v7322_v2 = vpop.f32.mrf.mxu0 }
 0x4e1   : > { %v7365_v3 = vpop.f32.mrf.mxu1  ;;  %v7323_v47 = vadd.f32 %v7322_v2, %v7280_v38 }
 0x4e2   : > { %v7324_v5 = vpop.f32.mrf.mxu0 }
 0x4e3   : > { %v7367_v9 = vpop.f32.mrf.mxu1  ;;  %v7325_v16 = vadd.f32 %v7324_v5, %v7282_v49  ;;  %v7366_v60 = vadd.f32 %v7365_v3, %v7323_v47 }
 0x4e4   : > { %v7326_v19 = vpop.f32.mrf.mxu0 }
 0x4e5   : > { %v7369_v20 = vpop.f32.mrf.mxu1  ;;  %v7327_v35 = vadd.f32 %v7326_v19, %v7284_v13  ;;  %v7368_v56 = vadd.f32 %v7367_v9, %v7325_v16  ;;  %v7586_v19 = vld [vmem:[%s12240_s12 + $0x8] sm:$0xff] (%p9746_p5) }
 0x4e6   : > { %v7328_v37 = vpop.f32.mrf.mxu0  ;;  %7587 = vst [vmem:[%s7571_s26 + $0x8] sm:$0xff] (%p9746_p5), %v7586_v19 }
 0x4e7   : > { %v7371_v8 = vpop.f32.mrf.mxu1  ;;  %v7329_v57 = vadd.f32 %v7328_v37, %v7286_v22  ;;  %v7370_v29 = vadd.f32 %v7369_v20, %v7327_v35 }
 0x4e9   : > { %v7372_v44 = vadd.f32 %v7371_v8, %v7329_v57 }
 0x520   : > { %v7408_v30 = vpop.f32.mrf.mxu0 }
 0x521   : > { %v7451_v59 = vpop.f32.mrf.mxu1  ;;  %v7409_v1 = vadd.f32 %v7408_v30, %v7366_v60 }
 0x522   : > { %v7410_v26 = vpop.f32.mrf.mxu0 }
 0x523   : > { %v7453_v41 = vpop.f32.mrf.mxu1  ;;  %v7411_v42 = vadd.f32 %v7410_v26, %v7368_v56  ;;  %v7452_v45 = vadd.f32 %v7451_v59, %v7409_v1 }
 0x524   : > { %v7412_v50 = vpop.f32.mrf.mxu0 }
 0x525   : > { %v7455_v53 = vpop.f32.mrf.mxu1  ;;  %v7413_v31 = vadd.f32 %v7412_v50, %v7370_v29  ;;  %v7454_v40 = vadd.f32 %v7453_v41, %v7411_v42 }
 0x526   : > { %v7414_v10 = vpop.f32.mrf.mxu0 }
 0x527   : > { %v7457_v11 = vpop.f32.mrf.mxu1  ;;  %v7415_v7 = vadd.f32 %v7414_v10, %v7372_v44  ;;  %v7456_v36 = vadd.f32 %v7455_v53, %v7413_v31 }
 0x529   : > { %v7458_v63 = vadd.f32 %v7457_v11, %v7415_v7 }
 0x560   : > { %v7494_v4 = vpop.f32.mrf.mxu0 }
 0x561   : > { %v7537_v32 = vpop.f32.mrf.mxu1  ;;  %v7495_v33 = vadd.f32 %v7494_v4, %v7452_v45 }
 0x562   : > { %v7496_v55 = vpop.f32.mrf.mxu0 }
 0x563   : > { %v7539_v27 = vpop.f32.mrf.mxu1  ;;  %v7538_v54 = vadd.f32 %v7537_v32, %v7495_v33  ;;  %v7497_v58 = vadd.f32 %v7496_v55, %v7454_v40 }
 0x564   : > { %v7498_v61 = vpop.f32.mrf.mxu0 }
 0x565   : > { %v7541_v62 = vpop.f32.mrf.mxu1  ;;  %9662 = vtanh.f32 %v7538_v54  ;;  %v7540_v2 = vadd.f32 %v7539_v27, %v7497_v58  ;;  %v7499_v3 = vadd.f32 %v7498_v61, %v7456_v36 }
 0x566   : > { %v7500_v14 = vpop.f32.mrf.mxu0 }
 0x567   : > { %9664 = vtanh.f32 %v7540_v2  ;;  %v7542_v12 = vadd.f32 %v7541_v62, %v7499_v3  ;;  %v7501_v6 = vadd.f32 %v7500_v14, %v7458_v63  ;;  %v7543_v5 = vpop.f32.mrf.mxu1 }
 0x569   : > { %9666 = vtanh.f32 %v7542_v12  ;;  %v7544_v9 = vadd.f32 %v7543_v5, %v7501_v6 }
 0x56b   : > { %9668 = vtanh.f32 %v7544_v9 }
 0x572   : > { %v9663_v51 = vpop.eup %9662 }
 0x573   : > { %7556 = vst [vmem:[%s12240_s12 + $0x10] sm:$0xff] %v9663_v51 }
 0x574   : > { %v9665_v52 = vpop.eup %9664 }
 0x575   : > { %7557 = vst [vmem:[%s12240_s12 + $0x18] sm:$0xff] %v9665_v52  ;;  %7568 = sbr.rel (!%p9746_p5) target bundleno = 1410 (0x582), region = 59 }
 0x576   : > { %v9667_v17 = vpop.eup %9666 }
 0x577   : > { %7560 = vst [vmem:[%s12240_s12 + $0x30] sm:$0xff] %v9667_v17 }
 0x578   : > { %v9669_v23 = vpop.eup %9668 }
 0x579   : > { %7561 = vst [vmem:[%s12240_s12 + $0x38] sm:$0xff] %v9669_v23 }
 0x57a   : > { %v7588_v20 = vld [vmem:[%s12240_s12 + $0x10] sm:$0xff] }
 0x57b   : > { %7589 = vst [vmem:[%s7571_s26 + $0x10] sm:$0xff] %v7588_v20 }
 0x57c   : > { %v7590_v48 = vld [vmem:[%s12240_s12 + $0x18] sm:$0xff] }
 0x57d   : > { %7591 = vst [vmem:[%s7571_s26 + $0x18] sm:$0xff] %v7590_v48 }
 0x57e   : > { %v7596_v15 = vld [vmem:[%s12240_s12 + $0x30] sm:$0xff] }
 0x57f   : > { %7597 = vst [vmem:[%s7571_s26 + $0x50] sm:$0xff] %v7596_v15 }
 0x580   : > { %v7598_v28 = vld [vmem:[%s12240_s12 + $0x38] sm:$0xff] }
 0x581   : > { %7599 = vst [vmem:[%s7571_s26 + $0x58] sm:$0xff] %v7598_v28 }
 0x582 PF: > { %p10_p11 = scmp.ge.s32.totalorder %s9734_s16, 4   ;;  %s12458_s12 = smov %s9689_s13 }
 0x583   : > { %s12459_s13 = smov %s9744_s19  ;;  %s12460_s14 = smov %s9734_s16 }
 0x584   :  { %12 = sbr.rel (!%p10_p11) target bundleno = 2 (0x2), region = 116 }

</bundles_post_ra>
